<compile_context>
chip_gen: v7x
topology: tpu7x:2x2x1
jax: 0.10.0
libtpu: 0.0.40
codegen_flags: <defaults>
</compile_context>

<pallas_src>
import math
import functools
import numpy as np
import jax
import jax.numpy as jnp
from jax import lax
from jax.experimental import pallas as pl
from jax.experimental.pallas import tpu as pltpu

# ---- small, module-consistent hyperparameters -------------------------------
N_EMB = 256                       # n_embedding (scaled down from 512)
NUM_HEADS = 2                     # num_heads   (scaled down from 8)
HEAD_SIZE = N_EMB // NUM_HEADS    # head_size = n_embedding // num_heads (=128, lane-aligned)
BLOCK_T = 128                     # sequence length (<= block_size, causal mask applies)
BATCH = 2
HIDDEN = 4 * N_EMB                # FFN hidden dim
EPS = 1e-5
NEG_BIG = -1e30                   # additive causal-mask bias (safer than -inf)
# TODO(synk): dropout (p=0.2) is a no-op here (inference mode); training-mode RNG
#             dropout could be added with pltpu.prng_seed / prng_random_bits.
# NOTE: the kernel assumes f32 activations (LN/softmax/residual math and out dtype follow x).


def _block_kernel(x_ref, g1_ref, be1_ref,
                  wqkv_ref, wp_ref, bp_ref,
                  g2_ref, be2_ref,
                  w1_ref, bf1_ref, w2_ref, bf2_ref,
                  o_ref, ho_ref, *, seq_len):
    """One grid step = `bpg` batch elements flattened to M = bpg*seq_len rows."""
    M, C = x_ref.shape
    T = seq_len
    bpg = M // T
    x = x_ref[...]                                  # (M, C) f32

    # ---------------- LayerNorm 1 (f32) ----------------
    mu = jnp.mean(x, axis=-1, keepdims=True)
    var = jnp.mean((x - mu) ** 2, axis=-1, keepdims=True)
    h = (x - mu) * lax.rsqrt(var + EPS) * g1_ref[...] + be1_ref[...]

    # ---------------- fused QKV projection (bf16 MXU, f32 acc), one bf16 pack ----
    qkv = jnp.dot(h.astype(jnp.bfloat16), wqkv_ref[...],
                  preferred_element_type=jnp.float32).astype(jnp.bfloat16)   # (M, 3C)

    scale = HEAD_SIZE ** -0.5
    # causal additive bias built in-kernel (VPU slack; saves a (T,T) f32 HBM input)
    row = lax.broadcasted_iota(jnp.int32, (T, T), 0)
    col = lax.broadcasted_iota(jnp.int32, (T, T), 1)
    mask = jnp.where(col <= row, 0.0, NEG_BIG).astype(jnp.float32)

    # ---------------- multi-head causal self-attention -----------------------
    # Per-head outputs are stored (lane-aligned columns, pure vst) into a bf16
    # (M, C) scratch so the output projection is a single K=C MXU matmul.
    for b in range(bpg):                           # static unrolled (bpg <= 2)
        r0 = b * T
        for hh in range(NUM_HEADS):                # static unrolled over heads
            lo = hh * HEAD_SIZE
            qs = qkv[r0:r0 + T, lo:lo + HEAD_SIZE]
            ks = qkv[r0:r0 + T, C + lo:C + lo + HEAD_SIZE]
            vs = qkv[r0:r0 + T, 2 * C + lo:2 * C + lo + HEAD_SIZE]

            # contract last dims of q and k directly (transposed-RHS MXU form,
            # same pattern flash-attention kernels use; no XLU vxpose of ks)
            s = lax.dot_general(qs, ks, (((1,), (1,)), ((), ())),
                                preferred_element_type=jnp.float32) * scale + mask
            m = jnp.max(s, axis=-1, keepdims=True)
            p = jnp.exp(s - m)
            p = p * pl.reciprocal(jnp.sum(p, axis=-1, keepdims=True), approx=True)

            ho = jnp.dot(p.astype(jnp.bfloat16), vs,
                         preferred_element_type=jnp.float32)    # (T, head_size)
            ho_ref[r0:r0 + T, lo:lo + HEAD_SIZE] = ho.astype(jnp.bfloat16)

    # single output-projection matmul over the full contraction depth K=C
    proj = jnp.dot(ho_ref[...], wp_ref[...],
                   preferred_element_type=jnp.float32)           # (M, C)
    x1 = x + proj + bp_ref[...]                    # first residual

    # ---------------- LayerNorm 2 (f32) ----------------
    mu2 = jnp.mean(x1, axis=-1, keepdims=True)
    var2 = jnp.mean((x1 - mu2) ** 2, axis=-1, keepdims=True)
    h2 = (x1 - mu2) * lax.rsqrt(var2 + EPS) * g2_ref[...] + be2_ref[...]

    # ---------------- FeedForward (Linear -> ReLU -> Linear) -----------------
    z = jnp.dot(h2.astype(jnp.bfloat16), w1_ref[...],
                preferred_element_type=jnp.float32) + bf1_ref[...]
    z = jnp.maximum(z, 0.0)
    z = jnp.dot(z.astype(jnp.bfloat16), w2_ref[...],
                preferred_element_type=jnp.float32) + bf2_ref[...]

    o_ref[...] = x1 + z                            # second residual


def _rows_per_grid_step(batch):
    """Batch elements folded into one grid step.

    v5e/v6e are single-TC: fold the whole batch -> grid=(1,), M=B*T=256 fills the
    256-deep MXU on v6e and removes a grid-step boundary on v5e.
    v7x has 2 TensorCores: keep 2 parallel grid steps so both cores stay busy
    (per-TC split outweighs the MXU-fill gain at this size).
    """
    try:
        kind = jax.devices()[0].device_kind.lower()
        two_tc = ("v7" in kind) or ("7x" in kind)
    except Exception:
        two_tc = False
    if two_tc and batch >= 2 and batch % 2 == 0:
        return batch // 2
    return batch


def prepare_params(params):
    """One-time weight prep (hoisted out of the per-call path): fuse QKV and
    pre-cast all matmul weights to bf16 (halves weight DMA, native MXU dtype)."""
    (g1, be1, wq, wk, wv, wp, bp, g2, be2, w1, bf1, w2, bf2) = params
    wqkv = jnp.concatenate([wq, wk, wv], axis=1).astype(jnp.bfloat16)   # (C, 3C)
    return (wqkv, wp.astype(jnp.bfloat16), bp, g1, be1, g2, be2,
            w1.astype(jnp.bfloat16), bf1, w2.astype(jnp.bfloat16), bf2)


def _transformer_block_impl(x, prep):
    B, T, C = x.shape
    (wqkv, wp_b, bp, g1, be1, g2, be2, w1_b, bf1, w2_b, bf2) = prep

    bpg = _rows_per_grid_step(B)                   # batch elems per grid step
    grid = B // bpg
    M = bpg * T                                    # matmul M-dim rows per step

    xr = x.reshape(B * T, C)                       # free (contiguous) view under jit

    # NOTE: the weight in_specs below have constant index_maps; at these sizes the
    # default double-buffered footprint (~3 MiB) fits everywhere. If C/HIDDEN are
    # scaled up, add pipeline_mode=pl.Buffered(1) to single-buffer them (v7x: 64 MiB VMEM).
    full = lambda shape: pl.BlockSpec(shape, lambda i: (0,) * len(shape))
    in_specs = [
        pl.BlockSpec((M, C), lambda i: (i, 0)),    # x rows (bpg batch elems)
        full((1, C)), full((1, C)),                # ln1 gamma/beta
        full((C, 3 * C)),                          # fused Wqkv (bf16)
        full((C, C)), full((1, C)),                # Wproj (bf16), bproj
        full((1, C)), full((1, C)),                # ln2 gamma/beta
        full((C, HIDDEN)), full((1, HIDDEN)),      # W1 (bf16), b1
        full((HIDDEN, C)), full((1, C)),           # W2 (bf16), b2
    ]
    out_spec = pl.BlockSpec((M, C), lambda i: (i, 0))

    out = pl.pallas_call(
        functools.partial(_block_kernel, seq_len=T),
        out_shape=jax.ShapeDtypeStruct((B * T, C), x.dtype),
        grid_spec=pltpu.PrefetchScalarGridSpec(
            num_scalar_prefetch=0,
            grid=(grid,),
            in_specs=in_specs,
            out_specs=out_spec,
            scratch_shapes=[pltpu.VMEM((M, C), jnp.bfloat16)],   # per-head output staging
        ),
        compiler_params=pltpu.CompilerParams(
            # row-blocks (batch elements) are independent -> parallel (2-TC split on v7x);
            # default scoped VMEM limit is plenty (~3 MiB footprint), so no override.
            dimension_semantics=("parallel",),
        ),
    )(xr, g1, be1, wqkv, wp_b, bp, g2, be2, w1_b, bf1, w2_b, bf2)
    return out.reshape(B, T, C)


transformer_block = jax.jit(_transformer_block_impl)


# ---------------- pure-JAX reference (mirrors the PyTorch forward, f32) ------
def reference_block(x, params):
    (g1, be1, wq, wk, wv, wp, bp, g2, be2, w1, bf1, w2, bf2) = params

    def ln(t, g, b):
        mu = t.mean(-1, keepdims=True)
        var = ((t - mu) ** 2).mean(-1, keepdims=True)
        return (t - mu) / jnp.sqrt(var + EPS) * g[0] + b[0]

    B, T, C = x.shape
    h = ln(x, g1, be1)
    q = h @ wq
    k = h @ wk
    v = h @ wv
    qh = q.reshape(B, T, NUM_HEADS, HEAD_SIZE).transpose(0, 2, 1, 3)
    kh = k.reshape(B, T, NUM_HEADS, HEAD_SIZE).transpose(0, 2, 1, 3)
    vh = v.reshape(B, T, NUM_HEADS, HEAD_SIZE).transpose(0, 2, 1, 3)
    s = jnp.einsum("bhqd,bhkd->bhqk", qh, kh) * HEAD_SIZE ** -0.5
    mask = jnp.tril(jnp.ones((T, T), bool))
    s = jnp.where(mask, s, -jnp.inf)
    p = jax.nn.softmax(s, axis=-1)
    o = jnp.einsum("bhqk,bhkd->bhqd", p, vh).transpose(0, 2, 1, 3).reshape(B, T, C)
    x1 = x + (o @ wp + bp[0])
    h2 = ln(x1, g2, be2)
    z = jnp.maximum(h2 @ w1 + bf1[0], 0.0) @ w2 + bf2[0]
    return x1 + z


def init_params(key):
    ks = jax.random.split(key, 8)
    s_qkv = 1.0 / math.sqrt(N_EMB)
    s_h = 1.0 / math.sqrt(HIDDEN)
    f32 = jnp.float32
    g1 = jnp.ones((1, N_EMB), f32);  be1 = jnp.zeros((1, N_EMB), f32)
    g2 = jnp.ones((1, N_EMB), f32);  be2 = jnp.zeros((1, N_EMB), f32)
    wq = jax.random.normal(ks[0], (N_EMB, N_EMB), f32) * s_qkv
    wk = jax.random.normal(ks[1], (N_EMB, N_EMB), f32) * s_qkv
    wv = jax.random.normal(ks[2], (N_EMB, N_EMB), f32) * s_qkv
    wp = jax.random.normal(ks[3], (N_EMB, N_EMB), f32) * s_qkv
    bp = jax.random.normal(ks[4], (1, N_EMB), f32) * 0.01
    w1 = jax.random.normal(ks[5], (N_EMB, HIDDEN), f32) * s_qkv
    bf1 = jnp.zeros((1, HIDDEN), f32)
    w2 = jax.random.normal(ks[6], (HIDDEN, N_EMB), f32) * s_h
    bf2 = jax.random.normal(ks[7], (1, N_EMB), f32) * 0.01
    return (g1, be1, wq, wk, wv, wp, bp, g2, be2, w1, bf1, w2, bf2)


if __name__ == "__main__":
    key = jax.random.PRNGKey(0)
    kx, kp = jax.random.split(key)
    x = jax.random.normal(kx, (BATCH, BLOCK_T, N_EMB), jnp.float32)
    params = init_params(kp)

    # one-time prep (fused/bf16 weights), hoisted out of the per-call path
    prepared = jax.tree_util.tree_map(jax.block_until_ready, prepare_params(params))

    out = transformer_block(x, prepared)
    out = jax.block_until_ready(out)

    ref = jax.block_until_ready(reference_block(x, params))
    # tolerance loosened vs. the f32 reference because matmul inputs are bf16
    np.testing.assert_allclose(np.asarray(out), np.asarray(ref), atol=5e-2, rtol=5e-2)
    print("KERNEL_OK")
</pallas_src>

<mosaic_0001>
module attributes {stable_mosaic.version = 11 : i64} {
  func.func @_block_kernel(%arg0: i32, %arg1: memref<256x256xf32, #tpu.memory_space<vmem>>, %arg2: memref<1x256xf32, #tpu.memory_space<vmem>>, %arg3: memref<1x256xf32, #tpu.memory_space<vmem>>, %arg4: memref<256x768xbf16, #tpu.memory_space<vmem>>, %arg5: memref<256x256xbf16, #tpu.memory_space<vmem>>, %arg6: memref<1x256xf32, #tpu.memory_space<vmem>>, %arg7: memref<1x256xf32, #tpu.memory_space<vmem>>, %arg8: memref<1x256xf32, #tpu.memory_space<vmem>>, %arg9: memref<256x1024xbf16, #tpu.memory_space<vmem>>, %arg10: memref<1x1024xf32, #tpu.memory_space<vmem>>, %arg11: memref<1024x256xbf16, #tpu.memory_space<vmem>>, %arg12: memref<1x256xf32, #tpu.memory_space<vmem>>, %arg13: memref<256x256xf32, #tpu.memory_space<vmem>>, %arg14: memref<256x256xbf16, #tpu.memory_space<vmem>>) attributes {dimension_semantics = [#tpu.dimension_semantics<parallel>], iteration_bounds = array<i64: 1>, scalar_prefetch = 0 : i64, scratch_operands = 1 : i64, tpu.core_type = #tpu.core_type<tc>, window_params = [{transform_indices = @transform_0, window_bounds = array<i64: 256, 256>}, {pipeline_mode = #tpu.pipeline_mode<synchronous>, transform_indices = @transform_1, window_bounds = array<i64: 1, 256>}, {pipeline_mode = #tpu.pipeline_mode<synchronous>, transform_indices = @transform_2, window_bounds = array<i64: 1, 256>}, {pipeline_mode = #tpu.pipeline_mode<synchronous>, transform_indices = @transform_3, window_bounds = array<i64: 256, 768>}, {pipeline_mode = #tpu.pipeline_mode<synchronous>, transform_indices = @transform_4, window_bounds = array<i64: 256, 256>}, {pipeline_mode = #tpu.pipeline_mode<synchronous>, transform_indices = @transform_5, window_bounds = array<i64: 1, 256>}, {pipeline_mode = #tpu.pipeline_mode<synchronous>, transform_indices = @transform_6, window_bounds = array<i64: 1, 256>}, {pipeline_mode = #tpu.pipeline_mode<synchronous>, transform_indices = @transform_7, window_bounds = array<i64: 1, 256>}, {pipeline_mode = #tpu.pipeline_mode<synchronous>, transform_indices = @transform_8, window_bounds = array<i64: 256, 1024>}, {pipeline_mode = #tpu.pipeline_mode<synchronous>, transform_indices = @transform_9, window_bounds = array<i64: 1, 1024>}, {pipeline_mode = #tpu.pipeline_mode<synchronous>, transform_indices = @transform_10, window_bounds = array<i64: 1024, 256>}, {pipeline_mode = #tpu.pipeline_mode<synchronous>, transform_indices = @transform_11, window_bounds = array<i64: 1, 256>}, {transform_indices = @transform_12, window_bounds = array<i64: 256, 256>}]} {
    %c0 = arith.constant 0 : index
    %c0_0 = arith.constant 0 : index
    %0 = vector.load %arg1[%c0, %c0_0] : memref<256x256xf32, #tpu.memory_space<vmem>>, vector<256x256xf32>
    %cst = arith.constant dense<0.000000e+00> : vector<256xf32>
    %1 = vector.multi_reduction <add>, %0, %cst [1] : vector<256x256xf32> to vector<256xf32>
    %2 = vector.shape_cast %1 : vector<256xf32> to vector<256x1xf32>
    %cst_1 = arith.constant 2.560000e+02 : f32
    %3 = vector.broadcast %cst_1 : f32 to vector<256x1xf32>
    %4 = arith.divf %2, %3 : vector<256x1xf32>
    %5 = vector.broadcast %4 : vector<256x1xf32> to vector<256x256xf32>
    %6 = arith.subf %0, %5 : vector<256x256xf32>
    %7 = arith.mulf %6, %6 : vector<256x256xf32>
    %cst_2 = arith.constant dense<0.000000e+00> : vector<256xf32>
    %8 = vector.multi_reduction <add>, %7, %cst_2 [1] : vector<256x256xf32> to vector<256xf32>
    %9 = vector.shape_cast %8 : vector<256xf32> to vector<256x1xf32>
    %cst_3 = arith.constant 2.560000e+02 : f32
    %10 = vector.broadcast %cst_3 : f32 to vector<256x1xf32>
    %11 = arith.divf %9, %10 : vector<256x1xf32>
    %12 = vector.broadcast %4 : vector<256x1xf32> to vector<256x256xf32>
    %13 = arith.subf %0, %12 : vector<256x256xf32>
    %cst_4 = arith.constant 9.99999974E-6 : f32
    %14 = vector.broadcast %cst_4 : f32 to vector<256x1xf32>
    %15 = arith.addf %11, %14 : vector<256x1xf32>
    %16 = math.rsqrt %15 : vector<256x1xf32>
    %17 = vector.broadcast %16 : vector<256x1xf32> to vector<256x256xf32>
    %18 = arith.mulf %13, %17 : vector<256x256xf32>
    %c0_5 = arith.constant 0 : index
    %c0_6 = arith.constant 0 : index
    %19 = vector.load %arg2[%c0_5, %c0_6] : memref<1x256xf32, #tpu.memory_space<vmem>>, vector<1x256xf32>
    %20 = vector.broadcast %19 : vector<1x256xf32> to vector<256x256xf32>
    %21 = arith.mulf %18, %20 : vector<256x256xf32>
    %c0_7 = arith.constant 0 : index
    %c0_8 = arith.constant 0 : index
    %22 = vector.load %arg3[%c0_7, %c0_8] : memref<1x256xf32, #tpu.memory_space<vmem>>, vector<1x256xf32>
    %23 = vector.broadcast %22 : vector<1x256xf32> to vector<256x256xf32>
    %24 = arith.addf %21, %23 : vector<256x256xf32>
    %25 = arith.truncf %24 : vector<256x256xf32> to vector<256x256xbf16>
    %c0_9 = arith.constant 0 : index
    %c0_10 = arith.constant 0 : index
    %26 = vector.load %arg4[%c0_9, %c0_10] : memref<256x768xbf16, #tpu.memory_space<vmem>>, vector<256x768xbf16>
    %cst_11 = arith.constant dense<0.000000e+00> : vector<256x768xf32>
    %27 = tpu.matmul %25, %26, %cst_11 {dimension_numbers = #tpu.dot_dimension_numbers<[1], [0], [0], [1], [0, 0, 1, 1], [], []>} : vector<256x256xbf16>, vector<256x768xbf16>, vector<256x768xf32> -> vector<256x768xf32>
    %28 = arith.truncf %27 : vector<256x768xf32> to vector<256x768xbf16>
    %29 = tpu.iota {dimensions = array<i32: 0>} : vector<128x128xi32>
    %30 = tpu.iota {dimensions = array<i32: 1>} : vector<128x128xi32>
    %31 = arith.cmpi sle, %30, %29 : vector<128x128xi32>
    %cst_12 = arith.constant 0.000000e+00 : f32
    %cst_13 = arith.constant -1.000000e+30 : f32
    %32 = vector.broadcast %cst_12 : f32 to vector<128x128xf32>
    %33 = vector.broadcast %cst_13 : f32 to vector<128x128xf32>
    %34 = arith.select %31, %32, %33 : vector<128x128xi1>, vector<128x128xf32>
    %35 = vector.extract_strided_slice %28 {offsets = [0, 0], sizes = [128, 128], strides = [1, 1]} : vector<256x768xbf16> to vector<128x128xbf16>
    %36 = vector.extract_strided_slice %28 {offsets = [0, 256], sizes = [128, 128], strides = [1, 1]} : vector<256x768xbf16> to vector<128x128xbf16>
    %37 = vector.extract_strided_slice %28 {offsets = [0, 512], sizes = [128, 128], strides = [1, 1]} : vector<256x768xbf16> to vector<128x128xbf16>
    %cst_14 = arith.constant dense<0.000000e+00> : vector<128x128xf32>
    %38 = tpu.matmul %35, %36, %cst_14 {dimension_numbers = #tpu.dot_dimension_numbers<[1], [1], [0], [0], [0, 0, 1, 0], [], []>} : vector<128x128xbf16>, vector<128x128xbf16>, vector<128x128xf32> -> vector<128x128xf32>
    %cst_15 = arith.constant 0.0883883461 : f32
    %39 = vector.broadcast %cst_15 : f32 to vector<128x128xf32>
    %40 = arith.mulf %38, %39 : vector<128x128xf32>
    %41 = arith.addf %40, %34 : vector<128x128xf32>
    %cst_16 = arith.constant dense<0xFF800000> : vector<128xf32>
    %42 = vector.multi_reduction <maximumf>, %41, %cst_16 [1] : vector<128x128xf32> to vector<128xf32>
    %43 = vector.shape_cast %42 : vector<128xf32> to vector<128x1xf32>
    %44 = vector.broadcast %43 : vector<128x1xf32> to vector<128x128xf32>
    %45 = arith.subf %41, %44 : vector<128x128xf32>
    %46 = math.exp %45 : vector<128x128xf32>
    %cst_17 = arith.constant dense<0.000000e+00> : vector<128xf32>
    %47 = vector.multi_reduction <add>, %46, %cst_17 [1] : vector<128x128xf32> to vector<128xf32>
    %48 = vector.shape_cast %47 : vector<128xf32> to vector<128x1xf32>
    %49 = tpu.reciprocal %48 {approx = true} : vector<128x1xf32> -> vector<128x1xf32>
    %50 = vector.broadcast %49 : vector<128x1xf32> to vector<128x128xf32>
    %51 = arith.mulf %46, %50 : vector<128x128xf32>
    %52 = arith.truncf %51 : vector<128x128xf32> to vector<128x128xbf16>
    %cst_18 = arith.constant dense<0.000000e+00> : vector<128x128xf32>
    %53 = tpu.matmul %52, %37, %cst_18 {dimension_numbers = #tpu.dot_dimension_numbers<[1], [0], [0], [1], [0, 0, 1, 1], [], []>} : vector<128x128xbf16>, vector<128x128xbf16>, vector<128x128xf32> -> vector<128x128xf32>
    %54 = arith.truncf %53 : vector<128x128xf32> to vector<128x128xbf16>
    %c0_19 = arith.constant 0 : index
    %c0_20 = arith.constant 0 : index
    %55 = vector.load %arg14[%c0_19, %c0_20] : memref<256x256xbf16, #tpu.memory_space<vmem>>, vector<128x128xbf16>
    tpu.vector_store %arg14[%c0_19, %c0_20], %54 {strides = array<i32>} : memref<256x256xbf16, #tpu.memory_space<vmem>>, vector<128x128xbf16>,
    %56 = vector.extract_strided_slice %28 {offsets = [0, 128], sizes = [128, 128], strides = [1, 1]} : vector<256x768xbf16> to vector<128x128xbf16>
    %57 = vector.extract_strided_slice %28 {offsets = [0, 384], sizes = [128, 128], strides = [1, 1]} : vector<256x768xbf16> to vector<128x128xbf16>
    %58 = vector.extract_strided_slice %28 {offsets = [0, 640], sizes = [128, 128], strides = [1, 1]} : vector<256x768xbf16> to vector<128x128xbf16>
    %cst_21 = arith.constant dense<0.000000e+00> : vector<128x128xf32>
    %59 = tpu.matmul %56, %57, %cst_21 {dimension_numbers = #tpu.dot_dimension_numbers<[1], [1], [0], [0], [0, 0, 1, 0], [], []>} : vector<128x128xbf16>, vector<128x128xbf16>, vector<128x128xf32> -> vector<128x128xf32>
    %cst_22 = arith.constant 0.0883883461 : f32
    %60 = vector.broadcast %cst_22 : f32 to vector<128x128xf32>
    %61 = arith.mulf %59, %60 : vector<128x128xf32>
    %62 = arith.addf %61, %34 : vector<128x128xf32>
    %cst_23 = arith.constant dense<0xFF800000> : vector<128xf32>
    %63 = vector.multi_reduction <maximumf>, %62, %cst_23 [1] : vector<128x128xf32> to vector<128xf32>
    %64 = vector.shape_cast %63 : vector<128xf32> to vector<128x1xf32>
    %65 = vector.broadcast %64 : vector<128x1xf32> to vector<128x128xf32>
    %66 = arith.subf %62, %65 : vector<128x128xf32>
    %67 = math.exp %66 : vector<128x128xf32>
    %cst_24 = arith.constant dense<0.000000e+00> : vector<128xf32>
    %68 = vector.multi_reduction <add>, %67, %cst_24 [1] : vector<128x128xf32> to vector<128xf32>
    %69 = vector.shape_cast %68 : vector<128xf32> to vector<128x1xf32>
    %70 = tpu.reciprocal %69 {approx = true} : vector<128x1xf32> -> vector<128x1xf32>
    %71 = vector.broadcast %70 : vector<128x1xf32> to vector<128x128xf32>
    %72 = arith.mulf %67, %71 : vector<128x128xf32>
    %73 = arith.truncf %72 : vector<128x128xf32> to vector<128x128xbf16>
    %cst_25 = arith.constant dense<0.000000e+00> : vector<128x128xf32>
    %74 = tpu.matmul %73, %58, %cst_25 {dimension_numbers = #tpu.dot_dimension_numbers<[1], [0], [0], [1], [0, 0, 1, 1], [], []>} : vector<128x128xbf16>, vector<128x128xbf16>, vector<128x128xf32> -> vector<128x128xf32>
    %75 = arith.truncf %74 : vector<128x128xf32> to vector<128x128xbf16>
    %c0_26 = arith.constant 0 : index
    %c128 = arith.constant 128 : index
    %76 = vector.load %arg14[%c0_26, %c128] : memref<256x256xbf16, #tpu.memory_space<vmem>>, vector<128x128xbf16>
    tpu.vector_store %arg14[%c0_26, %c128], %75 {strides = array<i32>} : memref<256x256xbf16, #tpu.memory_space<vmem>>, vector<128x128xbf16>,
    %77 = vector.extract_strided_slice %28 {offsets = [128, 0], sizes = [128, 128], strides = [1, 1]} : vector<256x768xbf16> to vector<128x128xbf16>
    %78 = vector.extract_strided_slice %28 {offsets = [128, 256], sizes = [128, 128], strides = [1, 1]} : vector<256x768xbf16> to vector<128x128xbf16>
    %79 = vector.extract_strided_slice %28 {offsets = [128, 512], sizes = [128, 128], strides = [1, 1]} : vector<256x768xbf16> to vector<128x128xbf16>
    %cst_27 = arith.constant dense<0.000000e+00> : vector<128x128xf32>
    %80 = tpu.matmul %77, %78, %cst_27 {dimension_numbers = #tpu.dot_dimension_numbers<[1], [1], [0], [0], [0, 0, 1, 0], [], []>} : vector<128x128xbf16>, vector<128x128xbf16>, vector<128x128xf32> -> vector<128x128xf32>
    %cst_28 = arith.constant 0.0883883461 : f32
    %81 = vector.broadcast %cst_28 : f32 to vector<128x128xf32>
    %82 = arith.mulf %80, %81 : vector<128x128xf32>
    %83 = arith.addf %82, %34 : vector<128x128xf32>
    %cst_29 = arith.constant dense<0xFF800000> : vector<128xf32>
    %84 = vector.multi_reduction <maximumf>, %83, %cst_29 [1] : vector<128x128xf32> to vector<128xf32>
    %85 = vector.shape_cast %84 : vector<128xf32> to vector<128x1xf32>
    %86 = vector.broadcast %85 : vector<128x1xf32> to vector<128x128xf32>
    %87 = arith.subf %83, %86 : vector<128x128xf32>
    %88 = math.exp %87 : vector<128x128xf32>
    %cst_30 = arith.constant dense<0.000000e+00> : vector<128xf32>
    %89 = vector.multi_reduction <add>, %88, %cst_30 [1] : vector<128x128xf32> to vector<128xf32>
    %90 = vector.shape_cast %89 : vector<128xf32> to vector<128x1xf32>
    %91 = tpu.reciprocal %90 {approx = true} : vector<128x1xf32> -> vector<128x1xf32>
    %92 = vector.broadcast %91 : vector<128x1xf32> to vector<128x128xf32>
    %93 = arith.mulf %88, %92 : vector<128x128xf32>
    %94 = arith.truncf %93 : vector<128x128xf32> to vector<128x128xbf16>
    %cst_31 = arith.constant dense<0.000000e+00> : vector<128x128xf32>
    %95 = tpu.matmul %94, %79, %cst_31 {dimension_numbers = #tpu.dot_dimension_numbers<[1], [0], [0], [1], [0, 0, 1, 1], [], []>} : vector<128x128xbf16>, vector<128x128xbf16>, vector<128x128xf32> -> vector<128x128xf32>
    %96 = arith.truncf %95 : vector<128x128xf32> to vector<128x128xbf16>
    %c128_32 = arith.constant 128 : index
    %c0_33 = arith.constant 0 : index
    %97 = vector.load %arg14[%c128_32, %c0_33] : memref<256x256xbf16, #tpu.memory_space<vmem>>, vector<128x128xbf16>
    tpu.vector_store %arg14[%c128_32, %c0_33], %96 {strides = array<i32>} : memref<256x256xbf16, #tpu.memory_space<vmem>>, vector<128x128xbf16>,
    %98 = vector.extract_strided_slice %28 {offsets = [128, 128], sizes = [128, 128], strides = [1, 1]} : vector<256x768xbf16> to vector<128x128xbf16>
    %99 = vector.extract_strided_slice %28 {offsets = [128, 384], sizes = [128, 128], strides = [1, 1]} : vector<256x768xbf16> to vector<128x128xbf16>
    %100 = vector.extract_strided_slice %28 {offsets = [128, 640], sizes = [128, 128], strides = [1, 1]} : vector<256x768xbf16> to vector<128x128xbf16>
    %cst_34 = arith.constant dense<0.000000e+00> : vector<128x128xf32>
    %101 = tpu.matmul %98, %99, %cst_34 {dimension_numbers = #tpu.dot_dimension_numbers<[1], [1], [0], [0], [0, 0, 1, 0], [], []>} : vector<128x128xbf16>, vector<128x128xbf16>, vector<128x128xf32> -> vector<128x128xf32>
    %cst_35 = arith.constant 0.0883883461 : f32
    %102 = vector.broadcast %cst_35 : f32 to vector<128x128xf32>
    %103 = arith.mulf %101, %102 : vector<128x128xf32>
    %104 = arith.addf %103, %34 : vector<128x128xf32>
    %cst_36 = arith.constant dense<0xFF800000> : vector<128xf32>
    %105 = vector.multi_reduction <maximumf>, %104, %cst_36 [1] : vector<128x128xf32> to vector<128xf32>
    %106 = vector.shape_cast %105 : vector<128xf32> to vector<128x1xf32>
    %107 = vector.broadcast %106 : vector<128x1xf32> to vector<128x128xf32>
    %108 = arith.subf %104, %107 : vector<128x128xf32>
    %109 = math.exp %108 : vector<128x128xf32>
    %cst_37 = arith.constant dense<0.000000e+00> : vector<128xf32>
    %110 = vector.multi_reduction <add>, %109, %cst_37 [1] : vector<128x128xf32> to vector<128xf32>
    %111 = vector.shape_cast %110 : vector<128xf32> to vector<128x1xf32>
    %112 = tpu.reciprocal %111 {approx = true} : vector<128x1xf32> -> vector<128x1xf32>
    %113 = vector.broadcast %112 : vector<128x1xf32> to vector<128x128xf32>
    %114 = arith.mulf %109, %113 : vector<128x128xf32>
    %115 = arith.truncf %114 : vector<128x128xf32> to vector<128x128xbf16>
    %cst_38 = arith.constant dense<0.000000e+00> : vector<128x128xf32>
    %116 = tpu.matmul %115, %100, %cst_38 {dimension_numbers = #tpu.dot_dimension_numbers<[1], [0], [0], [1], [0, 0, 1, 1], [], []>} : vector<128x128xbf16>, vector<128x128xbf16>, vector<128x128xf32> -> vector<128x128xf32>
    %117 = arith.truncf %116 : vector<128x128xf32> to vector<128x128xbf16>
    %c128_39 = arith.constant 128 : index
    %c128_40 = arith.constant 128 : index
    %118 = vector.load %arg14[%c128_39, %c128_40] : memref<256x256xbf16, #tpu.memory_space<vmem>>, vector<128x128xbf16>
    tpu.vector_store %arg14[%c128_39, %c128_40], %117 {strides = array<i32>} : memref<256x256xbf16, #tpu.memory_space<vmem>>, vector<128x128xbf16>,
    %c0_41 = arith.constant 0 : index
    %c0_42 = arith.constant 0 : index
    %119 = vector.load %arg14[%c0_41, %c0_42] : memref<256x256xbf16, #tpu.memory_space<vmem>>, vector<256x256xbf16>
    %c0_43 = arith.constant 0 : index
    %c0_44 = arith.constant 0 : index
    %120 = vector.load %arg5[%c0_43, %c0_44] : memref<256x256xbf16, #tpu.memory_space<vmem>>, vector<256x256xbf16>
    %cst_45 = arith.constant dense<0.000000e+00> : vector<256x256xf32>
    %121 = tpu.matmul %119, %120, %cst_45 {dimension_numbers = #tpu.dot_dimension_numbers<[1], [0], [0], [1], [0, 0, 1, 1], [], []>} : vector<256x256xbf16>, vector<256x256xbf16>, vector<256x256xf32> -> vector<256x256xf32>
    %122 = arith.addf %0, %121 : vector<256x256xf32>
    %c0_46 = arith.constant 0 : index
    %c0_47 = arith.constant 0 : index
    %123 = vector.load %arg6[%c0_46, %c0_47] : memref<1x256xf32, #tpu.memory_space<vmem>>, vector<1x256xf32>
    %124 = vector.broadcast %123 : vector<1x256xf32> to vector<256x256xf32>
    %125 = arith.addf %122, %124 : vector<256x256xf32>
    %cst_48 = arith.constant dense<0.000000e+00> : vector<256xf32>
    %126 = vector.multi_reduction <add>, %125, %cst_48 [1] : vector<256x256xf32> to vector<256xf32>
    %127 = vector.shape_cast %126 : vector<256xf32> to vector<256x1xf32>
    %cst_49 = arith.constant 2.560000e+02 : f32
    %128 = vector.broadcast %cst_49 : f32 to vector<256x1xf32>
    %129 = arith.divf %127, %128 : vector<256x1xf32>
    %130 = vector.broadcast %129 : vector<256x1xf32> to vector<256x256xf32>
    %131 = arith.subf %125, %130 : vector<256x256xf32>
    %132 = arith.mulf %131, %131 : vector<256x256xf32>
    %cst_50 = arith.constant dense<0.000000e+00> : vector<256xf32>
    %133 = vector.multi_reduction <add>, %132, %cst_50 [1] : vector<256x256xf32> to vector<256xf32>
    %134 = vector.shape_cast %133 : vector<256xf32> to vector<256x1xf32>
    %cst_51 = arith.constant 2.560000e+02 : f32
    %135 = vector.broadcast %cst_51 : f32 to vector<256x1xf32>
    %136 = arith.divf %134, %135 : vector<256x1xf32>
    %137 = vector.broadcast %129 : vector<256x1xf32> to vector<256x256xf32>
    %138 = arith.subf %125, %137 : vector<256x256xf32>
    %cst_52 = arith.constant 9.99999974E-6 : f32
    %139 = vector.broadcast %cst_52 : f32 to vector<256x1xf32>
    %140 = arith.addf %136, %139 : vector<256x1xf32>
    %141 = math.rsqrt %140 : vector<256x1xf32>
    %142 = vector.broadcast %141 : vector<256x1xf32> to vector<256x256xf32>
    %143 = arith.mulf %138, %142 : vector<256x256xf32>
    %c0_53 = arith.constant 0 : index
    %c0_54 = arith.constant 0 : index
    %144 = vector.load %arg7[%c0_53, %c0_54] : memref<1x256xf32, #tpu.memory_space<vmem>>, vector<1x256xf32>
    %145 = vector.broadcast %144 : vector<1x256xf32> to vector<256x256xf32>
    %146 = arith.mulf %143, %145 : vector<256x256xf32>
    %c0_55 = arith.constant 0 : index
    %c0_56 = arith.constant 0 : index
    %147 = vector.load %arg8[%c0_55, %c0_56] : memref<1x256xf32, #tpu.memory_space<vmem>>, vector<1x256xf32>
    %148 = vector.broadcast %147 : vector<1x256xf32> to vector<256x256xf32>
    %149 = arith.addf %146, %148 : vector<256x256xf32>
    %150 = arith.truncf %149 : vector<256x256xf32> to vector<256x256xbf16>
    %c0_57 = arith.constant 0 : index
    %c0_58 = arith.constant 0 : index
    %151 = vector.load %arg9[%c0_57, %c0_58] : memref<256x1024xbf16, #tpu.memory_space<vmem>>, vector<256x1024xbf16>
    %cst_59 = arith.constant dense<0.000000e+00> : vector<256x1024xf32>
    %152 = tpu.matmul %150, %151, %cst_59 {dimension_numbers = #tpu.dot_dimension_numbers<[1], [0], [0], [1], [0, 0, 1, 1], [], []>} : vector<256x256xbf16>, vector<256x1024xbf16>, vector<256x1024xf32> -> vector<256x1024xf32>
    %c0_60 = arith.constant 0 : index
    %c0_61 = arith.constant 0 : index
    %153 = vector.load %arg10[%c0_60, %c0_61] : memref<1x1024xf32, #tpu.memory_space<vmem>>, vector<1x1024xf32>
    %154 = vector.broadcast %153 : vector<1x1024xf32> to vector<256x1024xf32>
    %155 = arith.addf %152, %154 : vector<256x1024xf32>
    %cst_62 = arith.constant 0.000000e+00 : f32
    %156 = vector.broadcast %cst_62 : f32 to vector<256x1024xf32>
    %157 = arith.maximumf %155, %156 : vector<256x1024xf32>
    %158 = arith.truncf %157 : vector<256x1024xf32> to vector<256x1024xbf16>
    %c0_63 = arith.constant 0 : index
    %c0_64 = arith.constant 0 : index
    %159 = vector.load %arg11[%c0_63, %c0_64] : memref<1024x256xbf16, #tpu.memory_space<vmem>>, vector<1024x256xbf16>
    %cst_65 = arith.constant dense<0.000000e+00> : vector<256x256xf32>
    %160 = tpu.matmul %158, %159, %cst_65 {dimension_numbers = #tpu.dot_dimension_numbers<[1], [0], [0], [1], [0, 0, 1, 1], [], []>} : vector<256x1024xbf16>, vector<1024x256xbf16>, vector<256x256xf32> -> vector<256x256xf32>
    %c0_66 = arith.constant 0 : index
    %c0_67 = arith.constant 0 : index
    %161 = vector.load %arg12[%c0_66, %c0_67] : memref<1x256xf32, #tpu.memory_space<vmem>>, vector<1x256xf32>
    %162 = vector.broadcast %161 : vector<1x256xf32> to vector<256x256xf32>
    %163 = arith.addf %160, %162 : vector<256x256xf32>
    %164 = arith.addf %125, %163 : vector<256x256xf32>
    %c0_68 = arith.constant 0 : index
    %c0_69 = arith.constant 0 : index
    %165 = vector.load %arg13[%c0_68, %c0_69] : memref<256x256xf32, #tpu.memory_space<vmem>>, vector<256x256xf32>
    tpu.vector_store %arg13[%c0_68, %c0_69], %164 {strides = array<i32>} : memref<256x256xf32, #tpu.memory_space<vmem>>, vector<256x256xf32>,
    return
  }
  func.func @transform_0(%arg0: i32) -> (i32, i32) {
    %c0_i32 = arith.constant 0 : i32
    %c0_i32_0 = arith.constant 0 : i32
    return %arg0, %c0_i32 : i32, i32
  }
  func.func @transform_1(%arg0: i32) -> (i32, i32) {
    %c0_i32 = arith.constant 0 : i32
    %c0_i32_0 = arith.constant 0 : i32
    %c0_i32_1 = arith.constant 0 : i32
    return %c0_i32, %c0_i32_0 : i32, i32
  }
  func.func @transform_2(%arg0: i32) -> (i32, i32) {
    %c0_i32 = arith.constant 0 : i32
    %c0_i32_0 = arith.constant 0 : i32
    %c0_i32_1 = arith.constant 0 : i32
    return %c0_i32, %c0_i32_0 : i32, i32
  }
  func.func @transform_3(%arg0: i32) -> (i32, i32) {
    %c0_i32 = arith.constant 0 : i32
    %c0_i32_0 = arith.constant 0 : i32
    %c0_i32_1 = arith.constant 0 : i32
    return %c0_i32, %c0_i32_0 : i32, i32
  }
  func.func @transform_4(%arg0: i32) -> (i32, i32) {
    %c0_i32 = arith.constant 0 : i32
    %c0_i32_0 = arith.constant 0 : i32
    %c0_i32_1 = arith.constant 0 : i32
    return %c0_i32, %c0_i32_0 : i32, i32
  }
  func.func @transform_5(%arg0: i32) -> (i32, i32) {
    %c0_i32 = arith.constant 0 : i32
    %c0_i32_0 = arith.constant 0 : i32
    %c0_i32_1 = arith.constant 0 : i32
    return %c0_i32, %c0_i32_0 : i32, i32
  }
  func.func @transform_6(%arg0: i32) -> (i32, i32) {
    %c0_i32 = arith.constant 0 : i32
    %c0_i32_0 = arith.constant 0 : i32
    %c0_i32_1 = arith.constant 0 : i32
    return %c0_i32, %c0_i32_0 : i32, i32
  }
  func.func @transform_7(%arg0: i32) -> (i32, i32) {
    %c0_i32 = arith.constant 0 : i32
    %c0_i32_0 = arith.constant 0 : i32
    %c0_i32_1 = arith.constant 0 : i32
    return %c0_i32, %c0_i32_0 : i32, i32
  }
  func.func @transform_8(%arg0: i32) -> (i32, i32) {
    %c0_i32 = arith.constant 0 : i32
    %c0_i32_0 = arith.constant 0 : i32
    %c0_i32_1 = arith.constant 0 : i32
    return %c0_i32, %c0_i32_0 : i32, i32
  }
  func.func @transform_9(%arg0: i32) -> (i32, i32) {
    %c0_i32 = arith.constant 0 : i32
    %c0_i32_0 = arith.constant 0 : i32
    %c0_i32_1 = arith.constant 0 : i32
    return %c0_i32, %c0_i32_0 : i32, i32
  }
  func.func @transform_10(%arg0: i32) -> (i32, i32) {
    %c0_i32 = arith.constant 0 : i32
    %c0_i32_0 = arith.constant 0 : i32
    %c0_i32_1 = arith.constant 0 : i32
    return %c0_i32, %c0_i32_0 : i32, i32
  }
  func.func @transform_11(%arg0: i32) -> (i32, i32) {
    %c0_i32 = arith.constant 0 : i32
    %c0_i32_0 = arith.constant 0 : i32
    %c0_i32_1 = arith.constant 0 : i32
    return %c0_i32, %c0_i32_0 : i32, i32
  }
  func.func @transform_12(%arg0: i32) -> (i32, i32) {
    %c0_i32 = arith.constant 0 : i32
    %c0_i32_0 = arith.constant 0 : i32
    return %arg0, %c0_i32 : i32, i32
  }
}

</mosaic_0001>

<bundles_post_ra>
// kernel: _transformer_block_impl.1
= control target key start
LH: loop header
LB: loop body
LE: loop exit
PB: predicated region body
PF: predicated region fallthrough
CT: control target
= control target key end

     0   :  { %17 = vsyncpa [#allocation4], 0  ;;  %s14913_s0 = inlined_call_operand.hbm [shape: f32[256,256], index: 0, kind: input, shape index: {}]   ;;  %s14914_s1 = inlined_call_operand.vmem [shape: f32[1,256], index: 1, kind: input, shape index: {}]   ;;  %s14915_s2 = inlined_call_operand.vmem [shape: f32[1,256], index: 2, kind: input, shape index: {}]   ;;  %s14916_s3 = inlined_call_operand.hbm [shape: bf16[256,768], index: 3, kind: input, shape index: {}]   ;;  %s14917_s4 = inlined_call_operand.hbm [shape: bf16[256,256], index: 4, kind: input, shape index: {}]   ;;  %s14918_s5 = inlined_call_operand.vmem [shape: f32[1,256], index: 5, kind: input, shape index: {}]   ;;  %s14919_s6 = inlined_call_operand.vmem [shape: f32[1,256], index: 6, kind: input, shape index: {}]   ;;  %s14920_s7 = inlined_call_operand.vmem [shape: f32[1,256], index: 7, kind: input, shape index: {}]   ;;  %s14921_s8 = inlined_call_operand.hbm [shape: bf16[256,1024], index: 8, kind: input, shape index: {}]   ;;  %s14922_s9 = inlined_call_operand.vmem [shape: f32[1,1024], index: 9, kind: input, shape index: {}]   ;;  %s14923_s10 = inlined_call_operand.hbm [shape: bf16[1024,256], index: 10, kind: input, shape index: {}]   ;;  %s14924_s11 = inlined_call_operand.vmem [shape: f32[1,256], index: 11, kind: input, shape index: {}]   ;;  %s14925_s12 = inlined_call_operand.hbm [shape: f32[256,256], index: 12, kind: output, shape index: {}]  }
   0x1   :  { %18 = vsyncpa [#allocation7], 0 }
   0x2   :  { %19 = vsyncpa [#allocation10], 0 }
   0x3   :  { %20 = vsyncpa [#allocation5], 0  ;;  %s10768_s21 = smov [#allocation6]   ;;  %s10628_s25 = scalar_lea.hbm %s14916_s3, 12288 }
   0x4   :  { %s42_s22 = sshll.u32 %s10768_s21, 4  ;;  %p10629_p0 = scmp.ne.s32.totalorder %s14916_s3, %s10628_s25  ;;  %s43_s22 = int_to_ptr.vmem [resolvable:$true] %s42_s22 }
   0x5   :  { %p10632_p1 = scmp.lt.u32.totalorder %s10628_s25, %s14916_s3 }
   0x7   :  { %p10634_p2 = pnand %p10632_p1, %p10629_p0 }
   0x9   :  { %10637 = shalt.err (!%p10634_p2)
}
   0xa   :  { %s10638_s30 = scalar_lea.vmem %s43_s22, 12288  ;;  %p10643_p4 = scmp.lt.s32.totalorder %s43_s22, %s43_s22 }
   0xb   :  { %p10639_p3 = scmp.ne.s32.totalorder %s43_s22, %s10638_s30  ;;  %p10644_p5 = scmp.lt.s32.totalorder %s10638_s30, %s10638_s30 }
   0xd   :  { %p10645_p6 = por %p10644_p5, %p10643_p4 }
   0xf   :  { %p10646_p7 = pnand %p10645_p6, %p10639_p3 }
  0x11   :  { %10649 = shalt.err (!%p10646_p7)
}
  0x12   :  { %s10769_s13 = smov 384   ;;  %s10770_s14 = smov 24  }
  0x13   :  { %48 = dma.hbm_to_vmem [thread:$0]  %s14916_s3, 12288, %s43_s22, [#allocation7], %s10769_s13, %s10769_s13, %s10770_s14  }
  0x14   :  { %s10771_s17 = smov [#allocation9]   ;;  %s10650_s21 = scalar_lea.hbm %s14921_s8, 16384 }
  0x15   :  { %s72_s18 = sshll.u32 %s10771_s17, 4  ;;  %p10651_p8 = scmp.ne.s32.totalorder %s14921_s8, %s10650_s21  ;;  %s73_s18 = int_to_ptr.vmem [resolvable:$true] %s72_s18 }
  0x16   :  { %p10654_p9 = scmp.lt.u32.totalorder %s10650_s21, %s14921_s8 }
  0x18   :  { %p10656_p10 = pnand %p10654_p9, %p10651_p8 }
  0x1a   :  { %10659 = shalt.err (!%p10656_p10)
}
  0x1b   :  { %s10660_s27 = scalar_lea.vmem %s73_s18, 16384  ;;  %p10665_p12 = scmp.lt.s32.totalorder %s73_s18, %s73_s18 }
  0x1c   :  { %p10661_p11 = scmp.ne.s32.totalorder %s73_s18, %s10660_s27  ;;  %p10666_p13 = scmp.lt.s32.totalorder %s10660_s27, %s10660_s27 }
  0x1e   :  { %p10667_p0 = por %p10666_p13, %p10665_p12 }
  0x20   :  { %p10668_p1 = pnand %p10667_p0, %p10661_p11 }
  0x22   :  { %10671 = shalt.err (!%p10668_p1)
}
  0x23   :  { %s10772_s3 = smov 512   ;;  %s10773_s22 = smov 32  }
  0x24   :  { %78 = dma.hbm_to_vmem [thread:$0]  %s14921_s8, 16384, %s73_s18, [#allocation10], %s10772_s3, %s10772_s3, %s10773_s22  }
  0x25   :  { %s10774_s30 = smov [#allocation3]   ;;  %s10672_s16 = scalar_lea.hbm %s14913_s0, 8192 }
  0x26   :  { %s26_s13 = sshll.u32 %s10774_s30, 4  ;;  %p10673_p2 = scmp.ne.s32.totalorder %s14913_s0, %s10672_s16  ;;  %s27_s13 = int_to_ptr.vmem [resolvable:$true] %s26_s13 }
  0x27   :  { %p10676_p3 = scmp.lt.u32.totalorder %s10672_s16, %s14913_s0 }
  0x29   :  { %p10678_p4 = pnand %p10676_p3, %p10673_p2 }
  0x2b   :  { %10681 = shalt.err (!%p10678_p4)
}
  0x2c   :  { %s10682_s23 = scalar_lea.vmem %s27_s13, 8192  ;;  %p10687_p6 = scmp.lt.s32.totalorder %s27_s13, %s27_s13 }
  0x2d   :  { %p10683_p5 = scmp.ne.s32.totalorder %s27_s13, %s10682_s23  ;;  %p10688_p7 = scmp.lt.s32.totalorder %s10682_s23, %s10682_s23 }
  0x2f   :  { %p10689_p8 = por %p10688_p7, %p10687_p6 }
  0x31   :  { %p10690_p9 = pnand %p10689_p8, %p10683_p5 }
  0x33   :  { %10693 = shalt.err (!%p10690_p9)
}
  0x34   :  { %s10775_s8 = smov 256   ;;  %s10776_s18 = smov 16  }
  0x35   :  { %32 = dma.hbm_to_vmem [thread:$0]  %s14913_s0, 8192, %s27_s13, [#allocation4], %s10775_s8, %s10775_s8, %s10776_s18  }
  0x36   :  { %s10777_s26 = smov [#allocation8]   ;;  %s10694_s28 = scalar_lea.hbm %s14917_s4, 4096 }
  0x37   :  { %s54_s27 = sshll.u32 %s10777_s26, 4  ;;  %p10695_p10 = scmp.ne.s32.totalorder %s14917_s4, %s10694_s28  ;;  %s55_s27 = int_to_ptr.vmem [resolvable:$true] %s54_s27 }
  0x38   :  { %p10698_p11 = scmp.lt.u32.totalorder %s10694_s28, %s14917_s4 }
  0x3a   :  { %p10700_p12 = pnand %p10698_p11, %p10695_p10 }
  0x3c   :  { %10703 = shalt.err (!%p10700_p12)
}
  0x3d   :  { %s10704_s16 = scalar_lea.vmem %s55_s27, 4096  ;;  %p10709_p0 = scmp.lt.s32.totalorder %s55_s27, %s55_s27 }
  0x3e   :  { %p10705_p13 = scmp.ne.s32.totalorder %s55_s27, %s10704_s16  ;;  %p10710_p1 = scmp.lt.s32.totalorder %s10704_s16, %s10704_s16 }
  0x40   :  { %p10711_p2 = por %p10710_p1, %p10709_p0 }
  0x42   :  { %p10712_p3 = pnand %p10711_p2, %p10705_p13 }
  0x44   :  { %10715 = shalt.err (!%p10712_p3)
}
  0x45   :  { %s10778_s0 = smov 128   ;;  %s10779_s13 = smov 8  }
  0x46   :  { %60 = dma.hbm_to_vmem [thread:$0]  %s14917_s4, 4096, %s55_s27, [#allocation7], %s10778_s0, %s10778_s0, %s10779_s13  }
  0x47   :  { %s10780_s20 = smov [#allocation11]   ;;  %s10716_s25 = scalar_lea.hbm %s14923_s10, 16384 }
  0x48   :  { %s86_s21 = sshll.u32 %s10780_s20, 4  ;;  %p10717_p4 = scmp.ne.s32.totalorder %s14923_s10, %s10716_s25  ;;  %s87_s21 = int_to_ptr.vmem [resolvable:$true] %s86_s21 }
  0x49   :  { %p10720_p5 = scmp.lt.u32.totalorder %s10716_s25, %s14923_s10 }
  0x4b   :  { %p10722_p6 = pnand %p10720_p5, %p10717_p4 }
  0x4d   :  { %10725 = shalt.err (!%p10722_p6)
}
  0x4e   :  { %s10726_s29 = scalar_lea.vmem %s87_s21, 16384  ;;  %p10731_p8 = scmp.lt.s32.totalorder %s87_s21, %s87_s21 }
  0x4f   :  { %p10727_p7 = scmp.ne.s32.totalorder %s87_s21, %s10726_s29  ;;  %p10732_p9 = scmp.lt.s32.totalorder %s10726_s29, %s10726_s29 }
  0x51   :  { %p10733_p10 = por %p10732_p9, %p10731_p8 }
  0x53   :  { %p10734_p11 = pnand %p10733_p10, %p10727_p7 }
  0x55   :  { %10737 = shalt.err (!%p10734_p11)
}
  0x56   :  { %92 = dma.hbm_to_vmem [thread:$0]  %s14923_s10, 16384, %s87_s21, [#allocation10], %s10778_s0, %s10778_s0, %s10779_s13  }
  0x57   :  { %10760 = dma.done.wait [#allocation4], 8192  }
  0x58   :  { %10761 = vsyncadd [#allocation4], 4294959104 }
  0x59   :  { %10762 = dma.done.wait [#allocation7], 16384  }
  0x5a   :  { %10763 = vsyncadd [#allocation7], 4294950912 }
  0x5b   :  { %10764 = dma.done.wait [#allocation10], 32768  }
  0x5c   :  { %10765 = vsyncadd [#allocation10], 4294934528  ;;  %v10911_v0 = vld [vmem:[#allocation3] sm:$0xff]  ;;  %v10913_v1 = vld [vmem:[#allocation3 + $0x8] sm:$0xff] }
  0x5d   :  { %v10915_v2 = vld [vmem:[#allocation3 + $0x10] sm:$0xff]  ;;  %v175_v3 = vadd.f32 %v10913_v1, %v10911_v0  ;;  %v10919_v4 = vld [vmem:[#allocation3 + $0x18] sm:$0xff]  ;;  %v10921_v5 = vld [vmem:[#allocation3 + $0x20] sm:$0xff] }
  0x5e   :  { %v10923_v6 = vld [vmem:[#allocation3 + $0x28] sm:$0xff]  ;;  %v10927_v8 = vld [vmem:[#allocation3 + $0x30] sm:$0xff]  ;;  %v10929_v9 = vld [vmem:[#allocation3 + $0x38] sm:$0xff]  ;;  %v178_v10 = vadd.f32 %v10919_v4, %v10915_v2 }
  0x5f   :  { %v181_v7 = vadd.f32 %v10923_v6, %v10921_v5  ;;  %176 = vadd.xlane.f32.xlu0 %v175_v3  ;;  %v184_v11 = vadd.f32 %v10929_v9, %v10927_v8  ;;  %v10935_v12 = vld [vmem:[#allocation3 + $0x40] sm:$0xff]  ;;  %v10937_v13 = vld [vmem:[#allocation3 + $0x48] sm:$0xff]  ;;  %v10939_v14 = vld [vmem:[#allocation3 + $0x50] sm:$0xff] }
  0x60   :  { %v10941_v15 = vld [vmem:[#allocation3 + $0x58] sm:$0xff]  ;;  %v187_v16 = vadd.f32 %v10937_v13, %v10935_v12  ;;  %v10947_v18 = vld [vmem:[#allocation3 + $0x60] sm:$0xff]  ;;  %v10949_v19 = vld [vmem:[#allocation3 + $0x68] sm:$0xff] }
  0x61   :  { %182 = vadd.xlane.f32.xlu1 %v181_v7  ;;  %v190_v17 = vadd.f32 %v10941_v15, %v10939_v14  ;;  %v10951_v20 = vld [vmem:[#allocation3 + $0x70] sm:$0xff]  ;;  %v10953_v21 = vld [vmem:[#allocation3 + $0x78] sm:$0xff]  ;;  %v193_v22 = vadd.f32 %v10949_v19, %v10947_v18  ;;  %v10959_v24 = vld [vmem:[#allocation3 + $0x80] sm:$0xff] }
  0x62   :  { %v196_v23 = vadd.f32 %v10953_v21, %v10951_v20  ;;  %v10961_v25 = vld [vmem:[#allocation3 + $0x88] sm:$0xff]  ;;  %v10963_v26 = vld [vmem:[#allocation3 + $0x90] sm:$0xff]  ;;  %v10965_v27 = vld [vmem:[#allocation3 + $0x98] sm:$0xff] }
  0x63   :  { %179 = vadd.xlane.f32.xlu0 %v178_v10  ;;  %v131_v28 = vld [vmem:[#allocation3 + $0xa0] sm:$0xff]  ;;  %v132_v29 = vld [vmem:[#allocation3 + $0xa8] sm:$0xff]  ;;  %v199_v30 = vadd.f32 %v10961_v25, %v10959_v24  ;;  %v133_v31 = vld [vmem:[#allocation3 + $0xb0] sm:$0xff]  ;;  %v202_v33 = vadd.f32 %v10965_v27, %v10963_v26 }
  0x64   :  { %v134_v32 = vld [vmem:[#allocation3 + $0xb8] sm:$0xff]  ;;  %v135_v34 = vld [vmem:[#allocation3 + $0xc0] sm:$0xff]  ;;  %v136_v35 = vld [vmem:[#allocation3 + $0xc8] sm:$0xff]  ;;  %v205_v36 = vadd.f32 %v132_v29, %v131_v28 }
  0x65   :  { %185 = vadd.xlane.f32.xlu1 %v184_v11  ;;  %v137_v37 = vld [vmem:[#allocation3 + $0xd0] sm:$0xff]  ;;  %v138_v38 = vld [vmem:[#allocation3 + $0xd8] sm:$0xff]  ;;  %v208_v39 = vadd.f32 %v134_v32, %v133_v31  ;;  %v139_v40 = vld [vmem:[#allocation3 + $0xe0] sm:$0xff]  ;;  %v211_v42 = vadd.f32 %v136_v35, %v135_v34 }
  0x66   :  { %v140_v41 = vld [vmem:[#allocation3 + $0xe8] sm:$0xff]  ;;  %v214_v43 = vadd.f32 %v138_v38, %v137_v37  ;;  %v141_v44 = vld [vmem:[#allocation3 + $0xf0] sm:$0xff]  ;;  %v142_v45 = vld [vmem:[#allocation3 + $0xf8] sm:$0xff] }
  0x67   :  { %188 = vadd.xlane.f32.xlu0 %v187_v16  ;;  %v143_v46 = vld [vmem:[#allocation3 + $0x100] sm:$0xff]  ;;  %v144_v47 = vld [vmem:[#allocation3 + $0x108] sm:$0xff]  ;;  %v217_v48 = vadd.f32 %v140_v41, %v139_v40  ;;  %v145_v49 = vld [vmem:[#allocation3 + $0x110] sm:$0xff]  ;;  %v220_v51 = vadd.f32 %v142_v45, %v141_v44 }
  0x68   :  { %v146_v50 = vld [vmem:[#allocation3 + $0x118] sm:$0xff]  ;;  %v147_v52 = vld [vmem:[#allocation3 + $0x120] sm:$0xff]  ;;  %v148_v53 = vld [vmem:[#allocation3 + $0x128] sm:$0xff]  ;;  %v223_v54 = vadd.f32 %v144_v47, %v143_v46 }
  0x69   :  { %191 = vadd.xlane.f32.xlu1 %v190_v17  ;;  %v226_v55 = vadd.f32 %v146_v50, %v145_v49  ;;  %v149_v56 = vld [vmem:[#allocation3 + $0x130] sm:$0xff]  ;;  %v150_v57 = vld [vmem:[#allocation3 + $0x138] sm:$0xff]  ;;  %v151_v58 = vld [vmem:[#allocation3 + $0x140] sm:$0xff]  ;;  %v229_v60 = vadd.f32 %v148_v53, %v147_v52 }
  0x6a   :  { %v152_v59 = vld [vmem:[#allocation3 + $0x148] sm:$0xff]  ;;  %v232_v61 = vadd.f32 %v150_v57, %v149_v56  ;;  %v153_v62 = vld [vmem:[#allocation3 + $0x150] sm:$0xff]  ;;  %v154_v63 = vld [vmem:[#allocation3 + $0x158] sm:$0xff] }
  0x6b   :  { %194 = vadd.xlane.f32.xlu0 %v193_v22  ;;  %v235_v3 = vadd.f32 %v152_v59, %v151_v58  ;;  %v238_v7 = vadd.f32 %v154_v63, %v153_v62  ;;  %v9739_v10 = vld [vmem:[#allocation6 + $0x4] ss:$24 sps:$4 sm:$0xff]   ;;  %v9741_v11 = vld [vmem:[#allocation6 + $0x14] ss:$24 sps:$4 sm:$0xff]   ;;  %v9743_v16 = vld [vmem:[#allocation6] ss:$24 sps:$4 sm:$0xff]  }
  0x6c   :  { %v9744_v17 = vld [vmem:[#allocation6 + $0x10] ss:$24 sps:$4 sm:$0xff]   ;;  %v9745_v22 = vld [vmem:[#allocation6 + $0x34] ss:$24 sps:$4 sm:$0xff]   ;;  %1448 = vmatprep.subr.bf16.mxu1 %v9739_v10  ;;  %1834 = vmatprep.subr.bf16.mxu0 %v9741_v11  ;;  %v9750_v29 = vld [vmem:[#allocation6 + $0x40] ss:$24 sps:$4 sm:$0xff]  }
  0x6d   :  { %197 = vadd.xlane.f32.xlu1 %v196_v23  ;;  %v9747_v23 = vld [vmem:[#allocation6 + $0x44] ss:$24 sps:$4 sm:$0xff]   ;;  %1449 = vmatpush1.bf16.msra.mxu1 %v9743_v16  ;;  %v9749_v28 = vld [vmem:[#allocation6 + $0x30] ss:$24 sps:$4 sm:$0xff]   ;;  %v9753_v31 = vld [vmem:[#allocation6 + $0x74] ss:$24 sps:$4 sm:$0xff]  }
  0x6e   :  { %1835 = vmatpush1.bf16.msra.mxu0 %v9744_v17  ;;  %1450 = vmatprep.subr.bf16.mxu1 %v9745_v22  ;;  %v9755_v32 = vld [vmem:[#allocation6 + $0x60] ss:$24 sps:$4 sm:$0xff]   ;;  %v9757_v34 = vld [vmem:[#allocation6 + $0x94] ss:$24 sps:$4 sm:$0xff]   ;;  %v9759_v35 = vld [vmem:[#allocation6 + $0xa4] ss:$24 sps:$4 sm:$0xff]  }
  0x6f   :  { %200 = vadd.xlane.f32.xlu0 %v199_v30  ;;  %1836 = vmatprep.subr.bf16.mxu0 %v9747_v23  ;;  %v9751_v30 = vld [vmem:[#allocation6 + $0x64] ss:$24 sps:$4 sm:$0xff]   ;;  %v9762_v37 = vld [vmem:[#allocation6 + $0xa0] ss:$24 sps:$4 sm:$0xff]   ;;  %v9768_v41 = vld [vmem:[#allocation6 + $0xd0] ss:$24 sps:$4 sm:$0xff]  }
  0x70   :  { %v9763_v38 = vld [vmem:[#allocation6 + $0xc4] ss:$24 sps:$4 sm:$0xff]   ;;  %v9767_v40 = vld [vmem:[#allocation6 + $0xc0] ss:$24 sps:$4 sm:$0xff]   ;;  %v9773_v44 = vld [vmem:[#allocation6 + $0xf0] ss:$24 sps:$4 sm:$0xff]  }
  0x71   :  { %203 = vadd.xlane.f32.xlu1 %v202_v33  ;;  %1451 = vmatpush1.bf16.msra.mxu1 %v9749_v28  ;;  %v9756_v33 = vld [vmem:[#allocation6 + $0x70] ss:$24 sps:$4 sm:$0xff]   ;;  %v9774_v45 = vld [vmem:[#allocation6 + $0x100] ss:$24 sps:$4 sm:$0xff]   ;;  %v9775_v46 = vld [vmem:[#allocation6 + $0x124] ss:$24 sps:$4 sm:$0xff]  }
  0x72   :  { %1837 = vmatpush1.bf16.msra.mxu0 %v9750_v29  ;;  %1452 = vmatprep.subr.bf16.mxu1 %v9751_v30  ;;  %v9777_v47 = vld [vmem:[#allocation6 + $0x134] ss:$24 sps:$4 sm:$0xff]   ;;  %v9780_v49 = vld [vmem:[#allocation6 + $0x130] ss:$24 sps:$4 sm:$0xff]   ;;  %v9786_v53 = vld [vmem:[#allocation6 + $0x160] ss:$24 sps:$4 sm:$0xff]  }
  0x73   :  { %206 = vadd.xlane.f32.xlu0 %v205_v36  ;;  %1838 = vmatprep.subr.bf16.mxu0 %v9753_v31  ;;  %v9761_v36 = vld [vmem:[#allocation6 + $0x90] ss:$24 sps:$4 sm:$0xff]   ;;  %v9781_v50 = vld [vmem:[#allocation6 + $0x154] ss:$24 sps:$4 sm:$0xff]   ;;  %v9791_v56 = vld [vmem:[#allocation6 + $0x180] ss:$24 sps:$4 sm:$0xff]  }
  0x74   :  { %v9785_v52 = vld [vmem:[#allocation6 + $0x150] ss:$24 sps:$4 sm:$0xff]  }
  0x75   :  { %209 = vadd.xlane.f32.xlu1 %v208_v39  ;;  %1453 = vmatpush1.bf16.msra.mxu1 %v9755_v32  ;;  %v9765_v39 = vld [vmem:[#allocation6 + $0xd4] ss:$24 sps:$4 sm:$0xff]   ;;  %v9792_v57 = vld [vmem:[#allocation6 + $0x190] ss:$24 sps:$4 sm:$0xff]  }
  0x76   :  { %1839 = vmatpush1.bf16.msra.mxu0 %v9756_v33  ;;  %1454 = vmatprep.subr.bf16.mxu1 %v9757_v34  ;;  %v10989_v23 = vld [vmem:[#allocation3 + $0x168] sm:$0xff] }
  0x77   :  { %212 = vadd.xlane.f32.xlu0 %v211_v42  ;;  %1840 = vmatprep.subr.bf16.mxu0 %v9759_v35  ;;  %v9769_v42 = vld [vmem:[#allocation6 + $0xf4] ss:$24 sps:$4 sm:$0xff]  }
  0x78   :  { %v11013_v35 = vld [vmem:[#allocation3 + $0x170] sm:$0xff] }
  0x79   :  { %215 = vadd.xlane.f32.xlu1 %v214_v43  ;;  %v9771_v43 = vld [vmem:[#allocation6 + $0x104] ss:$24 sps:$4 sm:$0xff]   ;;  %1455 = vmatpush1.bf16.msra.mxu1 %v9761_v36 }
  0x7a   :  { %1841 = vmatpush1.bf16.msra.mxu0 %v9762_v37  ;;  %1456 = vmatprep.subr.bf16.mxu1 %v9763_v38  ;;  %v11015_v36 = vld [vmem:[#allocation3 + $0x178] sm:$0xff] }
  0x7b   :  { %218 = vadd.xlane.f32.xlu0 %v217_v48  ;;  %1842 = vmatprep.subr.bf16.mxu0 %v9765_v39  ;;  %v9779_v48 = vld [vmem:[#allocation6 + $0x120] ss:$24 sps:$4 sm:$0xff]  }
  0x7d   :  { %221 = vadd.xlane.f32.xlu1 %v220_v51  ;;  %1457 = vmatpush1.bf16.msra.mxu1 %v9767_v40  ;;  %v9783_v51 = vld [vmem:[#allocation6 + $0x164] ss:$24 sps:$4 sm:$0xff]   ;;  %v244_v40 = vadd.f32 %v11015_v36, %v11013_v35 }
  0x7e   :  { %1843 = vmatpush1.bf16.msra.mxu0 %v9768_v41  ;;  %1458 = vmatprep.subr.bf16.mxu1 %v9769_v42 }
  0x7f   :  { %224 = vadd.xlane.f32.xlu0 %v223_v54  ;;  %1844 = vmatprep.subr.bf16.mxu0 %v9771_v43  ;;  %v9787_v54 = vld [vmem:[#allocation6 + $0x184] ss:$24 sps:$4 sm:$0xff]  }
  0x81   :  { %227 = vadd.xlane.f32.xlu1 %v226_v55  ;;  %1459 = vmatpush1.bf16.msra.mxu1 %v9773_v44  ;;  %v9789_v55 = vld [vmem:[#allocation6 + $0x194] ss:$24 sps:$4 sm:$0xff]  }
  0x82   :  { %1845 = vmatpush1.bf16.msra.mxu0 %v9774_v45  ;;  %1460 = vmatprep.subr.bf16.mxu1 %v9775_v46  ;;  %v11027_v45 = vld [vmem:[#allocation3 + $0x180] sm:$0xff]  ;;  %v11029_v46 = vld [vmem:[#allocation3 + $0x188] sm:$0xff] }
  0x83   :  { %230 = vadd.xlane.f32.xlu0 %v229_v60  ;;  %1846 = vmatprep.subr.bf16.mxu0 %v9777_v47 }
  0x85   :  { %233 = vadd.xlane.f32.xlu1 %v232_v61  ;;  %1461 = vmatpush1.bf16.msra.mxu1 %v9779_v48 }
  0x86   :  { %1847 = vmatpush1.bf16.msra.mxu0 %v9780_v49  ;;  %1462 = vmatprep.subr.bf16.mxu1 %v9781_v50 }
  0x87   :  { %236 = vadd.xlane.f32.xlu0 %v235_v3  ;;  %1848 = vmatprep.subr.bf16.mxu0 %v9783_v51 }
  0x89   :  { %239 = vadd.xlane.f32.xlu1 %v238_v7  ;;  %1463 = vmatpush1.bf16.msra.mxu1 %v9785_v52 }
  0x8a   :  { %1849 = vmatpush1.bf16.msra.mxu0 %v9786_v53  ;;  %1464 = vmatprep.subr.bf16.mxu1 %v9787_v54  ;;  %v11041_v53 = vld [vmem:[#allocation3 + $0x190] sm:$0xff]  ;;  %v11043_v54 = vld [vmem:[#allocation3 + $0x198] sm:$0xff] }
  0x8b   :  { %1850 = vmatprep.subr.bf16.mxu0 %v9789_v55 }
  0x8d   :  { %1465 = vmatpush1.bf16.msra.mxu1 %v9791_v56  ;;  %v250_v56 = vadd.f32 %v11043_v54, %v11041_v53 }
  0x8e   :  { %1851 = vmatpush1.bf16.msra.mxu0 %v9792_v57 }
  0xec   :  { %v177_v58 = vpop.xlane.xlu0 %176 }
  0xed   :  { %v272_v59 = vmul.f32 0.00390625, %v177_v58 }
  0xee   :  { %v183_v60 = vpop.xlane.xlu1 %182 }
  0xef   :  { %v274_v61 = vmul.f32 0.00390625, %v183_v60  ;;  %v10972_v62 = vsub.f32 %v10911_v0, %v272_v59  ;;  %v10975_v63 = vsub.f32 %v10913_v1, %v272_v59  ;;  %v10987_v0 = vld [vmem:[#allocation3 + $0x160] sm:$0xff] }
  0xf0   :  { %v180_v3 = vpop.xlane.xlu0 %179  ;;  %v241_v30 = vadd.f32 %v10989_v23, %v10987_v0  ;;  %v11055_v60 = vld [vmem:[#allocation3 + $0x1a0] sm:$0xff] }
  0xf1   :  { %v10978_v7 = vsub.f32 %v10921_v5, %v274_v61  ;;  %v10981_v10 = vsub.f32 %v10923_v6, %v274_v61  ;;  %v273_v11 = vmul.f32 0.00390625, %v180_v3  ;;  %v368_v16 = vmul.f32 %v10972_v62, %v10972_v62 }
  0xf2   :  { %v369_v17 = vmul.f32 %v10975_v63, %v10975_v63  ;;  %v186_v22 = vpop.xlane.xlu1 %185 }
  0xf3   :  { %v275_v1 = vmul.f32 0.00390625, %v186_v22  ;;  %v10992_v28 = vsub.f32 %v10915_v2, %v273_v11  ;;  %v10995_v5 = vsub.f32 %v10919_v4, %v273_v11  ;;  %v372_v32 = vmul.f32 %v10978_v7, %v10978_v7  ;;  %v9793_v22 = vld [vmem:[#allocation6 + $0x1b4] ss:$24 sps:$4 sm:$0xff]  }
  0xf4   :  { %v432_v6 = vadd.f32 %v369_v17, %v368_v16  ;;  %v189_v31 = vpop.xlane.xlu0 %188  ;;  %v373_v33 = vmul.f32 %v10981_v10, %v10981_v10  ;;  %v11065_v17 = vld [vmem:[#allocation3 + $0x1a8] sm:$0xff]  ;;  %1466 = vmatprep.subr.bf16.mxu1 %v9793_v22 }
  0xf5   :  { %v10998_v29 = vsub.f32 %v10927_v8, %v275_v1  ;;  %v11007_v2 = vsub.f32 %v10929_v9, %v275_v1  ;;  %v370_v4 = vmul.f32 %v10992_v28, %v10992_v28  ;;  %v371_v8 = vmul.f32 %v10995_v5, %v10995_v5  ;;  %v9795_v1 = vld [vmem:[#allocation6 + $0x1c4] ss:$24 sps:$4 sm:$0xff]  }
  0xf6   :  { %433 = vadd.xlane.f32.xlu0 %v432_v6  ;;  %v276_v34 = vmul.f32 0.00390625, %v189_v31  ;;  %v192_v37 = vpop.xlane.xlu1 %191  ;;  %v438_v39 = vadd.f32 %v373_v33, %v372_v32  ;;  %v9797_v6 = vld [vmem:[#allocation6 + $0x1b0] ss:$24 sps:$4 sm:$0xff]   ;;  %1852 = vmatprep.subr.bf16.mxu0 %v9795_v1 }
  0xf7   :  { %v435_v38 = vadd.f32 %v371_v8, %v370_v4  ;;  %v277_v41 = vmul.f32 0.00390625, %v192_v37  ;;  %v374_v9 = vmul.f32 %v10998_v29, %v10998_v29  ;;  %v375_v47 = vmul.f32 %v11007_v2, %v11007_v2  ;;  %1467 = vmatpush1.bf16.msra.mxu1 %v9797_v6  ;;  %v9799_v37 = vld [vmem:[#allocation6 + $0x1e4] ss:$24 sps:$4 sm:$0xff]  }
  0xf8   :  { %v195_v42 = vpop.xlane.xlu0 %194  ;;  %v11022_v43 = vsub.f32 %v10935_v12, %v276_v34  ;;  %v11025_v44 = vsub.f32 %v10937_v13, %v276_v34  ;;  %v247_v12 = vadd.f32 %v11029_v46, %v11027_v45  ;;  %v11077_v34 = vld [vmem:[#allocation3 + $0x1b8] sm:$0xff]  ;;  %1468 = vmatprep.subr.bf16.mxu1 %v9799_v37  ;;  %v9816_v37 = vld [vmem:[#allocation6 + $0x250] ss:$24 sps:$4 sm:$0xff]  }
  0xf9   :  { %436 = vadd.xlane.f32.xlu1 %v435_v38  ;;  %v11034_v49 = vsub.f32 %v10939_v14, %v277_v41  ;;  %v11037_v50 = vsub.f32 %v10941_v15, %v277_v41  ;;  %v441_v13 = vadd.f32 %v375_v47, %v374_v9  ;;  %v278_v52 = vmul.f32 0.00390625, %v195_v42  ;;  %v9801_v38 = vld [vmem:[#allocation6 + $0x1f4] ss:$24 sps:$4 sm:$0xff]   ;;  %v9804_v41 = vld [vmem:[#allocation6 + $0x1f0] ss:$24 sps:$4 sm:$0xff]  }
  0xfa   :  { %242 = vadd.xlane.f32.xlu0 %v241_v30  ;;  %v198_v48 = vpop.xlane.xlu1 %197  ;;  %v376_v55 = vmul.f32 %v11022_v43, %v11022_v43  ;;  %v377_v14 = vmul.f32 %v11025_v44, %v11025_v44  ;;  %v9798_v30 = vld [vmem:[#allocation6 + $0x1c0] ss:$24 sps:$4 sm:$0xff]  }
  0xfb   :  { %v279_v57 = vmul.f32 0.00390625, %v198_v48  ;;  %v378_v58 = vmul.f32 %v11034_v49, %v11034_v49  ;;  %v379_v59 = vmul.f32 %v11037_v50, %v11037_v50  ;;  %v11060_v3 = vsub.f32 %v10947_v18, %v278_v52  ;;  %1853 = vmatpush1.bf16.msra.mxu0 %v9798_v30  ;;  %v11110_v30 = vld [vmem:[#allocation3 + $0x1d8] sm:$0xff] }
  0xfc   :  { %v201_v51 = vpop.xlane.xlu0 %200  ;;  %v11063_v11 = vsub.f32 %v10949_v19, %v278_v52  ;;  %v444_v16 = vadd.f32 %v377_v14, %v376_v55  ;;  %v253_v18 = vadd.f32 %v11065_v17, %v11055_v60  ;;  %v11075_v19 = vld [vmem:[#allocation3 + $0x1b0] sm:$0xff]  ;;  %1854 = vmatprep.subr.bf16.mxu0 %v9801_v38  ;;  %v11097_v55 = vld [vmem:[#allocation3 + $0x1c8] sm:$0xff] }
  0xfd   :  { %245 = vadd.xlane.f32.xlu1 %v244_v40  ;;  %15189 = vst [vmem:[#allocation17_spill] sm:$0xff] %v11060_v3  ;;  %v11068_v32 = vsub.f32 %v10951_v20, %v279_v57  ;;  %v11071_v33 = vsub.f32 %v10953_v21, %v279_v57  ;;  %v447_v4 = vadd.f32 %v379_v59, %v378_v58  ;;  %v280_v8 = vmul.f32 0.00390625, %v201_v51  ;;  %v9803_v40 = vld [vmem:[#allocation6 + $0x1e0] ss:$24 sps:$4 sm:$0xff]   ;;  %v9809_v57 = vld [vmem:[#allocation6 + $0x210] ss:$24 sps:$4 sm:$0xff]  }
  0xfe   :  { %439 = vadd.xlane.f32.xlu0 %v438_v39  ;;  %v204_v15 = vpop.xlane.xlu1 %203  ;;  %v380_v20 = vmul.f32 %v11060_v3, %v11060_v3  ;;  %v381_v21 = vmul.f32 %v11063_v11, %v11063_v11  ;;  %v256_v9 = vadd.f32 %v11077_v34, %v11075_v19  ;;  %1469 = vmatpush1.bf16.msra.mxu1 %v9803_v40  ;;  %v9810_v58 = vld [vmem:[#allocation6 + $0x220] ss:$24 sps:$4 sm:$0xff]  }
  0xff   :  { %15190 = vst [vmem:[#allocation18_spill] sm:$0xff] %v11068_v32  ;;  %15191 = vst [vmem:[#allocation19_spill] sm:$0xff] %v11071_v33  ;;  %v281_v42 = vmul.f32 0.00390625, %v204_v15  ;;  %v382_v47 = vmul.f32 %v11068_v32, %v11068_v32  ;;  %v383_v48 = vmul.f32 %v11071_v33, %v11071_v33  ;;  %1855 = vmatpush1.bf16.msra.mxu0 %v9804_v41  ;;  %v9805_v15 = vld [vmem:[#allocation6 + $0x214] ss:$24 sps:$4 sm:$0xff]   ;;  %v10518_v3 = vld [vmem:[#allocation3 + $0xf8] sm:$0xff] }
 0x100   :  { %v11057_v61 = vpop.xlane.xlu0 %206  ;;  %v11092_v51 = vsub.f32 %v10959_v24, %v280_v8  ;;  %v450_v52 = vadd.f32 %v381_v21, %v380_v20  ;;  %1470 = vmatprep.subr.bf16.mxu1 %v9805_v15  ;;  %v9815_v21 = vld [vmem:[#allocation6 + $0x240] ss:$24 sps:$4 sm:$0xff]   ;;  %v11128_v15 = vld [vmem:[#allocation3 + $0x1e8] sm:$0xff] }
 0x101   :  { %442 = vadd.xlane.f32.xlu1 %v441_v13  ;;  %v11095_v13 = vsub.f32 %v10961_v25, %v280_v8  ;;  %v11100_v59 = vsub.f32 %v10963_v26, %v281_v42  ;;  %v11107_v25 = vld [vmem:[#allocation3 + $0x1d0] sm:$0xff]  ;;  %v453_v1 = vadd.f32 %v383_v48, %v382_v47  ;;  %v282_v6 = vmul.f32 0.00390625, %v11057_v61  ;;  %v9834_v33 = vld [vmem:[#allocation6 + $0x2e0] ss:$24 sps:$4 sm:$0xff]  }
 0x102   :  { %248 = vadd.xlane.f32.xlu0 %v247_v12  ;;  %v210_v31 = vpop.xlane.xlu1 %209  ;;  %v11089_v12 = vld [vmem:[#allocation3 + $0x1c0] sm:$0xff]  ;;  %15192 = vst [vmem:[#allocation20_spill] sm:$0xff] %v11092_v51  ;;  %1471 = vmatpush1.bf16.msra.mxu1 %v9809_v57  ;;  %v384_v26 = vmul.f32 %v11092_v51, %v11092_v51  ;;  %v262_v38 = vadd.f32 %v11110_v30, %v11107_v25 }
 0x103   :  { %15193 = vst [vmem:[#allocation21_spill] sm:$0xff] %v11095_v13  ;;  %15194 = vst [vmem:[#allocation22_spill] sm:$0xff] %v11100_v59  ;;  %v259_v24 = vadd.f32 %v11097_v55, %v11089_v12  ;;  %v283_v8 = vmul.f32 0.00390625, %v210_v31  ;;  %v386_v40 = vmul.f32 %v11100_v59, %v11100_v59  ;;  %v10508_v31 = vld [vmem:[#allocation3 + $0xa8] sm:$0xff]  ;;  %v9819_v57 = vld [vmem:[#allocation6 + $0x284] ss:$24 sps:$4 sm:$0xff]  }
 0x104   :  { %v213_v39 = vpop.xlane.xlu0 %212  ;;  %v11124_v47 = vsub.f32 %v10508_v31, %v282_v6  ;;  %v10511_v31 = vld [vmem:[#allocation3 + $0xc0] sm:$0xff] }
 0x105   :  { %251 = vadd.xlane.f32.xlu1 %v250_v56  ;;  %v9807_v56 = vld [vmem:[#allocation6 + $0x224] ss:$24 sps:$4 sm:$0xff]   ;;  %v284_v61 = vmul.f32 0.00390625, %v213_v39 }
 0x106   :  { %445 = vadd.xlane.f32.xlu0 %v444_v16  ;;  %v216_v14 = vpop.xlane.xlu1 %215  ;;  %1856 = vmatprep.subr.bf16.mxu0 %v9807_v56  ;;  %v11103_v16 = vsub.f32 %v10965_v27, %v281_v42  ;;  %v385_v27 = vmul.f32 %v11095_v13, %v11095_v13  ;;  %15197 = vst [vmem:[#allocation25_spill] sm:$0xff] %v11124_v47  ;;  %v9817_v56 = vld [vmem:[#allocation6 + $0x274] ss:$24 sps:$4 sm:$0xff]   ;;  %v10515_v51 = vld [vmem:[#allocation3 + $0xe0] sm:$0xff] }
 0x107   :  { %1857 = vmatpush1.bf16.msra.mxu0 %v9810_v58  ;;  %v10509_v58 = vld [vmem:[#allocation3 + $0xb0] sm:$0xff] }
 0x108   :  { %15195 = vst [vmem:[#allocation23_spill] sm:$0xff] %v11103_v16  ;;  %v219_v22 = vpop.xlane.xlu0 %218  ;;  %v387_v41 = vmul.f32 %v11103_v16, %v11103_v16  ;;  %v456_v48 = vadd.f32 %v385_v27, %v384_v26  ;;  %v11134_v26 = vsub.f32 %v10511_v31, %v284_v61  ;;  %v10512_v27 = vld [vmem:[#allocation3 + $0xc8] sm:$0xff]  ;;  %v10517_v13 = vld [vmem:[#allocation3 + $0xf0] sm:$0xff] }
 0x109   :  { %448 = vadd.xlane.f32.xlu1 %v447_v4  ;;  %v9813_v4 = vld [vmem:[#allocation6 + $0x254] ss:$24 sps:$4 sm:$0xff]   ;;  %v11136_v59 = vsub.f32 %v10512_v27, %v284_v61  ;;  %v11146_v61 = vld [vmem:[#allocation3 + $0x1f8] sm:$0xff]  ;;  %v9828_v16 = vld [vmem:[#allocation6 + $0x2b0] ss:$24 sps:$4 sm:$0xff]  }
 0x10a   :  { %254 = vadd.xlane.f32.xlu0 %v253_v18  ;;  %v9811_v18 = vld [vmem:[#allocation6 + $0x244] ss:$24 sps:$4 sm:$0xff]   ;;  %v222_v20 = vpop.xlane.xlu1 %221  ;;  %1858 = vmatprep.subr.bf16.mxu0 %v9813_v4  ;;  %v285_v4 = vmul.f32 0.00390625, %v216_v14  ;;  %15200 = vst [vmem:[#allocation28_spill] sm:$0xff] %v11134_v26 }
 0x10b   :  { %1472 = vmatprep.subr.bf16.mxu1 %v9811_v18  ;;  %1859 = vmatpush1.bf16.msra.mxu0 %v9816_v37  ;;  %v11130_v18 = vsub.f32 %v10509_v58, %v283_v8  ;;  %15201 = vst [vmem:[#allocation29_spill] sm:$0xff] %v11136_v59  ;;  %v286_v37 = vmul.f32 0.00390625, %v219_v22  ;;  %v459_v58 = vadd.f32 %v387_v41, %v386_v40  ;;  %v287_v27 = vmul.f32 0.00390625, %v222_v20  ;;  %v9823_v22 = vld [vmem:[#allocation6 + $0x2a4] ss:$24 sps:$4 sm:$0xff]  }
 0x10c   :  { %v225_v39 = vpop.xlane.xlu0 %224  ;;  %1473 = vmatpush1.bf16.msra.mxu1 %v9815_v21  ;;  %1860 = vmatprep.subr.bf16.mxu0 %v9819_v57  ;;  %v10513_v57 = vld [vmem:[#allocation3 + $0xd0] sm:$0xff]  ;;  %v10514_v40 = vld [vmem:[#allocation3 + $0xd8] sm:$0xff] }
 0x10d   :  { %257 = vadd.xlane.f32.xlu1 %v256_v9  ;;  %v10507_v9 = vld [vmem:[#allocation3 + $0xa0] sm:$0xff]  ;;  %15198 = vst [vmem:[#allocation26_spill] sm:$0xff] %v11130_v18  ;;  %1474 = vmatprep.subr.bf16.mxu1 %v9817_v56  ;;  %v9825_v56 = vld [vmem:[#allocation6 + $0x2b4] ss:$24 sps:$4 sm:$0xff]   ;;  %v11150_v41 = vsub.f32 %v10514_v40, %v285_v4  ;;  %v11156_v20 = vsub.f32 %v10515_v51, %v286_v37  ;;  %v288_v51 = vmul.f32 0.00390625, %v225_v39 }
 0x10e   :  { %451 = vadd.xlane.f32.xlu0 %v450_v52  ;;  %v11122_v42 = vsub.f32 %v10507_v9, %v282_v6  ;;  %v11126_v52 = vld [vmem:[#allocation3 + $0x1e0] sm:$0xff]  ;;  %v9821_v9 = vld [vmem:[#allocation6 + $0x270] ss:$24 sps:$4 sm:$0xff]   ;;  %v228_v31 = vpop.xlane.xlu1 %227  ;;  %v11166_v32 = vsub.f32 %v10517_v13, %v287_v27 }
 0x10f   :  { %v9822_v6 = vld [vmem:[#allocation6 + $0x280] ss:$24 sps:$4 sm:$0xff]   ;;  %v265_v21 = vadd.f32 %v11128_v15, %v11126_v52  ;;  %15202 = vst [vmem:[#allocation30_spill] sm:$0xff] %v11156_v20  ;;  %v395_v13 = vmul.f32 %v11150_v41, %v11150_v41 }
 0x110   :  { %15196 = vst [vmem:[#allocation24_spill] sm:$0xff] %v11122_v42  ;;  %v388_v14 = vmul.f32 %v11122_v42, %v11122_v42  ;;  %1475 = vmatpush1.bf16.msra.mxu1 %v9821_v9  ;;  %1861 = vmatpush1.bf16.msra.mxu0 %v9822_v6  ;;  %v392_v9 = vmul.f32 %v11134_v26, %v11134_v26  ;;  %15203 = vst [vmem:[#allocation31_spill] sm:$0xff] %v11166_v32  ;;  %v9829_v26 = vld [vmem:[#allocation6 + $0x2d4] ss:$24 sps:$4 sm:$0xff]  }
 0x111   :  { %454 = vadd.xlane.f32.xlu1 %v453_v1  ;;  %v393_v6 = vmul.f32 %v11136_v59, %v11136_v59  ;;  %1476 = vmatprep.subr.bf16.mxu1 %v9823_v22  ;;  %v9831_v59 = vld [vmem:[#allocation6 + $0x2e4] ss:$24 sps:$4 sm:$0xff]   ;;  %v11168_v22 = vsub.f32 %v10518_v3, %v287_v27 }
 0x112   :  { %260 = vadd.xlane.f32.xlu0 %v259_v24  ;;  %v10510_v24 = vld [vmem:[#allocation3 + $0xb8] sm:$0xff]  ;;  %1862 = vmatprep.subr.bf16.mxu0 %v9825_v56  ;;  %v234_v56 = vpop.xlane.xlu1 %233  ;;  %v10519_v3 = vld [vmem:[#allocation3 + $0x100] sm:$0xff] }
 0x113   :  { %v11132_v1 = vsub.f32 %v10510_v24, %v283_v8  ;;  %v11140_v8 = vld [vmem:[#allocation3 + $0x1f0] sm:$0xff]  ;;  %v389_v24 = vmul.f32 %v11124_v47, %v11124_v47  ;;  %v9827_v47 = vld [vmem:[#allocation6 + $0x2a0] ss:$24 sps:$4 sm:$0xff]  }
 0x114   :  { %1477 = vmatpush1.bf16.msra.mxu1 %v9827_v47  ;;  %1863 = vmatpush1.bf16.msra.mxu0 %v9828_v16  ;;  %v396_v16 = vmul.f32 %v11156_v20, %v11156_v20  ;;  %v10520_v47 = vld [vmem:[#allocation3 + $0x108] sm:$0xff] }
 0x115   :  { %15199 = vst [vmem:[#allocation27_spill] sm:$0xff] %v11132_v1  ;;  %263 = vadd.xlane.f32.xlu1 %v262_v38  ;;  %v11148_v38 = vsub.f32 %v10513_v57, %v285_v4  ;;  %v391_v42 = vmul.f32 %v11132_v1, %v11132_v1  ;;  %v231_v57 = vpop.xlane.xlu0 %230  ;;  %v10516_v4 = vld [vmem:[#allocation3 + $0xe8] sm:$0xff]  ;;  %v462_v1 = vadd.f32 %v389_v24, %v388_v14 }
 0x116   :  { %457 = vadd.xlane.f32.xlu0 %v456_v48  ;;  %v390_v48 = vmul.f32 %v11130_v18, %v11130_v18  ;;  %v11162_v40 = vsub.f32 %v10516_v4, %v286_v37  ;;  %v268_v18 = vadd.f32 %v11146_v61, %v11140_v8  ;;  %v9833_v4 = vld [vmem:[#allocation6 + $0x2d0] ss:$24 sps:$4 sm:$0xff]   ;;  %v468_v14 = vadd.f32 %v393_v6, %v392_v9 }
 0x117   :  { %v394_v37 = vmul.f32 %v11148_v38, %v11148_v38  ;;  %v290_v39 = vmul.f32 0.00390625, %v231_v57  ;;  %1478 = vmatprep.subr.bf16.mxu1 %v9829_v26  ;;  %1864 = vmatprep.subr.bf16.mxu0 %v9831_v59  ;;  %v11178_v24 = vsub.f32 %v10520_v47, %v288_v51  ;;  %v10521_v9 = vld [vmem:[#allocation3 + $0x110] sm:$0xff]  ;;  %v10522_v59 = vld [vmem:[#allocation3 + $0x118] sm:$0xff]  ;;  %v399_v6 = vmul.f32 %v11168_v22, %v11168_v22  ;;  %v10523_v57 = vld [vmem:[#allocation3 + $0x120] sm:$0xff] }
 0x118   :  { %1479 = vmatpush1.bf16.msra.mxu1 %v9833_v4  ;;  %1865 = vmatpush1.bf16.msra.mxu0 %v9834_v33 }
 0x119   :  { %460 = vadd.xlane.f32.xlu1 %v459_v58  ;;  %v465_v58 = vadd.f32 %v391_v42, %v390_v48  ;;  %v11176_v42 = vsub.f32 %v10519_v3, %v288_v51  ;;  %v237_v27 = vpop.xlane.xlu0 %236  ;;  %v398_v48 = vmul.f32 %v11166_v32, %v11166_v32  ;;  %v11190_v51 = vsub.f32 %v10523_v57, %v290_v39  ;;  %v10524_v3 = vld [vmem:[#allocation3 + $0x128] sm:$0xff] }
 0x11a   :  { %266 = vadd.xlane.f32.xlu0 %v265_v21  ;;  %v289_v21 = vmul.f32 0.00390625, %v228_v31  ;;  %v397_v31 = vmul.f32 %v11162_v40, %v11162_v40  ;;  %v11192_v47 = vsub.f32 %v10524_v3, %v290_v39  ;;  %v471_v20 = vadd.f32 %v395_v13, %v394_v37  ;;  %v10526_v37 = vld [vmem:[#allocation3 + $0x138] sm:$0xff] }
 0x11b   :  { %15204 = vst [vmem:[#allocation32_spill] sm:$0xff] %v11176_v42  ;;  %15206 = vst [vmem:[#allocation34_spill] sm:$0xff] %v11190_v51  ;;  %v292_v4 = vmul.f32 0.00390625, %v237_v27  ;;  %v477_v57 = vadd.f32 %v399_v6, %v398_v48  ;;  %v10527_v27 = vld [vmem:[#allocation3 + $0x140] sm:$0xff]  ;;  %v10528_v6 = vld [vmem:[#allocation3 + $0x148] sm:$0xff] }
 0x11c   :  { %v11184_v26 = vsub.f32 %v10521_v9, %v289_v21  ;;  %v474_v33 = vadd.f32 %v397_v31, %v396_v16  ;;  %v400_v9 = vmul.f32 %v11176_v42, %v11176_v42  ;;  %v404_v16 = vmul.f32 %v11190_v51, %v11190_v51 }
 0x11d   :  { %269 = vadd.xlane.f32.xlu1 %v268_v18  ;;  %v11186_v18 = vsub.f32 %v10522_v59, %v289_v21  ;;  %v401_v21 = vmul.f32 %v11178_v24, %v11178_v24  ;;  %v10525_v59 = vld [vmem:[#allocation3 + $0x130] sm:$0xff]  ;;  %v405_v31 = vmul.f32 %v11192_v47, %v11192_v47  ;;  %v11210_v48 = vsub.f32 %v10527_v27, %v292_v4 }
 0x11e   :  { %463 = vadd.xlane.f32.xlu0 %v462_v1  ;;  %15205 = vst [vmem:[#allocation33_spill] sm:$0xff] %v11184_v26  ;;  %v291_v1 = vmul.f32 0.00390625, %v234_v56  ;;  %v240_v56 = vpop.xlane.xlu1 %239  ;;  %v402_v39 = vmul.f32 %v11184_v26, %v11184_v26  ;;  %v11212_v3 = vsub.f32 %v10528_v6, %v292_v4  ;;  %v10529_v26 = vld [vmem:[#allocation3 + $0x150] sm:$0xff]  ;;  %v14944_v27 = vlaneseq }
 0x11f   :  { %v293_v13 = vmul.f32 0.00390625, %v240_v56  ;;  %v486_v56 = vadd.f32 %v405_v31, %v404_v16  ;;  %v408_v4 = vmul.f32 %v11210_v48, %v11210_v48 }
 0x120   :  { %v11198_v32 = vsub.f32 %v10525_v59, %v291_v1  ;;  %v480_v59 = vadd.f32 %v401_v21, %v400_v9  ;;  %v409_v9 = vmul.f32 %v11212_v3, %v11212_v3 }
 0x121   :  { %466 = vadd.xlane.f32.xlu1 %v465_v58  ;;  %v403_v58 = vmul.f32 %v11186_v18, %v11186_v18 }
 0x122   :  { %469 = vadd.xlane.f32.xlu0 %v468_v14  ;;  %v11204_v14 = vsub.f32 %v10526_v37, %v291_v1  ;;  %v11214_v1 = vsub.f32 %v10529_v26, %v293_v13  ;;  %v406_v37 = vmul.f32 %v11198_v32, %v11198_v32  ;;  %v492_v21 = vadd.f32 %v409_v9, %v408_v4 }
 0x123   :  { %v483_v42 = vadd.f32 %v403_v58, %v402_v39 }
 0x124   :  { %v407_v51 = vmul.f32 %v11204_v14, %v11204_v14  ;;  %v410_v39 = vmul.f32 %v11214_v1, %v11214_v1 }
 0x125   :  { %472 = vadd.xlane.f32.xlu1 %v471_v20  ;;  %v10530_v20 = vld [vmem:[#allocation3 + $0x158] sm:$0xff] }
 0x126   :  { %475 = vadd.xlane.f32.xlu0 %v474_v33  ;;  %v11220_v33 = vsub.f32 %v10530_v20, %v293_v13  ;;  %v489_v26 = vadd.f32 %v407_v51, %v406_v37  ;;  %v9837_v13 = vld [vmem:[#allocation6 + $0xc] ss:$24 sps:$4 sm:$0xff]   ;;  %v11231_v37 = vshrl.u32 %v14944_v27, 7 }
 0x127   :  { %1641 = vmatprep.subr.bf16.mxu1 %v9837_v13 }
 0x128   :  { %15207 = vst [vmem:[#allocation35_spill] sm:$0xff] %v11231_v37 }
 0x129   :  { %478 = vadd.xlane.f32.xlu1 %v477_v57  ;;  %v411_v57 = vmul.f32 %v11220_v33, %v11220_v33 }
 0x12a   :  { %481 = vadd.xlane.f32.xlu0 %v480_v59 }
 0x12b   :  { %v495_v58 = vadd.f32 %v411_v57, %v410_v39 }
 0x12d   :  { %484 = vadd.xlane.f32.xlu1 %v483_v42 }
 0x12e   :  { %487 = vadd.xlane.f32.xlu0 %v486_v56 }
 0x131   :  { %490 = vadd.xlane.f32.xlu1 %v489_v26 }
 0x132   :  { %493 = vadd.xlane.f32.xlu0 %v492_v21 }
 0x135   :  { %496 = vadd.xlane.f32.xlu1 %v495_v58 }
 0x183   :  { %v434_v16 = vpop.xlane.xlu0 %433 }
 0x184   :  { %v528_v31 = vmul.f32 0.00390625, %v434_v16  ;;  %v11244_v16 = vsub.s32 1, %v11231_v37 }
 0x186   :  { %v560_v6 = vadd.f32 1e-05, %v528_v31  ;;  %v437_v51 = vpop.xlane.xlu1 %436  ;;  %15208 = vst [vmem:[#allocation36_spill] sm:$0xff] %v11244_v16 }
 0x187   :  { %v243_v42 = vpop.xlane.xlu0 %242  ;;  %v529_v59 = vmul.f32 0.00390625, %v437_v51  ;;  %v11256_v51 = vsub.s32 0, %v11231_v37 }
 0x188   :  { %10123 = vrsqrt.f32 %v560_v6  ;;  %v294_v56 = vmul.f32 0.00390625, %v243_v42  ;;  %v688_v6 = vld [vmem:[%s14914_s1] sm:$0x3] }
 0x189   :  { %v561_v20 = vadd.f32 1e-05, %v529_v59  ;;  %15211 = vst [vmem:[#allocation39_spill] sm:$0xff] %v11256_v51 }
 0x18a   :  { %v11234_v4 = vsub.f32 %v10987_v0, %v294_v56  ;;  %v11237_v9 = vsub.f32 %v10989_v23, %v294_v56  ;;  %v246_v26 = vpop.xlane.xlu1 %245 }
 0x18b   :  { %v440_v21 = vpop.xlane.xlu0 %439  ;;  %10125 = vrsqrt.f32 %v561_v20  ;;  %v295_v39 = vmul.f32 0.00390625, %v246_v26 }
 0x18c   :  { %v530_v57 = vmul.f32 0.00390625, %v440_v21  ;;  %v412_v58 = vmul.f32 %v11234_v4, %v11234_v4  ;;  %v413_v13 = vmul.f32 %v11237_v9, %v11237_v9  ;;  %v11263_v21 = vrot.slane %v688_v6, %v11244_v16 }
 0x18d   :  { %v11247_v0 = vsub.f32 %v11013_v35, %v295_v39  ;;  %v11250_v23 = vsub.f32 %v11015_v36, %v295_v39 }
 0x18e   :  { %v562_v31 = vadd.f32 1e-05, %v530_v57  ;;  %v443_v42 = vpop.xlane.xlu1 %442  ;;  %v498_v56 = vadd.f32 %v413_v13, %v412_v58  ;;  %v764_v13 = vld [vmem:[%s14915_s2] sm:$0x3] }
 0x18f   :  { %15209 = vst [vmem:[#allocation37_spill] sm:$0xff] %v11247_v0  ;;  %15210 = vst [vmem:[#allocation38_spill] sm:$0xff] %v11250_v23  ;;  %v249_v59 = vpop.xlane.xlu0 %248  ;;  %v531_v20 = vmul.f32 0.00390625, %v443_v42  ;;  %v414_v35 = vmul.f32 %v11247_v0, %v11247_v0  ;;  %v415_v36 = vmul.f32 %v11250_v23, %v11250_v23  ;;  %v11285_v23 = vrot.slane %v764_v13, %v11244_v16 }
 0x190   :  { %10127 = vrsqrt.f32 %v562_v31  ;;  %v296_v26 = vmul.f32 0.00390625, %v249_v59  ;;  %499 = vadd.xlane.f32.xlu0 %v498_v56  ;;  %v11275_v31 = vrot.slane %v688_v6, %v11256_v51 }
 0x191   :  { %v563_v57 = vadd.f32 1e-05, %v531_v20  ;;  %v501_v56 = vadd.f32 %v415_v36, %v414_v35  ;;  %v11288_v35 = vrot.slane %v764_v13, %v11256_v51 }
 0x192   :  { %v10124_v39 = vpop.eup %10123  ;;  %v11266_v27 = vsub.f32 %v11027_v45, %v296_v26  ;;  %v11269_v58 = vsub.f32 %v11029_v46, %v296_v26  ;;  %v252_v42 = vpop.xlane.xlu1 %251 }
 0x193   :  { %v446_v59 = vpop.xlane.xlu0 %445  ;;  %v625_v37 = vmul.f32 %v10124_v39, %v10975_v63  ;;  %v624_v20 = vmul.f32 %v10124_v39, %v10972_v62  ;;  %10129 = vrsqrt.f32 %v563_v57  ;;  %v297_v45 = vmul.f32 0.00390625, %v252_v42  ;;  %502 = vadd.xlane.f32.xlu1 %v501_v56 }
 0x194   :  { %v532_v0 = vmul.f32 0.00390625, %v446_v59  ;;  %v416_v46 = vmul.f32 %v11266_v27, %v11266_v27  ;;  %v417_v26 = vmul.f32 %v11269_v58, %v11269_v58 }
 0x195   :  { %v701_v6 = vmul.f32 %v11263_v21, %v625_v37  ;;  %v10126_v63 = vpop.eup %10125  ;;  %v11291_v62 = vsub.f32 %v11041_v53, %v297_v45  ;;  %v11294_v36 = vsub.f32 %v11043_v54, %v297_v45  ;;  %v700_v57 = vmul.f32 %v11275_v31, %v624_v20 }
 0x196   :  { %v564_v39 = vadd.f32 1e-05, %v532_v0  ;;  %v449_v42 = vpop.xlane.xlu1 %448  ;;  %v504_v56 = vadd.f32 %v417_v26, %v416_v46  ;;  %v627_v37 = vmul.f32 %v10126_v63, %v10995_v5  ;;  %v626_v16 = vmul.f32 %v10126_v63, %v10992_v28 }
 0x197   :  { %v255_v59 = vpop.xlane.xlu0 %254  ;;  %v533_v13 = vmul.f32 0.00390625, %v449_v42  ;;  %v418_v53 = vmul.f32 %v11291_v62, %v11291_v62  ;;  %v419_v54 = vmul.f32 %v11294_v36, %v11294_v36  ;;  %v777_v20 = vadd.f32 %v11285_v23, %v701_v6 }
 0x198   :  { %10131 = vrsqrt.f32 %v564_v39  ;;  %v298_v51 = vmul.f32 0.00390625, %v255_v59  ;;  %505 = vadd.xlane.f32.xlu0 %v504_v56  ;;  %v703_v0 = vmul.f32 %v11263_v21, %v627_v37  ;;  %v702_v45 = vmul.f32 %v11275_v31, %v626_v16 }
 0x199   :  { %v565_v5 = vadd.f32 1e-05, %v533_v13  ;;  %v776_v63 = vadd.f32 %v11288_v35, %v700_v57  ;;  %v507_v59 = vadd.f32 %v419_v54, %v418_v53 }
 0x19a   :  { %v10128_v46 = vpop.eup %10127  ;;  %v11307_v28 = vsub.f32 %v11055_v60, %v298_v51  ;;  %v11310_v26 = vsub.f32 %v11065_v17, %v298_v51  ;;  %v258_v39 = vpop.xlane.xlu1 %257  ;;  %v779_v56 = vadd.f32 %v11285_v23, %v703_v0  ;;  %v778_v37 = vadd.f32 %v11288_v35, %v702_v45 }
 0x19b   :  { %v452_v42 = vpop.xlane.xlu0 %451  ;;  %v629_v6 = vmul.f32 %v10128_v46, %v10981_v10  ;;  %10133 = vrsqrt.f32 %v565_v5  ;;  %v299_v16 = vmul.f32 0.00390625, %v258_v39  ;;  %508 = vadd.xlane.f32.xlu1 %v507_v59  ;;  %v628_v5 = vmul.f32 %v10128_v46, %v10978_v7  ;;  %v9835_v39 = vld [vmem:[#allocation6 + $0x8] ss:$24 sps:$4 sm:$0xff]  }
 0x19c   :  { %v534_v13 = vmul.f32 0.00390625, %v452_v42  ;;  %v420_v60 = vmul.f32 %v11307_v28, %v11307_v28  ;;  %v11318_v17 = vpack.c.bf16 %v779_v56, %v777_v20  ;;  %v11320_v51 = vpack.c.bf16 %v778_v37, %v776_v63  ;;  %v9840_v56 = vld [vmem:[#allocation6 + $0x3c] ss:$24 sps:$4 sm:$0xff]  }
 0x19d   :  { %v421_v57 = vmul.f32 %v11310_v26, %v11310_v26  ;;  %v705_v53 = vmul.f32 %v11263_v21, %v629_v6  ;;  %v10130_v54 = vpop.eup %10129  ;;  %v11326_v0 = vsub.f32 %v11075_v19, %v299_v16  ;;  %v11329_v10 = vsub.f32 %v11077_v34, %v299_v16 }
 0x19e   :  { %15212 = vst [vmem:[#allocation40_spill] sm:$0xff] %v11320_v51  ;;  %v566_v45 = vadd.f32 1e-05, %v534_v13  ;;  %v455_v20 = vpop.xlane.xlu1 %454  ;;  %1480 = vmatprep.mubr.bf16.mxu1 %v11318_v17  ;;  %1866 = vmatprep.mubr.bf16.mxu0 %v11318_v17  ;;  %v631_v59 = vmul.f32 %v10130_v54, %v11007_v2  ;;  %v630_v2 = vmul.f32 %v10130_v54, %v10998_v29 }
 0x19f   :  { %v261_v63 = vpop.xlane.xlu0 %260  ;;  %v510_v42 = vadd.f32 %v421_v57, %v420_v60  ;;  %v535_v37 = vmul.f32 0.00390625, %v455_v20  ;;  %1481 = vmatmul.mubr.bf16.vlgmr.msra.gmra.mrb[0].mxu1 %v11320_v51  ;;  %1867 = vmatmul.mubr.bf16.vlgmr.msra.gmra.mrb[0].mxu0 %v11320_v51  ;;  %v422_v7 = vmul.f32 %v11326_v0, %v11326_v0  ;;  %v781_v34 = vadd.f32 %v11285_v23, %v705_v53  ;;  %v9838_v53 = vld [vmem:[#allocation6 + $0x38] ss:$24 sps:$4 sm:$0xff]  }
 0x1a0   :  { %v300_v19 = vmul.f32 0.00390625, %v261_v63  ;;  %v423_v46 = vmul.f32 %v11329_v10, %v11329_v10  ;;  %v707_v6 = vmul.f32 %v11263_v21, %v631_v59  ;;  %v704_v16 = vmul.f32 %v11275_v31, %v628_v5  ;;  %1642 = vmatpush1.bf16.msra.mxu1 %v9835_v39 }
 0x1a1   :  { %511 = vadd.xlane.f32.xlu0 %v510_v42  ;;  %10135 = vrsqrt.f32 %v566_v45  ;;  %v567_v60 = vadd.f32 1e-05, %v535_v37  ;;  %v706_v29 = vmul.f32 %v11275_v31, %v630_v2  ;;  %1643 = vmatprep.subr.bf16.mxu1 %v9840_v56 }
 0x1a2   :  { %v10132_v13 = vpop.eup %10131  ;;  %v11346_v57 = vsub.f32 %v11089_v12, %v300_v19  ;;  %v11349_v20 = vsub.f32 %v11097_v55, %v300_v19  ;;  %v264_v63 = vpop.xlane.xlu1 %263  ;;  %v513_v51 = vadd.f32 %v423_v46, %v422_v7  ;;  %v783_v59 = vadd.f32 %v11285_v23, %v707_v6  ;;  %v9843_v55 = vld [vmem:[#allocation6 + $0x6c] ss:$24 sps:$4 sm:$0xff]  }
 0x1a3   :  { %v458_v42 = vpop.xlane.xlu0 %457  ;;  %v780_v54 = vadd.f32 %v11288_v35, %v704_v16  ;;  %10137 = vrsqrt.f32 %v567_v60  ;;  %v301_v45 = vmul.f32 0.00390625, %v264_v63  ;;  %v782_v37 = vadd.f32 %v11288_v35, %v706_v29 }
 0x1a4   :  { %v536_v5 = vmul.f32 0.00390625, %v458_v42  ;;  %v424_v12 = vmul.f32 %v11346_v57, %v11346_v57  ;;  %514 = vadd.xlane.f32.xlu1 %v513_v51  ;;  %v11356_v39 = vpack.c.bf16 %v783_v59, %v781_v34  ;;  %v425_v19 = vmul.f32 %v11349_v20, %v11349_v20  ;;  %1644 = vmatpush1.bf16.msra.mxu1 %v9838_v53  ;;  %v9841_v51 = vld [vmem:[#allocation6 + $0x68] ss:$24 sps:$4 sm:$0xff]   ;;  %v9846_v42 = vld [vmem:[#allocation6 + $0x9c] ss:$24 sps:$4 sm:$0xff]  }
 0x1a5   :  { %v633_v7 = vmul.f32 %v10132_v13, %v11025_v44  ;;  %v10134_v46 = vpop.eup %10133  ;;  %v11363_v56 = vsub.f32 %v11107_v25, %v301_v45  ;;  %v11366_v6 = vsub.f32 %v11110_v30, %v301_v45  ;;  %v632_v16 = vmul.f32 %v10132_v13, %v11022_v43  ;;  %1645 = vmatprep.subr.bf16.mxu1 %v9843_v55 }
 0x1a6   :  { %v568_v2 = vadd.f32 1e-05, %v536_v5  ;;  %v461_v34 = vpop.xlane.xlu1 %460  ;;  %1490 = vmatprep.mubr.bf16.mxu1 %v11356_v39  ;;  %1876 = vmatprep.mubr.bf16.mxu0 %v11356_v39  ;;  %v11371_v63 = vpack.c.bf16 %v782_v37, %v780_v54  ;;  %v516_v44 = vadd.f32 %v425_v19, %v424_v12  ;;  %v635_v25 = vmul.f32 %v10134_v46, %v11037_v50  ;;  %v9844_v12 = vld [vmem:[#allocation6 + $0x98] ss:$24 sps:$4 sm:$0xff]  }
 0x1a7   :  { %v267_v60 = vpop.xlane.xlu0 %266  ;;  %v537_v30 = vmul.f32 0.00390625, %v461_v34  ;;  %v426_v43 = vmul.f32 %v11363_v56, %v11363_v56  ;;  %v427_v13 = vmul.f32 %v11366_v6, %v11366_v6  ;;  %v709_v53 = vmul.f32 %v11263_v21, %v633_v7 }
 0x1a8   :  { %10139 = vrsqrt.f32 %v568_v2  ;;  %v302_v59 = vmul.f32 0.00390625, %v267_v60  ;;  %1491 = vmatmul.mubr.bf16.gmra.mrb[4].mxu1 %v11371_v63  ;;  %1877 = vmatmul.mubr.bf16.gmra.mrb[4].mxu0 %v11371_v63  ;;  %v711_v29 = vmul.f32 %v11263_v21, %v635_v25  ;;  %v634_v5 = vmul.f32 %v10134_v46, %v11034_v49  ;;  %v9849_v25 = vld [vmem:[#allocation6 + $0xcc] ss:$24 sps:$4 sm:$0xff]  }
 0x1a9   :  { %v569_v50 = vadd.f32 1e-05, %v537_v30  ;;  %517 = vadd.xlane.f32.xlu0 %v516_v44  ;;  %1646 = vmatpush1.bf16.msra.mxu1 %v9841_v51  ;;  %v519_v19 = vadd.f32 %v427_v13, %v426_v43  ;;  %v785_v2 = vadd.f32 %v11285_v23, %v709_v53  ;;  %v708_v34 = vmul.f32 %v11275_v31, %v632_v16 }
 0x1aa   :  { %v11383_v54 = vsub.f32 %v11126_v52, %v302_v59  ;;  %v11386_v45 = vsub.f32 %v11128_v15, %v302_v59  ;;  %v270_v55 = vpop.xlane.xlu1 %269  ;;  %v787_v7 = vadd.f32 %v11285_v23, %v711_v29  ;;  %1647 = vmatprep.subr.bf16.mxu1 %v9846_v42  ;;  %v710_v44 = vmul.f32 %v11275_v31, %v634_v5 }
 0x1ab   :  { %v464_v37 = vpop.xlane.xlu0 %463  ;;  %v10136_v52 = vpop.eup %10135  ;;  %10141 = vrsqrt.f32 %v569_v50  ;;  %v303_v60 = vmul.f32 0.00390625, %v270_v55  ;;  %520 = vadd.xlane.f32.xlu1 %v519_v19  ;;  %v784_v46 = vadd.f32 %v11288_v35, %v708_v34  ;;  %v15214_v55 = vld [vmem:[#allocation19_spill] sm:$0xff] }
 0x1ac   :  { %v538_v15 = vmul.f32 0.00390625, %v464_v37  ;;  %v11393_v49 = vpack.c.bf16 %v787_v7, %v785_v2  ;;  %v428_v51 = vmul.f32 %v11383_v54, %v11383_v54  ;;  %v429_v30 = vmul.f32 %v11386_v45, %v11386_v45  ;;  %v9852_v7 = vld [vmem:[#allocation6 + $0xfc] ss:$24 sps:$4 sm:$0xff]  }
 0x1ad   :  { %v10138_v16 = vpop.eup %10137  ;;  %v11401_v42 = vsub.f32 %v11140_v8, %v303_v60  ;;  %v11404_v59 = vsub.f32 %v11146_v61, %v303_v60  ;;  %v786_v13 = vadd.f32 %v11288_v35, %v710_v44  ;;  %1648 = vmatpush1.bf16.msra.mxu1 %v9844_v12  ;;  %v637_v5 = vmul.f32 %v10136_v52, %v11063_v11  ;;  %v9847_v8 = vld [vmem:[#allocation6 + $0xc8] ss:$24 sps:$4 sm:$0xff]  }
 0x1ae   :  { %15213 = vst [vmem:[#allocation41_spill] sm:$0xff] %v11393_v49  ;;  %v570_v43 = vadd.f32 1e-05, %v538_v15  ;;  %v467_v53 = vpop.xlane.xlu1 %466  ;;  %1500 = vmatprep.mubr.bf16.mxu1 %v11393_v49  ;;  %1886 = vmatprep.mubr.bf16.mxu0 %v11393_v49  ;;  %v522_v50 = vadd.f32 %v429_v30, %v428_v51  ;;  %v639_v37 = vmul.f32 %v10138_v16, %v15214_v55  ;;  %v15217_v30 = vld [vmem:[#allocation18_spill] sm:$0xff]  ;;  %v15218_v55 = vld [vmem:[#allocation21_spill] sm:$0xff] }
 0x1af   :  { %v470_v29 = vpop.xlane.xlu0 %469  ;;  %v539_v19 = vmul.f32 0.00390625, %v467_v53  ;;  %v11411_v2 = vpack.c.bf16 %v786_v13, %v784_v46  ;;  %1649 = vmatprep.subr.bf16.mxu1 %v9849_v25  ;;  %v430_v12 = vmul.f32 %v11401_v42, %v11401_v42  ;;  %v431_v34 = vmul.f32 %v11404_v59, %v11404_v59  ;;  %v15216_v25 = vld [vmem:[#allocation17_spill] sm:$0xff] }
 0x1b0   :  { %10143 = vrsqrt.f32 %v570_v43  ;;  %v540_v61 = vmul.f32 0.00390625, %v470_v29  ;;  %523 = vadd.xlane.f32.xlu0 %v522_v50  ;;  %v713_v60 = vmul.f32 %v11263_v21, %v637_v5  ;;  %v715_v11 = vmul.f32 %v11263_v21, %v639_v37 }
 0x1b1   :  { %15215 = vst [vmem:[#allocation19_spill] sm:$0xff] %v11411_v2  ;;  %v571_v44 = vadd.f32 1e-05, %v539_v19  ;;  %1501 = vmatmul.mubr.bf16.gmra.mrb[8].mxu1 %v11411_v2  ;;  %1887 = vmatmul.mubr.bf16.gmra.mrb[8].mxu0 %v11411_v2  ;;  %v636_v46 = vmul.f32 %v10136_v52, %v15216_v25  ;;  %v638_v43 = vmul.f32 %v10138_v16, %v15217_v30  ;;  %v9850_v2 = vld [vmem:[#allocation6 + $0xf8] ss:$24 sps:$4 sm:$0xff]  }
 0x1b2   :  { %v10140_v15 = vpop.eup %10139  ;;  %v572_v51 = vadd.f32 1e-05, %v540_v61  ;;  %v473_v13 = vpop.xlane.xlu1 %472  ;;  %v525_v29 = vadd.f32 %v431_v34, %v430_v12  ;;  %v789_v50 = vadd.f32 %v11285_v23, %v713_v60  ;;  %v791_v5 = vadd.f32 %v11285_v23, %v715_v11  ;;  %1650 = vmatpush1.bf16.msra.mxu1 %v9847_v8  ;;  %v9855_v12 = vld [vmem:[#allocation6 + $0x12c] ss:$24 sps:$4 sm:$0xff]   ;;  %v15219_v25 = vld [vmem:[#allocation20_spill] sm:$0xff] }
 0x1b3   :  { %v476_v53 = vpop.xlane.xlu0 %475  ;;  %v641_v37 = vmul.f32 %v10140_v15, %v15218_v55  ;;  %10145 = vrsqrt.f32 %v571_v44  ;;  %v541_v19 = vmul.f32 0.00390625, %v473_v13  ;;  %v712_v49 = vmul.f32 %v11275_v31, %v636_v46  ;;  %1651 = vmatprep.subr.bf16.mxu1 %v9852_v7  ;;  %v15220_v46 = vld [vmem:[#allocation23_spill] sm:$0xff] }
 0x1b4   :  { %v542_v61 = vmul.f32 0.00390625, %v476_v53  ;;  %10147 = vrsqrt.f32 %v572_v51  ;;  %526 = vadd.xlane.f32.xlu1 %v525_v29  ;;  %v11427_v52 = vpack.c.bf16 %v791_v5, %v789_v50  ;;  %v714_v16 = vmul.f32 %v11275_v31, %v638_v43  ;;  %v15221_v29 = vld [vmem:[#allocation22_spill] sm:$0xff] }
 0x1b5   :  { %v10142_v34 = vpop.eup %10141  ;;  %v573_v60 = vadd.f32 1e-05, %v541_v19  ;;  %v717_v11 = vmul.f32 %v11263_v21, %v641_v37  ;;  %v640_v8 = vmul.f32 %v10140_v15, %v15219_v25  ;;  %v788_v7 = vadd.f32 %v11288_v35, %v712_v49  ;;  %v9853_v5 = vld [vmem:[#allocation6 + $0x128] ss:$24 sps:$4 sm:$0xff]   ;;  %v9858_v19 = vld [vmem:[#allocation6 + $0x15c] ss:$24 sps:$4 sm:$0xff]  }
 0x1b6   :  { %v574_v44 = vadd.f32 1e-05, %v542_v61  ;;  %v479_v30 = vpop.xlane.xlu1 %478  ;;  %1510 = vmatprep.mubr.bf16.mxu1 %v11427_v52  ;;  %1896 = vmatprep.mubr.bf16.mxu0 %v11427_v52  ;;  %v790_v51 = vadd.f32 %v11288_v35, %v714_v16  ;;  %v643_v13 = vmul.f32 %v10142_v34, %v15220_v46  ;;  %v642_v50 = vmul.f32 %v10142_v34, %v15221_v29  ;;  %v15225_v46 = vld [vmem:[#allocation24_spill] sm:$0xff] }
 0x1b7   :  { %10149 = vrsqrt.f32 %v573_v60  ;;  %v543_v43 = vmul.f32 0.00390625, %v479_v30  ;;  %v482_v53 = vpop.xlane.xlu0 %481  ;;  %1652 = vmatpush1.bf16.msra.mxu1 %v9850_v2  ;;  %v716_v37 = vmul.f32 %v11275_v31, %v640_v8  ;;  %v793_v16 = vadd.f32 %v11285_v23, %v717_v11  ;;  %v15223_v30 = vld [vmem:[#allocation25_spill] sm:$0xff] }
 0x1b8   :  { %v11438_v15 = vpack.c.bf16 %v790_v51, %v788_v7  ;;  %v719_v55 = vmul.f32 %v11263_v21, %v643_v13  ;;  %1653 = vmatprep.subr.bf16.mxu1 %v9855_v12  ;;  %v718_v60 = vmul.f32 %v11275_v31, %v642_v50  ;;  %10151 = vrsqrt.f32 %v574_v44  ;;  %v9856_v51 = vld [vmem:[#allocation6 + $0x158] ss:$24 sps:$4 sm:$0xff]  }
 0x1b9   :  { %v575_v61 = vadd.f32 1e-05, %v543_v43  ;;  %v544_v25 = vmul.f32 0.00390625, %v482_v53  ;;  %v792_v44 = vadd.f32 %v11288_v35, %v716_v37  ;;  %v9861_v43 = vld [vmem:[#allocation6 + $0x18c] ss:$24 sps:$4 sm:$0xff]  }
 0x1ba   :  { %15222 = vst [vmem:[#allocation17_spill] sm:$0xff] %v11438_v15  ;;  %v10144_v49 = vpop.eup %10143  ;;  %1511 = vmatmul.mubr.bf16.gmra.mrb[12].mxu1 %v11438_v15  ;;  %1897 = vmatmul.mubr.bf16.gmra.mrb[12].mxu0 %v11438_v15  ;;  %v485_v2 = vpop.xlane.xlu1 %484  ;;  %v795_v34 = vadd.f32 %v11285_v23, %v719_v55  ;;  %v794_v8 = vadd.f32 %v11288_v35, %v718_v60  ;;  %v15227_v60 = vld [vmem:[#allocation26_spill] sm:$0xff] }
 0x1bb   :  { %v645_v7 = vmul.f32 %v10144_v49, %v15223_v30  ;;  %10153 = vrsqrt.f32 %v575_v61  ;;  %v545_v12 = vmul.f32 0.00390625, %v485_v2  ;;  %1654 = vmatpush1.bf16.msra.mxu1 %v9853_v5  ;;  %v644_v13 = vmul.f32 %v10144_v49, %v15225_v46  ;;  %v488_v61 = vpop.xlane.xlu0 %487  ;;  %v15228_v46 = vld [vmem:[#allocation29_spill] sm:$0xff] }
 0x1bc   :  { %v11449_v11 = vpack.c.bf16 %v795_v34, %v793_v16  ;;  %1655 = vmatprep.subr.bf16.mxu1 %v9858_v19  ;;  %v576_v30 = vadd.f32 1e-05, %v544_v25  ;;  %v11456_v5 = vpack.c.bf16 %v794_v8, %v792_v44  ;;  %v15226_v16 = vld [vmem:[#allocation27_spill] sm:$0xff]  ;;  %v9859_v34 = vld [vmem:[#allocation6 + $0x188] ss:$24 sps:$4 sm:$0xff]   ;;  %v546_v44 = vmul.f32 0.00390625, %v488_v61 }
 0x1bd   :  { %v10146_v53 = vpop.eup %10145  ;;  %v577_v29 = vadd.f32 1e-05, %v545_v12  ;;  %v721_v50 = vmul.f32 %v11263_v21, %v645_v7  ;;  %v720_v19 = vmul.f32 %v11275_v31, %v644_v13 }
 0x1be   :  { %15224 = vst [vmem:[#allocation18_spill] sm:$0xff] %v11449_v11  ;;  %v10148_v55 = vpop.eup %10147  ;;  %v491_v2 = vpop.xlane.xlu1 %490  ;;  %1520 = vmatprep.mubr.bf16.mxu1 %v11449_v11  ;;  %1906 = vmatprep.mubr.bf16.mxu0 %v11449_v11  ;;  %v647_v37 = vmul.f32 %v10146_v53, %v15226_v16  ;;  %v646_v49 = vmul.f32 %v10146_v53, %v15227_v60  ;;  %v9864_v11 = vld [vmem:[#allocation6 + $0x1bc] ss:$24 sps:$4 sm:$0xff]  }
 0x1bf   :  { %10155 = vrsqrt.f32 %v577_v29  ;;  %1656 = vmatpush1.bf16.msra.mxu1 %v9856_v51  ;;  %v547_v7 = vmul.f32 0.00390625, %v491_v2  ;;  %v649_v15 = vmul.f32 %v10148_v55, %v15228_v46  ;;  %v797_v16 = vadd.f32 %v11285_v23, %v721_v50  ;;  %v9862_v2 = vld [vmem:[#allocation6 + $0x1b8] ss:$24 sps:$4 sm:$0xff]  }
 0x1c0   :  { %v723_v25 = vmul.f32 %v11263_v21, %v647_v37  ;;  %v722_v12 = vmul.f32 %v11275_v31, %v646_v49  ;;  %1657 = vmatprep.subr.bf16.mxu1 %v9861_v43  ;;  %10157 = vrsqrt.f32 %v576_v30  ;;  %v796_v29 = vadd.f32 %v11288_v35, %v720_v19 }
 0x1c1   :  { %v10150_v8 = vpop.eup %10149  ;;  %v725_v43 = vmul.f32 %v11263_v21, %v649_v15  ;;  %v579_v37 = vadd.f32 1e-05, %v547_v7  ;;  %v578_v19 = vadd.f32 1e-05, %v546_v44  ;;  %v9865_v44 = vld [vmem:[#allocation6 + $0x1e8] ss:$24 sps:$4 sm:$0xff]  }
 0x1c2   :  { %1521 = vmatmul.mubr.bf16.gmra.mrb[16].mxu1 %v11456_v5  ;;  %1907 = vmatmul.mubr.bf16.gmra.mrb[16].mxu0 %v11456_v5  ;;  %v799_v51 = vadd.f32 %v11285_v23, %v723_v25  ;;  %v798_v13 = vadd.f32 %v11288_v35, %v722_v12  ;;  %v651_v53 = vmul.f32 %v10150_v8, %v11150_v41  ;;  %v10152_v61 = vpop.eup %10151  ;;  %v497_v25 = vpop.xlane.xlu1 %496  ;;  %v15229_v41 = vld [vmem:[#allocation28_spill] sm:$0xff] }
 0x1c3   :  { %1658 = vmatpush1.bf16.msra.mxu1 %v9859_v34  ;;  %v650_v60 = vmul.f32 %v10150_v8, %v11148_v38  ;;  %v648_v46 = vmul.f32 %v10148_v55, %v15229_v41  ;;  %v801_v15 = vadd.f32 %v11285_v23, %v725_v43  ;;  %v494_v38 = vpop.xlane.xlu0 %493  ;;  %10159 = vrsqrt.f32 %v579_v37  ;;  %v9868_v41 = vld [vmem:[#allocation6 + $0x218] ss:$24 sps:$4 sm:$0xff]  }
 0x1c4   :  { %v11472_v50 = vpack.c.bf16 %v799_v51, %v797_v16  ;;  %v727_v30 = vmul.f32 %v11263_v21, %v651_v53  ;;  %1659 = vmatprep.subr.bf16.mxu1 %v9864_v11  ;;  %v11476_v12 = vpack.c.bf16 %v798_v13, %v796_v29  ;;  %v9867_v16 = vld [vmem:[#allocation6 + $0x1ec] ss:$24 sps:$4 sm:$0xff]   ;;  %v653_v11 = vmul.f32 %v10152_v61, %v11162_v40 }
 0x1c5   :  { %v10154_v49 = vpop.eup %10153  ;;  %v549_v8 = vmul.f32 0.00390625, %v497_v25  ;;  %v726_v55 = vmul.f32 %v11275_v31, %v650_v60  ;;  %10161 = vrsqrt.f32 %v578_v19  ;;  %v548_v29 = vmul.f32 0.00390625, %v494_v38  ;;  %v15230_v60 = vld [vmem:[#allocation31_spill] sm:$0xff] }
 0x1c6   :  { %1530 = vmatprep.mubr.bf16.mxu1 %v11472_v50  ;;  %1916 = vmatprep.mubr.bf16.mxu0 %v11472_v50  ;;  %v803_v34 = vadd.f32 %v11285_v23, %v727_v30  ;;  %v655_v7 = vmul.f32 %v10154_v49, %v11168_v22  ;;  %v724_v40 = vmul.f32 %v11275_v31, %v648_v46  ;;  %v9870_v22 = vld [vmem:[#allocation6 + $0x21c] ss:$24 sps:$4 sm:$0xff]  }
 0x1c7   :  { %1660 = vmatpush1.bf16.msra.mxu1 %v9862_v2  ;;  %v729_v43 = vmul.f32 %v11263_v21, %v653_v11  ;;  %v581_v37 = vadd.f32 1e-05, %v549_v8  ;;  %v802_v30 = vadd.f32 %v11288_v35, %v726_v55  ;;  %v654_v25 = vmul.f32 %v10154_v49, %v15230_v60 }
 0x1c8   :  { %v11485_v51 = vpack.c.bf16 %v803_v34, %v801_v15  ;;  %1661 = vmatprep.subr.bf16.mxu1 %v9867_v16  ;;  %v731_v53 = vmul.f32 %v11263_v21, %v655_v7  ;;  %v580_v34 = vadd.f32 1e-05, %v548_v29  ;;  %v800_v46 = vadd.f32 %v11288_v35, %v724_v40  ;;  %v15231_v7 = vld [vmem:[#allocation30_spill] sm:$0xff]  ;;  %v9876_v40 = vld [vmem:[#allocation6 + $0x27c] ss:$24 sps:$4 sm:$0xff]  }
 0x1c9   :  { %v10156_v13 = vpop.eup %10155  ;;  %v652_v16 = vmul.f32 %v10152_v61, %v15231_v7  ;;  %v805_v38 = vadd.f32 %v11285_v23, %v729_v43  ;;  %10163 = vrsqrt.f32 %v581_v37  ;;  %v730_v49 = vmul.f32 %v11275_v31, %v654_v25  ;;  %v9873_v29 = vld [vmem:[#allocation6 + $0x24c] ss:$24 sps:$4 sm:$0xff]  }
 0x1ca   :  { %1531 = vmatmul.mubr.bf16.gmra.mrb[20].mxu1 %v11476_v12  ;;  %1917 = vmatmul.mubr.bf16.gmra.mrb[20].mxu0 %v11476_v12  ;;  %v10158_v2 = vpop.eup %10157  ;;  %v807_v19 = vadd.f32 %v11285_v23, %v731_v53  ;;  %v659_v15 = vmul.f32 %v10156_v13, %v11186_v18  ;;  %v11502_v8 = vpack.c.bf16 %v802_v30, %v800_v46  ;;  %10165 = vrsqrt.f32 %v580_v34  ;;  %v9871_v53 = vld [vmem:[#allocation6 + $0x248] ss:$24 sps:$4 sm:$0xff]  }
 0x1cb   :  { %1540 = vmatprep.mubr.bf16.mxu1 %v11485_v51  ;;  %1662 = vmatpush1.bf16.msra.mxu1 %v9865_v44  ;;  %v657_v11 = vmul.f32 %v10158_v2, %v11178_v24  ;;  %v728_v61 = vmul.f32 %v11275_v31, %v652_v16  ;;  %v806_v43 = vadd.f32 %v11288_v35, %v730_v49  ;;  %v15232_v37 = vld [vmem:[#allocation33_spill] sm:$0xff] }
 0x1cc   :  { %1663 = vmatprep.subr.bf16.mxu1 %v9870_v22  ;;  %v11505_v55 = vpack.c.bf16 %v807_v19, %v805_v38  ;;  %v735_v18 = vmul.f32 %v11263_v21, %v659_v15  ;;  %v658_v30 = vmul.f32 %v10156_v13, %v15232_v37  ;;  %v15233_v15 = vld [vmem:[#allocation32_spill] sm:$0xff] }
 0x1cd   :  { %v10160_v44 = vpop.eup %10159  ;;  %v733_v24 = vmul.f32 %v11263_v21, %v657_v11  ;;  %v804_v19 = vadd.f32 %v11288_v35, %v728_v61  ;;  %v656_v34 = vmul.f32 %v10158_v2, %v15233_v15  ;;  %v9877_v2 = vld [vmem:[#allocation6 + $0x2a8] ss:$24 sps:$4 sm:$0xff]   ;;  %v9882_v61 = vld [vmem:[#allocation6 + $0x2dc] ss:$24 sps:$4 sm:$0xff]   ;;  %v9880_v37 = vld [vmem:[#allocation6 + $0x2d8] ss:$24 sps:$4 sm:$0xff]  }
 0x1ce   :  { %v811_v60 = vadd.f32 %v11285_v23, %v735_v18  ;;  %v663_v25 = vmul.f32 %v10160_v44, %v11204_v14  ;;  %v734_v13 = vmul.f32 %v11275_v31, %v658_v30  ;;  %v9879_v18 = vld [vmem:[#allocation6 + $0x2ac] ss:$24 sps:$4 sm:$0xff]  }
 0x1cf   :  { %1664 = vmatpush1.bf16.msra.mxu1 %v9868_v41  ;;  %v10162_v22 = vpop.eup %10161  ;;  %v9874_v41 = vld [vmem:[#allocation6 + $0x278] ss:$24 sps:$4 sm:$0xff]   ;;  %v809_v46 = vadd.f32 %v11285_v23, %v733_v24  ;;  %v11520_v16 = vpack.c.bf16 %v806_v43, %v804_v19  ;;  %v732_v49 = vmul.f32 %v11275_v31, %v656_v34  ;;  %v662_v24 = vmul.f32 %v10160_v44, %v11198_v32 }
 0x1d0   :  { %1665 = vmatprep.subr.bf16.mxu1 %v9873_v29  ;;  %v661_v7 = vmul.f32 %v10162_v22, %v11192_v47  ;;  %v739_v11 = vmul.f32 %v11263_v21, %v663_v25  ;;  %v810_v29 = vadd.f32 %v11288_v35, %v734_v13 }
 0x1d1   :  { %v11523_v38 = vpack.c.bf16 %v811_v60, %v809_v46  ;;  %v808_v30 = vadd.f32 %v11288_v35, %v732_v49  ;;  %v15234_v60 = vld [vmem:[#allocation34_spill] sm:$0xff]  ;;  %v738_v32 = vmul.f32 %v11275_v31, %v662_v24 }
 0x1d2   :  { %1541 = vmatmul.mubr.bf16.gmra.mrb[24].mxu1 %v11502_v8  ;;  %v737_v47 = vmul.f32 %v11263_v21, %v661_v7  ;;  %v660_v25 = vmul.f32 %v10162_v22, %v15234_v60  ;;  %v10531_v46 = vld [vmem:[#allocation6 + $0x14] ss:$24 sps:$4 sm:$0xff]  }
 0x1d3   :  { %1550 = vmatprep.mubr.bf16.mxu1 %v11505_v55  ;;  %1666 = vmatpush1.bf16.msra.mxu1 %v9871_v53  ;;  %v10164_v14 = vpop.eup %10163  ;;  %v11538_v15 = vpack.c.bf16 %v810_v29, %v808_v30 }
 0x1d4   :  { %1667 = vmatprep.subr.bf16.mxu1 %v9876_v40  ;;  %v10166_v53 = vpop.eup %10165  ;;  %v815_v40 = vadd.f32 %v11285_v23, %v739_v11  ;;  %v667_v43 = vmul.f32 %v10164_v14, %v11220_v33  ;;  %v736_v33 = vmul.f32 %v11275_v31, %v660_v25  ;;  %v666_v7 = vmul.f32 %v10164_v14, %v11214_v1 }
 0x1d5   :  { %v665_v19 = vmul.f32 %v10166_v53, %v11212_v3  ;;  %v814_v3 = vadd.f32 %v11288_v35, %v738_v32  ;;  %v664_v49 = vmul.f32 %v10166_v53, %v11210_v48 }
 0x1d6   :  { %v743_v34 = vmul.f32 %v11263_v21, %v667_v43  ;;  %v812_v11 = vadd.f32 %v11288_v35, %v736_v33 }
 0x1d7   :  { %1668 = vmatpush1.bf16.msra.mxu1 %v9874_v41  ;;  %v813_v41 = vadd.f32 %v11285_v23, %v737_v47  ;;  %v741_v22 = vmul.f32 %v11263_v21, %v665_v19  ;;  %v742_v47 = vmul.f32 %v11275_v31, %v666_v7  ;;  %v740_v29 = vmul.f32 %v11275_v31, %v664_v49 }
 0x1d8   :  { %1669 = vmatprep.subr.bf16.mxu1 %v9879_v18  ;;  %v819_v13 = vadd.f32 %v11285_v23, %v743_v34  ;;  %v11554_v18 = vpack.c.bf16 %v814_v3, %v812_v11 }
 0x1d9   :  { %v11541_v44 = vpack.c.bf16 %v815_v40, %v813_v41  ;;  %v818_v1 = vadd.f32 %v11288_v35, %v742_v47  ;;  %v816_v14 = vadd.f32 %v11288_v35, %v740_v29  ;;  %v15235_v29 = vld [vmem:[#allocation38_spill] sm:$0xff] }
 0x1da   :  { %1551 = vmatmul.mubr.bf16.gmra.mrb[28].mxu1 %v11520_v16 }
 0x1db   :  { %1560 = vmatprep.mubr.bf16.mxu1 %v11523_v38  ;;  %1670 = vmatpush1.bf16.msra.mxu1 %v9877_v2  ;;  %v817_v2 = vadd.f32 %v11285_v23, %v741_v22  ;;  %v11564_v24 = vpack.c.bf16 %v818_v1, %v816_v14  ;;  %v15236_v14 = vld [vmem:[#allocation37_spill] sm:$0xff] }
 0x1dc   :  { %1671 = vmatprep.subr.bf16.mxu1 %v9882_v61 }
 0x1dd   :  { %v11557_v61 = vpack.c.bf16 %v819_v13, %v817_v2 }
 0x1df   :  { %1672 = vmatpush1.bf16.msra.mxu1 %v9880_v37 }
 0x1e0   :  { %9436 = vmatprep.subr.bf16.mxu1 %v10531_v46 }
 0x1e2   :  { %1561 = vmatmul.mubr.bf16.gmra.mrb[32].mxu1 %v11538_v15 }
 0x1e3   :  { %1570 = vmatprep.mubr.bf16.mxu1 %v11541_v44 }
 0x1ea   :  { %1571 = vmatmul.mubr.bf16.gmra.mrb[36].mxu1 %v11554_v18 }
 0x1eb   :  { %1580 = vmatprep.mubr.bf16.mxu1 %v11557_v61 }
 0x1f2   :  { %1581 = vmatmul.mubr.bf16.gmra.mrb[40].mxu1 %v11564_v24 }
 0x21d   :  { %v500_v48 = vpop.xlane.xlu0 %499 }
 0x21e   :  { %v550_v53 = vmul.f32 0.00390625, %v500_v48 }
 0x220   :  { %v582_v40 = vadd.f32 1e-05, %v550_v53  ;;  %v503_v43 = vpop.xlane.xlu1 %502 }
 0x221   :  { %v551_v37 = vmul.f32 0.00390625, %v503_v43 }
 0x222   :  { %10167 = vrsqrt.f32 %v582_v40 }
 0x223   :  { %v583_v30 = vadd.f32 1e-05, %v551_v37 }
 0x225   :  { %v506_v60 = vpop.xlane.xlu0 %505  ;;  %10169 = vrsqrt.f32 %v583_v30 }
 0x226   :  { %v552_v25 = vmul.f32 0.00390625, %v506_v60 }
 0x228   :  { %v584_v41 = vadd.f32 1e-05, %v552_v25  ;;  %v509_v19 = vpop.xlane.xlu1 %508 }
 0x229   :  { %v553_v32 = vmul.f32 0.00390625, %v509_v19 }
 0x22a   :  { %10171 = vrsqrt.f32 %v584_v41 }
 0x22b   :  { %v585_v33 = vadd.f32 1e-05, %v553_v32 }
 0x22c   :  { %v10168_v34 = vpop.eup %10167 }
 0x22d   :  { %v669_v22 = vmul.f32 %v10168_v34, %v11237_v9  ;;  %v668_v3 = vmul.f32 %v10168_v34, %v11234_v4  ;;  %10173 = vrsqrt.f32 %v585_v33 }
 0x22e   :  { %v512_v46 = vpop.xlane.xlu0 %511 }
 0x22f   :  { %v554_v7 = vmul.f32 0.00390625, %v512_v46  ;;  %v10170_v13 = vpop.eup %10169  ;;  %v745_v49 = vmul.f32 %v11263_v21, %v669_v22  ;;  %v744_v2 = vmul.f32 %v11275_v31, %v668_v3 }
 0x230   :  { %v671_v1 = vmul.f32 %v10170_v13, %v15235_v29  ;;  %v670_v48 = vmul.f32 %v10170_v13, %v15236_v14 }
 0x231   :  { %v586_v11 = vadd.f32 1e-05, %v554_v7  ;;  %v515_v47 = vpop.xlane.xlu1 %514  ;;  %v821_v37 = vadd.f32 %v11285_v23, %v745_v49  ;;  %v820_v30 = vadd.f32 %v11288_v35, %v744_v2 }
 0x232   :  { %v555_v53 = vmul.f32 0.00390625, %v515_v47  ;;  %v747_v40 = vmul.f32 %v11263_v21, %v671_v1  ;;  %v746_v9 = vmul.f32 %v11275_v31, %v670_v48 }
 0x233   :  { %10175 = vrsqrt.f32 %v586_v11 }
 0x234   :  { %v10172_v4 = vpop.eup %10171  ;;  %v587_v43 = vadd.f32 1e-05, %v555_v53  ;;  %v823_v60 = vadd.f32 %v11285_v23, %v747_v40  ;;  %v822_v25 = vadd.f32 %v11288_v35, %v746_v9 }
 0x235   :  { %v673_v41 = vmul.f32 %v10172_v4, %v11269_v58  ;;  %v672_v19 = vmul.f32 %v10172_v4, %v11266_v27 }
 0x236   :  { %10177 = vrsqrt.f32 %v587_v43  ;;  %v518_v32 = vpop.xlane.xlu0 %517  ;;  %v11581_v33 = vpack.c.bf16 %v823_v60, %v821_v37  ;;  %v11583_v46 = vpack.c.bf16 %v822_v25, %v820_v30 }
 0x237   :  { %v556_v34 = vmul.f32 0.00390625, %v518_v32  ;;  %v10174_v22 = vpop.eup %10173  ;;  %v749_v3 = vmul.f32 %v11263_v21, %v673_v41  ;;  %v748_v7 = vmul.f32 %v11275_v31, %v672_v19 }
 0x238   :  { %v521_v11 = vpop.xlane.xlu1 %520  ;;  %1590 = vmatprep.mubr.bf16.mxu1 %v11581_v33  ;;  %v675_v58 = vmul.f32 %v10174_v22, %v11294_v36  ;;  %v674_v27 = vmul.f32 %v10174_v22, %v11291_v62 }
 0x239   :  { %v588_v13 = vadd.f32 1e-05, %v556_v34  ;;  %v557_v49 = vmul.f32 0.00390625, %v521_v11  ;;  %1591 = vmatmul.mubr.bf16.gmra.mrb[44].mxu1 %v11583_v46  ;;  %v825_v14 = vadd.f32 %v11285_v23, %v749_v3  ;;  %v824_v48 = vadd.f32 %v11288_v35, %v748_v7 }
 0x23a   :  { %v751_v2 = vmul.f32 %v11263_v21, %v675_v58  ;;  %v750_v47 = vmul.f32 %v11275_v31, %v674_v27 }
 0x23b   :  { %10179 = vrsqrt.f32 %v588_v13  ;;  %v589_v1 = vadd.f32 1e-05, %v557_v49 }
 0x23c   :  { %v827_v40 = vadd.f32 %v11285_v23, %v751_v2  ;;  %v826_v36 = vadd.f32 %v11288_v35, %v750_v47 }
 0x23d   :  { %v10176_v29 = vpop.eup %10175  ;;  %v524_v53 = vpop.xlane.xlu0 %523  ;;  %10181 = vrsqrt.f32 %v589_v1 }
 0x23e   :  { %v677_v62 = vmul.f32 %v10176_v29, %v11310_v26  ;;  %v676_v9 = vmul.f32 %v10176_v29, %v11307_v28  ;;  %v558_v4 = vmul.f32 0.00390625, %v524_v53  ;;  %v11599_v43 = vpack.c.bf16 %v827_v40, %v825_v14 }
 0x23f   :  { %v11601_v37 = vpack.c.bf16 %v826_v36, %v824_v48 }
 0x240   :  { %v10178_v30 = vpop.eup %10177  ;;  %v590_v60 = vadd.f32 1e-05, %v558_v4  ;;  %1600 = vmatprep.mubr.bf16.mxu1 %v11599_v43  ;;  %v753_v19 = vmul.f32 %v11263_v21, %v677_v62  ;;  %v752_v26 = vmul.f32 %v11275_v31, %v676_v9 }
 0x241   :  { %v527_v25 = vpop.xlane.xlu1 %526  ;;  %v679_v41 = vmul.f32 %v10178_v30, %v11329_v10  ;;  %v678_v32 = vmul.f32 %v10178_v30, %v11326_v0  ;;  %1601 = vmatmul.mubr.bf16.gmra.mrb[48].mxu1 %v11601_v37 }
 0x242   :  { %10183 = vrsqrt.f32 %v590_v60  ;;  %v559_v28 = vmul.f32 0.00390625, %v527_v25  ;;  %v829_v13 = vadd.f32 %v11285_v23, %v753_v19  ;;  %v828_v11 = vadd.f32 %v11288_v35, %v752_v26 }
 0x243   :  { %v755_v34 = vmul.f32 %v11263_v21, %v679_v41  ;;  %v754_v22 = vmul.f32 %v11275_v31, %v678_v32 }
 0x244   :  { %v591_v3 = vadd.f32 1e-05, %v559_v28 }
 0x245   :  { %v10180_v7 = vpop.eup %10179  ;;  %v831_v10 = vadd.f32 %v11285_v23, %v755_v34  ;;  %v830_v0 = vadd.f32 %v11288_v35, %v754_v22 }
 0x246   :  { %10185 = vrsqrt.f32 %v591_v3  ;;  %v681_v58 = vmul.f32 %v10180_v7, %v11349_v20  ;;  %v680_v27 = vmul.f32 %v10180_v7, %v11346_v57  ;;  %v15238_v7 = vld [vmem:[#allocation41_spill] sm:$0xff] }
 0x247   :  { %v11617_v49 = vpack.c.bf16 %v831_v10, %v829_v13  ;;  %v11619_v2 = vpack.c.bf16 %v830_v0, %v828_v11  ;;  %v10182_v47 = vpop.eup %10181  ;;  %v10536_v13 = vld [vmem:[#allocation6 + $0x70] ss:$24 sps:$4 sm:$0xff]   ;;  %v10537_v10 = vld [vmem:[#allocation6 + $0xa4] ss:$24 sps:$4 sm:$0xff]   ;;  %v10539_v11 = vld [vmem:[#allocation6 + $0xd4] ss:$24 sps:$4 sm:$0xff]  }
 0x248   :  { %v757_v29 = vmul.f32 %v11263_v21, %v681_v58  ;;  %v756_v1 = vmul.f32 %v11275_v31, %v680_v27  ;;  %v683_v14 = vmul.f32 %v10182_v47, %v11366_v6  ;;  %v682_v48 = vmul.f32 %v10182_v47, %v11363_v56  ;;  %v10540_v47 = vld [vmem:[#allocation6 + $0xd0] ss:$24 sps:$4 sm:$0xff]  }
 0x249   :  { %1610 = vmatprep.mubr.bf16.mxu1 %v11617_v49 }
 0x24a   :  { %1611 = vmatmul.mubr.bf16.gmra.mrb[52].mxu1 %v11619_v2  ;;  %v759_v20 = vmul.f32 %v11263_v21, %v683_v14  ;;  %v758_v57 = vmul.f32 %v11275_v31, %v682_v48  ;;  %v833_v40 = vadd.f32 %v11285_v23, %v757_v29  ;;  %v832_v36 = vadd.f32 %v11288_v35, %v756_v1  ;;  %v10541_v14 = vld [vmem:[#allocation6 + $0x104] ss:$24 sps:$4 sm:$0xff]  }
 0x24c   :  { %v10184_v53 = vpop.eup %10183  ;;  %v835_v62 = vadd.f32 %v11285_v23, %v759_v20  ;;  %v834_v9 = vadd.f32 %v11288_v35, %v758_v57 }
 0x24d   :  { %v685_v4 = vmul.f32 %v10184_v53, %v11386_v45  ;;  %v684_v6 = vmul.f32 %v10184_v53, %v11383_v54 }
 0x24e   :  { %v11635_v56 = vpack.c.bf16 %v835_v62, %v833_v40  ;;  %v11637_v30 = vpack.c.bf16 %v834_v9, %v832_v36  ;;  %v10542_v36 = vld [vmem:[#allocation6 + $0x100] ss:$24 sps:$4 sm:$0xff]   ;;  %v10543_v62 = vld [vmem:[#allocation6 + $0x134] ss:$24 sps:$4 sm:$0xff]  }
 0x24f   :  { %v761_v41 = vmul.f32 %v11263_v21, %v685_v4  ;;  %v760_v32 = vmul.f32 %v11275_v31, %v684_v6  ;;  %v15240_v9 = vld [vmem:[#allocation17_spill] sm:$0xff]  ;;  %v15241_v6 = vld [vmem:[#allocation18_spill] sm:$0xff] }
 0x250   :  { %v10186_v60 = vpop.eup %10185  ;;  %1620 = vmatprep.mubr.bf16.mxu1 %v11635_v56 }
 0x251   :  { %v687_v25 = vmul.f32 %v10186_v60, %v11404_v59  ;;  %v686_v19 = vmul.f32 %v10186_v60, %v11401_v42  ;;  %v837_v26 = vadd.f32 %v11285_v23, %v761_v41  ;;  %v836_v34 = vadd.f32 %v11288_v35, %v760_v32  ;;  %v10534_v42 = vld [vmem:[#allocation6 + $0x40] ss:$24 sps:$4 sm:$0xff]   ;;  %v10545_v32 = vld [vmem:[#allocation6 + $0x164] ss:$24 sps:$4 sm:$0xff]  }
 0x252   :  { %1621 = vmatmul.mubr.bf16.gmra.mrb[56].mxu1 %v11637_v30 }
 0x253   :  { %v763_v45 = vmul.f32 %v11263_v21, %v687_v25  ;;  %v762_v54 = vmul.f32 %v11275_v31, %v686_v19  ;;  %v15237_v21 = vld [vmem:[#allocation40_spill] sm:$0xff]  ;;  %v10532_v31 = vld [vmem:[#allocation6 + $0x10] ss:$24 sps:$4 sm:$0xff]  }
 0x254   :  { %v10544_v25 = vld [vmem:[#allocation6 + $0x130] ss:$24 sps:$4 sm:$0xff]  }
 0x255   :  { %v839_v28 = vadd.f32 %v11285_v23, %v763_v45  ;;  %v838_v59 = vadd.f32 %v11288_v35, %v762_v54  ;;  %v10533_v23 = vld [vmem:[#allocation6 + $0x44] ss:$24 sps:$4 sm:$0xff]   ;;  %v10535_v35 = vld [vmem:[#allocation6 + $0x74] ss:$24 sps:$4 sm:$0xff]  }
 0x257   :  { %v11651_v22 = vpack.c.bf16 %v839_v28, %v837_v26  ;;  %v11653_v3 = vpack.c.bf16 %v838_v59, %v836_v34 }
 0x259   :  { %1630 = vmatprep.mubr.bf16.mxu1 %v11651_v22 }
 0x25a   :  { %1631 = vmatmul.mubr.bf16.gmra.mrb[60].mxu1 %v11653_v3 }
 0x25b   :  { %1673 = vmatprep.mubr.bf16.mxu1 %v11318_v17  ;;  %v10538_v17 = vld [vmem:[#allocation6 + $0xa0] ss:$24 sps:$4 sm:$0xff]  }
 0x262   :  { %1674 = vmatmul.mubr.bf16.vlgmr.msra.gmra.mrb[64].mxu1 %v15237_v21 }
 0x263   :  { %1683 = vmatprep.mubr.bf16.mxu1 %v11356_v39  ;;  %9452 = vmatpush1.bf16.msra.mxu1 %v10532_v31  ;;  %v15239_v39 = vld [vmem:[#allocation19_spill] sm:$0xff] }
 0x264   :  { %9437 = vmatprep.subr.bf16.mxu1 %v10533_v23  ;;  %v10546_v23 = vld [vmem:[#allocation6 + $0x160] ss:$24 sps:$4 sm:$0xff]  }
 0x267   :  { %9453 = vmatpush1.bf16.msra.mxu1 %v10534_v42  ;;  %v10547_v42 = vld [vmem:[#allocation6 + $0x194] ss:$24 sps:$4 sm:$0xff]  }
 0x268   :  { %9438 = vmatprep.subr.bf16.mxu1 %v10535_v35  ;;  %v10548_v35 = vld [vmem:[#allocation6 + $0x190] ss:$24 sps:$4 sm:$0xff]  }
 0x26a   :  { %1684 = vmatmul.mubr.bf16.gmra.mrb[68].mxu1 %v11371_v63 }
 0x26b   :  { %1693 = vmatprep.mubr.bf16.mxu1 %v15238_v7  ;;  %9454 = vmatpush1.bf16.msra.mxu1 %v10536_v13 }
 0x26c   :  { %9439 = vmatprep.subr.bf16.mxu1 %v10537_v10  ;;  %v10549_v10 = vld [vmem:[#allocation6 + $0x1c4] ss:$24 sps:$4 sm:$0xff]  }
 0x26f   :  { %9455 = vmatpush1.bf16.msra.mxu1 %v10538_v17 }
 0x270   :  { %9440 = vmatprep.subr.bf16.mxu1 %v10539_v11 }
 0x272   :  { %1694 = vmatmul.mubr.bf16.gmra.mrb[72].mxu1 %v15239_v39  ;;  %v11663_v0 = vpop.f32.mrb[0].mxu1  ;;  %v1868_v58 = vpop.f32.mrb[0].mxu0 }
 0x273   :  { %1703 = vmatprep.mubr.bf16.mxu1 %v11427_v52  ;;  %v11666_v27 = vpop.f32.mrb[1].mxu1  ;;  %v1870_v63 = vpop.f32.mrb[1].mxu0  ;;  %9456 = vmatpush1.bf16.msra.mxu1 %v10540_v47 }
 0x274   :  { %v11668_v29 = vpop.f32.mrb[2].mxu1  ;;  %v1872_v1 = vpop.f32.mrb[2].mxu0  ;;  %9441 = vmatprep.subr.bf16.mxu1 %v10541_v14 }
 0x275   :  { %v11672_v20 = vpop.f32.mrb[3].mxu1  ;;  %v1874_v57 = vpop.f32.mrb[3].mxu0  ;;  %v11674_v53 = vpack.c.bf16 %v1872_v1, %v1868_v58  ;;  %v10550_v1 = vld [vmem:[#allocation6 + $0x1c0] ss:$24 sps:$4 sm:$0xff]  }
 0x276   :  { %v2032_v40 = vpack.c.bf16 %v1874_v57, %v1870_v63 }
 0x277   :  { %9457 = vmatpush1.bf16.msra.mxu1 %v10542_v36  ;;  %v10552_v36 = vld [vmem:[#allocation6 + $0x1f0] ss:$24 sps:$4 sm:$0xff]  }
 0x278   :  { %9276 = vmatprep.subr.bf16.mxu0 %v2032_v40  ;;  %9442 = vmatprep.subr.bf16.mxu1 %v10543_v62 }
 0x279   :  { %9277 = vmatpush3.bf16.msra.mxu0 %v2032_v40  ;;  %v10551_v40 = vld [vmem:[#allocation6 + $0x1f4] ss:$24 sps:$4 sm:$0xff]  }
 0x27a   :  { %1704 = vmatmul.mubr.bf16.gmra.mrb[76].mxu1 %v15240_v9 }
 0x27b   :  { %v11679_v4 = vpop.f32.mrb[4].mxu1  ;;  %1713 = vmatprep.mubr.bf16.mxu1 %v15241_v6  ;;  %v1878_v60 = vpop.f32.mrb[4].mxu0  ;;  %9458 = vmatpush1.bf16.msra.mxu1 %v10544_v25  ;;  %v10553_v6 = vld [vmem:[#allocation6 + $0x224] ss:$24 sps:$4 sm:$0xff]  }
 0x27c   :  { %v11682_v41 = vpop.f32.mrb[5].mxu1  ;;  %v1880_v19 = vpop.f32.mrb[5].mxu0  ;;  %9443 = vmatprep.subr.bf16.mxu1 %v10545_v32 }
 0x27d   :  { %v11684_v45 = vpop.f32.mrb[6].mxu1  ;;  %v1882_v54 = vpop.f32.mrb[6].mxu0 }
 0x27e   :  { %v11688_v28 = vpop.f32.mrb[7].mxu1  ;;  %v1884_v34 = vpop.f32.mrb[7].mxu0  ;;  %v11690_v59 = vpack.c.bf16 %v1882_v54, %v1878_v60 }
 0x27f   :  { %v2038_v31 = vpack.c.bf16 %v1884_v34, %v1880_v19  ;;  %9459 = vmatpush1.bf16.msra.mxu1 %v10546_v23  ;;  %v10554_v23 = vld [vmem:[#allocation6 + $0x220] ss:$24 sps:$4 sm:$0xff]  }
 0x280   :  { %9444 = vmatprep.subr.bf16.mxu1 %v10547_v42 }
 0x281   :  { %9278 = vmatprep.subr.bf16.mxu0 %v2038_v31 }
 0x282   :  { %1714 = vmatmul.mubr.bf16.gmra.mrb[80].mxu1 %v11456_v5  ;;  %9279 = vmatpush3.bf16.msra.mxu0 %v2038_v31 }
 0x283   :  { %1723 = vmatprep.mubr.bf16.mxu1 %v11472_v50  ;;  %9460 = vmatpush1.bf16.msra.mxu1 %v10548_v35 }
 0x284   :  { %v11696_v7 = vpop.f32.mrb[8].mxu1  ;;  %v1888_v13 = vpop.f32.mrb[8].mxu0  ;;  %9445 = vmatprep.subr.bf16.mxu1 %v10549_v10  ;;  %v10556_v10 = vld [vmem:[#allocation6 + $0x250] ss:$24 sps:$4 sm:$0xff]  }
 0x285   :  { %v11698_v17 = vpop.f32.mrb[9].mxu1  ;;  %v1890_v11 = vpop.f32.mrb[9].mxu0 }
 0x286   :  { %v11700_v39 = vpop.f32.mrb[10].mxu1  ;;  %v1892_v58 = vpop.f32.mrb[10].mxu0 }
 0x287   :  { %v11704_v5 = vpack.c.bf16 %v1892_v58, %v1888_v13  ;;  %v11706_v47 = vpop.f32.mrb[11].mxu1  ;;  %v1894_v50 = vpop.f32.mrb[11].mxu0  ;;  %9461 = vmatpush1.bf16.msra.mxu1 %v10550_v1  ;;  %v10555_v13 = vld [vmem:[#allocation6 + $0x254] ss:$24 sps:$4 sm:$0xff]  }
 0x288   :  { %v2044_v57 = vpack.c.bf16 %v1894_v50, %v1890_v11  ;;  %9446 = vmatprep.subr.bf16.mxu1 %v10551_v40  ;;  %v10557_v50 = vld [vmem:[#allocation6 + $0x284] ss:$24 sps:$4 sm:$0xff]  }
 0x28a   :  { %9280 = vmatprep.subr.bf16.mxu0 %v2044_v57  ;;  %1724 = vmatmul.mubr.bf16.gmra.mrb[84].mxu1 %v11476_v12 }
 0x28b   :  { %9281 = vmatpush3.bf16.msra.mxu0 %v2044_v57  ;;  %1733 = vmatprep.mubr.bf16.mxu1 %v11485_v51 }
 0x28c   :  { %9462 = vmatpush1.bf16.msra.mxu1 %v10552_v36 }
 0x28d   :  { %v11712_v62 = vpop.f32.mrb[12].mxu1  ;;  %v1898_v9 = vpop.f32.mrb[12].mxu0  ;;  %9447 = vmatprep.subr.bf16.mxu1 %v10553_v6 }
 0x28e   :  { %v11714_v60 = vpop.f32.mrb[13].mxu1  ;;  %v1900_v25 = vpop.f32.mrb[13].mxu0 }
 0x28f   :  { %v11716_v19 = vpop.f32.mrb[14].mxu1  ;;  %v1902_v32 = vpop.f32.mrb[14].mxu0 }
 0x290   :  { %v11720_v12 = vpack.c.bf16 %v1902_v32, %v1898_v9  ;;  %v11722_v34 = vpop.f32.mrb[15].mxu1  ;;  %v1904_v31 = vpop.f32.mrb[15].mxu0  ;;  %9463 = vmatpush1.bf16.msra.mxu1 %v10554_v23 }
 0x291   :  { %v2050_v35 = vpack.c.bf16 %v1904_v31, %v1900_v25  ;;  %9448 = vmatprep.subr.bf16.mxu1 %v10555_v13  ;;  %v10558_v31 = vld [vmem:[#allocation6 + $0x280] ss:$24 sps:$4 sm:$0xff]   ;;  %v10559_v13 = vld [vmem:[#allocation6 + $0x2b4] ss:$24 sps:$4 sm:$0xff]  }
 0x292   :  { %1734 = vmatmul.mubr.bf16.gmra.mrb[88].mxu1 %v11502_v8 }
 0x293   :  { %9282 = vmatprep.subr.bf16.mxu0 %v2050_v35  ;;  %1743 = vmatprep.mubr.bf16.mxu1 %v11505_v55 }
 0x294   :  { %9283 = vmatpush3.bf16.msra.mxu0 %v2050_v35  ;;  %9464 = vmatpush1.bf16.msra.mxu1 %v10556_v10  ;;  %v10560_v10 = vld [vmem:[#allocation6 + $0x2b0] ss:$24 sps:$4 sm:$0xff]  }
 0x295   :  { %v11728_v11 = vpop.f32.mrb[16].mxu1  ;;  %v1908_v58 = vpop.f32.mrb[16].mxu0  ;;  %9449 = vmatprep.subr.bf16.mxu1 %v10557_v50 }
 0x296   :  { %v11730_v1 = vpop.f32.mrb[17].mxu1  ;;  %v1910_v57 = vpop.f32.mrb[17].mxu0 }
 0x297   :  { %v11732_v40 = vpop.f32.mrb[18].mxu1  ;;  %v1912_v36 = vpop.f32.mrb[18].mxu0 }
 0x298   :  { %v11736_v6 = vpack.c.bf16 %v1912_v36, %v1908_v58  ;;  %v11738_v25 = vpop.f32.mrb[19].mxu1  ;;  %v1914_v32 = vpop.f32.mrb[19].mxu0  ;;  %9465 = vmatpush1.bf16.msra.mxu1 %v10558_v31  ;;  %v10561_v36 = vld [vmem:[#allocation6 + $0x2e4] ss:$24 sps:$4 sm:$0xff]  }
 0x299   :  { %v2056_v35 = vpack.c.bf16 %v1914_v32, %v1910_v57  ;;  %9450 = vmatprep.subr.bf16.mxu1 %v10559_v13 }
 0x29a   :  { %1744 = vmatmul.mubr.bf16.gmra.mrb[92].mxu1 %v11520_v16 }
 0x29b   :  { %9284 = vmatprep.subr.bf16.mxu0 %v2056_v35  ;;  %1753 = vmatprep.mubr.bf16.mxu1 %v11523_v38 }
 0x29c   :  { %9285 = vmatpush3.bf16.msra.mxu0 %v2056_v35  ;;  %9466 = vmatpush1.bf16.msra.mxu1 %v10560_v10  ;;  %v10562_v10 = vld [vmem:[#allocation6 + $0x2e0] ss:$24 sps:$4 sm:$0xff]  }
 0x29d   :  { %v11744_v58 = vpop.f32.mrb[20].mxu1  ;;  %v1918_v50 = vpop.f32.mrb[20].mxu0  ;;  %9451 = vmatprep.subr.bf16.mxu1 %v10561_v36 }
 0x29e   :  { %v11746_v31 = vpop.f32.mrb[21].mxu1  ;;  %v1920_v42 = vpop.f32.mrb[21].mxu0 }
 0x29f   :  { %15242 = vst [vmem:[#allocation21_spill] sm:$0xff] %v11746_v31  ;;  %v11748_v23 = vpop.f32.mrb[22].mxu1  ;;  %v1922_v57 = vpop.f32.mrb[22].mxu0 }
 0x2a0   :  { %v11752_v13 = vpack.c.bf16 %v1922_v57, %v1918_v50  ;;  %v11754_v14 = vpop.f32.mrb[23].mxu1  ;;  %v1924_v35 = vpop.f32.mrb[23].mxu0  ;;  %9467 = vmatpush1.bf16.msra.mxu1 %v10562_v10 }
 0x2a1   :  { %v2062_v36 = vpack.c.bf16 %v1924_v35, %v1920_v42 }
 0x2a2   :  { %1754 = vmatmul.mubr.bf16.gmra.mrb[96].mxu1 %v11538_v15 }
 0x2a3   :  { %9286 = vmatprep.subr.bf16.mxu0 %v2062_v36  ;;  %1763 = vmatprep.mubr.bf16.mxu1 %v11541_v44 }
 0x2a4   :  { %9287 = vmatpush3.bf16.msra.mxu0 %v2062_v36 }
 0x2a5   :  { %v11760_v52 = vpop.f32.mrb[24].mxu1 }
 0x2a6   :  { %v11762_v32 = vpop.f32.mrb[25].mxu1 }
 0x2a7   :  { %15243 = vst [vmem:[#allocation20_spill] sm:$0xff] %v11762_v32  ;;  %v11764_v50 = vpop.f32.mrb[26].mxu1 }
 0x2a8   :  { %v11768_v10 = vpop.f32.mrb[27].mxu1 }
 0x2a9   :  { %15244 = vst [vmem:[#allocation23_spill] sm:$0xff] %v11768_v10 }
 0x2aa   :  { %1764 = vmatmul.mubr.bf16.gmra.mrb[100].mxu1 %v11554_v18 }
 0x2ab   :  { %1773 = vmatprep.mubr.bf16.mxu1 %v11557_v61 }
 0x2ad   :  { %v11774_v35 = vpop.f32.mrb[28].mxu1 }
 0x2ae   :  { %v11776_v36 = vpop.f32.mrb[29].mxu1 }
 0x2af   :  { %15245 = vst [vmem:[#allocation22_spill] sm:$0xff] %v11776_v36  ;;  %v11778_v21 = vpop.f32.mrb[30].mxu1 }
 0x2b0   :  { %v11782_v54 = vpop.f32.mrb[31].mxu1 }
 0x2b1   :  { %15246 = vst [vmem:[#allocation25_spill] sm:$0xff] %v11782_v54 }
 0x2b2   :  { %1774 = vmatmul.mubr.bf16.gmra.mrb[104].mxu1 %v11564_v24 }
 0x2b3   :  { %1783 = vmatprep.mubr.bf16.mxu1 %v11581_v33 }
 0x2b5   :  { %v11788_v42 = vpop.f32.mrb[32].mxu1 }
 0x2b6   :  { %15247 = vst [vmem:[#allocation24_spill] sm:$0xff] %v11788_v42  ;;  %v11790_v63 = vpop.f32.mrb[33].mxu1 }
 0x2b7   :  { %15248 = vst [vmem:[#allocation27_spill] sm:$0xff] %v11790_v63  ;;  %v11792_v26 = vpop.f32.mrb[34].mxu1 }
 0x2b8   :  { %15249 = vst [vmem:[#allocation26_spill] sm:$0xff] %v11792_v26  ;;  %v11796_v32 = vpop.f32.mrb[35].mxu1 }
 0x2b9   :  { %15250 = vst [vmem:[#allocation29_spill] sm:$0xff] %v11796_v32 }
 0x2ba   :  { %1784 = vmatmul.mubr.bf16.gmra.mrb[108].mxu1 %v11583_v46 }
 0x2bb   :  { %1793 = vmatprep.mubr.bf16.mxu1 %v11599_v43 }
 0x2bd   :  { %v11802_v57 = vpop.f32.mrb[36].mxu1 }
 0x2be   :  { %v11804_v36 = vpop.f32.mrb[37].mxu1 }
 0x2bf   :  { %15251 = vst [vmem:[#allocation28_spill] sm:$0xff] %v11804_v36  ;;  %v11806_v54 = vpop.f32.mrb[38].mxu1 }
 0x2c0   :  { %v11810_v31 = vpop.f32.mrb[39].mxu1 }
 0x2c1   :  { %15252 = vst [vmem:[#allocation31_spill] sm:$0xff] %v11810_v31 }
 0x2c2   :  { %1794 = vmatmul.mubr.bf16.gmra.mrb[112].mxu1 %v11601_v37 }
 0x2c3   :  { %1803 = vmatprep.mubr.bf16.mxu1 %v11617_v49 }
 0x2c5   :  { %v11816_v9 = vpop.f32.mrb[40].mxu1 }
 0x2c6   :  { %v11818_v63 = vpop.f32.mrb[41].mxu1 }
 0x2c7   :  { %15253 = vst [vmem:[#allocation30_spill] sm:$0xff] %v11818_v63  ;;  %v11820_v32 = vpop.f32.mrb[42].mxu1 }
 0x2c8   :  { %v11824_v26 = vpop.f32.mrb[43].mxu1 }
 0x2c9   :  { %15254 = vst [vmem:[#allocation33_spill] sm:$0xff] %v11824_v26 }
 0x2ca   :  { %1804 = vmatmul.mubr.bf16.gmra.mrb[116].mxu1 %v11619_v2 }
 0x2cb   :  { %1813 = vmatprep.mubr.bf16.mxu1 %v11635_v56 }
 0x2d2   :  { %1814 = vmatmul.mubr.bf16.gmra.mrb[120].mxu1 %v11637_v30 }
 0x2d3   :  { %1823 = vmatprep.mubr.bf16.mxu1 %v11651_v22 }
 0x2da   :  { %1824 = vmatmul.mubr.bf16.gmra.mrb[124].mxu1 %v11653_v3 }
 0x2db   :  { %1926 = vmatprep.mubr.bf16.mxu1 %v11485_v51 }
 0x2e2   :  { %1927 = vmatmul.mubr.bf16.vlgmr.msra.gmra.mrb[128].mxu1 %v11502_v8 }
 0x2e3   :  { %1936 = vmatprep.mubr.bf16.mxu1 %v11505_v55 }
 0x2ea   :  { %1937 = vmatmul.mubr.bf16.gmra.mrb[132].mxu1 %v11520_v16 }
 0x2eb   :  { %1946 = vmatprep.mubr.bf16.mxu1 %v11523_v38 }
 0x2f2   :  { %1947 = vmatmul.mubr.bf16.gmra.mrb[136].mxu1 %v11538_v15 }
 0x2f3   :  { %1956 = vmatprep.mubr.bf16.mxu1 %v11541_v44 }
 0x2fa   :  { %1957 = vmatmul.mubr.bf16.gmra.mrb[140].mxu1 %v11554_v18 }
 0x2fb   :  { %1966 = vmatprep.mubr.bf16.mxu1 %v11557_v61 }
 0x302   :  { %1967 = vmatmul.mubr.bf16.gmra.mrb[144].mxu1 %v11564_v24 }
 0x303   :  { %1976 = vmatprep.mubr.bf16.mxu1 %v11581_v33 }
 0x30a   :  { %1977 = vmatmul.mubr.bf16.gmra.mrb[148].mxu1 %v11583_v46 }
 0x30b   :  { %1986 = vmatprep.mubr.bf16.mxu1 %v11599_v43 }
 0x30c   :  { %v11846_v51 = vpop.f32.mrb[44].mxu1 }
 0x30d   :  { %15255 = vst [vmem:[#allocation32_spill] sm:$0xff] %v11846_v51  ;;  %v11848_v8 = vpop.f32.mrb[45].mxu1 }
 0x30e   :  { %15256 = vst [vmem:[#allocation34_spill] sm:$0xff] %v11848_v8  ;;  %v11850_v55 = vpop.f32.mrb[46].mxu1 }
 0x30f   :  { %15257 = vst [vmem:[#allocation38_spill] sm:$0xff] %v11850_v55  ;;  %v11854_v38 = vpop.f32.mrb[47].mxu1 }
 0x310   :  { %15258 = vst [vmem:[#allocation37_spill] sm:$0xff] %v11854_v38 }
 0x312   :  { %1987 = vmatmul.mubr.bf16.gmra.mrb[152].mxu1 %v11601_v37 }
 0x313   :  { %1996 = vmatprep.mubr.bf16.mxu1 %v11617_v49 }
 0x314   :  { %v11860_v44 = vpop.f32.mrb[48].mxu1 }
 0x315   :  { %15259 = vst [vmem:[#allocation40_spill] sm:$0xff] %v11860_v44  ;;  %v11862_v18 = vpop.f32.mrb[49].mxu1 }
 0x316   :  { %15260 = vst [vmem:[#allocation41_spill] sm:$0xff] %v11862_v18  ;;  %v11864_v61 = vpop.f32.mrb[50].mxu1 }
 0x317   :  { %15261 = vst [vmem:[#allocation19_spill] sm:$0xff] %v11864_v61  ;;  %v11868_v33 = vpop.f32.mrb[51].mxu1 }
 0x318   :  { %15262 = vst [vmem:[#allocation17_spill] sm:$0xff] %v11868_v33 }
 0x31a   :  { %1997 = vmatmul.mubr.bf16.gmra.mrb[156].mxu1 %v11619_v2 }
 0x31b   :  { %2006 = vmatprep.mubr.bf16.mxu1 %v11635_v56 }
 0x31d   :  { %v11874_v43 = vpop.f32.mrb[52].mxu1 }
 0x31e   :  { %15263 = vst [vmem:[#allocation18_spill] sm:$0xff] %v11874_v43  ;;  %v11876_v37 = vpop.f32.mrb[53].mxu1 }
 0x31f   :  { %15264 = vst [vmem:[#allocation42_spill] sm:$0xff] %v11876_v37  ;;  %v11878_v49 = vpop.f32.mrb[54].mxu1 }
 0x320   :  { %15265 = vst [vmem:[#allocation43_spill] sm:$0xff] %v11878_v49  ;;  %v11882_v10 = vpop.f32.mrb[55].mxu1 }
 0x321   :  { %15266 = vst [vmem:[#allocation44_spill] sm:$0xff] %v11882_v10 }
 0x322   :  { %2007 = vmatmul.mubr.bf16.gmra.mrb[160].mxu1 %v11637_v30  ;;  %v15271_v30 = vpack.c.bf16 %v11668_v29, %v11663_v0 }
 0x323   :  { %2016 = vmatprep.mubr.bf16.mxu1 %v11651_v22 }
 0x325   :  { %v11888_v2 = vpop.f32.mrb[56].mxu1 }
 0x326   :  { %15267 = vst [vmem:[#allocation45_spill] sm:$0xff] %v11888_v2  ;;  %v11890_v56 = vpop.f32.mrb[57].mxu1 }
 0x327   :  { %15268 = vst [vmem:[#allocation46_spill] sm:$0xff] %v11890_v56  ;;  %v11892_v46 = vpop.f32.mrb[58].mxu1 }
 0x328   :  { %15269 = vst [vmem:[#allocation47_spill] sm:$0xff] %v11892_v46  ;;  %v11896_v16 = vpop.f32.mrb[59].mxu1 }
 0x329   :  { %15270 = vst [vmem:[#allocation48_spill] sm:$0xff] %v11896_v16 }
 0x32a   :  { %2017 = vmatmul.mubr.bf16.gmra.mrb[164].mxu1 %v11653_v3 }
 0x32b   :  { %9196 = vmatprep.mubr.bf16.mxu1 %v15271_v30 }
 0x32d   :  { %v11904_v22 = vpop.f32.mrb[60].mxu1 }
 0x32e   :  { %15272 = vst [vmem:[#allocation49_spill] sm:$0xff] %v11904_v22  ;;  %v11906_v48 = vpop.f32.mrb[61].mxu1 }
 0x32f   :  { %15273 = vst [vmem:[#allocation50_spill] sm:$0xff] %v11906_v48  ;;  %v11908_v42 = vpop.f32.mrb[62].mxu1 }
 0x330   :  { %15274 = vst [vmem:[#allocation51_spill] sm:$0xff] %v11908_v42  ;;  %v11912_v37 = vpop.f32.mrb[63].mxu1 }
 0x331   :  { %15275 = vst [vmem:[#allocation52_spill] sm:$0xff] %v11912_v37 }
 0x335   :  { %v1675_v56 = vpop.f32.mrb[64].mxu1 }
 0x336   :  { %v1677_v3 = vpop.f32.mrb[65].mxu1 }
 0x337   :  { %v1679_v16 = vpop.f32.mrb[66].mxu1 }
 0x338   :  { %v2029_v10 = vpack.c.bf16 %v1679_v16, %v1675_v56  ;;  %v1681_v0 = vpop.f32.mrb[67].mxu1 }
 0x339   :  { %v11916_v29 = vpack.c.bf16 %v1681_v0, %v1677_v3 }
 0x33a   :  { %9180 = vmatprep.subr.bf16.mxu1 %v2029_v10 }
 0x33b   :  { %9181 = vmatpush3.bf16.xpose.msra.mxu1 %v2029_v10 }
 0x33d   :  { %v1685_v30 = vpop.f32.mrb[68].mxu1 }
 0x33e   :  { %v1687_v18 = vpop.f32.mrb[69].mxu1 }
 0x33f   :  { %v1689_v33 = vpop.f32.mrb[70].mxu1 }
 0x340   :  { %v2035_v8 = vpack.c.bf16 %v1689_v33, %v1685_v30  ;;  %v1691_v38 = vpop.f32.mrb[71].mxu1 }
 0x341   :  { %v11918_v24 = vpack.c.bf16 %v1691_v38, %v1687_v18 }
 0x342   :  { %9182 = vmatprep.subr.bf16.mxu1 %v2035_v8 }
 0x343   :  { %9183 = vmatpush3.bf16.xpose.msra.mxu1 %v2035_v8 }
 0x345   :  { %v1695_v63 = vpop.f32.mrb[72].mxu1 }
 0x346   :  { %v1697_v15 = vpop.f32.mrb[73].mxu1 }
 0x347   :  { %v1699_v48 = vpop.f32.mrb[74].mxu1 }
 0x348   :  { %v2041_v37 = vpack.c.bf16 %v1699_v48, %v1695_v63  ;;  %v1701_v26 = vpop.f32.mrb[75].mxu1 }
 0x349   :  { %v11920_v16 = vpack.c.bf16 %v1701_v26, %v1697_v15 }
 0x34a   :  { %9184 = vmatprep.subr.bf16.mxu1 %v2041_v37 }
 0x34b   :  { %9185 = vmatpush3.bf16.xpose.msra.mxu1 %v2041_v37 }
 0x34d   :  { %v1705_v56 = vpop.f32.mrb[76].mxu1 }
 0x34e   :  { %v1707_v10 = vpop.f32.mrb[77].mxu1 }
 0x34f   :  { %v1709_v3 = vpop.f32.mrb[78].mxu1 }
 0x350   :  { %v2047_v0 = vpack.c.bf16 %v1709_v3, %v1705_v56  ;;  %v1711_v36 = vpop.f32.mrb[79].mxu1 }
 0x351   :  { %v11922_v33 = vpack.c.bf16 %v1711_v36, %v1707_v10 }
 0x352   :  { %9186 = vmatprep.subr.bf16.mxu1 %v2047_v0 }
 0x353   :  { %9187 = vmatpush3.bf16.xpose.msra.mxu1 %v2047_v0 }
 0x355   :  { %v1715_v38 = vpop.f32.mrb[80].mxu1 }
 0x356   :  { %v1717_v8 = vpop.f32.mrb[81].mxu1 }
 0x357   :  { %v1719_v18 = vpop.f32.mrb[82].mxu1 }
 0x358   :  { %v2053_v30 = vpack.c.bf16 %v1719_v18, %v1715_v38  ;;  %v1721_v31 = vpop.f32.mrb[83].mxu1 }
 0x359   :  { %v11924_v48 = vpack.c.bf16 %v1721_v31, %v1717_v8 }
 0x35a   :  { %9188 = vmatprep.subr.bf16.mxu1 %v2053_v30 }
 0x35b   :  { %9189 = vmatpush3.bf16.xpose.msra.mxu1 %v2053_v30 }
 0x35d   :  { %v1725_v26 = vpop.f32.mrb[84].mxu1 }
 0x35e   :  { %v1727_v63 = vpop.f32.mrb[85].mxu1 }
 0x35f   :  { %v1729_v15 = vpop.f32.mrb[86].mxu1 }
 0x360   :  { %v2059_v37 = vpack.c.bf16 %v1729_v15, %v1725_v26  ;;  %v1731_v22 = vpop.f32.mrb[87].mxu1 }
 0x361   :  { %v11926_v56 = vpack.c.bf16 %v1731_v22, %v1727_v63 }
 0x362   :  { %9190 = vmatprep.subr.bf16.mxu1 %v2059_v37 }
 0x363   :  { %9191 = vmatpush3.bf16.xpose.msra.mxu1 %v2059_v37 }
 0x365   :  { %v1735_v36 = vpop.f32.mrb[88].mxu1 }
 0x366   :  { %v1737_v10 = vpop.f32.mrb[89].mxu1 }
 0x367   :  { %v1739_v3 = vpop.f32.mrb[90].mxu1 }
 0x368   :  { %v2065_v0 = vpack.c.bf16 %v1739_v3, %v1735_v36  ;;  %v1741_v42 = vpop.f32.mrb[91].mxu1 }
 0x369   :  { %v11928_v38 = vpack.c.bf16 %v1741_v42, %v1737_v10  ;;  %v15277_v10 = vpack.c.bf16 %v11684_v45, %v11679_v4  ;;  %v15280_v45 = vpack.c.bf16 %v11716_v19, %v11712_v62  ;;  %v15283_v19 = vpack.c.bf16 %v11748_v23, %v11744_v58 }
 0x36a   :  { %9192 = vmatprep.subr.bf16.mxu1 %v2065_v0  ;;  %v15286_v23 = vpack.c.bf16 %v11778_v21, %v11774_v35 }
 0x36b   :  { %9193 = vmatpush3.bf16.xpose.msra.mxu1 %v2065_v0 }
 0x36d   :  { %v1745_v31 = vpop.f32.mrb[92].mxu1 }
 0x36e   :  { %v1747_v8 = vpop.f32.mrb[93].mxu1 }
 0x36f   :  { %v1749_v18 = vpop.f32.mrb[94].mxu1 }
 0x370   :  { %v2071_v30 = vpack.c.bf16 %v1749_v18, %v1745_v31  ;;  %v1751_v2 = vpop.f32.mrb[95].mxu1 }
 0x371   :  { %v11930_v26 = vpack.c.bf16 %v1751_v2, %v1747_v8  ;;  %v15278_v2 = vpack.c.bf16 %v11700_v39, %v11696_v7 }
 0x372   :  { %9194 = vmatprep.subr.bf16.mxu1 %v2071_v30 }
 0x373   :  { %9195 = vmatpush3.bf16.xpose.msra.mxu1 %v2071_v30 }
 0x374   :  { %9212 = vmatprep.subr.bf16.mxu1 %v11674_v53 }
 0x375   :  { %v1755_v22 = vpop.f32.mrb[96].mxu1 }
 0x376   :  { %v1757_v63 = vpop.f32.mrb[97].mxu1 }
 0x377   :  { %v1759_v15 = vpop.f32.mrb[98].mxu1 }
 0x378   :  { %v11933_v37 = vpack.c.bf16 %v1759_v15, %v1755_v22  ;;  %v1761_v42 = vpop.f32.mrb[99].mxu1 }
 0x379   :  { %v11935_v36 = vpack.c.bf16 %v1761_v42, %v1757_v63 }
 0x37a   :  { %9197 = vmatmul.mubr.bf16.vlgmr.msra.gmra.mrb[168].mxu1 %v15277_v10 }
 0x37b   :  { %15276 = vst [vmem:[#allocation53_spill] sm:$0xff] %v11935_v36  ;;  %9200 = vmatprep.mubr.bf16.mxu1 %v15278_v2  ;;  %9213 = vmatpush3.bf16.msra.mxu1 %v11674_v53  ;;  %v15281_v53 = vpack.c.bf16 %v11732_v40, %v11728_v11 }
 0x37c   :  { %9214 = vmatprep.subr.bf16.mxu1 %v11690_v59 }
 0x37d   :  { %v1765_v3 = vpop.f32.mrb[100].mxu1 }
 0x37e   :  { %v1767_v0 = vpop.f32.mrb[101].mxu1 }
 0x37f   :  { %v1769_v31 = vpop.f32.mrb[102].mxu1  ;;  %9215 = vmatpush3.bf16.msra.mxu1 %v11690_v59 }
 0x380   :  { %v11946_v8 = vpack.c.bf16 %v1769_v31, %v1765_v3  ;;  %v1771_v18 = vpop.f32.mrb[103].mxu1  ;;  %9216 = vmatprep.subr.bf16.mxu1 %v11704_v5 }
 0x381   :  { %v11949_v4 = vpack.c.bf16 %v1771_v18, %v1767_v0 }
 0x382   :  { %9201 = vmatmul.mubr.bf16.gmra.mrb[172].mxu1 %v15280_v45 }
 0x383   :  { %15279 = vst [vmem:[#allocation54_spill] sm:$0xff] %v11949_v4  ;;  %9204 = vmatprep.mubr.bf16.mxu1 %v15281_v53  ;;  %9217 = vmatpush3.bf16.msra.mxu1 %v11704_v5  ;;  %v15284_v5 = vpack.c.bf16 %v11764_v50, %v11760_v52 }
 0x384   :  { %9218 = vmatprep.subr.bf16.mxu1 %v11720_v12 }
 0x385   :  { %v1775_v59 = vpop.f32.mrb[104].mxu1 }
 0x386   :  { %v1777_v7 = vpop.f32.mrb[105].mxu1 }
 0x387   :  { %v1779_v39 = vpop.f32.mrb[106].mxu1  ;;  %9219 = vmatpush3.bf16.msra.mxu1 %v11720_v12 }
 0x388   :  { %v11960_v30 = vpack.c.bf16 %v1779_v39, %v1775_v59  ;;  %v1781_v22 = vpop.f32.mrb[107].mxu1  ;;  %9220 = vmatprep.subr.bf16.mxu1 %v11736_v6 }
 0x389   :  { %v11963_v62 = vpack.c.bf16 %v1781_v22, %v1777_v7 }
 0x38a   :  { %9205 = vmatmul.mubr.bf16.gmra.mrb[176].mxu1 %v15283_v19 }
 0x38b   :  { %15282 = vst [vmem:[#allocation55_spill] sm:$0xff] %v11963_v62  ;;  %9208 = vmatprep.mubr.bf16.mxu1 %v15284_v5  ;;  %9221 = vmatpush3.bf16.msra.mxu1 %v11736_v6 }
 0x38c   :  { %9222 = vmatprep.subr.bf16.mxu1 %v11752_v13 }
 0x38d   :  { %v1785_v12 = vpop.f32.mrb[108].mxu1 }
 0x38e   :  { %v1787_v11 = vpop.f32.mrb[109].mxu1 }
 0x38f   :  { %v1789_v40 = vpop.f32.mrb[110].mxu1  ;;  %9223 = vmatpush3.bf16.msra.mxu1 %v11752_v13 }
 0x390   :  { %v11974_v63 = vpack.c.bf16 %v1789_v40, %v1785_v12  ;;  %v1791_v15 = vpop.f32.mrb[111].mxu1 }
 0x391   :  { %v11976_v42 = vpack.c.bf16 %v1791_v15, %v1787_v11 }
 0x392   :  { %9209 = vmatmul.mubr.bf16.gmra.mrb[180].mxu1 %v15286_v23 }
 0x393   :  { %15285 = vst [vmem:[#allocation56_spill] sm:$0xff] %v11976_v42 }
 0x395   :  { %v1795_v52 = vpop.f32.mrb[112].mxu1 }
 0x396   :  { %v1797_v58 = vpop.f32.mrb[113].mxu1 }
 0x397   :  { %v1799_v50 = vpop.f32.mrb[114].mxu1 }
 0x398   :  { %v11981_v6 = vpack.c.bf16 %v1799_v50, %v1795_v52  ;;  %v1801_v10 = vpop.f32.mrb[115].mxu1 }
 0x399   :  { %v11983_v2 = vpack.c.bf16 %v1801_v10, %v1797_v58 }
 0x39b   :  { %15287 = vst [vmem:[#allocation57_spill] sm:$0xff] %v11983_v2 }
 0x39d   :  { %v1805_v3 = vpop.f32.mrb[116].mxu1 }
 0x39e   :  { %v1807_v0 = vpop.f32.mrb[117].mxu1 }
 0x39f   :  { %v1809_v13 = vpop.f32.mrb[118].mxu1 }
 0x3a0   :  { %v11985_v31 = vpack.c.bf16 %v1809_v13, %v1805_v3  ;;  %v1811_v18 = vpop.f32.mrb[119].mxu1 }
 0x3a1   :  { %v11987_v45 = vpack.c.bf16 %v1811_v18, %v1807_v0 }
 0x3a3   :  { %15288 = vst [vmem:[#allocation58_spill] sm:$0xff] %v11987_v45 }
 0x3a5   :  { %v1815_v53 = vpop.f32.mrb[120].mxu1 }
 0x3a6   :  { %v1817_v59 = vpop.f32.mrb[121].mxu1 }
 0x3a7   :  { %v1819_v21 = vpop.f32.mrb[122].mxu1 }
 0x3a8   :  { %v11989_v35 = vpack.c.bf16 %v1819_v21, %v1815_v53  ;;  %v1821_v7 = vpop.f32.mrb[123].mxu1 }
 0x3a9   :  { %v11991_v39 = vpack.c.bf16 %v1821_v7, %v1817_v59 }
 0x3ab   :  { %15289 = vst [vmem:[#allocation59_spill] sm:$0xff] %v11991_v39 }
 0x3ad   :  { %v1825_v22 = vpop.f32.mrb[124].mxu1 }
 0x3ae   :  { %v1827_v19 = vpop.f32.mrb[125].mxu1 }
 0x3af   :  { %v1829_v5 = vpop.f32.mrb[126].mxu1 }
 0x3b0   :  { %v11993_v12 = vpack.c.bf16 %v1829_v5, %v1825_v22  ;;  %v1831_v11 = vpop.f32.mrb[127].mxu1 }
 0x3b1   :  { %v11995_v40 = vpack.c.bf16 %v1831_v11, %v1827_v19 }
 0x3b3   :  { %15290 = vst [vmem:[#allocation60_spill] sm:$0xff] %v11995_v40 }
 0x3b5   :  { %v1928_v15 = vpop.f32.mrb[128].mxu1 }
 0x3b6   :  { %v1930_v23 = vpop.f32.mrb[129].mxu1 }
 0x3b7   :  { %v1932_v52 = vpop.f32.mrb[130].mxu1 }
 0x3b8   :  { %v2067_v58 = vpack.c.bf16 %v1932_v52, %v1928_v15  ;;  %v1934_v50 = vpop.f32.mrb[131].mxu1 }
 0x3b9   :  { %v2068_v10 = vpack.c.bf16 %v1934_v50, %v1930_v23 }
 0x3ba   :  { %9224 = vmatprep.subr.bf16.mxu1 %v2067_v58 }
 0x3bb   :  { %9225 = vmatpush3.bf16.msra.mxu1 %v2067_v58  ;;  %9288 = vmatprep.subr.bf16.mxu0 %v2068_v10 }
 0x3bc   :  { %9289 = vmatpush3.bf16.msra.mxu0 %v2068_v10 }
 0x3bd   :  { %v1938_v3 = vpop.f32.mrb[132].mxu1 }
 0x3be   :  { %v1940_v0 = vpop.f32.mrb[133].mxu1 }
 0x3bf   :  { %v1942_v13 = vpop.f32.mrb[134].mxu1 }
 0x3c0   :  { %v2073_v18 = vpack.c.bf16 %v1942_v13, %v1938_v3  ;;  %v1944_v53 = vpop.f32.mrb[135].mxu1 }
 0x3c1   :  { %v2074_v59 = vpack.c.bf16 %v1944_v53, %v1940_v0 }
 0x3c2   :  { %9226 = vmatprep.subr.bf16.mxu1 %v2073_v18 }
 0x3c3   :  { %9227 = vmatpush3.bf16.msra.mxu1 %v2073_v18  ;;  %9290 = vmatprep.subr.bf16.mxu0 %v2074_v59 }
 0x3c4   :  { %9244 = vmatprep.subr.bf16.mxu1 %v11916_v29  ;;  %9291 = vmatpush3.bf16.msra.mxu0 %v2074_v59 }
 0x3c5   :  { %v1948_v21 = vpop.f32.mrb[136].mxu1 }
 0x3c6   :  { %v1950_v7 = vpop.f32.mrb[137].mxu1 }
 0x3c7   :  { %v1952_v22 = vpop.f32.mrb[138].mxu1 }
 0x3c8   :  { %v11998_v19 = vpack.c.bf16 %v1952_v22, %v1948_v21  ;;  %v1954_v5 = vpop.f32.mrb[139].mxu1 }
 0x3c9   :  { %v12000_v11 = vpack.c.bf16 %v1954_v5, %v1950_v7 }
 0x3ca   :  { %15291 = vst [vmem:[#allocation61_spill] sm:$0xff] %v11998_v19  ;;  %9340 = vmatprep.subr.bf16.mxu0 %v11998_v19 }
 0x3cd   :  { %v1958_v15 = vpop.f32.mrb[140].mxu1 }
 0x3ce   :  { %v1960_v23 = vpop.f32.mrb[141].mxu1 }
 0x3cf   :  { %v1962_v52 = vpop.f32.mrb[142].mxu1 }
 0x3d0   :  { %v12003_v58 = vpack.c.bf16 %v1962_v52, %v1958_v15  ;;  %v1964_v50 = vpop.f32.mrb[143].mxu1 }
 0x3d1   :  { %v12005_v10 = vpack.c.bf16 %v1964_v50, %v1960_v23 }
 0x3d2   :  { %15292 = vst [vmem:[#allocation62_spill] sm:$0xff] %v12003_v58 }
 0x3d3   :  { %15293 = vst [vmem:[#allocation63_spill] sm:$0xff] %v12005_v10 }
 0x3d5   :  { %v1968_v3 = vpop.f32.mrb[144].mxu1 }
 0x3d6   :  { %v1970_v0 = vpop.f32.mrb[145].mxu1 }
 0x3d7   :  { %v1972_v13 = vpop.f32.mrb[146].mxu1 }
 0x3d8   :  { %v12007_v18 = vpack.c.bf16 %v1972_v13, %v1968_v3  ;;  %v1974_v53 = vpop.f32.mrb[147].mxu1 }
 0x3d9   :  { %v12009_v59 = vpack.c.bf16 %v1974_v53, %v1970_v0 }
 0x3da   :  { %15294 = vst [vmem:[#allocation64_spill] sm:$0xff] %v12007_v18 }
 0x3db   :  { %15295 = vst [vmem:[#allocation65_spill] sm:$0xff] %v12009_v59 }
 0x3dd   :  { %v1978_v21 = vpop.f32.mrb[148].mxu1 }
 0x3de   :  { %v1980_v7 = vpop.f32.mrb[149].mxu1 }
 0x3df   :  { %v1982_v22 = vpop.f32.mrb[150].mxu1 }
 0x3e0   :  { %v12011_v5 = vpack.c.bf16 %v1982_v22, %v1978_v21  ;;  %v1984_v40 = vpop.f32.mrb[151].mxu1 }
 0x3e1   :  { %v12013_v39 = vpack.c.bf16 %v1984_v40, %v1980_v7 }
 0x3e2   :  { %15296 = vst [vmem:[#allocation66_spill] sm:$0xff] %v12011_v5 }
 0x3e3   :  { %15297 = vst [vmem:[#allocation67_spill] sm:$0xff] %v12013_v39 }
 0x3e5   :  { %v1988_v15 = vpop.f32.mrb[152].mxu1 }
 0x3e6   :  { %v1990_v52 = vpop.f32.mrb[153].mxu1 }
 0x3e7   :  { %v1992_v23 = vpop.f32.mrb[154].mxu1 }
 0x3e8   :  { %v12015_v50 = vpack.c.bf16 %v1992_v23, %v1988_v15  ;;  %v1994_v45 = vpop.f32.mrb[155].mxu1 }
 0x3e9   :  { %v12017_v2 = vpack.c.bf16 %v1994_v45, %v1990_v52 }
 0x3ea   :  { %15298 = vst [vmem:[#allocation68_spill] sm:$0xff] %v12015_v50 }
 0x3eb   :  { %15299 = vst [vmem:[#allocation69_spill] sm:$0xff] %v12017_v2 }
 0x3ed   :  { %v1998_v3 = vpop.f32.mrb[156].mxu1 }
 0x3ee   :  { %v2000_v13 = vpop.f32.mrb[157].mxu1 }
 0x3ef   :  { %v2002_v0 = vpop.f32.mrb[158].mxu1 }
 0x3f0   :  { %v12019_v53 = vpack.c.bf16 %v2002_v0, %v1998_v3  ;;  %v2004_v42 = vpop.f32.mrb[159].mxu1  ;;  %v15306_v3 = vlaneseq }
 0x3f1   :  { %v12021_v62 = vpack.c.bf16 %v2004_v42, %v2000_v13  ;;  %v15307_v42 = vld [vmem:[#allocation35_spill] sm:$0xff] }
 0x3f2   :  { %15300 = vst [vmem:[#allocation70_spill] sm:$0xff] %v12019_v53  ;;  %v12032_v0 = vand.u32 127, %v15306_v3  ;;  %v2125_v13 = vadd.s32 8, %v15307_v42  ;;  %v2128_v3 = vadd.s32 32, %v15307_v42  ;;  %v2129_v58 = vadd.s32 40, %v15307_v42 }
 0x3f3   :  { %15301 = vst [vmem:[#allocation71_spill] sm:$0xff] %v12021_v62  ;;  %v2136_v49 = vadd.s32 96, %v15307_v42 }
 0x3f4   :  { %vm2142_vm0 = vcmp.le.s32.totalorder %v12032_v0, %v15307_v42  ;;  %vm2143_vm1 = vcmp.le.s32.totalorder %v12032_v0, %v2125_v13  ;;  %vm2146_vm4 = vcmp.le.s32.totalorder %v12032_v0, %v2128_v3  ;;  %vm2147_vm5 = vcmp.le.s32.totalorder %v12032_v0, %v2129_v58 }
 0x3f5   :  { %v2008_v21 = vpop.f32.mrb[160].mxu1  ;;  %vm2154_vm12 = vcmp.le.s32.totalorder %v12032_v0, %v2136_v49 }
 0x3f6   :  { %v2010_v22 = vpop.f32.mrb[161].mxu1 }
 0x3f7   :  { %v2012_v40 = vpop.f32.mrb[162].mxu1 }
 0x3f8   :  { %v12023_v7 = vpack.c.bf16 %v2012_v40, %v2008_v21  ;;  %v2014_v4 = vpop.f32.mrb[163].mxu1  ;;  %v2126_v21 = vadd.s32 16, %v15307_v42 }
 0x3f9   :  { %v12025_v36 = vpack.c.bf16 %v2014_v4, %v2010_v22  ;;  %v2127_v4 = vadd.s32 24, %v15307_v42 }
 0x3fa   :  { %15302 = vst [vmem:[#allocation72_spill] sm:$0xff] %v12023_v7  ;;  %vm2144_vm2 = vcmp.le.s32.totalorder %v12032_v0, %v2126_v21 }
 0x3fb   :  { %15303 = vst [vmem:[#allocation73_spill] sm:$0xff] %v12025_v36  ;;  %vm2145_vm3 = vcmp.le.s32.totalorder %v12032_v0, %v2127_v4  ;;  %v2130_v4 = vadd.s32 48, %v15307_v42  ;;  %v2132_v36 = vadd.s32 64, %v15307_v42 }
 0x3fd   :  { %v2018_v15 = vpop.f32.mrb[164].mxu1  ;;  %vm2148_vm6 = vcmp.le.s32.totalorder %v12032_v0, %v2130_v4  ;;  %vm2150_vm8 = vcmp.le.s32.totalorder %v12032_v0, %v2132_v36 }
 0x3fe   :  { %v2020_v23 = vpop.f32.mrb[165].mxu1 }
 0x3ff   :  { %v2022_v45 = vpop.f32.mrb[166].mxu1 }
 0x400   :  { %v12027_v52 = vpack.c.bf16 %v2022_v45, %v2018_v15  ;;  %v2024_v50 = vpop.f32.mrb[167].mxu1  ;;  %v10781_v15 = vmov -1e+30  }
 0x401   :  { %v12029_v5 = vpack.c.bf16 %v2024_v50, %v2020_v23  ;;  %v12041_v50 = vsel %vm2142_vm0, 0.0, %v10781_v15  ;;  %v12046_v7 = vsel %vm2143_vm1, 0.0, %v10781_v15  ;;  %v12054_v19 = vsel %vm2144_vm2, 0.0, %v10781_v15 }
 0x402   :  { %15304 = vst [vmem:[#allocation74_spill] sm:$0xff] %v12027_v52  ;;  %15308 = vst [vmem:[#allocation76_spill] sm:$0xff] %v12041_v50 }
 0x403   :  { %15305 = vst [vmem:[#allocation75_spill] sm:$0xff] %v12029_v5  ;;  %15309 = vst [vmem:[#allocation77_spill] sm:$0xff] %v12046_v7 }
 0x404   :  { %15310 = vst [vmem:[#allocation78_spill] sm:$0xff] %v12054_v19 }
 0x44d   :  { %v9198_v22 = vpop.f32.mrb[168].mxu1 }
 0x44e   :  { %v2208_v40 = vpop.f32.mrb[169].mxu1  ;;  %v2273_v18 = vmul.f32 0.088388346, %v9198_v22 }
 0x44f   :  { %v9199_v23 = vpop.f32.mrb[170].mxu1  ;;  %v2271_v45 = vmul.f32 0.088388346, %v2208_v40 }
 0x450   :  { %v2211_v52 = vpop.f32.mrb[171].mxu1  ;;  %v2274_v40 = vmul.f32 0.088388346, %v9199_v23  ;;  %v12072_v23 = vsel %vm2146_vm4, 0.0, %v10781_v15 }
 0x451   :  { %v12050_v53 = vadd.f32 %v2271_v45, %v12041_v50  ;;  %v2272_v13 = vmul.f32 0.088388346, %v2211_v52  ;;  %v12063_v45 = vsel %vm2145_vm3, 0.0, %v10781_v15  ;;  %v2131_v52 = vadd.s32 56, %v15307_v42  ;;  %15312 = vst [vmem:[#allocation80_spill] sm:$0xff] %v12072_v23 }
 0x452   :  { %15311 = vst [vmem:[#allocation79_spill] sm:$0xff] %v12063_v45  ;;  %v12068_v50 = vadd.f32 %v2273_v18, %v12054_v19  ;;  %v12081_v18 = vsel %vm2147_vm5, 0.0, %v10781_v15 }
 0x453   :  { %2303 = vmax.xlane.f32.xlu0 %v12050_v53  ;;  %v12058_v21 = vadd.f32 %v2272_v13, %v12046_v7  ;;  %v12076_v7 = vadd.f32 %v2274_v40, %v12063_v45  ;;  %15313 = vst [vmem:[#allocation81_spill] sm:$0xff] %v12081_v18  ;;  %vm2149_vm7 = vcmp.le.s32.totalorder %v12032_v0, %v2131_v52  ;;  %v2133_v40 = vadd.s32 72, %v15307_v42 }
 0x454   :  { %v2134_v52 = vadd.s32 80, %v15307_v42 }
 0x455   :  { %2305 = vmax.xlane.f32.xlu1 %v12058_v21  ;;  %v9202_v22 = vpop.f32.mrb[172].mxu1  ;;  %vm2151_vm9 = vcmp.le.s32.totalorder %v12032_v0, %v2133_v40 }
 0x456   :  { %v2224_v13 = vpop.f32.mrb[173].mxu1  ;;  %v2277_v46 = vmul.f32 0.088388346, %v9202_v22  ;;  %vm2152_vm10 = vcmp.le.s32.totalorder %v12032_v0, %v2134_v52 }
 0x457   :  { %2307 = vmax.xlane.f32.xlu0 %v12068_v50  ;;  %v9203_v3 = vpop.f32.mrb[174].mxu1  ;;  %v2275_v5 = vmul.f32 0.088388346, %v2224_v13  ;;  %v12090_v13 = vsel %vm2148_vm6, 0.0, %v10781_v15 }
 0x458   :  { %v2227_v62 = vpop.f32.mrb[175].mxu1  ;;  %15314 = vst [vmem:[#allocation82_spill] sm:$0xff] %v12090_v13  ;;  %v2278_v45 = vmul.f32 0.088388346, %v9203_v3  ;;  %v12108_v3 = vsel %vm2150_vm8, 0.0, %v10781_v15 }
 0x459   :  { %2309 = vmax.xlane.f32.xlu1 %v12076_v7  ;;  %v12086_v58 = vadd.f32 %v2275_v5, %v12072_v23  ;;  %v2276_v19 = vmul.f32 0.088388346, %v2227_v62  ;;  %v12099_v5 = vsel %vm2149_vm7, 0.0, %v10781_v15  ;;  %v2135_v62 = vadd.s32 88, %v15307_v42  ;;  %15316 = vst [vmem:[#allocation84_spill] sm:$0xff] %v12108_v3 }
 0x45a   :  { %15315 = vst [vmem:[#allocation83_spill] sm:$0xff] %v12099_v5  ;;  %v12104_v23 = vadd.f32 %v2277_v46, %v12090_v13  ;;  %v12117_v46 = vsel %vm2151_vm9, 0.0, %v10781_v15 }
 0x45b   :  { %2311 = vmax.xlane.f32.xlu0 %v12086_v58  ;;  %v12094_v4 = vadd.f32 %v2276_v19, %v12081_v18  ;;  %v12112_v18 = vadd.f32 %v2278_v45, %v12099_v5  ;;  %15317 = vst [vmem:[#allocation85_spill] sm:$0xff] %v12117_v46  ;;  %vm2153_vm11 = vcmp.le.s32.totalorder %v12032_v0, %v2135_v62  ;;  %v2137_v45 = vadd.s32 104, %v15307_v42 }
 0x45c   :  { %v2138_v62 = vadd.s32 112, %v15307_v42 }
 0x45d   :  { %2313 = vmax.xlane.f32.xlu1 %v12094_v4  ;;  %v9206_v22 = vpop.f32.mrb[176].mxu1  ;;  %vm2155_vm13 = vcmp.le.s32.totalorder %v12032_v0, %v2137_v45 }
 0x45e   :  { %v2240_v19 = vpop.f32.mrb[177].mxu1  ;;  %v2281_v39 = vmul.f32 0.088388346, %v9206_v22  ;;  %vm2156_vm14 = vcmp.le.s32.totalorder %v12032_v0, %v2138_v62 }
 0x45f   :  { %2315 = vmax.xlane.f32.xlu0 %v12104_v23  ;;  %v9207_v36 = vpop.f32.mrb[178].mxu1  ;;  %v2279_v43 = vmul.f32 0.088388346, %v2240_v19  ;;  %v12126_v19 = vsel %vm2152_vm10, 0.0, %v10781_v15  ;;  %v12160_v51 = vsel %vm2156_vm14, 0.0, %v10781_v15 }
 0x460   :  { %v2243_v2 = vpop.f32.mrb[179].mxu1  ;;  %15318 = vst [vmem:[#allocation86_spill] sm:$0xff] %v12126_v19  ;;  %v2282_v5 = vmul.f32 0.088388346, %v9207_v36  ;;  %v12139_v22 = vadd.f32 %v2281_v39, %v12126_v19  ;;  %v12144_v36 = vsel %vm2154_vm12, 0.0, %v10781_v15  ;;  %v12152_v39 = vsel %vm2155_vm13, 0.0, %v10781_v15 }
 0x461   :  { %2317 = vmax.xlane.f32.xlu1 %v12112_v18  ;;  %v12122_v40 = vadd.f32 %v2279_v43, %v12108_v3  ;;  %v2280_v13 = vmul.f32 0.088388346, %v2243_v2  ;;  %v12135_v43 = vsel %vm2153_vm11, 0.0, %v10781_v15  ;;  %v2139_v3 = vadd.s32 120, %v15307_v42  ;;  %15320 = vst [vmem:[#allocation88_spill] sm:$0xff] %v12144_v36  ;;  %15321 = vst [vmem:[#allocation89_spill] sm:$0xff] %v12152_v39 }
 0x462   :  { %15319 = vst [vmem:[#allocation87_spill] sm:$0xff] %v12135_v43  ;;  %15322 = vst [vmem:[#allocation90_spill] sm:$0xff] %v12160_v51 }
 0x463   :  { %2319 = vmax.xlane.f32.xlu0 %v12122_v40  ;;  %v12130_v52 = vadd.f32 %v2280_v13, %v12117_v46  ;;  %v12148_v46 = vadd.f32 %v2282_v5, %v12135_v43  ;;  %vm2157_vm15 = vcmp.le.s32.totalorder %v12032_v0, %v2139_v3 }
 0x465   :  { %2321 = vmax.xlane.f32.xlu1 %v12130_v52  ;;  %v9210_v2 = vpop.f32.mrb[180].mxu1 }
 0x466   :  { %v2256_v13 = vpop.f32.mrb[181].mxu1  ;;  %v2285_v19 = vmul.f32 0.088388346, %v9210_v2 }
 0x467   :  { %2323 = vmax.xlane.f32.xlu0 %v12139_v22  ;;  %v9211_v49 = vpop.f32.mrb[182].mxu1  ;;  %v2283_v44 = vmul.f32 0.088388346, %v2256_v13  ;;  %v12167_v13 = vsel %vm2157_vm15, 0.0, %v10781_v15 }
 0x468   :  { %v2259_v61 = vpop.f32.mrb[183].mxu1  ;;  %v2286_v62 = vmul.f32 0.088388346, %v9211_v49  ;;  %15323 = vst [vmem:[#allocation91_spill] sm:$0xff] %v12167_v13 }
 0x469   :  { %2325 = vmax.xlane.f32.xlu1 %v12148_v46  ;;  %v12156_v45 = vadd.f32 %v2283_v44, %v12144_v36  ;;  %v2284_v42 = vmul.f32 0.088388346, %v2259_v61  ;;  %v12171_v44 = vadd.f32 %v2285_v19, %v12160_v51 }
 0x46a   :  { %v12175_v61 = vadd.f32 %v2286_v62, %v12167_v13 }
 0x46b   :  { %2327 = vmax.xlane.f32.xlu0 %v12156_v45  ;;  %v12164_v5 = vadd.f32 %v2284_v42, %v12152_v39 }
 0x46d   :  { %2329 = vmax.xlane.f32.xlu1 %v12164_v5 }
 0x46f   :  { %2331 = vmax.xlane.f32.xlu0 %v12171_v44 }
 0x471   :  { %2333 = vmax.xlane.f32.xlu1 %v12175_v61 }
 0x4e0   :  { %v2304_v0 = vpop.xlane.xlu0 %2303 }
 0x4e1   :  { %v2335_v42 = vsub.f32 %v12050_v53, %v2304_v0 }
 0x4e2   :  { %v2306_v3 = vpop.xlane.xlu1 %2305 }
 0x4e3   :  { %v2351_v2 = vmul.f32 1.442695, %v2335_v42  ;;  %v2336_v15 = vsub.f32 %v12058_v21, %v2306_v3 }
 0x4e4   :  { %v2308_v49 = vpop.xlane.xlu0 %2307 }
 0x4e5   :  { %10187 = vpow2.f32 %v2351_v2  ;;  %v2353_v39 = vmul.f32 1.442695, %v2336_v15  ;;  %v2337_v19 = vsub.f32 %v12068_v50, %v2308_v49 }
 0x4e6   :  { %v2310_v51 = vpop.xlane.xlu1 %2309 }
 0x4e7   :  { %10189 = vpow2.f32 %v2353_v39  ;;  %v2355_v36 = vmul.f32 1.442695, %v2337_v19  ;;  %v2338_v62 = vsub.f32 %v12076_v7, %v2310_v51 }
 0x4e8   :  { %v2312_v13 = vpop.xlane.xlu0 %2311 }
 0x4e9   :  { %10191 = vpow2.f32 %v2355_v36  ;;  %v2357_v43 = vmul.f32 1.442695, %v2338_v62  ;;  %v2339_v55 = vsub.f32 %v12086_v58, %v2312_v13 }
 0x4ea   :  { %v2314_v53 = vpop.xlane.xlu1 %2313 }
 0x4eb   :  { %10193 = vpow2.f32 %v2357_v43  ;;  %v2359_v0 = vmul.f32 1.442695, %v2339_v55  ;;  %v2340_v21 = vsub.f32 %v12094_v4, %v2314_v53 }
 0x4ec   :  { %v2316_v42 = vpop.xlane.xlu0 %2315 }
 0x4ed   :  { %10195 = vpow2.f32 %v2359_v0  ;;  %v2361_v3 = vmul.f32 1.442695, %v2340_v21  ;;  %v2341_v50 = vsub.f32 %v12104_v23, %v2316_v42 }
 0x4ee   :  { %v2318_v2 = vpop.xlane.xlu1 %2317 }
 0x4ef   :  { %v12185_v39 = vpop.eup %10187  ;;  %10197 = vpow2.f32 %v2361_v3  ;;  %v2363_v51 = vmul.f32 1.442695, %v2341_v50  ;;  %v2342_v7 = vsub.f32 %v12112_v18, %v2318_v2 }
 0x4f0   :  { %v2320_v36 = vpop.xlane.xlu0 %2319  ;;  %2383 = vadd.xlane.f32.xlu0 %v12185_v39 }
 0x4f1   :  { %v12189_v58 = vpop.eup %10189  ;;  %10199 = vpow2.f32 %v2363_v51  ;;  %v2365_v55 = vmul.f32 1.442695, %v2342_v7  ;;  %v2343_v4 = vsub.f32 %v12122_v40, %v2320_v36 }
 0x4f2   :  { %v2322_v43 = vpop.xlane.xlu1 %2321  ;;  %2385 = vadd.xlane.f32.xlu1 %v12189_v58 }
 0x4f3   :  { %v12193_v23 = vpop.eup %10191  ;;  %10201 = vpow2.f32 %v2365_v55  ;;  %v2367_v13 = vmul.f32 1.442695, %v2343_v4  ;;  %v2344_v15 = vsub.f32 %v12130_v52, %v2322_v43 }
 0x4f4   :  { %v2324_v49 = vpop.xlane.xlu0 %2323  ;;  %2387 = vadd.xlane.f32.xlu0 %v12193_v23 }
 0x4f5   :  { %v12197_v18 = vpop.eup %10193  ;;  %10203 = vpow2.f32 %v2367_v13  ;;  %v2369_v19 = vmul.f32 1.442695, %v2344_v15  ;;  %v2345_v62 = vsub.f32 %v12139_v22, %v2324_v49 }
 0x4f6   :  { %v2326_v53 = vpop.xlane.xlu1 %2325  ;;  %2389 = vadd.xlane.f32.xlu1 %v12197_v18 }
 0x4f7   :  { %v12201_v40 = vpop.eup %10195  ;;  %10205 = vpow2.f32 %v2369_v19  ;;  %v2371_v0 = vmul.f32 1.442695, %v2345_v62  ;;  %v2346_v21 = vsub.f32 %v12148_v46, %v2326_v53 }
 0x4f8   :  { %2391 = vadd.xlane.f32.xlu0 %v12201_v40  ;;  %v2328_v52 = vpop.xlane.xlu0 %2327 }
 0x4f9   :  { %v12205_v42 = vpop.eup %10197  ;;  %10207 = vpow2.f32 %v2371_v0  ;;  %v2373_v3 = vmul.f32 1.442695, %v2346_v21  ;;  %v2347_v50 = vsub.f32 %v12156_v45, %v2328_v52 }
 0x4fa   :  { %2393 = vadd.xlane.f32.xlu1 %v12205_v42  ;;  %v2330_v22 = vpop.xlane.xlu1 %2329 }
 0x4fb   :  { %v12209_v2 = vpop.eup %10199  ;;  %10209 = vpow2.f32 %v2373_v3  ;;  %v2375_v51 = vmul.f32 1.442695, %v2347_v50  ;;  %v2348_v7 = vsub.f32 %v12164_v5, %v2330_v22 }
 0x4fc   :  { %2395 = vadd.xlane.f32.xlu0 %v12209_v2  ;;  %v2332_v46 = vpop.xlane.xlu0 %2331 }
 0x4fd   :  { %v12213_v36 = vpop.eup %10201  ;;  %10211 = vpow2.f32 %v2375_v51  ;;  %v2377_v55 = vmul.f32 1.442695, %v2348_v7  ;;  %v2349_v4 = vsub.f32 %v12171_v44, %v2332_v46 }
 0x4fe   :  { %2397 = vadd.xlane.f32.xlu1 %v12213_v36  ;;  %v2334_v45 = vpop.xlane.xlu1 %2333 }
 0x4ff   :  { %v12217_v43 = vpop.eup %10203  ;;  %10213 = vpow2.f32 %v2377_v55  ;;  %v2379_v13 = vmul.f32 1.442695, %v2349_v4  ;;  %v2350_v15 = vsub.f32 %v12175_v61, %v2334_v45 }
 0x500   :  { %2399 = vadd.xlane.f32.xlu0 %v12217_v43 }
 0x501   :  { %v12221_v5 = vpop.eup %10205  ;;  %10215 = vpow2.f32 %v2379_v13  ;;  %v2381_v49 = vmul.f32 1.442695, %v2350_v15 }
 0x502   :  { %2401 = vadd.xlane.f32.xlu1 %v12221_v5 }
 0x503   :  { %v12224_v19 = vpop.eup %10207  ;;  %10217 = vpow2.f32 %v2381_v49 }
 0x504   :  { %2403 = vadd.xlane.f32.xlu0 %v12224_v19 }
 0x505   :  { %v12227_v44 = vpop.eup %10209 }
 0x506   :  { %2405 = vadd.xlane.f32.xlu1 %v12227_v44 }
 0x507   :  { %v12230_v62 = vpop.eup %10211 }
 0x508   :  { %2407 = vadd.xlane.f32.xlu0 %v12230_v62 }
 0x509   :  { %v12233_v61 = vpop.eup %10213 }
 0x50a   :  { %2409 = vadd.xlane.f32.xlu1 %v12233_v61 }
 0x50b   :  { %v12236_v53 = vpop.eup %10215 }
 0x50c   :  { %2411 = vadd.xlane.f32.xlu0 %v12236_v53 }
 0x50d   :  { %v12239_v0 = vpop.eup %10217 }
 0x50e   :  { %2413 = vadd.xlane.f32.xlu1 %v12239_v0 }
 0x57d   :  { %v2384_v21 = vpop.xlane.xlu0 %2383 }
 0x57e   :  { %10219 = vrcp.f32 %v2384_v21 }
 0x57f   :  { %v2386_v52 = vpop.xlane.xlu1 %2385 }
 0x580   :  { %10221 = vrcp.f32 %v2386_v52 }
 0x581   :  { %v2388_v3 = vpop.xlane.xlu0 %2387 }
 0x582   :  { %10223 = vrcp.f32 %v2388_v3 }
 0x583   :  { %v2390_v50 = vpop.xlane.xlu1 %2389 }
 0x584   :  { %10225 = vrcp.f32 %v2390_v50 }
 0x585   :  { %v2392_v22 = vpop.xlane.xlu0 %2391 }
 0x586   :  { %10227 = vrcp.f32 %v2392_v22 }
 0x587   :  { %v2394_v51 = vpop.xlane.xlu1 %2393 }
 0x588   :  { %v10220_v7 = vpop.eup %10219  ;;  %10229 = vrcp.f32 %v2394_v51 }
 0x589   :  { %v2396_v46 = vpop.xlane.xlu0 %2395  ;;  %v2431_v45 = vmul.f32 %v10220_v7, %v12185_v39 }
 0x58a   :  { %v10222_v55 = vpop.eup %10221  ;;  %10231 = vrcp.f32 %v2396_v46 }
 0x58b   :  { %v2398_v4 = vpop.xlane.xlu1 %2397  ;;  %v2432_v13 = vmul.f32 %v10222_v55, %v12189_v58 }
 0x58c   :  { %v10224_v15 = vpop.eup %10223  ;;  %10233 = vrcp.f32 %v2398_v4 }
 0x58d   :  { %v2400_v49 = vpop.xlane.xlu0 %2399  ;;  %v2447_v21 = vpack.c.bf16 %v2432_v13, %v2431_v45  ;;  %v2433_v3 = vmul.f32 %v10224_v15, %v12193_v23 }
 0x58e   :  { %v10226_v52 = vpop.eup %10225  ;;  %10235 = vrcp.f32 %v2400_v49 }
 0x58f   :  { %v2434_v50 = vmul.f32 %v10226_v52, %v12197_v18  ;;  %9228 = vmatprep.mubr.bf16.mxu1 %v2447_v21  ;;  %v2402_v22 = vpop.xlane.xlu1 %2401 }
 0x590   :  { %v10228_v51 = vpop.eup %10227  ;;  %10237 = vrcp.f32 %v2402_v22 }
 0x591   :  { %v2404_v46 = vpop.xlane.xlu0 %2403  ;;  %v2448_v59 = vpack.c.bf16 %v2434_v50, %v2433_v3  ;;  %v2435_v58 = vmul.f32 %v10228_v51, %v12201_v40 }
 0x592   :  { %v10230_v10 = vpop.eup %10229  ;;  %10239 = vrcp.f32 %v2404_v46 }
 0x593   :  { %9229 = vmatmul.mubr.bf16.vlgmr.msra.gmra.mrb[184].mxu1 %v2448_v59  ;;  %v2406_v39 = vpop.xlane.xlu1 %2405  ;;  %v2436_v7 = vmul.f32 %v10230_v10, %v12205_v42 }
 0x594   :  { %v10232_v55 = vpop.eup %10231  ;;  %9245 = vmatpush3.bf16.xpose.msra.mxu1 %v11916_v29  ;;  %10241 = vrcp.f32 %v2406_v39 }
 0x595   :  { %9246 = vmatprep.subr.bf16.mxu1 %v11918_v24  ;;  %v2408_v23 = vpop.xlane.xlu0 %2407  ;;  %v2449_v18 = vpack.c.bf16 %v2436_v7, %v2435_v58  ;;  %v2437_v13 = vmul.f32 %v10232_v55, %v12209_v2  ;;  %v15358_v55 = vld [vmem:[#allocation71_spill] sm:$0xff] }
 0x596   :  { %v10234_v4 = vpop.eup %10233  ;;  %10243 = vrcp.f32 %v2408_v23  ;;  %v15359_v23 = vld [vmem:[#allocation73_spill] sm:$0xff] }
 0x597   :  { %9232 = vmatprep.mubr.bf16.mxu1 %v2449_v18  ;;  %v2410_v45 = vpop.xlane.xlu1 %2409  ;;  %v2438_v59 = vmul.f32 %v10234_v4, %v12213_v36  ;;  %v15360_v18 = vld [vmem:[#allocation51_spill] sm:$0xff]  ;;  %v15361_v4 = vld [vmem:[#allocation49_spill] sm:$0xff] }
 0x598   :  { %v10236_v15 = vpop.eup %10235  ;;  %10245 = vrcp.f32 %v2410_v45  ;;  %v15362_v45 = vpack.c.bf16 %v15360_v18, %v15361_v4 }
 0x599   :  { %v2412_v40 = vpop.xlane.xlu0 %2411  ;;  %v2450_v10 = vpack.c.bf16 %v2438_v59, %v2437_v13  ;;  %v2439_v49 = vmul.f32 %v10236_v15, %v12217_v43  ;;  %v15363_v13 = vld [vmem:[#allocation75_spill] sm:$0xff] }
 0x59a   :  { %v10238_v42 = vpop.eup %10237  ;;  %10247 = vrcp.f32 %v2412_v40 }
 0x59b   :  { %9233 = vmatmul.mubr.bf16.gmra.mrb[188].mxu1 %v2450_v10  ;;  %v2414_v29 = vpop.xlane.xlu1 %2413  ;;  %v2440_v21 = vmul.f32 %v10238_v42, %v12221_v5 }
 0x59c   :  { %v10240_v52 = vpop.eup %10239  ;;  %9247 = vmatpush3.bf16.xpose.msra.mxu1 %v11918_v24  ;;  %10249 = vrcp.f32 %v2414_v29 }
 0x59d   :  { %9248 = vmatprep.subr.bf16.mxu1 %v11920_v16  ;;  %v2451_v2 = vpack.c.bf16 %v2440_v21, %v2439_v49  ;;  %v2441_v3 = vmul.f32 %v10240_v52, %v12224_v19 }
 0x59e   :  { %v10242_v36 = vpop.eup %10241 }
 0x59f   :  { %9236 = vmatprep.mubr.bf16.mxu1 %v2451_v2  ;;  %v2442_v50 = vmul.f32 %v10242_v36, %v12227_v44 }
 0x5a0   :  { %v10244_v22 = vpop.eup %10243 }
 0x5a1   :  { %v2452_v51 = vpack.c.bf16 %v2442_v50, %v2441_v3  ;;  %v2443_v43 = vmul.f32 %v10244_v22, %v12230_v62  ;;  %v15324_v62 = vpack.c.bf16 %v11672_v20, %v11666_v27  ;;  %v15325_v27 = vpack.c.bf16 %v11688_v28, %v11682_v41  ;;  %v15329_v41 = vld [vmem:[#allocation21_spill] sm:$0xff] }
 0x5a2   :  { %v10246_v46 = vpop.eup %10245  ;;  %v15326_v20 = vpack.c.bf16 %v11706_v47, %v11698_v17  ;;  %v15330_v28 = vpack.c.bf16 %v11754_v14, %v15329_v41  ;;  %v15331_v17 = vld [vmem:[#allocation23_spill] sm:$0xff]  ;;  %v15332_v47 = vld [vmem:[#allocation20_spill] sm:$0xff]  ;;  %v15340_v14 = vpack.c.bf16 %v11806_v54, %v11802_v57 }
 0x5a3   :  { %9237 = vmatmul.mubr.bf16.gmra.mrb[192].mxu1 %v2452_v51  ;;  %v2444_v5 = vmul.f32 %v10246_v46, %v12233_v61  ;;  %v15352_v57 = vld [vmem:[#allocation43_spill] sm:$0xff] }
 0x5a4   :  { %v10248_v39 = vpop.eup %10247  ;;  %9249 = vmatpush3.bf16.xpose.msra.mxu1 %v11920_v16  ;;  %v15327_v16 = vpack.c.bf16 %v11722_v34, %v11714_v60  ;;  %v15334_v60 = vld [vmem:[#allocation25_spill] sm:$0xff]  ;;  %v15335_v34 = vld [vmem:[#allocation22_spill] sm:$0xff]  ;;  %v15355_v61 = vld [vmem:[#allocation47_spill] sm:$0xff] }
 0x5a5   :  { %9250 = vmatprep.subr.bf16.mxu1 %v11922_v33  ;;  %v2453_v24 = vpack.c.bf16 %v2444_v5, %v2443_v43  ;;  %v2445_v19 = vmul.f32 %v10248_v39, %v12236_v53  ;;  %v15356_v53 = vld [vmem:[#allocation45_spill] sm:$0xff] }
 0x5a6   :  { %v10250_v58 = vpop.eup %10249 }
 0x5a7   :  { %9240 = vmatprep.mubr.bf16.mxu1 %v2453_v24  ;;  %v2446_v44 = vmul.f32 %v10250_v58, %v12239_v0  ;;  %v15357_v0 = vpack.c.bf16 %v15355_v61, %v15356_v53  ;;  %v15387_v53 = vld [vmem:[#allocation83_spill] sm:$0xff] }
 0x5a9   :  { %v2454_v7 = vpack.c.bf16 %v2446_v44, %v2445_v19 }
 0x5ab   :  { %9241 = vmatmul.mubr.bf16.gmra.mrb[196].mxu1 %v2454_v7 }
 0x5ac   :  { %9251 = vmatpush3.bf16.xpose.msra.mxu1 %v11922_v33  ;;  %9260 = vmatprep.mubr.bf16.mxu1 %v15324_v62  ;;  %v15328_v33 = vpack.c.bf16 %v11738_v25, %v11730_v1  ;;  %v15336_v1 = vpack.c.bf16 %v15334_v60, %v15335_v34  ;;  %v15337_v25 = vld [vmem:[#allocation26_spill] sm:$0xff]  ;;  %v15381_v60 = vld [vmem:[#allocation77_spill] sm:$0xff] }
 0x5ad   :  { %9252 = vmatprep.subr.bf16.mxu1 %v11924_v48 }
 0x5b4   :  { %9253 = vmatpush3.bf16.xpose.msra.mxu1 %v11924_v48  ;;  %v15333_v48 = vpack.c.bf16 %v15331_v17, %v15332_v47  ;;  %v15380_v17 = vld [vmem:[#allocation76_spill] sm:$0xff] }
 0x5b5   :  { %9254 = vmatprep.subr.bf16.mxu1 %v11926_v56 }
 0x5bc   :  { %9255 = vmatpush3.bf16.xpose.msra.mxu1 %v11926_v56  ;;  %v15338_v56 = vld [vmem:[#allocation24_spill] sm:$0xff] }
 0x5bd   :  { %9256 = vmatprep.subr.bf16.mxu1 %v11928_v38 }
 0x5c4   :  { %9257 = vmatpush3.bf16.xpose.msra.mxu1 %v11928_v38  ;;  %v15339_v38 = vpack.c.bf16 %v15337_v25, %v15338_v56 }
 0x5c5   :  { %9258 = vmatprep.subr.bf16.mxu1 %v11930_v26 }
 0x5cc   :  { %9259 = vmatpush3.bf16.xpose.msra.mxu1 %v11930_v26  ;;  %v15341_v26 = vpack.c.bf16 %v11820_v32, %v11816_v9  ;;  %v15350_v9 = vld [vmem:[#allocation67_spill] sm:$0xff]  ;;  %v15351_v32 = vld [vmem:[#allocation69_spill] sm:$0xff] }
 0x5cd   :  { %9308 = vmatprep.subr.bf16.mxu1 %v11933_v37 }
 0x5d3   :  { %9261 = vmatmul.mubr.bf16.vlgmr.msra.gmra.mrb[200].mxu1 %v15325_v27 }
 0x5d4   :  { %9264 = vmatprep.mubr.bf16.mxu1 %v15326_v20  ;;  %9309 = vmatpush3.bf16.xpose.msra.mxu1 %v11933_v37  ;;  %v15342_v37 = vld [vmem:[#allocation63_spill] sm:$0xff] }
 0x5d5   :  { %9310 = vmatprep.subr.bf16.mxu1 %v11946_v8 }
 0x5db   :  { %9265 = vmatmul.mubr.bf16.gmra.mrb[204].mxu1 %v15327_v16 }
 0x5dc   :  { %9268 = vmatprep.mubr.bf16.mxu1 %v15328_v33  ;;  %9311 = vmatpush3.bf16.xpose.msra.mxu1 %v11946_v8  ;;  %v15343_v8 = vld [vmem:[#allocation65_spill] sm:$0xff] }
 0x5dd   :  { %9312 = vmatprep.subr.bf16.mxu1 %v11960_v30 }
 0x5e3   :  { %9269 = vmatmul.mubr.bf16.gmra.mrb[208].mxu1 %v15330_v28 }
 0x5e4   :  { %9272 = vmatprep.mubr.bf16.mxu1 %v15333_v48  ;;  %9313 = vmatpush3.bf16.xpose.msra.mxu1 %v11960_v30  ;;  %v15344_v30 = vld [vmem:[#allocation38_spill] sm:$0xff] }
 0x5e5   :  { %9314 = vmatprep.subr.bf16.mxu1 %v11974_v63 }
 0x5eb   :  { %9273 = vmatmul.mubr.bf16.gmra.mrb[212].mxu1 %v15336_v1  ;;  %v15382_v1 = vld [vmem:[#allocation78_spill] sm:$0xff] }
 0x5ec   :  { %9315 = vmatpush3.bf16.xpose.msra.mxu1 %v11974_v63  ;;  %9324 = vmatprep.mubr.bf16.mxu1 %v15339_v38  ;;  %v15345_v63 = vld [vmem:[#allocation32_spill] sm:$0xff] }
 0x5ed   :  { %9316 = vmatprep.subr.bf16.mxu1 %v11981_v6 }
 0x5f4   :  { %9317 = vmatpush3.bf16.xpose.msra.mxu1 %v11981_v6  ;;  %v15346_v6 = vpack.c.bf16 %v15344_v30, %v15345_v63 }
 0x5f5   :  { %9318 = vmatprep.subr.bf16.mxu1 %v11985_v31 }
 0x5fc   :  { %9319 = vmatpush3.bf16.xpose.msra.mxu1 %v11985_v31  ;;  %v15347_v31 = vld [vmem:[#allocation19_spill] sm:$0xff] }
 0x5fd   :  { %9320 = vmatprep.subr.bf16.mxu1 %v11989_v35 }
 0x604   :  { %9321 = vmatpush3.bf16.xpose.msra.mxu1 %v11989_v35  ;;  %v15348_v35 = vld [vmem:[#allocation40_spill] sm:$0xff] }
 0x605   :  { %9322 = vmatprep.subr.bf16.mxu1 %v11993_v12  ;;  %v15349_v54 = vpack.c.bf16 %v15347_v31, %v15348_v35 }
 0x60c   :  { %9323 = vmatpush3.bf16.xpose.msra.mxu1 %v11993_v12  ;;  %v15353_v12 = vld [vmem:[#allocation18_spill] sm:$0xff] }
 0x60d   :  { %9404 = vmatprep.subr.bf16.mxu1 %v12000_v11 }
 0x613   :  { %9325 = vmatmul.mubr.bf16.vlgmr.msra.gmra.mrb[216].mxu1 %v15340_v14  ;;  %v15383_v14 = vld [vmem:[#allocation79_spill] sm:$0xff] }
 0x614   :  { %9328 = vmatprep.mubr.bf16.mxu1 %v15341_v26  ;;  %9405 = vmatpush3.bf16.msra.mxu1 %v12000_v11  ;;  %v15354_v11 = vpack.c.bf16 %v15352_v57, %v15353_v12  ;;  %v15386_v57 = vld [vmem:[#allocation82_spill] sm:$0xff] }
 0x615   :  { %9406 = vmatprep.subr.bf16.mxu1 %v15342_v37 }
 0x618   :  { %9407 = vmatpush3.bf16.msra.mxu1 %v15342_v37 }
 0x619   :  { %9408 = vmatprep.subr.bf16.mxu1 %v15343_v8 }
 0x61b   :  { %9329 = vmatmul.mubr.bf16.gmra.mrb[220].mxu1 %v15346_v6  ;;  %v15384_v6 = vld [vmem:[#allocation80_spill] sm:$0xff] }
 0x61c   :  { %9332 = vmatprep.mubr.bf16.mxu1 %v15349_v54  ;;  %9409 = vmatpush3.bf16.msra.mxu1 %v15343_v8 }
 0x61d   :  { %9410 = vmatprep.subr.bf16.mxu1 %v15350_v9 }
 0x620   :  { %9411 = vmatpush3.bf16.msra.mxu1 %v15350_v9  ;;  %v15385_v9 = vld [vmem:[#allocation81_spill] sm:$0xff] }
 0x621   :  { %9412 = vmatprep.subr.bf16.mxu1 %v15351_v32 }
 0x623   :  { %9333 = vmatmul.mubr.bf16.gmra.mrb[224].mxu1 %v15354_v11 }
 0x624   :  { %9336 = vmatprep.mubr.bf16.mxu1 %v15357_v0  ;;  %9413 = vmatpush3.bf16.msra.mxu1 %v15351_v32 }
 0x625   :  { %9414 = vmatprep.subr.bf16.mxu1 %v15358_v55 }
 0x628   :  { %9415 = vmatpush3.bf16.msra.mxu1 %v15358_v55 }
 0x629   :  { %9416 = vmatprep.subr.bf16.mxu1 %v15359_v23 }
 0x62b   :  { %9337 = vmatmul.mubr.bf16.gmra.mrb[228].mxu1 %v15362_v45  ;;  %v15388_v45 = vld [vmem:[#allocation84_spill] sm:$0xff] }
 0x62c   :  { %9417 = vmatpush3.bf16.msra.mxu1 %v15359_v23 }
 0x62d   :  { %9418 = vmatprep.subr.bf16.mxu1 %v15363_v13 }
 0x630   :  { %9419 = vmatpush3.bf16.msra.mxu1 %v15363_v13 }
 0x666   :  { %v12353_v59 = vpop.f32.mrb[184].mxu1 }
 0x667   :  { %15364 = vst [vmem:[#allocation21_spill] sm:$0xff] %v12353_v59  ;;  %v12355_v15 = vpop.f32.mrb[185].mxu1 }
 0x668   :  { %15365 = vst [vmem:[#allocation23_spill] sm:$0xff] %v12355_v15  ;;  %v12357_v40 = vpop.f32.mrb[186].mxu1 }
 0x669   :  { %15366 = vst [vmem:[#allocation20_spill] sm:$0xff] %v12357_v40  ;;  %v12361_v42 = vpop.f32.mrb[187].mxu1 }
 0x66a   :  { %15367 = vst [vmem:[#allocation25_spill] sm:$0xff] %v12361_v42 }
 0x66e   :  { %v12365_v49 = vpop.f32.mrb[188].mxu1 }
 0x66f   :  { %15368 = vst [vmem:[#allocation22_spill] sm:$0xff] %v12365_v49  ;;  %v12367_v21 = vpop.f32.mrb[189].mxu1 }
 0x670   :  { %15369 = vst [vmem:[#allocation26_spill] sm:$0xff] %v12367_v21  ;;  %v12369_v52 = vpop.f32.mrb[190].mxu1 }
 0x671   :  { %15370 = vst [vmem:[#allocation24_spill] sm:$0xff] %v12369_v52  ;;  %v12373_v36 = vpop.f32.mrb[191].mxu1 }
 0x672   :  { %15371 = vst [vmem:[#allocation63_spill] sm:$0xff] %v12373_v36 }
 0x676   :  { %v12377_v50 = vpop.f32.mrb[192].mxu1 }
 0x677   :  { %15372 = vst [vmem:[#allocation65_spill] sm:$0xff] %v12377_v50  ;;  %v12379_v22 = vpop.f32.mrb[193].mxu1 }
 0x678   :  { %15373 = vst [vmem:[#allocation38_spill] sm:$0xff] %v12379_v22  ;;  %v12381_v51 = vpop.f32.mrb[194].mxu1 }
 0x679   :  { %15374 = vst [vmem:[#allocation32_spill] sm:$0xff] %v12381_v51  ;;  %v12385_v43 = vpop.f32.mrb[195].mxu1 }
 0x67a   :  { %15375 = vst [vmem:[#allocation19_spill] sm:$0xff] %v12385_v43 }
 0x67e   :  { %v12389_v39 = vpop.f32.mrb[196].mxu1 }
 0x67f   :  { %15376 = vst [vmem:[#allocation40_spill] sm:$0xff] %v12389_v39  ;;  %v12391_v24 = vpop.f32.mrb[197].mxu1 }
 0x680   :  { %15377 = vst [vmem:[#allocation67_spill] sm:$0xff] %v12391_v24  ;;  %v12393_v58 = vpop.f32.mrb[198].mxu1 }
 0x681   :  { %15378 = vst [vmem:[#allocation69_spill] sm:$0xff] %v12393_v58  ;;  %v12397_v44 = vpop.f32.mrb[199].mxu1 }
 0x682   :  { %15379 = vst [vmem:[#allocation43_spill] sm:$0xff] %v12397_v44 }
 0x6a6   :  { %v9262_v62 = vpop.f32.mrb[200].mxu1 }
 0x6a7   :  { %v2602_v27 = vpop.f32.mrb[201].mxu1  ;;  %v2667_v41 = vmul.f32 0.088388346, %v9262_v62 }
 0x6a8   :  { %v2665_v20 = vmul.f32 0.088388346, %v2602_v27  ;;  %v9263_v16 = vpop.f32.mrb[202].mxu1 }
 0x6a9   :  { %v2605_v33 = vpop.f32.mrb[203].mxu1  ;;  %v2668_v48 = vmul.f32 0.088388346, %v9263_v16  ;;  %v12409_v25 = vadd.f32 %v2667_v41, %v15382_v1 }
 0x6aa   :  { %v2666_v28 = vmul.f32 0.088388346, %v2605_v33  ;;  %v12402_v47 = vadd.f32 %v2665_v20, %v15380_v17  ;;  %v15389_v20 = vld [vmem:[#allocation85_spill] sm:$0xff]  ;;  %v15390_v33 = vld [vmem:[#allocation86_spill] sm:$0xff] }
 0x6ab   :  { %v12413_v26 = vadd.f32 %v2668_v48, %v15383_v14 }
 0x6ac   :  { %2697 = vmax.xlane.f32.xlu0 %v12402_v47  ;;  %v12406_v34 = vadd.f32 %v2666_v28, %v15381_v60 }
 0x6ae   :  { %2699 = vmax.xlane.f32.xlu1 %v12406_v34  ;;  %v9266_v56 = vpop.f32.mrb[204].mxu1 }
 0x6af   :  { %v2618_v38 = vpop.f32.mrb[205].mxu1  ;;  %v2671_v63 = vmul.f32 0.088388346, %v9266_v56  ;;  %v15391_v56 = vld [vmem:[#allocation87_spill] sm:$0xff] }
 0x6b0   :  { %v2669_v37 = vmul.f32 0.088388346, %v2618_v38  ;;  %2701 = vmax.xlane.f32.xlu0 %v12409_v25  ;;  %v9267_v8 = vpop.f32.mrb[206].mxu1 }
 0x6b1   :  { %v2621_v30 = vpop.f32.mrb[207].mxu1  ;;  %v2672_v54 = vmul.f32 0.088388346, %v9267_v8  ;;  %v12425_v12 = vadd.f32 %v2671_v63, %v15386_v57 }
 0x6b2   :  { %v12417_v31 = vadd.f32 %v2669_v37, %v15384_v6  ;;  %v2670_v35 = vmul.f32 0.088388346, %v2621_v30  ;;  %2703 = vmax.xlane.f32.xlu1 %v12413_v26 }
 0x6b3   :  { %v12429_v0 = vadd.f32 %v2672_v54, %v15387_v53 }
 0x6b4   :  { %v12421_v32 = vadd.f32 %v2670_v35, %v15385_v9  ;;  %2705 = vmax.xlane.f32.xlu0 %v12417_v31  ;;  %v15392_v35 = vld [vmem:[#allocation88_spill] sm:$0xff] }
 0x6b6   :  { %2707 = vmax.xlane.f32.xlu1 %v12421_v32  ;;  %v9270_v11 = vpop.f32.mrb[208].mxu1 }
 0x6b7   :  { %v2634_v61 = vpop.f32.mrb[209].mxu1  ;;  %v2675_v4 = vmul.f32 0.088388346, %v9270_v11 }
 0x6b8   :  { %v2673_v55 = vmul.f32 0.088388346, %v2634_v61  ;;  %2709 = vmax.xlane.f32.xlu0 %v12425_v12  ;;  %v9271_v23 = vpop.f32.mrb[210].mxu1 }
 0x6b9   :  { %v2637_v18 = vpop.f32.mrb[211].mxu1  ;;  %v2676_v27 = vmul.f32 0.088388346, %v9271_v23  ;;  %v12441_v41 = vadd.f32 %v2675_v4, %v15390_v33 }
 0x6ba   :  { %v12433_v13 = vadd.f32 %v2673_v55, %v15388_v45  ;;  %v2674_v62 = vmul.f32 0.088388346, %v2637_v18  ;;  %2711 = vmax.xlane.f32.xlu1 %v12429_v0  ;;  %v15393_v55 = vld [vmem:[#allocation89_spill] sm:$0xff]  ;;  %v15394_v18 = vld [vmem:[#allocation90_spill] sm:$0xff] }
 0x6bb   :  { %v12445_v38 = vadd.f32 %v2676_v27, %v15391_v56 }
 0x6bc   :  { %v12437_v16 = vadd.f32 %v2674_v62, %v15389_v20  ;;  %2713 = vmax.xlane.f32.xlu0 %v12433_v13  ;;  %v15395_v62 = vld [vmem:[#allocation91_spill] sm:$0xff] }
 0x6be   :  { %2715 = vmax.xlane.f32.xlu1 %v12437_v16  ;;  %v9274_v28 = vpop.f32.mrb[212].mxu1 }
 0x6bf   :  { %v2650_v48 = vpop.f32.mrb[213].mxu1  ;;  %v2679_v63 = vmul.f32 0.088388346, %v9274_v28 }
 0x6c0   :  { %v2677_v37 = vmul.f32 0.088388346, %v2650_v48  ;;  %2717 = vmax.xlane.f32.xlu0 %v12441_v41  ;;  %v9275_v8 = vpop.f32.mrb[214].mxu1 }
 0x6c1   :  { %v2653_v30 = vpop.f32.mrb[215].mxu1  ;;  %v2680_v61 = vmul.f32 0.088388346, %v9275_v8  ;;  %v12457_v4 = vadd.f32 %v2679_v63, %v15394_v18 }
 0x6c2   :  { %v12449_v54 = vadd.f32 %v2677_v37, %v15392_v35  ;;  %v2678_v11 = vmul.f32 0.088388346, %v2653_v30  ;;  %2719 = vmax.xlane.f32.xlu1 %v12445_v38 }
 0x6c3   :  { %v12461_v27 = vadd.f32 %v2680_v61, %v15395_v62 }
 0x6c4   :  { %v12453_v23 = vadd.f32 %v2678_v11, %v15393_v55  ;;  %2721 = vmax.xlane.f32.xlu0 %v12449_v54 }
 0x6c6   :  { %2723 = vmax.xlane.f32.xlu1 %v12453_v23 }
 0x6c8   :  { %2725 = vmax.xlane.f32.xlu0 %v12457_v4 }
 0x6ca   :  { %2727 = vmax.xlane.f32.xlu1 %v12461_v27 }
 0x6e6   :  { %v9326_v28 = vpop.f32.mrb[216].mxu1 }
 0x6e7   :  { %v2996_v48 = vpop.f32.mrb[217].mxu1  ;;  %v3061_v11 = vmul.f32 0.088388346, %v9326_v28 }
 0x6e8   :  { %v3059_v37 = vmul.f32 0.088388346, %v2996_v48  ;;  %v9327_v8 = vpop.f32.mrb[218].mxu1 }
 0x6e9   :  { %v2999_v30 = vpop.f32.mrb[219].mxu1  ;;  %v3062_v7 = vmul.f32 0.088388346, %v9327_v8  ;;  %v12473_v61 = vadd.f32 %v3061_v11, %v15382_v1 }
 0x6ea   :  { %v12466_v19 = vadd.f32 %v3059_v37, %v15380_v17  ;;  %v3060_v63 = vmul.f32 0.088388346, %v2999_v30 }
 0x6eb   :  { %v12477_v28 = vadd.f32 %v3062_v7, %v15383_v14 }
 0x6ec   :  { %v12469_v46 = vadd.f32 %v3060_v63, %v15381_v60  ;;  %3091 = vmax.xlane.f32.xlu0 %v12466_v19 }
 0x6ee   :  { %v9330_v5 = vpop.f32.mrb[220].mxu1  ;;  %3093 = vmax.xlane.f32.xlu1 %v12469_v46 }
 0x6ef   :  { %v3065_v48 = vmul.f32 0.088388346, %v9330_v5  ;;  %v3012_v2 = vpop.f32.mrb[221].mxu1 }
 0x6f0   :  { %3095 = vmax.xlane.f32.xlu0 %v12473_v61  ;;  %v9331_v37 = vpop.f32.mrb[222].mxu1  ;;  %v3063_v3 = vmul.f32 0.088388346, %v3012_v2 }
 0x6f1   :  { %v12481_v8 = vadd.f32 %v3065_v48, %v15386_v57  ;;  %v3066_v30 = vmul.f32 0.088388346, %v9331_v37  ;;  %v3015_v63 = vpop.f32.mrb[223].mxu1 }
 0x6f2   :  { %3097 = vmax.xlane.f32.xlu1 %v12477_v28  ;;  %v3064_v10 = vmul.f32 0.088388346, %v3015_v63  ;;  %v12489_v5 = vadd.f32 %v3063_v3, %v15384_v6 }
 0x6f3   :  { %v12485_v11 = vadd.f32 %v3066_v30, %v15387_v53 }
 0x6f4   :  { %3103 = vmax.xlane.f32.xlu0 %v12481_v8  ;;  %v12493_v37 = vadd.f32 %v3064_v10, %v15385_v9 }
 0x6f6   :  { %v9334_v7 = vpop.f32.mrb[224].mxu1  ;;  %3105 = vmax.xlane.f32.xlu1 %v12485_v11 }
 0x6f7   :  { %v3069_v29 = vmul.f32 0.088388346, %v9334_v7  ;;  %v3028_v48 = vpop.f32.mrb[225].mxu1 }
 0x6f8   :  { %3099 = vmax.xlane.f32.xlu0 %v12489_v5  ;;  %v9335_v2 = vpop.f32.mrb[226].mxu1  ;;  %v3067_v58 = vmul.f32 0.088388346, %v3028_v48 }
 0x6f9   :  { %v12497_v30 = vadd.f32 %v3069_v29, %v15390_v33  ;;  %v3070_v63 = vmul.f32 0.088388346, %v9335_v2  ;;  %v3031_v39 = vpop.f32.mrb[227].mxu1 }
 0x6fa   :  { %3101 = vmax.xlane.f32.xlu1 %v12493_v37  ;;  %v3068_v24 = vmul.f32 0.088388346, %v3031_v39  ;;  %v12505_v10 = vadd.f32 %v3067_v58, %v15388_v45 }
 0x6fb   :  { %v12501_v3 = vadd.f32 %v3070_v63, %v15391_v56 }
 0x6fc   :  { %3111 = vmax.xlane.f32.xlu0 %v12497_v30  ;;  %v12509_v29 = vadd.f32 %v3068_v24, %v15389_v20 }
 0x6fe   :  { %v9338_v7 = vpop.f32.mrb[228].mxu1  ;;  %3113 = vmax.xlane.f32.xlu1 %v12501_v3 }
 0x6ff   :  { %v3044_v44 = vpop.f32.mrb[229].mxu1 }
 0x700   :  { %3107 = vmax.xlane.f32.xlu0 %v12505_v10  ;;  %v9339_v48 = vpop.f32.mrb[230].mxu1 }
 0x701   :  { %v3047_v2 = vpop.f32.mrb[231].mxu1 }
 0x702   :  { %3109 = vmax.xlane.f32.xlu1 %v12509_v29 }
 0x739   :  { %v2698_v63 = vpop.xlane.xlu0 %2697 }
 0x73a   :  { %v2729_v51 = vsub.f32 %v12402_v47, %v2698_v63 }
 0x73b   :  { %v2700_v39 = vpop.xlane.xlu1 %2699 }
 0x73c   :  { %v2730_v43 = vsub.f32 %v12406_v34, %v2700_v39  ;;  %v2745_v21 = vmul.f32 1.442695, %v2729_v51 }
 0x73d   :  { %v2702_v50 = vpop.xlane.xlu0 %2701 }
 0x73e   :  { %v2731_v58 = vsub.f32 %v12409_v25, %v2702_v50  ;;  %v2747_v40 = vmul.f32 1.442695, %v2730_v43 }
 0x73f   :  { %v2704_v22 = vpop.xlane.xlu1 %2703 }
 0x740   :  { %v2749_v49 = vmul.f32 1.442695, %v2731_v58  ;;  %v2732_v24 = vsub.f32 %v12413_v26, %v2704_v22  ;;  %v3072_v26 = vmul.f32 0.088388346, %v3047_v2 }
 0x741   :  { %v2706_v52 = vpop.xlane.xlu0 %2705 }
 0x742   :  { %10251 = vpow2.f32 %v2749_v49  ;;  %v2751_v36 = vmul.f32 1.442695, %v2732_v24  ;;  %v2733_v50 = vsub.f32 %v12417_v31, %v2706_v52  ;;  %v12539_v2 = vadd.f32 %v3072_v26, %v15393_v55 }
 0x743   :  { %v2708_v59 = vpop.xlane.xlu1 %2707 }
 0x744   :  { %10253 = vpow2.f32 %v2751_v36  ;;  %v2734_v34 = vsub.f32 %v12421_v32, %v2708_v59  ;;  %v2753_v49 = vmul.f32 1.442695, %v2733_v50  ;;  %v3071_v36 = vmul.f32 0.088388346, %v3044_v44 }
 0x745   :  { %v2710_v15 = vpop.xlane.xlu0 %2709  ;;  %10255 = vpow2.f32 %v2745_v21 }
 0x746   :  { %10257 = vpow2.f32 %v2747_v40  ;;  %v2735_v51 = vsub.f32 %v12425_v12, %v2710_v15  ;;  %v2755_v21 = vmul.f32 1.442695, %v2734_v34  ;;  %v3073_v15 = vmul.f32 0.088388346, %v9338_v7 }
 0x747   :  { %v2712_v42 = vpop.xlane.xlu1 %2711  ;;  %10259 = vpow2.f32 %v2753_v49  ;;  %v12534_v44 = vadd.f32 %v3071_v36, %v15392_v35 }
 0x748   :  { %v2736_v52 = vsub.f32 %v12429_v0, %v2712_v42  ;;  %v2757_v32 = vmul.f32 1.442695, %v2735_v51  ;;  %10261 = vpow2.f32 %v2755_v21  ;;  %v3074_v0 = vmul.f32 0.088388346, %v9339_v48 }
 0x749   :  { %v2714_v47 = vpop.xlane.xlu0 %2713  ;;  %v12544_v7 = vadd.f32 %v3073_v15, %v15394_v18 }
 0x74a   :  { %v2737_v39 = vsub.f32 %v12433_v13, %v2714_v47  ;;  %v2759_v12 = vmul.f32 1.442695, %v2736_v52  ;;  %10263 = vpow2.f32 %v2757_v32  ;;  %v12549_v48 = vadd.f32 %v3074_v0, %v15395_v62 }
 0x74b   :  { %v2716_v25 = vpop.xlane.xlu1 %2715 }
 0x74c   :  { %v12518_v63 = vpop.eup %10251  ;;  %v2738_v42 = vsub.f32 %v12437_v16, %v2716_v25  ;;  %v2761_v24 = vmul.f32 1.442695, %v2737_v39  ;;  %10265 = vpow2.f32 %v2759_v12 }
 0x74d   :  { %2781 = vadd.xlane.f32.xlu0 %v12518_v63  ;;  %v2718_v43 = vpop.xlane.xlu0 %2717 }
 0x74e   :  { %v12522_v22 = vpop.eup %10253  ;;  %v2739_v13 = vsub.f32 %v12441_v41, %v2718_v43  ;;  %v2763_v50 = vmul.f32 1.442695, %v2738_v42  ;;  %10267 = vpow2.f32 %v2761_v24 }
 0x74f   :  { %2783 = vadd.xlane.f32.xlu1 %v12522_v22  ;;  %v12526_v40 = vpop.eup %10255  ;;  %v2720_v31 = vpop.xlane.xlu1 %2719 }
 0x750   :  { %v12530_v59 = vpop.eup %10257  ;;  %v2740_v16 = vsub.f32 %v12445_v38, %v2720_v31  ;;  %v2765_v25 = vmul.f32 1.442695, %v2739_v13  ;;  %10269 = vpow2.f32 %v2763_v50 }
 0x751   :  { %2777 = vadd.xlane.f32.xlu0 %v12526_v40  ;;  %v2722_v58 = vpop.xlane.xlu0 %2721  ;;  %v12554_v49 = vpop.eup %10259 }
 0x752   :  { %v2741_v34 = vsub.f32 %v12449_v54, %v2722_v58  ;;  %v2767_v51 = vmul.f32 1.442695, %v2740_v16  ;;  %v12558_v38 = vpop.eup %10261  ;;  %10271 = vpow2.f32 %v2765_v25 }
 0x753   :  { %2779 = vadd.xlane.f32.xlu1 %v12530_v59  ;;  %v2724_v47 = vpop.xlane.xlu1 %2723 }
 0x754   :  { %v2742_v36 = vsub.f32 %v12453_v23, %v2724_v47  ;;  %v2769_v21 = vmul.f32 1.442695, %v2741_v34  ;;  %v12562_v54 = vpop.eup %10263  ;;  %10273 = vpow2.f32 %v2767_v51 }
 0x755   :  { %3115 = vmax.xlane.f32.xlu0 %v12534_v44  ;;  %v2726_v41 = vpop.xlane.xlu0 %2725 }
 0x756   :  { %v2743_v52 = vsub.f32 %v12457_v4, %v2726_v41  ;;  %v2771_v26 = vmul.f32 1.442695, %v2742_v36  ;;  %v12566_v23 = vpop.eup %10265  ;;  %10275 = vpow2.f32 %v2769_v21 }
 0x757   :  { %3117 = vmax.xlane.f32.xlu1 %v12539_v2  ;;  %v2728_v43 = vpop.xlane.xlu1 %2727 }
 0x758   :  { %v2744_v31 = vsub.f32 %v12461_v27, %v2728_v43  ;;  %v2773_v32 = vmul.f32 1.442695, %v2743_v52  ;;  %v12569_v39 = vpop.eup %10267  ;;  %10277 = vpow2.f32 %v2771_v26 }
 0x759   :  { %3119 = vmax.xlane.f32.xlu0 %v12544_v7 }
 0x75a   :  { %v2775_v4 = vmul.f32 1.442695, %v2744_v31  ;;  %v12572_v15 = vpop.eup %10269  ;;  %10279 = vpow2.f32 %v2773_v32 }
 0x75b   :  { %3121 = vmax.xlane.f32.xlu1 %v12549_v48 }
 0x75c   :  { %v12575_v27 = vpop.eup %10271  ;;  %10281 = vpow2.f32 %v2775_v4 }
 0x75d   :  { %2785 = vadd.xlane.f32.xlu0 %v12554_v49 }
 0x75e   :  { %v12578_v12 = vpop.eup %10273 }
 0x75f   :  { %2787 = vadd.xlane.f32.xlu1 %v12558_v38 }
 0x760   :  { %v12581_v42 = vpop.eup %10275 }
 0x761   :  { %2789 = vadd.xlane.f32.xlu0 %v12562_v54 }
 0x762   :  { %v12584_v0 = vpop.eup %10277 }
 0x763   :  { %2791 = vadd.xlane.f32.xlu1 %v12566_v23 }
 0x764   :  { %v12587_v58 = vpop.eup %10279 }
 0x765   :  { %2793 = vadd.xlane.f32.xlu0 %v12569_v39 }
 0x766   :  { %v12590_v24 = vpop.eup %10281 }
 0x767   :  { %2795 = vadd.xlane.f32.xlu1 %v12572_v15 }
 0x769   :  { %2797 = vadd.xlane.f32.xlu0 %v12575_v27 }
 0x76b   :  { %2799 = vadd.xlane.f32.xlu1 %v12578_v12 }
 0x76d   :  { %2801 = vadd.xlane.f32.xlu0 %v12581_v42 }
 0x76f   :  { %2803 = vadd.xlane.f32.xlu1 %v12584_v0 }
 0x771   :  { %2805 = vadd.xlane.f32.xlu0 %v12587_v58 }
 0x773   :  { %2807 = vadd.xlane.f32.xlu1 %v12590_v24 }
 0x779   :  { %v3092_v13 = vpop.xlane.xlu0 %3091 }
 0x77a   :  { %v3123_v47 = vsub.f32 %v12466_v19, %v3092_v13 }
 0x77b   :  { %v3094_v50 = vpop.xlane.xlu1 %3093 }
 0x77c   :  { %v3139_v16 = vmul.f32 1.442695, %v3123_v47  ;;  %v3124_v25 = vsub.f32 %v12469_v46, %v3094_v50 }
 0x77d   :  { %v3096_v34 = vpop.xlane.xlu0 %3095 }
 0x77e   :  { %10283 = vpow2.f32 %v3139_v16  ;;  %v3141_v41 = vmul.f32 1.442695, %v3124_v25  ;;  %v3125_v51 = vsub.f32 %v12473_v61, %v3096_v34 }
 0x77f   :  { %v3098_v36 = vpop.xlane.xlu1 %3097 }
 0x780   :  { %10285 = vpow2.f32 %v3141_v41  ;;  %v3143_v43 = vmul.f32 1.442695, %v3125_v51  ;;  %v3126_v21 = vsub.f32 %v12477_v28, %v3098_v36 }
 0x781   :  { %v3104_v52 = vpop.xlane.xlu0 %3103 }
 0x782   :  { %10287 = vpow2.f32 %v3143_v43  ;;  %v3145_v26 = vmul.f32 1.442695, %v3126_v21  ;;  %v3129_v32 = vsub.f32 %v12481_v8, %v3104_v52 }
 0x783   :  { %v3106_v31 = vpop.xlane.xlu1 %3105 }
 0x784   :  { %10289 = vpow2.f32 %v3145_v26  ;;  %v3130_v61 = vsub.f32 %v12485_v11, %v3106_v31  ;;  %v3151_v25 = vmul.f32 1.442695, %v3129_v32 }
 0x785   :  { %v3100_v19 = vpop.xlane.xlu0 %3099 }
 0x786   :  { %v3127_v46 = vsub.f32 %v12489_v5, %v3100_v19  ;;  %v3153_v41 = vmul.f32 1.442695, %v3130_v61 }
 0x787   :  { %v3102_v4 = vpop.xlane.xlu1 %3101 }
 0x788   :  { %v12599_v13 = vpop.eup %10283  ;;  %v3147_v47 = vmul.f32 1.442695, %v3127_v46  ;;  %v3128_v50 = vsub.f32 %v12493_v37, %v3102_v4 }
 0x789   :  { %v3112_v16 = vpop.xlane.xlu0 %3111  ;;  %3171 = vadd.xlane.f32.xlu0 %v12599_v13 }
 0x78a   :  { %v12604_v28 = vpop.eup %10285  ;;  %10291 = vpow2.f32 %v3147_v47  ;;  %v3149_v34 = vmul.f32 1.442695, %v3128_v50  ;;  %v3133_v37 = vsub.f32 %v12497_v30, %v3112_v16 }
 0x78b   :  { %3173 = vadd.xlane.f32.xlu1 %v12604_v28  ;;  %v3114_v8 = vpop.xlane.xlu1 %3113 }
 0x78c   :  { %v12607_v5 = vpop.eup %10287  ;;  %10293 = vpow2.f32 %v3149_v34  ;;  %v3134_v21 = vsub.f32 %v12501_v3, %v3114_v8  ;;  %v3159_v31 = vmul.f32 1.442695, %v3133_v37 }
 0x78d   :  { %v3108_v51 = vpop.xlane.xlu0 %3107  ;;  %3175 = vadd.xlane.f32.xlu0 %v12607_v5  ;;  %10295 = vpow2.f32 %v3151_v25 }
 0x78e   :  { %v12610_v11 = vpop.eup %10289  ;;  %v3131_v36 = vsub.f32 %v12505_v10, %v3108_v51  ;;  %10297 = vpow2.f32 %v3153_v41  ;;  %v3161_v46 = vmul.f32 1.442695, %v3134_v21 }
 0x78f   :  { %3177 = vadd.xlane.f32.xlu1 %v12610_v11  ;;  %v3110_v43 = vpop.xlane.xlu1 %3109 }
 0x790   :  { %v3155_v52 = vmul.f32 1.442695, %v3131_v36  ;;  %v3132_v26 = vsub.f32 %v12509_v29, %v3110_v43 }
 0x792   :  { %10299 = vpow2.f32 %v3155_v52  ;;  %v3157_v19 = vmul.f32 1.442695, %v3132_v26 }
 0x794   :  { %v12617_v32 = vpop.eup %10291  ;;  %10301 = vpow2.f32 %v3157_v19 }
 0x795   :  { %3179 = vadd.xlane.f32.xlu0 %v12617_v32  ;;  %10303 = vpow2.f32 %v3159_v31 }
 0x796   :  { %v12620_v30 = vpop.eup %10293  ;;  %10305 = vpow2.f32 %v3161_v46 }
 0x797   :  { %3181 = vadd.xlane.f32.xlu1 %v12620_v30  ;;  %v12623_v10 = vpop.eup %10295 }
 0x798   :  { %v12626_v3 = vpop.eup %10297 }
 0x799   :  { %3183 = vadd.xlane.f32.xlu0 %v12623_v10 }
 0x79b   :  { %3185 = vadd.xlane.f32.xlu1 %v12626_v3 }
 0x79c   :  { %v12629_v29 = vpop.eup %10299 }
 0x79d   :  { %3187 = vadd.xlane.f32.xlu0 %v12629_v29 }
 0x79e   :  { %v12632_v4 = vpop.eup %10301 }
 0x79f   :  { %3189 = vadd.xlane.f32.xlu1 %v12632_v4  ;;  %v12635_v61 = vpop.eup %10303 }
 0x7a0   :  { %v12638_v47 = vpop.eup %10305 }
 0x7a1   :  { %3191 = vadd.xlane.f32.xlu0 %v12635_v61 }
 0x7a3   :  { %3193 = vadd.xlane.f32.xlu1 %v12638_v47 }
 0x7da   :  { %v2782_v50 = vpop.xlane.xlu0 %2781 }
 0x7dc   :  { %v2784_v16 = vpop.xlane.xlu1 %2783 }
 0x7dd   :  { %10307 = vrcp.f32 %v2784_v16 }
 0x7de   :  { %v2778_v25 = vpop.xlane.xlu0 %2777 }
 0x7df   :  { %10309 = vrcp.f32 %v2778_v25 }
 0x7e0   :  { %10311 = vrcp.f32 %v2782_v50  ;;  %v2780_v34 = vpop.xlane.xlu1 %2779 }
 0x7e1   :  { %10313 = vrcp.f32 %v2780_v34 }
 0x7e2   :  { %v3116_v8 = vpop.xlane.xlu0 %3115 }
 0x7e3   :  { %v3135_v41 = vsub.f32 %v12534_v44, %v3116_v8 }
 0x7e4   :  { %v3118_v51 = vpop.xlane.xlu1 %3117 }
 0x7e5   :  { %v3163_v37 = vmul.f32 1.442695, %v3135_v41  ;;  %v3136_v36 = vsub.f32 %v12539_v2, %v3118_v51 }
 0x7e6   :  { %v3120_v43 = vpop.xlane.xlu0 %3119 }
 0x7e7   :  { %10315 = vpow2.f32 %v3163_v37  ;;  %v3165_v21 = vmul.f32 1.442695, %v3136_v36  ;;  %v3137_v52 = vsub.f32 %v12544_v7, %v3120_v43  ;;  %v10308_v26 = vpop.eup %10307 }
 0x7e8   :  { %v3122_v31 = vpop.xlane.xlu1 %3121  ;;  %v2828_v44 = vmul.f32 %v10308_v26, %v12522_v22  ;;  %v15396_v22 = vld [vmem:[#allocation61_spill] sm:$0xff] }
 0x7e9   :  { %v10310_v19 = vpop.eup %10309  ;;  %10317 = vpow2.f32 %v3165_v21  ;;  %v3167_v46 = vmul.f32 1.442695, %v3137_v52  ;;  %v3138_v50 = vsub.f32 %v12549_v48, %v3122_v31 }
 0x7ea   :  { %v10312_v16 = vpop.eup %10311  ;;  %v2786_v25 = vpop.xlane.xlu0 %2785  ;;  %v2825_v41 = vmul.f32 %v10310_v19, %v12526_v40 }
 0x7eb   :  { %v10314_v34 = vpop.eup %10313  ;;  %10319 = vpow2.f32 %v3167_v46  ;;  %v3169_v8 = vmul.f32 1.442695, %v3138_v50  ;;  %v2827_v51 = vmul.f32 %v10312_v16, %v12518_v63  ;;  %v15397_v63 = vld [vmem:[#allocation62_spill] sm:$0xff]  ;;  %v15398_v50 = vld [vmem:[#allocation64_spill] sm:$0xff] }
 0x7ec   :  { %10321 = vrcp.f32 %v2786_v25  ;;  %v2788_v2 = vpop.xlane.xlu1 %2787  ;;  %v2826_v7 = vmul.f32 %v10314_v34, %v12530_v59 }
 0x7ed   :  { %10323 = vpow2.f32 %v3169_v8  ;;  %v2842_v48 = vpack.c.bf16 %v2828_v44, %v2827_v51 }
 0x7ee   :  { %10325 = vrcp.f32 %v2788_v2  ;;  %v2790_v37 = vpop.xlane.xlu0 %2789  ;;  %v2841_v36 = vpack.c.bf16 %v2826_v7, %v2825_v41  ;;  %v15399_v7 = vld [vmem:[#allocation66_spill] sm:$0xff] }
 0x7ef   :  { %10327 = vrcp.f32 %v2790_v37 }
 0x7f0   :  { %9292 = vmatprep.mubr.bf16.mxu0 %v2841_v36  ;;  %v2792_v43 = vpop.xlane.xlu1 %2791 }
 0x7f1   :  { %v12649_v21 = vpop.eup %10315  ;;  %10329 = vrcp.f32 %v2792_v43  ;;  %9293 = vmatmul.mubr.bf16.vlgmr.msra.gmra.mrb[24].mxu0 %v2842_v48 }
 0x7f2   :  { %9341 = vmatpush3.bf16.msra.mxu0 %v15396_v22  ;;  %3195 = vadd.xlane.f32.xlu0 %v12649_v21  ;;  %v2794_v40 = vpop.xlane.xlu0 %2793 }
 0x7f3   :  { %v12653_v59 = vpop.eup %10317  ;;  %10331 = vrcp.f32 %v2794_v40  ;;  %9342 = vmatprep.subr.bf16.mxu0 %v15397_v63  ;;  %v15400_v40 = vld [vmem:[#allocation68_spill] sm:$0xff] }
 0x7f4   :  { %3197 = vadd.xlane.f32.xlu1 %v12653_v59  ;;  %v2796_v52 = vpop.xlane.xlu1 %2795 }
 0x7f5   :  { %v12657_v26 = vpop.eup %10319  ;;  %10333 = vrcp.f32 %v2796_v52 }
 0x7f6   :  { %v10322_v31 = vpop.eup %10321  ;;  %9343 = vmatpush3.bf16.msra.mxu0 %v15397_v63  ;;  %3199 = vadd.xlane.f32.xlu0 %v12657_v26  ;;  %v2798_v19 = vpop.xlane.xlu0 %2797 }
 0x7f7   :  { %v12661_v46 = vpop.eup %10323  ;;  %10335 = vrcp.f32 %v2798_v19  ;;  %9344 = vmatprep.subr.bf16.mxu0 %v15398_v50  ;;  %v2829_v44 = vmul.f32 %v10322_v31, %v12554_v49 }
 0x7f8   :  { %v10326_v16 = vpop.eup %10325  ;;  %3201 = vadd.xlane.f32.xlu1 %v12661_v46  ;;  %v2800_v25 = vpop.xlane.xlu1 %2799 }
 0x7f9   :  { %v10328_v34 = vpop.eup %10327  ;;  %10337 = vrcp.f32 %v2800_v25  ;;  %v2830_v8 = vmul.f32 %v10326_v16, %v12558_v38 }
 0x7fa   :  { %9345 = vmatpush3.bf16.msra.mxu0 %v15398_v50  ;;  %v2802_v2 = vpop.xlane.xlu0 %2801  ;;  %v2831_v36 = vmul.f32 %v10328_v34, %v12562_v54  ;;  %v15401_v50 = vld [vmem:[#allocation70_spill] sm:$0xff] }
 0x7fb   :  { %v10330_v41 = vpop.eup %10329  ;;  %10339 = vrcp.f32 %v2802_v2  ;;  %9346 = vmatprep.subr.bf16.mxu0 %v15399_v7  ;;  %v2843_v51 = vpack.c.bf16 %v2830_v8, %v2829_v44  ;;  %v15402_v8 = vld [vmem:[#allocation72_spill] sm:$0xff] }
 0x7fc   :  { %v2804_v37 = vpop.xlane.xlu1 %2803  ;;  %v2832_v48 = vmul.f32 %v10330_v41, %v12566_v23 }
 0x7fd   :  { %v10332_v43 = vpop.eup %10331  ;;  %9296 = vmatprep.mubr.bf16.mxu0 %v2843_v51  ;;  %10341 = vrcp.f32 %v2804_v37 }
 0x7fe   :  { %9347 = vmatpush3.bf16.msra.mxu0 %v15399_v7  ;;  %v2806_v49 = vpop.xlane.xlu0 %2805  ;;  %v2844_v38 = vpack.c.bf16 %v2832_v48, %v2831_v36  ;;  %v2833_v52 = vmul.f32 %v10332_v43, %v12569_v39  ;;  %v15404_v48 = vld [vmem:[#allocation53_spill] sm:$0xff] }
 0x7ff   :  { %v10334_v22 = vpop.eup %10333  ;;  %10343 = vrcp.f32 %v2806_v49  ;;  %9348 = vmatprep.subr.bf16.mxu0 %v15400_v40 }
 0x800   :  { %9297 = vmatmul.mubr.bf16.gmra.mrb[28].mxu0 %v2844_v38  ;;  %v2808_v63 = vpop.xlane.xlu1 %2807  ;;  %v2834_v31 = vmul.f32 %v10334_v22, %v12572_v15 }
 0x801   :  { %v10336_v54 = vpop.eup %10335  ;;  %10345 = vrcp.f32 %v2808_v63 }
 0x802   :  { %9349 = vmatpush3.bf16.msra.mxu0 %v15400_v40  ;;  %v2845_v23 = vpack.c.bf16 %v2834_v31, %v2833_v52  ;;  %v2835_v16 = vmul.f32 %v10336_v54, %v12575_v27  ;;  %v15403_v27 = vld [vmem:[#allocation74_spill] sm:$0xff] }
 0x803   :  { %v10338_v19 = vpop.eup %10337  ;;  %9350 = vmatprep.subr.bf16.mxu0 %v15401_v50 }
 0x804   :  { %9300 = vmatprep.mubr.bf16.mxu0 %v2845_v23  ;;  %v2836_v25 = vmul.f32 %v10338_v19, %v12578_v12 }
 0x805   :  { %v10340_v34 = vpop.eup %10339 }
 0x806   :  { %9351 = vmatpush3.bf16.msra.mxu0 %v15401_v50  ;;  %v2846_v44 = vpack.c.bf16 %v2836_v25, %v2835_v16  ;;  %v2837_v15 = vmul.f32 %v10340_v34, %v12581_v42 }
 0x807   :  { %v10342_v39 = vpop.eup %10341  ;;  %9352 = vmatprep.subr.bf16.mxu0 %v15402_v8 }
 0x808   :  { %9301 = vmatmul.mubr.bf16.gmra.mrb[32].mxu0 %v2846_v44  ;;  %v2838_v2 = vmul.f32 %v10342_v39, %v12584_v0 }
 0x809   :  { %v10344_v41 = vpop.eup %10343 }
 0x80a   :  { %9353 = vmatpush3.bf16.msra.mxu0 %v15402_v8  ;;  %v2847_v7 = vpack.c.bf16 %v2838_v2, %v2837_v15  ;;  %v2839_v12 = vmul.f32 %v10344_v41, %v12587_v58 }
 0x80b   :  { %v10346_v51 = vpop.eup %10345  ;;  %9354 = vmatprep.subr.bf16.mxu0 %v15403_v27 }
 0x80c   :  { %9304 = vmatprep.mubr.bf16.mxu0 %v2847_v7  ;;  %v2840_v37 = vmul.f32 %v10346_v51, %v12590_v24 }
 0x80e   :  { %9355 = vmatpush3.bf16.msra.mxu0 %v15403_v27  ;;  %v2848_v36 = vpack.c.bf16 %v2840_v37, %v2839_v12  ;;  %v15406_v37 = vld [vmem:[#allocation55_spill] sm:$0xff] }
 0x80f   :  { %9372 = vmatprep.subr.bf16.mxu0 %v15404_v48 }
 0x810   :  { %9305 = vmatmul.mubr.bf16.gmra.mrb[36].mxu0 %v2848_v36 }
 0x816   :  { %v3172_v42 = vpop.xlane.xlu0 %3171 }
 0x817   :  { %10347 = vrcp.f32 %v3172_v42 }
 0x818   :  { %v3174_v0 = vpop.xlane.xlu1 %3173 }
 0x819   :  { %10349 = vrcp.f32 %v3174_v0 }
 0x81a   :  { %v3176_v43 = vpop.xlane.xlu0 %3175 }
 0x81b   :  { %10351 = vrcp.f32 %v3176_v43 }
 0x81c   :  { %v3178_v49 = vpop.xlane.xlu1 %3177 }
 0x81d   :  { %10353 = vrcp.f32 %v3178_v49  ;;  %v15407_v49 = vld [vmem:[#allocation56_spill] sm:$0xff] }
 0x821   :  { %v10348_v38 = vpop.eup %10347 }
 0x822   :  { %v3180_v22 = vpop.xlane.xlu0 %3179  ;;  %v3219_v24 = vmul.f32 %v10348_v38, %v12599_v13 }
 0x823   :  { %v10350_v40 = vpop.eup %10349  ;;  %10355 = vrcp.f32 %v3180_v22  ;;  %v15408_v22 = vld [vmem:[#allocation57_spill] sm:$0xff] }
 0x824   :  { %v3182_v58 = vpop.xlane.xlu1 %3181  ;;  %v3220_v63 = vmul.f32 %v10350_v40, %v12604_v28  ;;  %v15405_v28 = vld [vmem:[#allocation54_spill] sm:$0xff] }
 0x825   :  { %v10352_v52 = vpop.eup %10351  ;;  %10357 = vrcp.f32 %v3182_v58 }
 0x826   :  { %v3184_v31 = vpop.xlane.xlu0 %3183  ;;  %v3235_v54 = vpack.c.bf16 %v3220_v63, %v3219_v24  ;;  %v3221_v19 = vmul.f32 %v10352_v52, %v12607_v5 }
 0x827   :  { %v10354_v23 = vpop.eup %10353  ;;  %10359 = vrcp.f32 %v3184_v31 }
 0x828   :  { %v3222_v50 = vmul.f32 %v10354_v23, %v12610_v11  ;;  %9356 = vmatprep.mubr.bf16.mxu0 %v3235_v54  ;;  %v3186_v16 = vpop.xlane.xlu1 %3185 }
 0x829   :  { %10361 = vrcp.f32 %v3186_v16 }
 0x82a   :  { %v3188_v25 = vpop.xlane.xlu0 %3187  ;;  %v3236_v34 = vpack.c.bf16 %v3222_v50, %v3221_v19 }
 0x82b   :  { %10363 = vrcp.f32 %v3188_v25 }
 0x82c   :  { %9357 = vmatmul.mubr.bf16.vlgmr.msra.gmra.mrb[40].mxu0 %v3236_v34  ;;  %v3190_v13 = vpop.xlane.xlu1 %3189 }
 0x82d   :  { %v10356_v44 = vpop.eup %10355  ;;  %9373 = vmatpush3.bf16.xpose.msra.mxu0 %v15404_v48  ;;  %10365 = vrcp.f32 %v3190_v13  ;;  %v15412_v13 = vld [vmem:[#allocation29_spill] sm:$0xff] }
 0x82e   :  { %9374 = vmatprep.subr.bf16.mxu0 %v15405_v28  ;;  %v3192_v39 = vpop.xlane.xlu0 %3191  ;;  %v3223_v11 = vmul.f32 %v10356_v44, %v12617_v32  ;;  %v15413_v44 = vld [vmem:[#allocation27_spill] sm:$0xff] }
 0x82f   :  { %v10358_v8 = vpop.eup %10357  ;;  %10367 = vrcp.f32 %v3192_v39  ;;  %v15415_v39 = vld [vmem:[#allocation31_spill] sm:$0xff] }
 0x830   :  { %v3194_v5 = vpop.xlane.xlu1 %3193  ;;  %v3224_v15 = vmul.f32 %v10358_v8, %v12620_v30  ;;  %v15416_v8 = vld [vmem:[#allocation28_spill] sm:$0xff] }
 0x831   :  { %v10360_v2 = vpop.eup %10359  ;;  %10369 = vrcp.f32 %v3194_v5  ;;  %v15417_v5 = vpack.c.bf16 %v15415_v39, %v15416_v8 }
 0x832   :  { %v3237_v41 = vpack.c.bf16 %v3224_v15, %v3223_v11  ;;  %v3225_v51 = vmul.f32 %v10360_v2, %v12623_v10  ;;  %v15421_v15 = vld [vmem:[#allocation37_spill] sm:$0xff]  ;;  %v15422_v2 = vld [vmem:[#allocation34_spill] sm:$0xff] }
 0x833   :  { %v10362_v7 = vpop.eup %10361 }
 0x834   :  { %9360 = vmatprep.mubr.bf16.mxu0 %v3237_v41  ;;  %v3226_v27 = vmul.f32 %v10362_v7, %v12626_v3  ;;  %v15423_v41 = vpack.c.bf16 %v15421_v15, %v15422_v2 }
 0x835   :  { %v10364_v12 = vpop.eup %10363  ;;  %9375 = vmatpush3.bf16.xpose.msra.mxu0 %v15405_v28  ;;  %v15414_v28 = vpack.c.bf16 %v15412_v13, %v15413_v44 }
 0x836   :  { %9376 = vmatprep.subr.bf16.mxu0 %v15406_v37  ;;  %v3238_v36 = vpack.c.bf16 %v3226_v27, %v3225_v51  ;;  %v3227_v32 = vmul.f32 %v10364_v12, %v12629_v29  ;;  %v15409_v29 = vld [vmem:[#allocation58_spill] sm:$0xff]  ;;  %v15427_v51 = vld [vmem:[#allocation44_spill] sm:$0xff] }
 0x837   :  { %v10366_v48 = vpop.eup %10365  ;;  %v15428_v27 = vld [vmem:[#allocation42_spill] sm:$0xff] }
 0x838   :  { %9361 = vmatmul.mubr.bf16.gmra.mrb[44].mxu0 %v3238_v36  ;;  %v3228_v30 = vmul.f32 %v10366_v48, %v12632_v4  ;;  %v15410_v4 = vld [vmem:[#allocation59_spill] sm:$0xff]  ;;  %v15429_v12 = vpack.c.bf16 %v15427_v51, %v15428_v27  ;;  %v15431_v36 = vld [vmem:[#allocation46_spill] sm:$0xff] }
 0x839   :  { %v10368_v42 = vpop.eup %10367 }
 0x83a   :  { %v3239_v0 = vpack.c.bf16 %v3228_v30, %v3227_v32  ;;  %v3229_v10 = vmul.f32 %v10368_v42, %v12635_v61  ;;  %v15411_v61 = vld [vmem:[#allocation60_spill] sm:$0xff]  ;;  %v15434_v30 = vld [vmem:[#allocation50_spill] sm:$0xff] }
 0x83b   :  { %v10370_v43 = vpop.eup %10369  ;;  %v15433_v32 = vld [vmem:[#allocation52_spill] sm:$0xff] }
 0x83c   :  { %9364 = vmatprep.mubr.bf16.mxu0 %v3239_v0  ;;  %v3230_v3 = vmul.f32 %v10370_v43, %v12638_v47  ;;  %v15435_v42 = vpack.c.bf16 %v15433_v32, %v15434_v30 }
 0x83d   :  { %9377 = vmatpush3.bf16.xpose.msra.mxu0 %v15406_v37  ;;  %v15430_v37 = vld [vmem:[#allocation48_spill] sm:$0xff] }
 0x83e   :  { %9378 = vmatprep.subr.bf16.mxu0 %v15407_v49  ;;  %v3240_v38 = vpack.c.bf16 %v3230_v3, %v3229_v10  ;;  %v15432_v48 = vpack.c.bf16 %v15430_v37, %v15431_v36 }
 0x840   :  { %9365 = vmatmul.mubr.bf16.gmra.mrb[48].mxu0 %v3240_v38 }
 0x845   :  { %9379 = vmatpush3.bf16.xpose.msra.mxu0 %v15407_v49 }
 0x846   :  { %9380 = vmatprep.subr.bf16.mxu0 %v15408_v22 }
 0x84d   :  { %9381 = vmatpush3.bf16.xpose.msra.mxu0 %v15408_v22 }
 0x84e   :  { %9382 = vmatprep.subr.bf16.mxu0 %v15409_v29 }
 0x855   :  { %9383 = vmatpush3.bf16.xpose.msra.mxu0 %v15409_v29 }
 0x856   :  { %9384 = vmatprep.subr.bf16.mxu0 %v15410_v4 }
 0x85d   :  { %9385 = vmatpush3.bf16.xpose.msra.mxu0 %v15410_v4 }
 0x85e   :  { %9386 = vmatprep.subr.bf16.mxu0 %v15411_v61 }
 0x865   :  { %9387 = vmatpush3.bf16.xpose.msra.mxu0 %v15411_v61 }
 0x87f   :  { %v3196_v47 = vpop.xlane.xlu0 %3195 }
 0x880   :  { %10371 = vrcp.f32 %v3196_v47 }
 0x881   :  { %v3198_v40 = vpop.xlane.xlu1 %3197 }
 0x882   :  { %10373 = vrcp.f32 %v3198_v40 }
 0x883   :  { %v3200_v58 = vpop.xlane.xlu0 %3199 }
 0x884   :  { %10375 = vrcp.f32 %v3200_v58 }
 0x885   :  { %v3202_v24 = vpop.xlane.xlu1 %3201 }
 0x886   :  { %10377 = vrcp.f32 %v3202_v24 }
 0x88a   :  { %v10372_v63 = vpop.eup %10371 }
 0x88b   :  { %v3231_v31 = vmul.f32 %v10372_v63, %v12649_v21  ;;  %v15418_v21 = vld [vmem:[#allocation33_spill] sm:$0xff] }
 0x88c   :  { %v10374_v52 = vpop.eup %10373 }
 0x88d   :  { %v3232_v54 = vmul.f32 %v10374_v52, %v12653_v59  ;;  %v15419_v59 = vld [vmem:[#allocation30_spill] sm:$0xff] }
 0x88e   :  { %v10376_v23 = vpop.eup %10375  ;;  %v15420_v11 = vpack.c.bf16 %v15418_v21, %v15419_v59 }
 0x88f   :  { %v3241_v19 = vpack.c.bf16 %v3232_v54, %v3231_v31  ;;  %v3233_v16 = vmul.f32 %v10376_v23, %v12657_v26  ;;  %v15424_v26 = vld [vmem:[#allocation17_spill] sm:$0xff] }
 0x890   :  { %v10378_v50 = vpop.eup %10377 }
 0x891   :  { %9368 = vmatprep.mubr.bf16.mxu0 %v3241_v19  ;;  %v3234_v25 = vmul.f32 %v10378_v50, %v12661_v46  ;;  %v15425_v46 = vld [vmem:[#allocation41_spill] sm:$0xff] }
 0x892   :  { %v15426_v7 = vpack.c.bf16 %v15424_v26, %v15425_v46 }
 0x893   :  { %v3242_v34 = vpack.c.bf16 %v3234_v25, %v3233_v16 }
 0x895   :  { %9369 = vmatmul.mubr.bf16.gmra.mrb[52].mxu0 %v3242_v34 }
 0x896   :  { %9388 = vmatprep.mubr.bf16.mxu0 %v15414_v28 }
 0x89d   :  { %9389 = vmatmul.mubr.bf16.vlgmr.msra.gmra.mrb[56].mxu0 %v15417_v5 }
 0x89e   :  { %9392 = vmatprep.mubr.bf16.mxu0 %v15420_v11 }
 0x8a5   :  { %9393 = vmatmul.mubr.bf16.gmra.mrb[60].mxu0 %v15423_v41 }
 0x8a6   :  { %9396 = vmatprep.mubr.bf16.mxu0 %v15426_v7 }
 0x8ad   :  { %9397 = vmatmul.mubr.bf16.gmra.mrb[64].mxu0 %v15429_v12 }
 0x8ae   :  { %9400 = vmatprep.mubr.bf16.mxu0 %v15432_v48 }
 0x8b5   :  { %9401 = vmatmul.mubr.bf16.gmra.mrb[68].mxu0 %v15435_v42 }
 0x8c4   :  { %v12744_v0 = vpop.f32.mrb[24].mxu0 }
 0x8c5   :  { %v12746_v43 = vpop.f32.mrb[25].mxu0 }
 0x8c6   :  { %v12748_v10 = vpop.f32.mrb[26].mxu0 }
 0x8c7   :  { %v12752_v49 = vpop.f32.mrb[27].mxu0 }
 0x8d3   :  { %v12756_v22 = vpop.f32.mrb[28].mxu0 }
 0x8d4   :  { %v12758_v29 = vpop.f32.mrb[29].mxu0 }
 0x8d5   :  { %v12760_v4 = vpop.f32.mrb[30].mxu0 }
 0x8d6   :  { %v12764_v47 = vpop.f32.mrb[31].mxu0 }
 0x8db   :  { %v12768_v58 = vpop.f32.mrb[32].mxu0 }
 0x8dc   :  { %v12770_v24 = vpop.f32.mrb[33].mxu0 }
 0x8dd   :  { %v12772_v63 = vpop.f32.mrb[34].mxu0 }
 0x8de   :  { %v12776_v31 = vpop.f32.mrb[35].mxu0 }
 0x8e3   :  { %v12780_v23 = vpop.f32.mrb[36].mxu0 }
 0x8e4   :  { %v12782_v19 = vpop.f32.mrb[37].mxu0 }
 0x8e5   :  { %v12784_v50 = vpop.f32.mrb[38].mxu0 }
 0x8e6   :  { %v12788_v25 = vpop.f32.mrb[39].mxu0 }
 0x8ff   :  { %v12792_v13 = vpop.f32.mrb[40].mxu0 }
 0x900   :  { %v12794_v44 = vpop.f32.mrb[41].mxu0 }
 0x901   :  { %v12796_v28 = vpop.f32.mrb[42].mxu0 }
 0x902   :  { %v12800_v8 = vpop.f32.mrb[43].mxu0 }
 0x90b   :  { %v12804_v21 = vpop.f32.mrb[44].mxu0 }
 0x90c   :  { %v12806_v59 = vpop.f32.mrb[45].mxu0 }
 0x90d   :  { %v12808_v11 = vpop.f32.mrb[46].mxu0 }
 0x90e   :  { %v12812_v2 = vpop.f32.mrb[47].mxu0 }
 0x913   :  { %v12816_v26 = vpop.f32.mrb[48].mxu0 }
 0x914   :  { %v12818_v46 = vpop.f32.mrb[49].mxu0 }
 0x915   :  { %v12820_v7 = vpop.f32.mrb[50].mxu0 }
 0x916   :  { %v12824_v27 = vpop.f32.mrb[51].mxu0 }
 0x968   :  { %v12828_v37 = vpop.f32.mrb[52].mxu0 }
 0x969   :  { %v12830_v36 = vpop.f32.mrb[53].mxu0 }
 0x96a   :  { %v12832_v48 = vpop.f32.mrb[54].mxu0 }
 0x96b   :  { %v12836_v30 = vpop.f32.mrb[55].mxu0 }
 0x970   :  { %v9390_v51 = vpop.f32.mrb[56].mxu0 }
 0x971   :  { %v3390_v15 = vpop.f32.mrb[57].mxu0  ;;  %v3455_v12 = vmul.f32 0.088388346, %v9390_v51 }
 0x972   :  { %v3453_v41 = vmul.f32 0.088388346, %v3390_v15  ;;  %v9391_v39 = vpop.f32.mrb[58].mxu0 }
 0x973   :  { %v3393_v5 = vpop.f32.mrb[59].mxu0  ;;  %v3456_v52 = vmul.f32 0.088388346, %v9391_v39  ;;  %v12843_v32 = vadd.f32 %v3455_v12, %v15382_v1 }
 0x974   :  { %v3469_v16 = vadd.f32 %v3453_v41, %v15380_v17  ;;  %v3454_v34 = vmul.f32 0.088388346, %v3393_v5 }
 0x975   :  { %v12846_v42 = vadd.f32 %v3456_v52, %v15383_v14 }
 0x976   :  { %v3470_v54 = vadd.f32 %v3454_v34, %v15381_v60  ;;  %3485 = vmax.xlane.f32.xlu0 %v3469_v16 }
 0x978   :  { %3487 = vmax.xlane.f32.xlu1 %v3470_v54  ;;  %v9394_v61 = vpop.f32.mrb[60].mxu0 }
 0x979   :  { %v3406_v40 = vpop.f32.mrb[61].mxu0  ;;  %v3459_v17 = vmul.f32 0.088388346, %v9394_v61 }
 0x97a   :  { %v3457_v15 = vmul.f32 0.088388346, %v3406_v40  ;;  %3489 = vmax.xlane.f32.xlu0 %v12843_v32  ;;  %v9395_v51 = vpop.f32.mrb[62].mxu0 }
 0x97b   :  { %v3409_v3 = vpop.f32.mrb[63].mxu0  ;;  %v3460_v60 = vmul.f32 0.088388346, %v9395_v51  ;;  %v12853_v34 = vadd.f32 %v3459_v17, %v15386_v57 }
 0x97c   :  { %v3473_v39 = vadd.f32 %v3457_v15, %v15384_v6  ;;  %v3458_v5 = vmul.f32 0.088388346, %v3409_v3  ;;  %3491 = vmax.xlane.f32.xlu1 %v12846_v42 }
 0x97d   :  { %v12856_v52 = vadd.f32 %v3460_v60, %v15387_v53 }
 0x97e   :  { %v3474_v1 = vadd.f32 %v3458_v5, %v15385_v9  ;;  %3493 = vmax.xlane.f32.xlu0 %v3473_v39 }
 0x980   :  { %3495 = vmax.xlane.f32.xlu1 %v3474_v1  ;;  %v9398_v14 = vpop.f32.mrb[64].mxu0 }
 0x981   :  { %v3422_v40 = vpop.f32.mrb[65].mxu0  ;;  %v3463_v61 = vmul.f32 0.088388346, %v9398_v14 }
 0x982   :  { %v3461_v41 = vmul.f32 0.088388346, %v3422_v40  ;;  %3497 = vmax.xlane.f32.xlu0 %v12853_v34  ;;  %v9399_v6 = vpop.f32.mrb[66].mxu0 }
 0x983   :  { %v3425_v3 = vpop.f32.mrb[67].mxu0  ;;  %v3464_v57 = vmul.f32 0.088388346, %v9399_v6  ;;  %v12868_v53 = vadd.f32 %v3463_v61, %v15390_v33 }
 0x984   :  { %v12860_v12 = vadd.f32 %v3461_v41, %v15388_v45  ;;  %v3462_v9 = vmul.f32 0.088388346, %v3425_v3  ;;  %3499 = vmax.xlane.f32.xlu1 %v12856_v52 }
 0x985   :  { %v12872_v5 = vadd.f32 %v3464_v57, %v15391_v56 }
 0x986   :  { %v12864_v15 = vadd.f32 %v3462_v9, %v15389_v20  ;;  %3501 = vmax.xlane.f32.xlu0 %v12860_v12 }
 0x988   :  { %3503 = vmax.xlane.f32.xlu1 %v12864_v15  ;;  %v9402_v51 = vpop.f32.mrb[68].mxu0 }
 0x989   :  { %v3438_v17 = vpop.f32.mrb[69].mxu0  ;;  %v3467_v40 = vmul.f32 0.088388346, %v9402_v51 }
 0x98a   :  { %v3465_v45 = vmul.f32 0.088388346, %v3438_v17  ;;  %3505 = vmax.xlane.f32.xlu0 %v12868_v53  ;;  %v9403_v60 = vpop.f32.mrb[70].mxu0 }
 0x98b   :  { %v3441_v14 = vpop.f32.mrb[71].mxu0  ;;  %v3468_v33 = vmul.f32 0.088388346, %v9403_v60  ;;  %v12884_v56 = vadd.f32 %v3467_v40, %v15394_v18 }
 0x98c   :  { %v12876_v20 = vadd.f32 %v3465_v45, %v15392_v35  ;;  %v3466_v41 = vmul.f32 0.088388346, %v3441_v14  ;;  %3507 = vmax.xlane.f32.xlu1 %v12872_v5 }
 0x98d   :  { %v12888_v3 = vadd.f32 %v3468_v33, %v15395_v62 }
 0x98e   :  { %v12880_v6 = vadd.f32 %v3466_v41, %v15393_v55  ;;  %3509 = vmax.xlane.f32.xlu0 %v12876_v20 }
 0x990   :  { %3511 = vmax.xlane.f32.xlu1 %v12880_v6 }
 0x992   :  { %3513 = vmax.xlane.f32.xlu0 %v12884_v56 }
 0x994   :  { %3515 = vmax.xlane.f32.xlu1 %v12888_v3 }
 0xa03   :  { %v3486_v35 = vpop.xlane.xlu0 %3485 }
 0xa04   :  { %v3517_v61 = vsub.f32 %v3469_v16, %v3486_v35 }
 0xa05   :  { %v3488_v9 = vpop.xlane.xlu1 %3487 }
 0xa06   :  { %v3533_v57 = vmul.f32 1.442695, %v3517_v61  ;;  %v3518_v55 = vsub.f32 %v3470_v54, %v3488_v9 }
 0xa07   :  { %v3490_v51 = vpop.xlane.xlu0 %3489 }
 0xa08   :  { %10379 = vpow2.f32 %v3533_v57  ;;  %v3535_v17 = vmul.f32 1.442695, %v3518_v55  ;;  %v3519_v18 = vsub.f32 %v12843_v32, %v3490_v51 }
 0xa09   :  { %v3492_v45 = vpop.xlane.xlu1 %3491 }
 0xa0a   :  { %10381 = vpow2.f32 %v3535_v17  ;;  %v3537_v60 = vmul.f32 1.442695, %v3519_v18  ;;  %v3520_v62 = vsub.f32 %v12846_v42, %v3492_v45 }
 0xa0b   :  { %v3494_v14 = vpop.xlane.xlu0 %3493 }
 0xa0c   :  { %10383 = vpow2.f32 %v3537_v60  ;;  %v3539_v40 = vmul.f32 1.442695, %v3520_v62  ;;  %v3521_v41 = vsub.f32 %v3473_v39, %v3494_v14 }
 0xa0d   :  { %v3496_v33 = vpop.xlane.xlu1 %3495 }
 0xa0e   :  { %10385 = vpow2.f32 %v3539_v40  ;;  %v3541_v16 = vmul.f32 1.442695, %v3521_v41  ;;  %v3522_v35 = vsub.f32 %v3474_v1, %v3496_v33 }
 0xa0f   :  { %v3498_v61 = vpop.xlane.xlu0 %3497 }
 0xa10   :  { %10387 = vpow2.f32 %v3541_v16  ;;  %v3543_v54 = vmul.f32 1.442695, %v3522_v35  ;;  %v3523_v9 = vsub.f32 %v12853_v34, %v3498_v61 }
 0xa11   :  { %v3500_v57 = vpop.xlane.xlu1 %3499 }
 0xa12   :  { %v12895_v32 = vpop.eup %10379  ;;  %10389 = vpow2.f32 %v3543_v54  ;;  %v3545_v55 = vmul.f32 1.442695, %v3523_v9  ;;  %v3524_v42 = vsub.f32 %v12856_v52, %v3500_v57 }
 0xa13   :  { %v3502_v51 = vpop.xlane.xlu0 %3501  ;;  %3565 = vadd.xlane.f32.xlu0 %v12895_v32 }
 0xa14   :  { %v12899_v39 = vpop.eup %10381  ;;  %10391 = vpow2.f32 %v3545_v55  ;;  %v3547_v17 = vmul.f32 1.442695, %v3524_v42  ;;  %v3525_v1 = vsub.f32 %v12860_v12, %v3502_v51 }
 0xa15   :  { %v3504_v18 = vpop.xlane.xlu1 %3503  ;;  %3567 = vadd.xlane.f32.xlu1 %v12899_v39 }
 0xa16   :  { %v12903_v34 = vpop.eup %10383  ;;  %10393 = vpow2.f32 %v3547_v17  ;;  %v3549_v45 = vmul.f32 1.442695, %v3525_v1  ;;  %v3526_v60 = vsub.f32 %v12864_v15, %v3504_v18 }
 0xa17   :  { %v3506_v62 = vpop.xlane.xlu0 %3505  ;;  %3569 = vadd.xlane.f32.xlu0 %v12903_v34 }
 0xa18   :  { %v12907_v52 = vpop.eup %10385  ;;  %10395 = vpow2.f32 %v3549_v45  ;;  %v3551_v14 = vmul.f32 1.442695, %v3526_v60  ;;  %v3527_v40 = vsub.f32 %v12868_v53, %v3506_v62 }
 0xa19   :  { %v3508_v41 = vpop.xlane.xlu1 %3507  ;;  %3571 = vadd.xlane.f32.xlu1 %v12907_v52 }
 0xa1a   :  { %v12911_v12 = vpop.eup %10387  ;;  %10397 = vpow2.f32 %v3551_v14  ;;  %v3553_v33 = vmul.f32 1.442695, %v3527_v40  ;;  %v3528_v16 = vsub.f32 %v12872_v5, %v3508_v41 }
 0xa1b   :  { %3573 = vadd.xlane.f32.xlu0 %v12911_v12  ;;  %v3510_v15 = vpop.xlane.xlu0 %3509 }
 0xa1c   :  { %v12915_v35 = vpop.eup %10389  ;;  %10399 = vpow2.f32 %v3553_v33  ;;  %v3555_v61 = vmul.f32 1.442695, %v3528_v16  ;;  %v3529_v54 = vsub.f32 %v12876_v20, %v3510_v15  ;;  %v9885_v33 = vld [vmem:[#allocation8 + $0x4] ss:$8 sps:$4 sm:$0xff]  }
 0xa1d   :  { %3575 = vadd.xlane.f32.xlu1 %v12915_v35  ;;  %v3512_v53 = vpop.xlane.xlu1 %3511  ;;  %3974 = vmatprep.subr.bf16.mxu1 %v9885_v33 }
 0xa1e   :  { %v12919_v9 = vpop.eup %10391  ;;  %10401 = vpow2.f32 %v3555_v61  ;;  %v3557_v57 = vmul.f32 1.442695, %v3529_v54  ;;  %v3530_v55 = vsub.f32 %v12880_v6, %v3512_v53 }
 0xa1f   :  { %3577 = vadd.xlane.f32.xlu0 %v12919_v9  ;;  %v3514_v5 = vpop.xlane.xlu0 %3513 }
 0xa20   :  { %v12923_v42 = vpop.eup %10393  ;;  %10403 = vpow2.f32 %v3557_v57  ;;  %v3559_v51 = vmul.f32 1.442695, %v3530_v55  ;;  %v3531_v17 = vsub.f32 %v12884_v56, %v3514_v5 }
 0xa21   :  { %3579 = vadd.xlane.f32.xlu1 %v12923_v42  ;;  %v3516_v20 = vpop.xlane.xlu1 %3515 }
 0xa22   :  { %v12927_v1 = vpop.eup %10395  ;;  %10405 = vpow2.f32 %v3559_v51  ;;  %v3561_v18 = vmul.f32 1.442695, %v3531_v17  ;;  %v3532_v45 = vsub.f32 %v12888_v3, %v3516_v20 }
 0xa23   :  { %3581 = vadd.xlane.f32.xlu0 %v12927_v1 }
 0xa24   :  { %v12931_v6 = vpop.eup %10397  ;;  %10407 = vpow2.f32 %v3561_v18  ;;  %v3563_v60 = vmul.f32 1.442695, %v3532_v45 }
 0xa25   :  { %3583 = vadd.xlane.f32.xlu1 %v12931_v6 }
 0xa26   :  { %v12934_v62 = vpop.eup %10399  ;;  %10409 = vpow2.f32 %v3563_v60 }
 0xa27   :  { %3585 = vadd.xlane.f32.xlu0 %v12934_v62 }
 0xa28   :  { %v12937_v56 = vpop.eup %10401 }
 0xa29   :  { %3587 = vadd.xlane.f32.xlu1 %v12937_v56 }
 0xa2a   :  { %v12940_v14 = vpop.eup %10403 }
 0xa2b   :  { %3589 = vadd.xlane.f32.xlu0 %v12940_v14 }
 0xa2c   :  { %v12943_v3 = vpop.eup %10405 }
 0xa2d   :  { %3591 = vadd.xlane.f32.xlu1 %v12943_v3 }
 0xa2e   :  { %v12946_v40 = vpop.eup %10407 }
 0xa2f   :  { %3593 = vadd.xlane.f32.xlu0 %v12946_v40 }
 0xa30   :  { %v12949_v41 = vpop.eup %10409 }
 0xa31   :  { %3595 = vadd.xlane.f32.xlu1 %v12949_v41 }
 0xaa0   :  { %v3566_v16 = vpop.xlane.xlu0 %3565 }
 0xaa1   :  { %10411 = vrcp.f32 %v3566_v16 }
 0xaa2   :  { %v3568_v15 = vpop.xlane.xlu1 %3567 }
 0xaa3   :  { %10413 = vrcp.f32 %v3568_v15 }
 0xaa4   :  { %v3570_v61 = vpop.xlane.xlu0 %3569 }
 0xaa5   :  { %10415 = vrcp.f32 %v3570_v61 }
 0xaa6   :  { %v3572_v54 = vpop.xlane.xlu1 %3571 }
 0xaa7   :  { %10417 = vrcp.f32 %v3572_v54 }
 0xaa8   :  { %v3574_v53 = vpop.xlane.xlu0 %3573 }
 0xaa9   :  { %10419 = vrcp.f32 %v3574_v53 }
 0xaaa   :  { %v3576_v57 = vpop.xlane.xlu1 %3575 }
 0xaab   :  { %v10412_v55 = vpop.eup %10411  ;;  %10421 = vrcp.f32 %v3576_v57  ;;  %v9883_v57 = vld [vmem:[#allocation8] ss:$8 sps:$4 sm:$0xff]  }
 0xaac   :  { %v3578_v5 = vpop.xlane.xlu0 %3577  ;;  %v3613_v20 = vmul.f32 %v10412_v55, %v12895_v32  ;;  %v9888_v32 = vld [vmem:[#allocation8 + $0x14] ss:$8 sps:$4 sm:$0xff]  }
 0xaad   :  { %v10414_v51 = vpop.eup %10413  ;;  %10423 = vrcp.f32 %v3578_v5 }
 0xaae   :  { %v3580_v17 = vpop.xlane.xlu1 %3579  ;;  %v3614_v18 = vmul.f32 %v10414_v51, %v12899_v39 }
 0xaaf   :  { %v10416_v45 = vpop.eup %10415  ;;  %10425 = vrcp.f32 %v3580_v17 }
 0xab0   :  { %v3582_v60 = vpop.xlane.xlu0 %3581  ;;  %v3629_v33 = vpack.c.bf16 %v3614_v18, %v3613_v20  ;;  %v3615_v15 = vmul.f32 %v10416_v45, %v12903_v34  ;;  %v9886_v34 = vld [vmem:[#allocation8 + $0x10] ss:$8 sps:$4 sm:$0xff]   ;;  %v9891_v45 = vld [vmem:[#allocation8 + $0x24] ss:$8 sps:$4 sm:$0xff]  }
 0xab1   :  { %v10418_v16 = vpop.eup %10417  ;;  %10427 = vrcp.f32 %v3582_v60 }
 0xab2   :  { %v3616_v61 = vmul.f32 %v10418_v16, %v12907_v52  ;;  %9420 = vmatprep.mubr.bf16.mxu1 %v3629_v33  ;;  %v3584_v54 = vpop.xlane.xlu1 %3583 }
 0xab3   :  { %v10420_v53 = vpop.eup %10419  ;;  %10429 = vrcp.f32 %v3584_v54  ;;  %v9894_v54 = vld [vmem:[#allocation8 + $0x34] ss:$8 sps:$4 sm:$0xff]  }
 0xab4   :  { %v3586_v5 = vpop.xlane.xlu0 %3585  ;;  %v3630_v38 = vpack.c.bf16 %v3616_v61, %v3615_v15  ;;  %v3617_v51 = vmul.f32 %v10420_v53, %v12911_v12  ;;  %v9889_v12 = vld [vmem:[#allocation8 + $0x20] ss:$8 sps:$4 sm:$0xff]  }
 0xab5   :  { %v10422_v55 = vpop.eup %10421  ;;  %10431 = vrcp.f32 %v3586_v5 }
 0xab6   :  { %v3588_v39 = vpop.xlane.xlu1 %3587  ;;  %9421 = vmatmul.mubr.bf16.vlgmr.msra.gmra.mrb[232].mxu1 %v3630_v38  ;;  %v3618_v17 = vmul.f32 %v10422_v55, %v12915_v35 }
 0xab7   :  { %v10424_v20 = vpop.eup %10423  ;;  %10433 = vrcp.f32 %v3588_v39  ;;  %3975 = vmatpush1.bf16.msra.mxu1 %v9883_v57  ;;  %v9897_v39 = vld [vmem:[#allocation8 + $0x44] ss:$8 sps:$4 sm:$0xff]  }
 0xab8   :  { %v3590_v52 = vpop.xlane.xlu0 %3589  ;;  %3976 = vmatprep.subr.bf16.mxu1 %v9888_v32  ;;  %v3631_v18 = vpack.c.bf16 %v3618_v17, %v3617_v51  ;;  %v3619_v16 = vmul.f32 %v10424_v20, %v12919_v9  ;;  %v9892_v9 = vld [vmem:[#allocation8 + $0x30] ss:$8 sps:$4 sm:$0xff]  }
 0xab9   :  { %v10426_v60 = vpop.eup %10425  ;;  %10435 = vrcp.f32 %v3590_v52  ;;  %v9895_v52 = vld [vmem:[#allocation8 + $0x40] ss:$8 sps:$4 sm:$0xff]  }
 0xaba   :  { %v3592_v33 = vpop.xlane.xlu1 %3591  ;;  %9424 = vmatprep.mubr.bf16.mxu1 %v3631_v18  ;;  %v3620_v38 = vmul.f32 %v10426_v60, %v12923_v42  ;;  %v9900_v18 = vld [vmem:[#allocation8 + $0x54] ss:$8 sps:$4 sm:$0xff]  }
 0xabb   :  { %v10428_v15 = vpop.eup %10427  ;;  %10437 = vrcp.f32 %v3592_v33  ;;  %3977 = vmatpush1.bf16.msra.mxu1 %v9886_v34 }
 0xabc   :  { %v3594_v35 = vpop.xlane.xlu0 %3593  ;;  %3978 = vmatprep.subr.bf16.mxu1 %v9891_v45  ;;  %v3632_v61 = vpack.c.bf16 %v3620_v38, %v3619_v16  ;;  %v3621_v5 = vmul.f32 %v10428_v15, %v12927_v1  ;;  %v9898_v16 = vld [vmem:[#allocation8 + $0x50] ss:$8 sps:$4 sm:$0xff]  }
 0xabd   :  { %v10430_v53 = vpop.eup %10429  ;;  %10439 = vrcp.f32 %v3594_v35  ;;  %v9901_v35 = vld [vmem:[#allocation8 + $0x60] ss:$8 sps:$4 sm:$0xff]  }
 0xabe   :  { %v3596_v57 = vpop.xlane.xlu1 %3595  ;;  %9425 = vmatmul.mubr.bf16.gmra.mrb[236].mxu1 %v3632_v61  ;;  %v3622_v32 = vmul.f32 %v10430_v53, %v12931_v6  ;;  %v9909_v53 = vld [vmem:[#allocation8 + $0x84] ss:$8 sps:$4 sm:$0xff]  }
 0xabf   :  { %v10432_v55 = vpop.eup %10431  ;;  %10441 = vrcp.f32 %v3596_v57  ;;  %3979 = vmatpush1.bf16.msra.mxu1 %v9889_v12  ;;  %v9907_v57 = vld [vmem:[#allocation8 + $0x80] ss:$8 sps:$4 sm:$0xff]  }
 0xac0   :  { %3980 = vmatprep.subr.bf16.mxu1 %v9894_v54  ;;  %v3633_v42 = vpack.c.bf16 %v3622_v32, %v3621_v5  ;;  %v3623_v17 = vmul.f32 %v10432_v55, %v12934_v62  ;;  %v9903_v62 = vld [vmem:[#allocation8 + $0x64] ss:$8 sps:$4 sm:$0xff]   ;;  %v9906_v54 = vld [vmem:[#allocation8 + $0x74] ss:$8 sps:$4 sm:$0xff]   ;;  %v9913_v32 = vld [vmem:[#allocation8 + $0xa0] ss:$8 sps:$4 sm:$0xff]  }
 0xac1   :  { %v10434_v51 = vpop.eup %10433  ;;  %v9915_v5 = vld [vmem:[#allocation8 + $0xa4] ss:$8 sps:$4 sm:$0xff]   ;;  %v9918_v55 = vld [vmem:[#allocation8 + $0xb4] ss:$8 sps:$4 sm:$0xff]  }
 0xac2   :  { %9428 = vmatprep.mubr.bf16.mxu1 %v3633_v42  ;;  %v3624_v20 = vmul.f32 %v10434_v51, %v12937_v56  ;;  %v9924_v42 = vld [vmem:[#allocation8 + $0xd4] ss:$8 sps:$4 sm:$0xff]   ;;  %v9927_v51 = vld [vmem:[#allocation8 + $0xe4] ss:$8 sps:$4 sm:$0xff]  }
 0xac3   :  { %v10436_v34 = vpop.eup %10435  ;;  %3981 = vmatpush1.bf16.msra.mxu1 %v9892_v9  ;;  %v9916_v9 = vld [vmem:[#allocation8 + $0xb0] ss:$8 sps:$4 sm:$0xff]  }
 0xac4   :  { %3982 = vmatprep.subr.bf16.mxu1 %v9897_v39  ;;  %v3634_v1 = vpack.c.bf16 %v3624_v20, %v3623_v17  ;;  %v3625_v45 = vmul.f32 %v10436_v34, %v12940_v14  ;;  %v15436_v14 = vpack.c.bf16 %v12752_v49, %v12746_v43  ;;  %v9921_v43 = vld [vmem:[#allocation8 + $0xc4] ss:$8 sps:$4 sm:$0xff]   ;;  %v9919_v49 = vld [vmem:[#allocation8 + $0xc0] ss:$8 sps:$4 sm:$0xff]   ;;  %v9922_v39 = vld [vmem:[#allocation8 + $0xd0] ss:$8 sps:$4 sm:$0xff]  }
 0xac5   :  { %v10438_v6 = vpop.eup %10437  ;;  %v9925_v17 = vld [vmem:[#allocation8 + $0xe0] ss:$8 sps:$4 sm:$0xff]   ;;  %v9930_v20 = vld [vmem:[#allocation8 + $0xf4] ss:$8 sps:$4 sm:$0xff]   ;;  %v9928_v34 = vld [vmem:[#allocation8 + $0xf0] ss:$8 sps:$4 sm:$0xff]  }
 0xac6   :  { %9429 = vmatmul.mubr.bf16.gmra.mrb[240].mxu1 %v3634_v1  ;;  %v3626_v60 = vmul.f32 %v10438_v6, %v12943_v3  ;;  %v9904_v3 = vld [vmem:[#allocation8 + $0x70] ss:$8 sps:$4 sm:$0xff]   ;;  %v15440_v6 = vpack.c.bf16 %v12748_v10, %v12744_v0  ;;  %v15452_v10 = vpack.c.bf16 %v12776_v31, %v12770_v24  ;;  %v15464_v31 = vpack.c.bf16 %v12784_v50, %v12780_v23 }
 0xac7   :  { %v10440_v33 = vpop.eup %10439  ;;  %3983 = vmatpush1.bf16.msra.mxu1 %v9895_v52  ;;  %v15437_v52 = vld [vmem:[#allocation25_spill] sm:$0xff]  ;;  %v15438_v1 = vld [vmem:[#allocation23_spill] sm:$0xff] }
 0xac8   :  { %3984 = vmatprep.subr.bf16.mxu1 %v9900_v18  ;;  %v3635_v38 = vpack.c.bf16 %v3626_v60, %v3625_v45  ;;  %v3627_v56 = vmul.f32 %v10440_v33, %v12946_v40  ;;  %v9912_v40 = vld [vmem:[#allocation8 + $0x94] ss:$8 sps:$4 sm:$0xff]   ;;  %v15439_v18 = vpack.c.bf16 %v15437_v52, %v15438_v1  ;;  %v15442_v60 = vld [vmem:[#allocation21_spill] sm:$0xff] }
 0xac9   :  { %v10442_v15 = vpop.eup %10441  ;;  %v15441_v45 = vld [vmem:[#allocation20_spill] sm:$0xff] }
 0xaca   :  { %9432 = vmatprep.mubr.bf16.mxu1 %v3635_v38  ;;  %v3628_v12 = vmul.f32 %v10442_v15, %v12949_v41  ;;  %v9910_v41 = vld [vmem:[#allocation8 + $0x90] ss:$8 sps:$4 sm:$0xff]   ;;  %v15443_v33 = vpack.c.bf16 %v15441_v45, %v15442_v60 }
 0xacb   :  { %3985 = vmatpush1.bf16.msra.mxu1 %v9898_v16  ;;  %v15444_v16 = vpack.c.bf16 %v12764_v47, %v12758_v29  ;;  %v15445_v38 = vld [vmem:[#allocation63_spill] sm:$0xff]  ;;  %v15456_v47 = vpack.c.bf16 %v12772_v63, %v12768_v58 }
 0xacc   :  { %3986 = vmatprep.subr.bf16.mxu1 %v9903_v62  ;;  %v3636_v61 = vpack.c.bf16 %v3628_v12, %v3627_v56  ;;  %v15446_v62 = vld [vmem:[#allocation26_spill] sm:$0xff]  ;;  %v15448_v56 = vpack.c.bf16 %v12760_v4, %v12756_v22  ;;  %v15449_v12 = vld [vmem:[#allocation24_spill] sm:$0xff]  ;;  %v15460_v4 = vpack.c.bf16 %v12788_v25, %v12782_v19  ;;  %v15468_v19 = vpack.c.bf16 %v12800_v8, %v12794_v44 }
 0xacd   :  { %v15447_v15 = vpack.c.bf16 %v15445_v38, %v15446_v62  ;;  %v15470_v44 = vpack.c.bf16 %v12812_v2, %v12806_v59  ;;  %v15473_v59 = vpack.c.bf16 %v12820_v7, %v12816_v26  ;;  %v15474_v2 = vpack.c.bf16 %v12836_v30, %v12830_v36  ;;  %v15477_v26 = vld [vmem:[#allocation36_spill] sm:$0xff]  ;;  %v10563_v62 = vld [vmem:[#allocation3] sm:$0xff]  ;;  %v10564_v30 = vld [vmem:[#allocation3 + $0x8] sm:$0xff] }
 0xace   :  { %9433 = vmatmul.mubr.bf16.gmra.mrb[244].mxu1 %v3636_v61  ;;  %v15453_v61 = vld [vmem:[#allocation19_spill] sm:$0xff] }
 0xacf   :  { %3987 = vmatpush1.bf16.msra.mxu1 %v9901_v35  ;;  %4006 = vmatprep.mubr.bf16.mxu1 %v15436_v14  ;;  %v15450_v35 = vld [vmem:[#allocation22_spill] sm:$0xff]  ;;  %v15457_v14 = vld [vmem:[#allocation32_spill] sm:$0xff] }
 0xad0   :  { %3988 = vmatprep.subr.bf16.mxu1 %v9906_v54  ;;  %v15451_v0 = vpack.c.bf16 %v15449_v12, %v15450_v35  ;;  %v15454_v54 = vld [vmem:[#allocation38_spill] sm:$0xff] }
 0xad1   :  { %v15455_v29 = vpack.c.bf16 %v15453_v61, %v15454_v54 }
 0xad3   :  { %3989 = vmatpush1.bf16.msra.mxu1 %v9904_v3  ;;  %v15458_v3 = vld [vmem:[#allocation65_spill] sm:$0xff] }
 0xad4   :  { %3990 = vmatprep.subr.bf16.mxu1 %v9909_v53  ;;  %v15459_v22 = vpack.c.bf16 %v15457_v14, %v15458_v3  ;;  %v15461_v53 = vld [vmem:[#allocation43_spill] sm:$0xff] }
 0xad7   :  { %3991 = vmatpush1.bf16.msra.mxu1 %v9907_v57  ;;  %v15462_v57 = vld [vmem:[#allocation67_spill] sm:$0xff] }
 0xad8   :  { %3992 = vmatprep.subr.bf16.mxu1 %v9912_v40  ;;  %v15463_v24 = vpack.c.bf16 %v15461_v53, %v15462_v57  ;;  %v15465_v40 = vld [vmem:[#allocation69_spill] sm:$0xff] }
 0xadb   :  { %3993 = vmatpush1.bf16.msra.mxu1 %v9910_v41  ;;  %v15466_v41 = vld [vmem:[#allocation40_spill] sm:$0xff] }
 0xadc   :  { %3994 = vmatprep.subr.bf16.mxu1 %v9915_v5  ;;  %v15467_v58 = vpack.c.bf16 %v15465_v40, %v15466_v41 }
 0xadf   :  { %3995 = vmatpush1.bf16.msra.mxu1 %v9913_v32 }
 0xae0   :  { %3996 = vmatprep.subr.bf16.mxu1 %v9918_v55 }
 0xae3   :  { %3997 = vmatpush1.bf16.msra.mxu1 %v9916_v9 }
 0xae4   :  { %3998 = vmatprep.subr.bf16.mxu1 %v9921_v43 }
 0xae7   :  { %3999 = vmatpush1.bf16.msra.mxu1 %v9919_v49 }
 0xae8   :  { %4000 = vmatprep.subr.bf16.mxu1 %v9924_v42 }
 0xaeb   :  { %4001 = vmatpush1.bf16.msra.mxu1 %v9922_v39 }
 0xaec   :  { %4002 = vmatprep.subr.bf16.mxu1 %v9927_v51  ;;  %v15469_v51 = vpack.c.bf16 %v12796_v28, %v12792_v13  ;;  %v15471_v13 = vpack.c.bf16 %v12808_v11, %v12804_v21  ;;  %v15472_v28 = vpack.c.bf16 %v12824_v27, %v12818_v46  ;;  %v4231_v21 = vld [vmem:[%s14918_s5] sm:$0x3]  ;;  %v15475_v11 = vld [vmem:[#allocation39_spill] sm:$0xff]  ;;  %v15476_v46 = vpack.c.bf16 %v12832_v48, %v12828_v37  ;;  %v10566_v37 = vld [vmem:[#allocation3 + $0x18] sm:$0xff] }
 0xaed   :  { %v13041_v38 = vrot.slane %v4231_v21, %v15475_v11  ;;  %v13047_v7 = vrot.slane %v4231_v21, %v15477_v26  ;;  %v10576_v21 = vld [vmem:[#allocation3 + $0x68] sm:$0xff] }
 0xaee   :  { %v5060_v26 = vld [vmem:[#allocation9 + $0x1c8] sm:$0xff] }
 0xaef   :  { %4003 = vmatpush1.bf16.msra.mxu1 %v9925_v17 }
 0xaf0   :  { %4004 = vmatprep.subr.bf16.mxu1 %v9930_v20 }
 0xaf3   :  { %4005 = vmatpush1.bf16.msra.mxu1 %v9928_v34 }
 0xaf6   :  { %4007 = vmatmul.mubr.bf16.vlgmr.msra.gmra.mrb[248].mxu1 %v15439_v18 }
 0xaf7   :  { %4016 = vmatprep.mubr.bf16.mxu1 %v15440_v6 }
 0xafe   :  { %4017 = vmatmul.mubr.bf16.gmra.mrb[252].mxu1 %v15443_v33 }
 0xaff   :  { %4026 = vmatprep.mubr.bf16.mxu1 %v15444_v16 }
 0xb06   :  { %4027 = vmatmul.mubr.bf16.gmra.mrb[0].mxu1 %v15447_v15 }
 0xb07   :  { %4036 = vmatprep.mubr.bf16.mxu1 %v15448_v56 }
 0xb0e   :  { %4037 = vmatmul.mubr.bf16.gmra.mrb[4].mxu1 %v15451_v0  ;;  %v10565_v0 = vld [vmem:[#allocation3 + $0x10] sm:$0xff] }
 0xb0f   :  { %4046 = vmatprep.mubr.bf16.mxu1 %v15452_v10 }
 0xb16   :  { %4047 = vmatmul.mubr.bf16.gmra.mrb[8].mxu1 %v15455_v29 }
 0xb17   :  { %4056 = vmatprep.mubr.bf16.mxu1 %v15456_v47 }
 0xb1e   :  { %4057 = vmatmul.mubr.bf16.gmra.mrb[12].mxu1 %v15459_v22 }
 0xb1f   :  { %4066 = vmatprep.mubr.bf16.mxu1 %v15460_v4  ;;  %v10567_v4 = vld [vmem:[#allocation3 + $0x20] sm:$0xff] }
 0xb26   :  { %4067 = vmatmul.mubr.bf16.gmra.mrb[16].mxu1 %v15463_v24  ;;  %v10568_v24 = vld [vmem:[#allocation3 + $0x28] sm:$0xff] }
 0xb27   :  { %4076 = vmatprep.mubr.bf16.mxu1 %v15464_v31 }
 0xb2e   :  { %4077 = vmatmul.mubr.bf16.gmra.mrb[20].mxu1 %v15467_v58  ;;  %v10569_v58 = vld [vmem:[#allocation3 + $0x30] sm:$0xff] }
 0xb89   :  { %v9422_v63 = vpop.f32.mrb[232].mxu1 }
 0xb8a   :  { %v3671_v5 = vpop.f32.mrb[233].mxu1 }
 0xb8b   :  { %v9423_v32 = vpop.f32.mrb[234].mxu1 }
 0xb8c   :  { %v3735_v55 = vpack.c.bf16 %v9423_v32, %v9422_v63  ;;  %v3674_v9 = vpop.f32.mrb[235].mxu1 }
 0xb8d   :  { %v3734_v43 = vpack.c.bf16 %v3674_v9, %v3671_v5 }
 0xb8f   :  { %4086 = vmatprep.mubr.bf16.mxu1 %v3734_v43 }
 0xb90   :  { %4087 = vmatmul.mubr.bf16.gmra.mrb[24].mxu1 %v15468_v19 }
 0xb91   :  { %v9426_v25 = vpop.f32.mrb[236].mxu1  ;;  %4096 = vmatprep.mubr.bf16.mxu1 %v3735_v55  ;;  %v10570_v55 = vld [vmem:[#allocation3 + $0x38] sm:$0xff] }
 0xb92   :  { %v3687_v49 = vpop.f32.mrb[237].mxu1 }
 0xb93   :  { %v9427_v23 = vpop.f32.mrb[238].mxu1 }
 0xb94   :  { %v3737_v50 = vpack.c.bf16 %v9427_v23, %v9426_v25  ;;  %v3690_v42 = vpop.f32.mrb[239].mxu1 }
 0xb95   :  { %v3736_v39 = vpack.c.bf16 %v3690_v42, %v3687_v49 }
 0xb98   :  { %4097 = vmatmul.mubr.bf16.gmra.mrb[28].mxu1 %v15469_v51  ;;  %v10572_v51 = vld [vmem:[#allocation3 + $0x48] sm:$0xff] }
 0xb99   :  { %v9430_v17 = vpop.f32.mrb[240].mxu1  ;;  %4106 = vmatprep.mubr.bf16.mxu1 %v3736_v39 }
 0xb9a   :  { %v3703_v20 = vpop.f32.mrb[241].mxu1 }
 0xb9b   :  { %v9431_v34 = vpop.f32.mrb[242].mxu1 }
 0xb9c   :  { %v3739_v52 = vpack.c.bf16 %v9431_v34, %v9430_v17  ;;  %v3706_v1 = vpop.f32.mrb[243].mxu1 }
 0xb9d   :  { %v3738_v18 = vpack.c.bf16 %v3706_v1, %v3703_v20 }
 0xba0   :  { %4107 = vmatmul.mubr.bf16.gmra.mrb[32].mxu1 %v15470_v44 }
 0xba1   :  { %v9434_v8 = vpop.f32.mrb[244].mxu1  ;;  %4116 = vmatprep.mubr.bf16.mxu1 %v3737_v50  ;;  %v10571_v50 = vld [vmem:[#allocation3 + $0x40] sm:$0xff] }
 0xba2   :  { %v3719_v6 = vpop.f32.mrb[245].mxu1 }
 0xba3   :  { %v9435_v45 = vpop.f32.mrb[246].mxu1 }
 0xba4   :  { %v3741_v60 = vpack.c.bf16 %v9435_v45, %v9434_v8  ;;  %v3722_v33 = vpop.f32.mrb[247].mxu1  ;;  %v10574_v8 = vld [vmem:[#allocation3 + $0x58] sm:$0xff] }
 0xba5   :  { %v3740_v16 = vpack.c.bf16 %v3722_v33, %v3719_v6 }
 0xba8   :  { %4117 = vmatmul.mubr.bf16.gmra.mrb[36].mxu1 %v15471_v13 }
 0xba9   :  { %4126 = vmatprep.mubr.bf16.mxu1 %v3738_v18 }
 0xbb0   :  { %4127 = vmatmul.mubr.bf16.gmra.mrb[40].mxu1 %v15472_v28  ;;  %v10575_v28 = vld [vmem:[#allocation3 + $0x60] sm:$0xff] }
 0xbb1   :  { %4136 = vmatprep.mubr.bf16.mxu1 %v3739_v52  ;;  %v10573_v52 = vld [vmem:[#allocation3 + $0x50] sm:$0xff] }
 0xbb8   :  { %4137 = vmatmul.mubr.bf16.gmra.mrb[44].mxu1 %v15473_v59 }
 0xbb9   :  { %4146 = vmatprep.mubr.bf16.mxu1 %v3740_v16 }
 0xbc0   :  { %4147 = vmatmul.mubr.bf16.gmra.mrb[48].mxu1 %v15474_v2 }
 0xbc1   :  { %4156 = vmatprep.mubr.bf16.mxu1 %v3741_v60 }
 0xbc8   :  { %4157 = vmatmul.mubr.bf16.gmra.mrb[52].mxu1 %v15476_v46 }
 0xbc9   :  { %v4008_v27 = vpop.f32.mrb[248].mxu1 }
 0xbca   :  { %v4167_v15 = vadd.f32 %v10563_v62, %v4008_v27  ;;  %v4010_v36 = vpop.f32.mrb[249].mxu1 }
 0xbcb   :  { %v4168_v56 = vadd.f32 %v10564_v30, %v4010_v36  ;;  %v4012_v12 = vpop.f32.mrb[250].mxu1 }
 0xbcc   :  { %v13050_v35 = vadd.f32 %v13041_v38, %v4167_v15  ;;  %v4169_v10 = vadd.f32 %v10565_v0, %v4012_v12  ;;  %v4014_v61 = vpop.f32.mrb[251].mxu1  ;;  %v10577_v15 = vld [vmem:[#allocation3 + $0x70] sm:$0xff]  ;;  %v10578_v12 = vld [vmem:[#allocation3 + $0x78] sm:$0xff] }
 0xbcd   :  { %v13053_v54 = vadd.f32 %v13047_v7, %v4168_v56  ;;  %v4170_v48 = vadd.f32 %v10566_v37, %v4014_v61 }
 0xbce   :  { %15478 = vst [vmem:[#allocation18_spill] sm:$0xff] %v13050_v35  ;;  %v13056_v29 = vadd.f32 %v13041_v38, %v4169_v10 }
 0xbcf   :  { %15479 = vst [vmem:[#allocation47_spill] sm:$0xff] %v13053_v54  ;;  %v13059_v47 = vadd.f32 %v13047_v7, %v4170_v48  ;;  %v4307_v14 = vadd.f32 %v13053_v54, %v13050_v35 }
 0xbd0   :  { %15480 = vst [vmem:[#allocation45_spill] sm:$0xff] %v13056_v29 }
 0xbd1   :  { %15481 = vst [vmem:[#allocation71_spill] sm:$0xff] %v13059_v47  ;;  %4308 = vadd.xlane.f32.xlu0 %v4307_v14  ;;  %v4018_v3 = vpop.f32.mrb[252].mxu1  ;;  %v4310_v22 = vadd.f32 %v13059_v47, %v13056_v29 }
 0xbd2   :  { %v4171_v53 = vadd.f32 %v10567_v4, %v4018_v3  ;;  %v4020_v57 = vpop.f32.mrb[253].mxu1  ;;  %v10579_v3 = vld [vmem:[#allocation3 + $0x80] sm:$0xff] }
 0xbd3   :  { %v4172_v31 = vadd.f32 %v10568_v24, %v4020_v57  ;;  %4311 = vadd.xlane.f32.xlu1 %v4310_v22  ;;  %v4022_v40 = vpop.f32.mrb[254].mxu1 }
 0xbd4   :  { %v13066_v41 = vadd.f32 %v13041_v38, %v4171_v53  ;;  %v4173_v63 = vadd.f32 %v10569_v58, %v4022_v40  ;;  %v4024_v5 = vpop.f32.mrb[255].mxu1  ;;  %v10580_v53 = vld [vmem:[#allocation3 + $0x88] sm:$0xff]  ;;  %v10581_v40 = vld [vmem:[#allocation3 + $0x90] sm:$0xff] }
 0xbd5   :  { %v13069_v32 = vadd.f32 %v13047_v7, %v4172_v31  ;;  %v4174_v9 = vadd.f32 %v10570_v55, %v4024_v5  ;;  %v10582_v55 = vld [vmem:[#allocation3 + $0x98] sm:$0xff] }
 0xbd6   :  { %15482 = vst [vmem:[#allocation73_spill] sm:$0xff] %v13066_v41  ;;  %v13072_v43 = vadd.f32 %v13041_v38, %v4173_v63 }
 0xbd7   :  { %15483 = vst [vmem:[#allocation51_spill] sm:$0xff] %v13069_v32  ;;  %v13075_v19 = vadd.f32 %v13047_v7, %v4174_v9  ;;  %v4313_v25 = vadd.f32 %v13069_v32, %v13066_v41 }
 0xbd8   :  { %15484 = vst [vmem:[#allocation49_spill] sm:$0xff] %v13072_v43 }
 0xbd9   :  { %15485 = vst [vmem:[#allocation75_spill] sm:$0xff] %v13075_v19  ;;  %4314 = vadd.xlane.f32.xlu0 %v4313_v25  ;;  %v4028_v49 = vpop.f32.mrb[0].mxu1  ;;  %v4316_v23 = vadd.f32 %v13075_v19, %v13072_v43 }
 0xbda   :  { %v4175_v42 = vadd.f32 %v10571_v50, %v4028_v49  ;;  %v4030_v39 = vpop.f32.mrb[1].mxu1 }
 0xbdb   :  { %v4176_v17 = vadd.f32 %v10572_v51, %v4030_v39  ;;  %4317 = vadd.xlane.f32.xlu1 %v4316_v23  ;;  %v4032_v20 = vpop.f32.mrb[2].mxu1  ;;  %v10583_v39 = vld [vmem:[#allocation3 + $0xa0] sm:$0xff] }
 0xbdc   :  { %v13082_v34 = vadd.f32 %v13041_v38, %v4175_v42  ;;  %v4177_v1 = vadd.f32 %v10573_v52, %v4032_v20  ;;  %v4034_v18 = vpop.f32.mrb[3].mxu1  ;;  %v10584_v20 = vld [vmem:[#allocation3 + $0xa8] sm:$0xff] }
 0xbdd   :  { %v13085_v44 = vadd.f32 %v13047_v7, %v4176_v17  ;;  %v4178_v6 = vadd.f32 %v10574_v8, %v4034_v18  ;;  %v10585_v8 = vld [vmem:[#allocation3 + $0xb0] sm:$0xff] }
 0xbde   :  { %15486 = vst [vmem:[#allocation76_spill] sm:$0xff] %v13082_v34  ;;  %v13088_v45 = vadd.f32 %v13041_v38, %v4177_v1 }
 0xbdf   :  { %15487 = vst [vmem:[#allocation77_spill] sm:$0xff] %v13085_v44  ;;  %v13091_v60 = vadd.f32 %v13047_v7, %v4178_v6  ;;  %v4319_v33 = vadd.f32 %v13085_v44, %v13082_v34 }
 0xbe0   :  { %15488 = vst [vmem:[#allocation78_spill] sm:$0xff] %v13088_v45 }
 0xbe1   :  { %15489 = vst [vmem:[#allocation79_spill] sm:$0xff] %v13091_v60  ;;  %4320 = vadd.xlane.f32.xlu0 %v4319_v33  ;;  %v4038_v16 = vpop.f32.mrb[4].mxu1  ;;  %v4322_v13 = vadd.f32 %v13091_v60, %v13088_v45 }
 0xbe2   :  { %v4179_v59 = vadd.f32 %v10575_v28, %v4038_v16  ;;  %v4040_v2 = vpop.f32.mrb[5].mxu1 }
 0xbe3   :  { %v4180_v46 = vadd.f32 %v10576_v21, %v4040_v2  ;;  %4323 = vadd.xlane.f32.xlu1 %v4322_v13  ;;  %v4042_v27 = vpop.f32.mrb[6].mxu1  ;;  %v10586_v13 = vld [vmem:[#allocation3 + $0xb8] sm:$0xff] }
 0xbe4   :  { %v13098_v62 = vadd.f32 %v13041_v38, %v4179_v59  ;;  %v4181_v36 = vadd.f32 %v10577_v15, %v4042_v27  ;;  %v4044_v30 = vpop.f32.mrb[7].mxu1  ;;  %v10587_v15 = vld [vmem:[#allocation3 + $0xc0] sm:$0xff] }
 0xbe5   :  { %v13101_v56 = vadd.f32 %v13047_v7, %v4180_v46  ;;  %v4182_v0 = vadd.f32 %v10578_v12, %v4044_v30  ;;  %v10588_v12 = vld [vmem:[#allocation3 + $0xc8] sm:$0xff] }
 0xbe6   :  { %15490 = vst [vmem:[#allocation80_spill] sm:$0xff] %v13098_v62  ;;  %v13104_v10 = vadd.f32 %v13041_v38, %v4181_v36 }
 0xbe7   :  { %15491 = vst [vmem:[#allocation81_spill] sm:$0xff] %v13101_v56  ;;  %v13107_v61 = vadd.f32 %v13047_v7, %v4182_v0  ;;  %v4325_v37 = vadd.f32 %v13101_v56, %v13098_v62 }
 0xbe8   :  { %15492 = vst [vmem:[#allocation82_spill] sm:$0xff] %v13104_v10 }
 0xbe9   :  { %15493 = vst [vmem:[#allocation83_spill] sm:$0xff] %v13107_v61  ;;  %4326 = vadd.xlane.f32.xlu0 %v4325_v37  ;;  %v4048_v48 = vpop.f32.mrb[8].mxu1  ;;  %v4328_v14 = vadd.f32 %v13107_v61, %v13104_v10 }
 0xbea   :  { %v4183_v22 = vadd.f32 %v10579_v3, %v4048_v48  ;;  %v4050_v4 = vpop.f32.mrb[9].mxu1 }
 0xbeb   :  { %v4184_v57 = vadd.f32 %v10580_v53, %v4050_v4  ;;  %4329 = vadd.xlane.f32.xlu1 %v4328_v14  ;;  %v4052_v24 = vpop.f32.mrb[10].mxu1  ;;  %v10589_v14 = vld [vmem:[#allocation3 + $0xd0] sm:$0xff]  ;;  %v10590_v53 = vld [vmem:[#allocation3 + $0xd8] sm:$0xff] }
 0xbec   :  { %v13114_v31 = vadd.f32 %v13041_v38, %v4183_v22  ;;  %v4185_v58 = vadd.f32 %v10581_v40, %v4052_v24  ;;  %v4054_v63 = vpop.f32.mrb[11].mxu1 }
 0xbed   :  { %v13117_v5 = vadd.f32 %v13047_v7, %v4184_v57  ;;  %v4186_v9 = vadd.f32 %v10582_v55, %v4054_v63 }
 0xbee   :  { %15494 = vst [vmem:[#allocation84_spill] sm:$0xff] %v13114_v31  ;;  %v13120_v25 = vadd.f32 %v13041_v38, %v4185_v58 }
 0xbef   :  { %15495 = vst [vmem:[#allocation85_spill] sm:$0xff] %v13117_v5  ;;  %v13123_v49 = vadd.f32 %v13047_v7, %v4186_v9  ;;  %v4331_v23 = vadd.f32 %v13117_v5, %v13114_v31  ;;  %v10591_v9 = vld [vmem:[#allocation3 + $0xe0] sm:$0xff] }
 0xbf0   :  { %15496 = vst [vmem:[#allocation86_spill] sm:$0xff] %v13120_v25 }
 0xbf1   :  { %15497 = vst [vmem:[#allocation87_spill] sm:$0xff] %v13123_v49  ;;  %4332 = vadd.xlane.f32.xlu0 %v4331_v23  ;;  %v4058_v50 = vpop.f32.mrb[12].mxu1  ;;  %v4334_v42 = vadd.f32 %v13123_v49, %v13120_v25 }
 0xbf2   :  { %v4187_v51 = vadd.f32 %v10583_v39, %v4058_v50  ;;  %v4060_v17 = vpop.f32.mrb[13].mxu1 }
 0xbf3   :  { %v4188_v52 = vadd.f32 %v10584_v20, %v4060_v17  ;;  %4335 = vadd.xlane.f32.xlu1 %v4334_v42  ;;  %v4062_v1 = vpop.f32.mrb[14].mxu1  ;;  %v10592_v42 = vld [vmem:[#allocation3 + $0xe8] sm:$0xff]  ;;  %v10593_v20 = vld [vmem:[#allocation3 + $0xf0] sm:$0xff] }
 0xbf4   :  { %v13130_v18 = vadd.f32 %v13041_v38, %v4187_v51  ;;  %v4189_v6 = vadd.f32 %v10585_v8, %v4062_v1  ;;  %v4064_v33 = vpop.f32.mrb[15].mxu1 }
 0xbf5   :  { %v13133_v16 = vadd.f32 %v13047_v7, %v4188_v52  ;;  %v4190_v28 = vadd.f32 %v10586_v13, %v4064_v33 }
 0xbf6   :  { %15498 = vst [vmem:[#allocation88_spill] sm:$0xff] %v13130_v18  ;;  %v13136_v59 = vadd.f32 %v13041_v38, %v4189_v6  ;;  %v10594_v6 = vld [vmem:[#allocation3 + $0xf8] sm:$0xff] }
 0xbf7   :  { %15499 = vst [vmem:[#allocation89_spill] sm:$0xff] %v13133_v16  ;;  %v13139_v2 = vadd.f32 %v13047_v7, %v4190_v28  ;;  %v4337_v21 = vadd.f32 %v13133_v16, %v13130_v18 }
 0xbf8   :  { %15500 = vst [vmem:[#allocation90_spill] sm:$0xff] %v13136_v59 }
 0xbf9   :  { %15501 = vst [vmem:[#allocation91_spill] sm:$0xff] %v13139_v2  ;;  %4338 = vadd.xlane.f32.xlu0 %v4337_v21  ;;  %v4068_v46 = vpop.f32.mrb[16].mxu1  ;;  %v4340_v27 = vadd.f32 %v13139_v2, %v13136_v59 }
 0xbfa   :  { %v4191_v36 = vadd.f32 %v10587_v15, %v4068_v46  ;;  %v4070_v30 = vpop.f32.mrb[17].mxu1  ;;  %v5007_v15 = vld [vmem:[#allocation9 + $0x20] sm:$0xff] }
 0xbfb   :  { %v4192_v0 = vadd.f32 %v10588_v12, %v4070_v30  ;;  %4341 = vadd.xlane.f32.xlu1 %v4340_v27  ;;  %v4072_v37 = vpop.f32.mrb[18].mxu1  ;;  %v5003_v27 = vld [vmem:[#allocation9] sm:$0xff] }
 0xbfc   :  { %v13146_v48 = vadd.f32 %v13041_v38, %v4191_v36  ;;  %v4193_v3 = vadd.f32 %v10589_v14, %v4072_v37  ;;  %v4074_v22 = vpop.f32.mrb[19].mxu1  ;;  %v5004_v36 = vld [vmem:[#allocation9 + $0x8] sm:$0xff]  ;;  %v8796_v30 = vcombine.low %v5003_v27, %v5007_v15  ;;  %v8797_v12 = vcombine.high %v5003_v27, %v5007_v15  ;;  %v5011_v37 = vld [vmem:[#allocation9 + $0x40] sm:$0xff] }
 0xbfd   :  { %v13149_v4 = vadd.f32 %v13047_v7, %v4192_v0  ;;  %v4194_v57 = vadd.f32 %v10590_v53, %v4074_v22  ;;  %v5008_v0 = vld [vmem:[#allocation9 + $0x28] sm:$0xff]  ;;  %v5015_v14 = vld [vmem:[#allocation9 + $0x60] sm:$0xff] }
 0xbfe   :  { %15502 = vst [vmem:[#allocation61_spill] sm:$0xff] %v13146_v48  ;;  %v13152_v24 = vadd.f32 %v13041_v38, %v4193_v3  ;;  %v8798_v3 = vcombine.low %v5004_v36, %v5008_v0  ;;  %v8799_v22 = vcombine.high %v5004_v36, %v5008_v0  ;;  %v8805_v53 = vcombine.high %v5011_v37, %v5015_v14  ;;  %v5035_v36 = vld [vmem:[#allocation9 + $0x100] sm:$0xff]  ;;  %v5040_v0 = vld [vmem:[#allocation9 + $0x128] sm:$0xff] }
 0xbff   :  { %15503 = vst [vmem:[#allocation62_spill] sm:$0xff] %v13149_v4  ;;  %v13155_v40 = vadd.f32 %v13047_v7, %v4194_v57  ;;  %v4343_v58 = vadd.f32 %v13149_v4, %v13146_v48  ;;  %v5012_v57 = vld [vmem:[#allocation9 + $0x48] sm:$0xff]  ;;  %5813 = vmatprep.subr.bf16.mxu0 %v8797_v12 }
 0xc00   :  { %15504 = vst [vmem:[#allocation64_spill] sm:$0xff] %v13152_v24  ;;  %6006 = vmatprep.subr.bf16.mxu1 %v8799_v22  ;;  %5814 = vmatpush1.bf16.msra.mxu0 %v8796_v30  ;;  %v5039_v30 = vld [vmem:[#allocation9 + $0x120] sm:$0xff]  ;;  %v5036_v12 = vld [vmem:[#allocation9 + $0x108] sm:$0xff] }
 0xc01   :  { %15505 = vst [vmem:[#allocation66_spill] sm:$0xff] %v13155_v40  ;;  %4344 = vadd.xlane.f32.xlu0 %v4343_v58  ;;  %v4078_v63 = vpop.f32.mrb[20].mxu1  ;;  %v4346_v55 = vadd.f32 %v13155_v40, %v13152_v24  ;;  %v5016_v58 = vld [vmem:[#allocation9 + $0x68] sm:$0xff]  ;;  %6007 = vmatpush1.bf16.msra.mxu1 %v8798_v3  ;;  %v8829_v3 = vcombine.high %v5035_v36, %v5039_v30 }
 0xc02   :  { %v4195_v23 = vadd.f32 %v10591_v9, %v4078_v63  ;;  %v4080_v50 = vpop.f32.mrb[21].mxu1  ;;  %v5019_v63 = vld [vmem:[#allocation9 + $0x80] sm:$0xff]  ;;  %5815 = vmatprep.subr.bf16.mxu0 %v8805_v53  ;;  %v8831_v22 = vcombine.high %v5036_v12, %v5040_v0 }
 0xc03   :  { %v4196_v39 = vadd.f32 %v10592_v42, %v4080_v50  ;;  %4347 = vadd.xlane.f32.xlu1 %v4346_v55  ;;  %v4082_v51 = vpop.f32.mrb[22].mxu1  ;;  %v8807_v55 = vcombine.high %v5012_v57, %v5016_v58  ;;  %v5023_v9 = vld [vmem:[#allocation9 + $0xa0] sm:$0xff]  ;;  %v5024_v50 = vld [vmem:[#allocation9 + $0xa8] sm:$0xff]  ;;  %v8804_v42 = vcombine.low %v5011_v37, %v5015_v14 }
 0xc04   :  { %v13162_v17 = vadd.f32 %v13041_v38, %v4195_v23  ;;  %v4197_v52 = vadd.f32 %v10593_v20, %v4082_v51  ;;  %v4084_v1 = vpop.f32.mrb[23].mxu1  ;;  %v5020_v23 = vld [vmem:[#allocation9 + $0x88] sm:$0xff]  ;;  %v8813_v51 = vcombine.high %v5019_v63, %v5023_v9  ;;  %v5043_v53 = vld [vmem:[#allocation9 + $0x140] sm:$0xff] }
 0xc05   :  { %v13165_v8 = vadd.f32 %v13047_v7, %v4196_v39  ;;  %v4198_v33 = vadd.f32 %v10594_v6, %v4084_v1  ;;  %v8806_v39 = vcombine.low %v5012_v57, %v5016_v58  ;;  %6008 = vmatprep.subr.bf16.mxu1 %v8807_v55  ;;  %v8815_v20 = vcombine.high %v5020_v23, %v5024_v50  ;;  %v5031_v1 = vld [vmem:[#allocation9 + $0xe0] sm:$0xff]  ;;  %v5028_v6 = vld [vmem:[#allocation9 + $0xc8] sm:$0xff] }
 0xc06   :  { %15506 = vst [vmem:[#allocation68_spill] sm:$0xff] %v13162_v17  ;;  %v13168_v13 = vadd.f32 %v13041_v38, %v4197_v52  ;;  %v5027_v52 = vld [vmem:[#allocation9 + $0xc0] sm:$0xff]  ;;  %5816 = vmatpush1.bf16.msra.mxu0 %v8804_v42  ;;  %v5044_v58 = vld [vmem:[#allocation9 + $0x148] sm:$0xff]  ;;  %v8828_v55 = vcombine.low %v5035_v36, %v5039_v30 }
 0xc07   :  { %15507 = vst [vmem:[#allocation70_spill] sm:$0xff] %v13165_v8  ;;  %v13171_v28 = vadd.f32 %v13047_v7, %v4198_v33  ;;  %v4349_v21 = vadd.f32 %v13165_v8, %v13162_v17  ;;  %v5032_v33 = vld [vmem:[#allocation9 + $0xe8] sm:$0xff]  ;;  %6009 = vmatpush1.bf16.msra.mxu1 %v8806_v39  ;;  %5817 = vmatprep.subr.bf16.mxu0 %v8813_v51  ;;  %v5047_v57 = vld [vmem:[#allocation9 + $0x160] sm:$0xff] }
 0xc08   :  { %15508 = vst [vmem:[#allocation72_spill] sm:$0xff] %v13168_v13  ;;  %v8821_v27 = vcombine.high %v5027_v52, %v5031_v1  ;;  %6010 = vmatprep.subr.bf16.mxu1 %v8815_v20  ;;  %v8823_v15 = vcombine.high %v5028_v6, %v5032_v33  ;;  %v8820_v37 = vcombine.low %v5027_v52, %v5031_v1  ;;  %v5051_v42 = vld [vmem:[#allocation9 + $0x180] sm:$0xff]  ;;  %v5052_v51 = vld [vmem:[#allocation9 + $0x188] sm:$0xff] }
 0xc09   :  { %15509 = vst [vmem:[#allocation74_spill] sm:$0xff] %v13171_v28  ;;  %4350 = vadd.xlane.f32.xlu0 %v4349_v21  ;;  %v4352_v46 = vadd.f32 %v13171_v28, %v13168_v13  ;;  %v8812_v21 = vcombine.low %v5019_v63, %v5023_v9  ;;  %v8822_v14 = vcombine.low %v5028_v6, %v5032_v33  ;;  %v5048_v63 = vld [vmem:[#allocation9 + $0x168] sm:$0xff]  ;;  %v5055_v39 = vld [vmem:[#allocation9 + $0x1a0] sm:$0xff] }
 0xc0a   :  { %v8830_v9 = vcombine.low %v5036_v12, %v5040_v0  ;;  %v5056_v20 = vld [vmem:[#allocation9 + $0x1a8] sm:$0xff]  ;;  %v8836_v52 = vcombine.low %v5043_v53, %v5047_v57  ;;  %v8838_v1 = vcombine.low %v5044_v58, %v5048_v63  ;;  %v8845_v6 = vcombine.high %v5051_v42, %v5055_v39 }
 0xc0b   :  { %4353 = vadd.xlane.f32.xlu1 %v4352_v46  ;;  %v8814_v46 = vcombine.low %v5020_v23, %v5024_v50  ;;  %5818 = vmatpush1.bf16.msra.mxu0 %v8812_v21  ;;  %v8837_v23 = vcombine.high %v5043_v53, %v5047_v57  ;;  %v8839_v50 = vcombine.high %v5044_v58, %v5048_v63  ;;  %v10596_v12 = vld [vmem:[#allocation3 + $0x108] sm:$0xff]  ;;  %v10598_v63 = vld [vmem:[#allocation3 + $0x118] sm:$0xff] }
 0xc0c   :  { %5819 = vmatprep.subr.bf16.mxu0 %v8821_v27  ;;  %v8847_v33 = vcombine.high %v5052_v51, %v5056_v20  ;;  %v8844_v21 = vcombine.low %v5051_v42, %v5055_v39 }
 0xc0d   :  { %6011 = vmatpush1.bf16.msra.mxu1 %v8814_v46  ;;  %v8846_v46 = vcombine.low %v5052_v51, %v5056_v20 }
 0xc0e   :  { %6012 = vmatprep.subr.bf16.mxu1 %v8823_v15  ;;  %v10595_v15 = vld [vmem:[#allocation3 + $0x100] sm:$0xff] }
 0xc0f   :  { %5820 = vmatpush1.bf16.msra.mxu0 %v8820_v37 }
 0xc10   :  { %5821 = vmatprep.subr.bf16.mxu0 %v8829_v3  ;;  %v10597_v3 = vld [vmem:[#allocation3 + $0x110] sm:$0xff] }
 0xc11   :  { %6013 = vmatpush1.bf16.msra.mxu1 %v8822_v14 }
 0xc12   :  { %6014 = vmatprep.subr.bf16.mxu1 %v8831_v22 }
 0xc13   :  { %5822 = vmatpush1.bf16.msra.mxu0 %v8828_v55 }
 0xc14   :  { %5823 = vmatprep.subr.bf16.mxu0 %v8837_v23 }
 0xc15   :  { %6015 = vmatpush1.bf16.msra.mxu1 %v8830_v9 }
 0xc16   :  { %6016 = vmatprep.subr.bf16.mxu1 %v8839_v50 }
 0xc17   :  { %5824 = vmatpush1.bf16.msra.mxu0 %v8836_v52  ;;  %v10599_v52 = vld [vmem:[#allocation3 + $0x120] sm:$0xff] }
 0xc18   :  { %5825 = vmatprep.subr.bf16.mxu0 %v8845_v6 }
 0xc19   :  { %6017 = vmatpush1.bf16.msra.mxu1 %v8838_v1 }
 0xc1a   :  { %6018 = vmatprep.subr.bf16.mxu1 %v8847_v33 }
 0xc1b   :  { %5826 = vmatpush1.bf16.msra.mxu0 %v8844_v21 }
 0xc1d   :  { %6019 = vmatpush1.bf16.msra.mxu1 %v8846_v46  ;;  %v10600_v46 = vld [vmem:[#allocation3 + $0x128] sm:$0xff] }
 0xc5e   :  { %v4309_v57 = vpop.xlane.xlu0 %4308 }
 0xc5f   :  { %v4403_v42 = vmul.f32 0.00390625, %v4309_v57 }
 0xc60   :  { %v4312_v9 = vpop.xlane.xlu1 %4311 }
 0xc61   :  { %v4404_v51 = vmul.f32 0.00390625, %v4312_v9 }
 0xc63   :  { %v4088_v27 = vpop.f32.mrb[24].mxu1  ;;  %v13209_v9 = vsub.f32 %v13059_v47, %v4404_v51 }
 0xc64   :  { %v4199_v36 = vadd.f32 %v10595_v15, %v4088_v27  ;;  %v4090_v30 = vpop.f32.mrb[25].mxu1 }
 0xc65   :  { %v4200_v0 = vadd.f32 %v10596_v12, %v4090_v30  ;;  %v4092_v37 = vpop.f32.mrb[26].mxu1  ;;  %v13197_v30 = vsub.f32 %v13053_v54, %v4403_v42  ;;  %15519 = vst [vmem:[#allocation27_spill] sm:$0xff] %v13209_v9 }
 0xc66   :  { %v13178_v14 = vadd.f32 %v13041_v38, %v4199_v36  ;;  %v4201_v22 = vadd.f32 %v10597_v3, %v4092_v37  ;;  %v4094_v53 = vpop.f32.mrb[27].mxu1  ;;  %v4315_v21 = vpop.xlane.xlu0 %4314  ;;  %v13194_v36 = vsub.f32 %v13050_v35, %v4403_v42  ;;  %v10601_v37 = vld [vmem:[#allocation3 + $0x130] sm:$0xff] }
 0xc67   :  { %v13181_v58 = vadd.f32 %v13047_v7, %v4200_v0  ;;  %v4202_v55 = vadd.f32 %v10598_v63, %v4094_v53  ;;  %15515 = vst [vmem:[#allocation58_spill] sm:$0xff] %v13197_v30  ;;  %v13203_v53 = vsub.f32 %v13056_v29, %v4404_v51  ;;  %v10602_v63 = vld [vmem:[#allocation3 + $0x138] sm:$0xff]  ;;  %v4405_v42 = vmul.f32 0.00390625, %v4315_v21 }
 0xc68   :  { %15510 = vst [vmem:[#allocation53_spill] sm:$0xff] %v13178_v14  ;;  %v13184_v23 = vadd.f32 %v13041_v38, %v4201_v22  ;;  %15514 = vst [vmem:[#allocation57_spill] sm:$0xff] %v13194_v36  ;;  %v4318_v12 = vpop.xlane.xlu1 %4317 }
 0xc69   :  { %15511 = vst [vmem:[#allocation54_spill] sm:$0xff] %v13181_v58  ;;  %v13187_v50 = vadd.f32 %v13047_v7, %v4202_v55  ;;  %v4355_v39 = vadd.f32 %v13181_v58, %v13178_v14  ;;  %15517 = vst [vmem:[#allocation60_spill] sm:$0xff] %v13203_v53  ;;  %v4501_v51 = vmul.f32 %v13203_v53, %v13203_v53 }
 0xc6a   :  { %15512 = vst [vmem:[#allocation55_spill] sm:$0xff] %v13184_v23 }
 0xc6b   :  { %15513 = vst [vmem:[#allocation56_spill] sm:$0xff] %v13187_v50  ;;  %v4098_v20 = vpop.f32.mrb[28].mxu1  ;;  %4356 = vadd.xlane.f32.xlu0 %v4355_v39  ;;  %v4358_v33 = vadd.f32 %v13187_v50, %v13184_v23 }
 0xc6c   :  { %v4203_v1 = vadd.f32 %v10599_v52, %v4098_v20  ;;  %v4100_v6 = vpop.f32.mrb[29].mxu1  ;;  %v4406_v20 = vmul.f32 0.00390625, %v4318_v12  ;;  %v10603_v12 = vld [vmem:[#allocation3 + $0x140] sm:$0xff] }
 0xc6d   :  { %v4204_v27 = vadd.f32 %v10600_v46, %v4100_v6  ;;  %v4102_v15 = vpop.f32.mrb[30].mxu1  ;;  %4359 = vadd.xlane.f32.xlu1 %v4358_v33  ;;  %v4500_v6 = vmul.f32 %v13197_v30, %v13197_v30  ;;  %v4502_v46 = vmul.f32 %v13209_v9, %v13209_v9 }
 0xc6e   :  { %v13200_v0 = vadd.f32 %v13041_v38, %v4203_v1  ;;  %v4205_v3 = vadd.f32 %v10601_v37, %v4102_v15  ;;  %v4104_v22 = vpop.f32.mrb[31].mxu1  ;;  %v4499_v1 = vmul.f32 %v13194_v36, %v13194_v36  ;;  %v4321_v15 = vpop.xlane.xlu0 %4320  ;;  %v13239_v47 = vsub.f32 %v13075_v19, %v4406_v20 }
 0xc6f   :  { %v13206_v57 = vadd.f32 %v13047_v7, %v4204_v27  ;;  %v4206_v55 = vadd.f32 %v10602_v63, %v4104_v22  ;;  %v13228_v27 = vsub.f32 %v13066_v41, %v4405_v42  ;;  %v13233_v63 = vsub.f32 %v13069_v32, %v4405_v42  ;;  %v10604_v41 = vld [vmem:[#allocation3 + $0x148] sm:$0xff] }
 0xc70   :  { %15516 = vst [vmem:[#allocation59_spill] sm:$0xff] %v13200_v0  ;;  %v13212_v39 = vadd.f32 %v13041_v38, %v4205_v3  ;;  %15525 = vst [vmem:[#allocation34_spill] sm:$0xff] %v13239_v47  ;;  %v4324_v29 = vpop.xlane.xlu1 %4323  ;;  %v4563_v53 = vadd.f32 %v4500_v6, %v4499_v1  ;;  %v4407_v42 = vmul.f32 0.00390625, %v4321_v15  ;;  %v10607_v15 = vld [vmem:[#allocation3 + $0x160] sm:$0xff] }
 0xc71   :  { %15518 = vst [vmem:[#allocation29_spill] sm:$0xff] %v13206_v57  ;;  %v13215_v52 = vadd.f32 %v13047_v7, %v4206_v55  ;;  %v4361_v33 = vadd.f32 %v13206_v57, %v13200_v0  ;;  %15522 = vst [vmem:[#allocation33_spill] sm:$0xff] %v13228_v27  ;;  %v13236_v55 = vsub.f32 %v13072_v43, %v4406_v20  ;;  %v10606_v43 = vld [vmem:[#allocation3 + $0x158] sm:$0xff]  ;;  %v4408_v19 = vmul.f32 0.00390625, %v4324_v29 }
 0xc72   :  { %15520 = vst [vmem:[#allocation31_spill] sm:$0xff] %v13212_v39  ;;  %15523 = vst [vmem:[#allocation30_spill] sm:$0xff] %v13233_v63  ;;  %v4503_v20 = vmul.f32 %v13228_v27, %v13228_v27 }
 0xc73   :  { %15521 = vst [vmem:[#allocation28_spill] sm:$0xff] %v13215_v52  ;;  %v4108_v21 = vpop.f32.mrb[32].mxu1  ;;  %4362 = vadd.xlane.f32.xlu0 %v4361_v33  ;;  %v4364_v22 = vadd.f32 %v13215_v52, %v13212_v39  ;;  %15524 = vst [vmem:[#allocation37_spill] sm:$0xff] %v13236_v55  ;;  %v4505_v1 = vmul.f32 %v13236_v55, %v13236_v55  ;;  %v5063_v55 = vld [vmem:[#allocation9 + $0x1e0] sm:$0xff] }
 0xc74   :  { %v4207_v37 = vadd.f32 %v10603_v12, %v4108_v21  ;;  %v4110_v3 = vpop.f32.mrb[33].mxu1  ;;  %v10605_v21 = vld [vmem:[#allocation3 + $0x150] sm:$0xff] }
 0xc75   :  { %v4208_v54 = vadd.f32 %v10604_v41, %v4110_v3  ;;  %v4112_v35 = vpop.f32.mrb[34].mxu1  ;;  %4365 = vadd.xlane.f32.xlu1 %v4364_v22 }
 0xc76   :  { %v13242_v33 = vadd.f32 %v13041_v38, %v4207_v37  ;;  %v4209_v12 = vadd.f32 %v10605_v21, %v4112_v35  ;;  %v4114_v9 = vpop.f32.mrb[35].mxu1  ;;  %v4566_v37 = vadd.f32 %v4502_v46, %v4501_v51  ;;  %v4504_v35 = vmul.f32 %v13233_v63, %v13233_v63  ;;  %v4327_v6 = vpop.xlane.xlu0 %4326 }
 0xc77   :  { %v13245_v32 = vadd.f32 %v13047_v7, %v4208_v54  ;;  %v4210_v30 = vadd.f32 %v10606_v43, %v4114_v9  ;;  %4564 = vadd.xlane.f32.xlu0 %v4563_v53  ;;  %v4506_v54 = vmul.f32 %v13239_v47, %v13239_v47  ;;  %v13264_v9 = vsub.f32 %v13082_v34, %v4407_v42  ;;  %v5059_v47 = vld [vmem:[#allocation9 + $0x1c0] sm:$0xff] }
 0xc78   :  { %15526 = vst [vmem:[#allocation17_spill] sm:$0xff] %v13242_v33  ;;  %v13250_v41 = vadd.f32 %v13041_v38, %v4209_v12  ;;  %v13267_v53 = vsub.f32 %v13085_v44, %v4407_v42  ;;  %v13270_v46 = vsub.f32 %v13088_v45, %v4408_v19  ;;  %v13275_v21 = vsub.f32 %v13091_v60, %v4408_v19  ;;  %v10608_v12 = vld [vmem:[#allocation3 + $0x168] sm:$0xff]  ;;  %v4330_v45 = vpop.xlane.xlu1 %4329 }
 0xc79   :  { %15527 = vst [vmem:[#allocation41_spill] sm:$0xff] %v13245_v32  ;;  %v13259_v43 = vadd.f32 %v13047_v7, %v4210_v30  ;;  %4567 = vadd.xlane.f32.xlu1 %v4566_v37  ;;  %v4367_v29 = vadd.f32 %v13245_v32, %v13242_v33  ;;  %15530 = vst [vmem:[#allocation48_spill] sm:$0xff] %v13264_v9  ;;  %v4569_v42 = vadd.f32 %v4504_v35, %v4503_v20  ;;  %v5064_v19 = vld [vmem:[#allocation9 + $0x1e8] sm:$0xff] }
 0xc7a   :  { %15528 = vst [vmem:[#allocation44_spill] sm:$0xff] %v13250_v41  ;;  %15531 = vst [vmem:[#allocation46_spill] sm:$0xff] %v13267_v53  ;;  %v4572_v44 = vadd.f32 %v4506_v54, %v4505_v1  ;;  %v4409_v63 = vmul.f32 0.00390625, %v4327_v6  ;;  %v8853_v36 = vcombine.high %v5059_v47, %v5063_v55  ;;  %v4508_v20 = vmul.f32 %v13267_v53, %v13267_v53  ;;  %v10610_v1 = vld [vmem:[#allocation3 + $0x178] sm:$0xff] }
 0xc7b   :  { %15529 = vst [vmem:[#allocation42_spill] sm:$0xff] %v13259_v43  ;;  %v4118_v51 = vpop.f32.mrb[36].mxu1  ;;  %15532 = vst [vmem:[#allocation52_spill] sm:$0xff] %v13270_v46  ;;  %4368 = vadd.xlane.f32.xlu0 %v4367_v29  ;;  %v4370_v22 = vadd.f32 %v13259_v43, %v13250_v41  ;;  %v4509_v6 = vmul.f32 %v13270_v46, %v13270_v46  ;;  %v4410_v60 = vmul.f32 0.00390625, %v4330_v45 }
 0xc7c   :  { %v4211_v3 = vadd.f32 %v10607_v15, %v4118_v51  ;;  %v4120_v30 = vpop.f32.mrb[37].mxu1  ;;  %15533 = vst [vmem:[#allocation50_spill] sm:$0xff] %v13275_v21  ;;  %v10609_v51 = vld [vmem:[#allocation3 + $0x170] sm:$0xff]  ;;  %5827 = vmatprep.subr.bf16.mxu0 %v8853_v36  ;;  %v8854_v53 = vcombine.low %v5060_v26, %v5064_v19 }
 0xc7d   :  { %v4212_v37 = vadd.f32 %v10608_v12, %v4120_v30  ;;  %v4122_v34 = vpop.f32.mrb[38].mxu1  ;;  %4371 = vadd.xlane.f32.xlu1 %v4370_v22  ;;  %v4507_v30 = vmul.f32 %v13264_v9, %v13264_v9  ;;  %v5067_v22 = vld [vmem:[#allocation9 + $0x200] sm:$0xff]  ;;  %v5068_v9 = vld [vmem:[#allocation9 + $0x208] sm:$0xff] }
 0xc7e   :  { %v13278_v29 = vadd.f32 %v13041_v38, %v4211_v3  ;;  %v4213_v15 = vadd.f32 %v10609_v51, %v4122_v34  ;;  %v4124_v27 = vpop.f32.mrb[39].mxu1  ;;  %v8852_v3 = vcombine.low %v5059_v47, %v5063_v55  ;;  %v5071_v12 = vld [vmem:[#allocation9 + $0x220] sm:$0xff]  ;;  %v4510_v51 = vmul.f32 %v13275_v21, %v13275_v21  ;;  %v4333_v45 = vpop.xlane.xlu0 %4332 }
 0xc7f   :  { %v13285_v35 = vadd.f32 %v13047_v7, %v4212_v37  ;;  %v4214_v54 = vadd.f32 %v10610_v1, %v4124_v27  ;;  %4570 = vadd.xlane.f32.xlu0 %v4569_v42  ;;  %v13298_v27 = vsub.f32 %v13098_v62, %v4409_v63  ;;  %v8855_v42 = vcombine.high %v5060_v26, %v5064_v19  ;;  %v10612_v19 = vld [vmem:[#allocation3 + $0x188] sm:$0xff] }
 0xc80   :  { %15534 = vst [vmem:[#allocation25_spill] sm:$0xff] %v13278_v29  ;;  %v13290_v34 = vadd.f32 %v13041_v38, %v4213_v15  ;;  %5828 = vmatpush1.bf16.msra.mxu0 %v8852_v3  ;;  %v13303_v47 = vsub.f32 %v13101_v56, %v4409_v63  ;;  %v4575_v55 = vadd.f32 %v4508_v20, %v4507_v30 }
 0xc81   :  { %15535 = vst [vmem:[#allocation23_spill] sm:$0xff] %v13285_v35  ;;  %v13295_v37 = vadd.f32 %v13047_v7, %v4214_v54  ;;  %15538 = vst [vmem:[#allocation63_spill] sm:$0xff] %v13298_v27  ;;  %4573 = vadd.xlane.f32.xlu1 %v4572_v44  ;;  %v4373_v15 = vadd.f32 %v13285_v35, %v13278_v29  ;;  %v8860_v1 = vcombine.low %v5067_v22, %v5071_v12  ;;  %v10611_v54 = vld [vmem:[#allocation3 + $0x180] sm:$0xff]  ;;  %v5072_v35 = vld [vmem:[#allocation9 + $0x228] sm:$0xff] }
 0xc82   :  { %15536 = vst [vmem:[#allocation20_spill] sm:$0xff] %v13290_v34  ;;  %15539 = vst [vmem:[#allocation26_spill] sm:$0xff] %v13303_v47  ;;  %6020 = vmatprep.subr.bf16.mxu1 %v8855_v42  ;;  %v8861_v44 = vcombine.high %v5067_v22, %v5071_v12  ;;  %v13308_v26 = vsub.f32 %v13104_v10, %v4410_v60  ;;  %v13311_v63 = vsub.f32 %v13107_v61, %v4410_v60  ;;  %v4336_v42 = vpop.xlane.xlu1 %4335  ;;  %v10613_v12 = vld [vmem:[#allocation3 + $0x190] sm:$0xff]  ;;  %v5080_v61 = vld [vmem:[#allocation9 + $0x268] sm:$0xff] }
 0xc83   :  { %15537 = vst [vmem:[#allocation21_spill] sm:$0xff] %v13295_v37  ;;  %v4128_v36 = vpop.f32.mrb[40].mxu1  ;;  %4374 = vadd.xlane.f32.xlu0 %v4373_v15  ;;  %v4376_v62 = vadd.f32 %v13295_v37, %v13290_v34  ;;  %v4578_v3 = vadd.f32 %v4510_v51, %v4509_v6  ;;  %6021 = vmatpush1.bf16.msra.mxu1 %v8854_v53  ;;  %v5075_v15 = vld [vmem:[#allocation9 + $0x240] sm:$0xff]  ;;  %v4411_v60 = vmul.f32 0.00390625, %v4333_v45  ;;  %v10614_v6 = vld [vmem:[#allocation3 + $0x198] sm:$0xff] }
 0xc84   :  { %v4215_v21 = vadd.f32 %v10611_v54, %v4128_v36  ;;  %v4130_v46 = vpop.f32.mrb[41].mxu1  ;;  %15540 = vst [vmem:[#allocation24_spill] sm:$0xff] %v13308_v26  ;;  %15541 = vst [vmem:[#allocation22_spill] sm:$0xff] %v13311_v63  ;;  %v5079_v36 = vld [vmem:[#allocation9 + $0x260] sm:$0xff]  ;;  %v4511_v54 = vmul.f32 %v13298_v27, %v13298_v27  ;;  %5829 = vmatprep.subr.bf16.mxu0 %v8861_v44  ;;  %v8862_v51 = vcombine.low %v5068_v9, %v5072_v35 }
 0xc85   :  { %v4216_v30 = vadd.f32 %v10612_v19, %v4130_v46  ;;  %v4132_v20 = vpop.f32.mrb[42].mxu1  ;;  %4377 = vadd.xlane.f32.xlu1 %v4376_v62  ;;  %5830 = vmatpush1.bf16.msra.mxu0 %v8860_v1  ;;  %v5076_v19 = vld [vmem:[#allocation9 + $0x248] sm:$0xff]  ;;  %v4512_v27 = vmul.f32 %v13303_v47, %v13303_v47  ;;  %v8863_v62 = vcombine.high %v5068_v9, %v5072_v35 }
 0xc86   :  { %v13316_v22 = vadd.f32 %v13041_v38, %v4215_v21  ;;  %v4217_v10 = vadd.f32 %v10613_v12, %v4132_v20  ;;  %v4134_v56 = vpop.f32.mrb[43].mxu1  ;;  %v8869_v20 = vcombine.high %v5075_v15, %v5079_v36  ;;  %v4513_v45 = vmul.f32 %v13308_v26, %v13308_v26 }
 0xc87   :  { %v13319_v46 = vadd.f32 %v13047_v7, %v4216_v30  ;;  %v4218_v53 = vadd.f32 %v10614_v6, %v4134_v56  ;;  %4576 = vadd.xlane.f32.xlu0 %v4575_v55  ;;  %v4514_v44 = vmul.f32 %v13311_v63, %v13311_v63  ;;  %v4412_v56 = vmul.f32 0.00390625, %v4336_v42  ;;  %6022 = vmatprep.subr.bf16.mxu1 %v8863_v62  ;;  %v10615_v42 = vld [vmem:[#allocation3 + $0x1a0] sm:$0xff] }
 0xc88   :  { %15542 = vst [vmem:[#allocation19_spill] sm:$0xff] %v13316_v22  ;;  %v13324_v21 = vadd.f32 %v13041_v38, %v4217_v10  ;;  %v8868_v10 = vcombine.low %v5075_v15, %v5079_v36  ;;  %v8871_v12 = vcombine.high %v5076_v19, %v5080_v61  ;;  %v13336_v9 = vsub.f32 %v13114_v31, %v4411_v60  ;;  %v5083_v62 = vld [vmem:[#allocation9 + $0x280] sm:$0xff] }
 0xc89   :  { %15543 = vst [vmem:[#allocation38_spill] sm:$0xff] %v13319_v46  ;;  %v13331_v1 = vadd.f32 %v13047_v7, %v4218_v53  ;;  %4579 = vadd.xlane.f32.xlu1 %v4578_v3  ;;  %v4379_v30 = vadd.f32 %v13319_v46, %v13316_v22  ;;  %v13339_v35 = vsub.f32 %v13117_v5, %v4411_v60  ;;  %v10616_v60 = vld [vmem:[#allocation3 + $0x1a8] sm:$0xff] }
 0xc8a   :  { %15544 = vst [vmem:[#allocation32_spill] sm:$0xff] %v13324_v21  ;;  %15546 = vst [vmem:[#allocation43_spill] sm:$0xff] %v13336_v9  ;;  %6023 = vmatpush1.bf16.msra.mxu1 %v8862_v51  ;;  %v8870_v6 = vcombine.low %v5076_v19, %v5080_v61  ;;  %5831 = vmatprep.subr.bf16.mxu0 %v8869_v20  ;;  %v13344_v15 = vsub.f32 %v13120_v25, %v4412_v56  ;;  %v5087_v61 = vld [vmem:[#allocation9 + $0x2a0] sm:$0xff]  ;;  %v5084_v19 = vld [vmem:[#allocation9 + $0x288] sm:$0xff] }
 0xc8b   :  { %15545 = vst [vmem:[#allocation65_spill] sm:$0xff] %v13331_v1  ;;  %15547 = vst [vmem:[#allocation67_spill] sm:$0xff] %v13339_v35  ;;  %v4138_v55 = vpop.f32.mrb[44].mxu1  ;;  %4380 = vadd.xlane.f32.xlu0 %v4379_v30  ;;  %v4382_v3 = vadd.f32 %v13331_v1, %v13324_v21  ;;  %v13347_v36 = vsub.f32 %v13123_v49, %v4412_v56  ;;  %v4581_v51 = vadd.f32 %v4512_v27, %v4511_v54  ;;  %v5088_v30 = vld [vmem:[#allocation9 + $0x2a8] sm:$0xff]  ;;  %v10617_v20 = vld [vmem:[#allocation3 + $0x1b0] sm:$0xff]  ;;  %v4342_v49 = vpop.xlane.xlu1 %4341 }
 0xc8c   :  { %v4219_v53 = vadd.f32 %v10615_v42, %v4138_v55  ;;  %v4140_v63 = vpop.f32.mrb[45].mxu1  ;;  %15548 = vst [vmem:[#allocation69_spill] sm:$0xff] %v13344_v15  ;;  %6024 = vmatprep.subr.bf16.mxu1 %v8871_v12  ;;  %v4584_v25 = vadd.f32 %v4514_v44, %v4513_v45  ;;  %5832 = vmatpush1.bf16.msra.mxu0 %v8868_v10  ;;  %v10618_v54 = vld [vmem:[#allocation3 + $0x1b8] sm:$0xff]  ;;  %v5103_v21 = vld [vmem:[#allocation9 + $0x320] sm:$0xff] }
 0xc8d   :  { %15549 = vst [vmem:[#allocation40_spill] sm:$0xff] %v13347_v36  ;;  %v4220_v5 = vadd.f32 %v10616_v60, %v4140_v63  ;;  %v4142_v31 = vpop.f32.mrb[46].mxu1  ;;  %4383 = vadd.xlane.f32.xlu1 %v4382_v3  ;;  %v4515_v56 = vmul.f32 %v13336_v9, %v13336_v9  ;;  %v4516_v63 = vmul.f32 %v13339_v35, %v13339_v35  ;;  %v5095_v60 = vld [vmem:[#allocation9 + $0x2e0] sm:$0xff]  ;;  %v4339_v3 = vpop.xlane.xlu0 %4338 }
 0xc8e   :  { %v13350_v55 = vadd.f32 %v13041_v38, %v4219_v53  ;;  %v4221_v42 = vadd.f32 %v10617_v20, %v4142_v31  ;;  %v4144_v26 = vpop.f32.mrb[47].mxu1  ;;  %6025 = vmatpush1.bf16.msra.mxu1 %v8870_v6  ;;  %v5091_v53 = vld [vmem:[#allocation9 + $0x2c0] sm:$0xff]  ;;  %v8876_v45 = vcombine.low %v5083_v62, %v5087_v61  ;;  %v8877_v44 = vcombine.high %v5083_v62, %v5087_v61  ;;  %v5096_v62 = vld [vmem:[#allocation9 + $0x2e8] sm:$0xff] }
 0xc8f   :  { %v13357_v27 = vadd.f32 %v13047_v7, %v4220_v5  ;;  %v4222_v12 = vadd.f32 %v10618_v54, %v4144_v26  ;;  %4582 = vadd.xlane.f32.xlu0 %v4581_v51  ;;  %v8879_v10 = vcombine.high %v5084_v19, %v5088_v30  ;;  %v4517_v20 = vmul.f32 %v13344_v15, %v13344_v15  ;;  %v5092_v54 = vld [vmem:[#allocation9 + $0x2c8] sm:$0xff]  ;;  %v10619_v9 = vld [vmem:[#allocation3 + $0x1c0] sm:$0xff] }
 0xc90   :  { %15550 = vst [vmem:[#allocation92_spill] sm:$0xff] %v13350_v55  ;;  %v13360_v31 = vadd.f32 %v13041_v38, %v4221_v42  ;;  %v4518_v5 = vmul.f32 %v13347_v36, %v13347_v36  ;;  %v8878_v6 = vcombine.low %v5084_v19, %v5088_v30  ;;  %5833 = vmatprep.subr.bf16.mxu0 %v8877_v44  ;;  %v4413_v61 = vmul.f32 0.00390625, %v4339_v3  ;;  %v5099_v3 = vld [vmem:[#allocation9 + $0x300] sm:$0xff] }
 0xc91   :  { %15551 = vst [vmem:[#allocation93_spill] sm:$0xff] %v13357_v27  ;;  %v13367_v26 = vadd.f32 %v13047_v7, %v4222_v12  ;;  %4585 = vadd.xlane.f32.xlu1 %v4584_v25  ;;  %v4385_v42 = vadd.f32 %v13357_v27, %v13350_v55  ;;  %v8885_v51 = vcombine.high %v5091_v53, %v5095_v60  ;;  %v4414_v15 = vmul.f32 0.00390625, %v4342_v49  ;;  %v10620_v25 = vld [vmem:[#allocation3 + $0x1c8] sm:$0xff] }
 0xc92   :  { %15552 = vst [vmem:[#allocation94_spill] sm:$0xff] %v13360_v31  ;;  %6026 = vmatprep.subr.bf16.mxu1 %v8879_v10  ;;  %v4587_v19 = vadd.f32 %v4516_v63, %v4515_v56  ;;  %5834 = vmatpush1.bf16.msra.mxu0 %v8876_v45  ;;  %v4590_v44 = vadd.f32 %v4518_v5, %v4517_v20  ;;  %v4345_v10 = vpop.xlane.xlu0 %4344  ;;  %v5100_v20 = vld [vmem:[#allocation9 + $0x308] sm:$0xff] }
 0xc93   :  { %15553 = vst [vmem:[#allocation95_spill] sm:$0xff] %v13367_v26  ;;  %v4148_v35 = vpop.f32.mrb[48].mxu1  ;;  %4386 = vadd.xlane.f32.xlu0 %v4385_v42  ;;  %v4388_v12 = vadd.f32 %v13367_v26, %v13360_v31  ;;  %6027 = vmatpush1.bf16.msra.mxu1 %v8878_v6  ;;  %v8884_v55 = vcombine.low %v5091_v53, %v5095_v60  ;;  %v10622_v60 = vld [vmem:[#allocation3 + $0x1d8] sm:$0xff] }
 0xc94   :  { %v4223_v36 = vadd.f32 %v10619_v9, %v4148_v35  ;;  %v4150_v47 = vpop.f32.mrb[49].mxu1  ;;  %v8886_v1 = vcombine.low %v5092_v54, %v5096_v62  ;;  %v10621_v9 = vld [vmem:[#allocation3 + $0x1d0] sm:$0xff]  ;;  %5835 = vmatprep.subr.bf16.mxu0 %v8885_v51  ;;  %v8887_v56 = vcombine.high %v5092_v54, %v5096_v62  ;;  %v13377_v63 = vsub.f32 %v13130_v18, %v4413_v61 }
 0xc95   :  { %v4224_v30 = vadd.f32 %v10620_v25, %v4150_v47  ;;  %v4152_v27 = vpop.f32.mrb[50].mxu1  ;;  %4389 = vadd.xlane.f32.xlu1 %v4388_v12  ;;  %v13380_v47 = vsub.f32 %v13133_v16, %v4413_v61  ;;  %v13386_v5 = vsub.f32 %v13136_v59, %v4414_v15  ;;  %v8893_v6 = vcombine.high %v5099_v3, %v5103_v21 }
 0xc96   :  { %v13374_v49 = vadd.f32 %v13041_v38, %v4223_v36  ;;  %v4225_v35 = vadd.f32 %v10621_v9, %v4152_v27  ;;  %v4154_v42 = vpop.f32.mrb[51].mxu1  ;;  %15555 = vst [vmem:[#allocation97_spill] sm:$0xff] %v13377_v63  ;;  %v5104_v36 = vld [vmem:[#allocation9 + $0x328] sm:$0xff]  ;;  %6028 = vmatprep.subr.bf16.mxu1 %v8887_v56  ;;  %v13392_v51 = vsub.f32 %v13139_v2, %v4414_v15  ;;  %v4415_v54 = vmul.f32 0.00390625, %v4345_v10  ;;  %v5111_v9 = vld [vmem:[#allocation9 + $0x360] sm:$0xff] }
 0xc97   :  { %15556 = vst [vmem:[#allocation98_spill] sm:$0xff] %v13380_v47  ;;  %v13383_v53 = vadd.f32 %v13047_v7, %v4224_v30  ;;  %v4226_v45 = vadd.f32 %v10622_v60, %v4154_v42  ;;  %15558 = vst [vmem:[#allocation100_spill] sm:$0xff] %v13386_v5  ;;  %4588 = vadd.xlane.f32.xlu0 %v4587_v19  ;;  %5836 = vmatpush1.bf16.msra.mxu0 %v8884_v55  ;;  %v5107_v19 = vld [vmem:[#allocation9 + $0x340] sm:$0xff]  ;;  %v4348_v55 = vpop.xlane.xlu1 %4347  ;;  %v5108_v56 = vld [vmem:[#allocation9 + $0x348] sm:$0xff] }
 0xc98   :  { %15554 = vst [vmem:[#allocation96_spill] sm:$0xff] %v13374_v49  ;;  %v13389_v27 = vadd.f32 %v13041_v38, %v4225_v35  ;;  %15560 = vst [vmem:[#allocation102_spill] sm:$0xff] %v13392_v51  ;;  %6029 = vmatpush1.bf16.msra.mxu1 %v8886_v1  ;;  %v8892_v61 = vcombine.low %v5099_v3, %v5103_v21  ;;  %5837 = vmatprep.subr.bf16.mxu0 %v8893_v6  ;;  %v5112_v60 = vld [vmem:[#allocation9 + $0x368] sm:$0xff]  ;;  %v4416_v16 = vmul.f32 0.00390625, %v4348_v55 }
 0xc99   :  { %15557 = vst [vmem:[#allocation99_spill] sm:$0xff] %v13383_v53  ;;  %v13395_v62 = vadd.f32 %v13047_v7, %v4226_v45  ;;  %4591 = vadd.xlane.f32.xlu1 %v4590_v44  ;;  %v4391_v12 = vadd.f32 %v13383_v53, %v13374_v49  ;;  %v8894_v25 = vcombine.low %v5100_v20, %v5104_v36  ;;  %v10623_v44 = vld [vmem:[#allocation3 + $0x1e0] sm:$0xff]  ;;  %v10624_v6 = vld [vmem:[#allocation3 + $0x1e8] sm:$0xff] }
 0xc9a   :  { %15559 = vst [vmem:[#allocation101_spill] sm:$0xff] %v13389_v27  ;;  %v8895_v30 = vcombine.high %v5100_v20, %v5104_v36  ;;  %v13401_v15 = vmul.f32 %v13377_v63, %v13377_v63  ;;  %v13405_v10 = vmul.f32 %v13380_v47, %v13380_v47  ;;  %v13409_v21 = vmul.f32 %v13386_v5, %v13386_v5  ;;  %v4351_v36 = vpop.xlane.xlu0 %4350  ;;  %v5120_v63 = vld [vmem:[#allocation9 + $0x3a8] sm:$0xff] }
 0xc9b   :  { %15561 = vst [vmem:[#allocation103_spill] sm:$0xff] %v13395_v62  ;;  %v4158_v1 = vpop.f32.mrb[52].mxu1  ;;  %4392 = vadd.xlane.f32.xlu0 %v4391_v12  ;;  %v4394_v42 = vadd.f32 %v13395_v62, %v13389_v27  ;;  %v4522_v45 = vmul.f32 %v13392_v51, %v13392_v51  ;;  %v13416_v20 = vsub.f32 %v13146_v48, %v4415_v54  ;;  %v5116_v48 = vld [vmem:[#allocation9 + $0x388] sm:$0xff]  ;;  %v5123_v27 = vld [vmem:[#allocation9 + $0x3c0] sm:$0xff]  ;;  %v4417_v53 = vmul.f32 0.00390625, %v4351_v36 }
 0xc9c   :  { %v4227_v3 = vadd.f32 %v10623_v44, %v4158_v1  ;;  %v4160_v35 = vpop.f32.mrb[53].mxu1  ;;  %6030 = vmatprep.subr.bf16.mxu1 %v8895_v30  ;;  %5838 = vmatpush1.bf16.msra.mxu0 %v8892_v61  ;;  %v8900_v12 = vcombine.low %v5107_v19, %v5111_v9  ;;  %v5115_v1 = vld [vmem:[#allocation9 + $0x380] sm:$0xff]  ;;  %v10625_v30 = vld [vmem:[#allocation3 + $0x1f0] sm:$0xff]  ;;  %v8901_v51 = vcombine.high %v5107_v19, %v5111_v9 }
 0xc9d   :  { %v4228_v2 = vadd.f32 %v10624_v6, %v4160_v35  ;;  %v4162_v59 = vpop.f32.mrb[54].mxu1  ;;  %v5119_v44 = vld [vmem:[#allocation9 + $0x3a0] sm:$0xff]  ;;  %4395 = vadd.xlane.f32.xlu1 %v4394_v42  ;;  %6031 = vmatpush1.bf16.msra.mxu1 %v8894_v25  ;;  %v13422_v62 = vsub.f32 %v13149_v4, %v4415_v54  ;;  %v10626_v35 = vld [vmem:[#allocation3 + $0x1f8] sm:$0xff]  ;;  %v8902_v55 = vcombine.low %v5108_v56, %v5112_v60  ;;  %v4354_v42 = vpop.xlane.xlu1 %4353 }
 0xc9e   :  { %v13419_v18 = vadd.f32 %v13041_v38, %v4227_v3  ;;  %v4229_v5 = vadd.f32 %v10625_v30, %v4162_v59  ;;  %v4164_v47 = vpop.f32.mrb[55].mxu1  ;;  %v5127_v3 = vld [vmem:[#allocation9 + $0x3e0] sm:$0xff]  ;;  %5839 = vmatprep.subr.bf16.mxu0 %v8901_v51  ;;  %v8903_v25 = vcombine.high %v5108_v56, %v5112_v60  ;;  %v8909_v19 = vcombine.high %v5115_v1, %v5119_v44  ;;  %v5124_v30 = vld [vmem:[#allocation9 + $0x3c8] sm:$0xff] }
 0xc9f   :  { %v13425_v61 = vadd.f32 %v13047_v7, %v4228_v2  ;;  %v4230_v6 = vadd.f32 %v10626_v35, %v4164_v47  ;;  %v8908_v54 = vcombine.low %v5115_v1, %v5119_v44  ;;  %v8911_v47 = vcombine.high %v5116_v48, %v5120_v63  ;;  %v5128_v35 = vld [vmem:[#allocation9 + $0x3e8] sm:$0xff] }
 0xca0   :  { %15562 = vst [vmem:[#allocation104_spill] sm:$0xff] %v13419_v18  ;;  %v13428_v59 = vadd.f32 %v13041_v38, %v4229_v5  ;;  %5840 = vmatpush1.bf16.msra.mxu0 %v8900_v12  ;;  %v13436_v36 = vsub.f32 %v13152_v24, %v4416_v16  ;;  %v13439_v38 = vsub.f32 %v13155_v40, %v4416_v16  ;;  %v4418_v51 = vmul.f32 0.00390625, %v4354_v42 }
 0xca1   :  { %15563 = vst [vmem:[#allocation105_spill] sm:$0xff] %v13425_v61  ;;  %v13431_v9 = vadd.f32 %v13047_v7, %v4230_v6  ;;  %v4397_v2 = vadd.f32 %v13425_v61, %v13419_v18  ;;  %6032 = vmatprep.subr.bf16.mxu1 %v8903_v25  ;;  %5841 = vmatprep.subr.bf16.mxu0 %v8909_v19 }
 0xca2   :  { %15564 = vst [vmem:[#allocation106_spill] sm:$0xff] %v13428_v59  ;;  %v8917_v5 = vcombine.high %v5123_v27, %v5127_v3  ;;  %6033 = vmatpush1.bf16.msra.mxu1 %v8902_v55  ;;  %v8910_v56 = vcombine.low %v5116_v48, %v5120_v63  ;;  %v4523_v60 = vmul.f32 %v13416_v20, %v13416_v20 }
 0xca3   :  { %15565 = vst [vmem:[#allocation107_spill] sm:$0xff] %v13431_v9  ;;  %4398 = vadd.xlane.f32.xlu0 %v4397_v2  ;;  %v4400_v7 = vadd.f32 %v13431_v9, %v13428_v59  ;;  %v4524_v12 = vmul.f32 %v13422_v62, %v13422_v62  ;;  %v4593_v16 = vadd.f32 %v13405_v10, %v13401_v15 }
 0xca4   :  { %6034 = vmatprep.subr.bf16.mxu1 %v8911_v47  ;;  %v8919_v1 = vcombine.high %v5124_v30, %v5128_v35  ;;  %v13450_v44 = vsub.f32 %v13162_v17, %v4417_v53  ;;  %v13453_v6 = vsub.f32 %v13165_v8, %v4417_v53  ;;  %5842 = vmatpush1.bf16.msra.mxu0 %v8908_v54  ;;  %v13474_v47 = vld [vmem:[#allocation9 + $0x10] sm:$0xff] }
 0xca5   :  { %4401 = vadd.xlane.f32.xlu1 %v4400_v7  ;;  %v8916_v48 = vcombine.low %v5123_v27, %v5127_v3  ;;  %v4525_v63 = vmul.f32 %v13436_v36, %v13436_v36  ;;  %v4526_v55 = vmul.f32 %v13439_v38, %v13439_v38  ;;  %v4596_v42 = vadd.f32 %v4522_v45, %v13409_v21 }
 0xca6   :  { %5843 = vmatprep.subr.bf16.mxu0 %v8917_v5  ;;  %v13461_v15 = vsub.f32 %v13168_v13, %v4418_v51  ;;  %v13464_v10 = vsub.f32 %v13171_v28, %v4418_v51  ;;  %6035 = vmatpush1.bf16.msra.mxu1 %v8910_v56  ;;  %v8918_v53 = vcombine.low %v5124_v30, %v5128_v35  ;;  %v13476_v30 = vld [vmem:[#allocation9 + $0x30] sm:$0xff]  ;;  %v15568_v28 = vld [vmem:[#allocation57_spill] sm:$0xff]  ;;  %v15570_v13 = vld [vmem:[#allocation60_spill] sm:$0xff] }
 0xca7   :  { %4594 = vadd.xlane.f32.xlu0 %v4593_v16  ;;  %6036 = vmatprep.subr.bf16.mxu1 %v8919_v1  ;;  %v4527_v27 = vmul.f32 %v13450_v44, %v13450_v44  ;;  %v4528_v3 = vmul.f32 %v13453_v6, %v13453_v6  ;;  %v4599_v25 = vadd.f32 %v4524_v12, %v4523_v60 }
 0xca8   :  { %5844 = vmatpush1.bf16.msra.mxu0 %v8916_v48  ;;  %v4529_v21 = vmul.f32 %v13461_v15, %v13461_v15  ;;  %v4530_v45 = vmul.f32 %v13464_v10, %v13464_v10  ;;  %v4602_v19 = vadd.f32 %v4526_v55, %v4525_v63  ;;  %v8801_v5 = vcombine.high %v13474_v47, %v13476_v30 }
 0xca9   :  { %4597 = vadd.xlane.f32.xlu1 %v4596_v42  ;;  %v4605_v2 = vadd.f32 %v4528_v3, %v4527_v27 }
 0xcaa   :  { %6037 = vmatpush1.bf16.msra.mxu1 %v8918_v53  ;;  %v4608_v54 = vadd.f32 %v4530_v45, %v4529_v21  ;;  %6199 = vmatprep.subr.bf16.mxu0 %v8801_v5 }
 0xcab   :  { %4600 = vadd.xlane.f32.xlu0 %v4599_v25 }
 0xcad   :  { %4603 = vadd.xlane.f32.xlu1 %v4602_v19 }
 0xcaf   :  { %4606 = vadd.xlane.f32.xlu0 %v4605_v2 }
 0xcb1   :  { %4609 = vadd.xlane.f32.xlu1 %v4608_v54 }
 0xcf8   :  { %v4357_v51 = vpop.xlane.xlu0 %4356 }
 0xcf9   :  { %v4419_v7 = vmul.f32 0.00390625, %v4357_v51 }
 0xcfa   :  { %v4360_v56 = vpop.xlane.xlu1 %4359 }
 0xcfb   :  { %v13483_v60 = vsub.f32 %v13178_v14, %v4419_v7  ;;  %v13486_v12 = vsub.f32 %v13181_v58, %v4419_v7  ;;  %v4420_v16 = vmul.f32 0.00390625, %v4360_v56 }
 0xcfd   :  { %v4531_v1 = vmul.f32 %v13483_v60, %v13483_v60  ;;  %v4532_v48 = vmul.f32 %v13486_v12, %v13486_v12  ;;  %v13493_v63 = vsub.f32 %v13184_v23, %v4420_v16  ;;  %v13496_v55 = vsub.f32 %v13187_v50, %v4420_v16  ;;  %v13554_v50 = vld [vmem:[#allocation9 + $0xb0] sm:$0xff] }
 0xcff   :  { %v4533_v42 = vmul.f32 %v13493_v63, %v13493_v63  ;;  %v4534_v53 = vmul.f32 %v13496_v55, %v13496_v55  ;;  %v4611_v27 = vadd.f32 %v4532_v48, %v4531_v1 }
 0xd00   :  { %v4363_v3 = vpop.xlane.xlu0 %4362 }
 0xd01   :  { %v4421_v25 = vmul.f32 0.00390625, %v4363_v3  ;;  %4612 = vadd.xlane.f32.xlu0 %v4611_v27  ;;  %v4614_v21 = vadd.f32 %v4534_v53, %v4533_v42 }
 0xd02   :  { %v4366_v45 = vpop.xlane.xlu1 %4365 }
 0xd03   :  { %v13503_v19 = vsub.f32 %v13200_v0, %v4421_v25  ;;  %v13506_v2 = vsub.f32 %v13206_v57, %v4421_v25  ;;  %v4422_v54 = vmul.f32 0.00390625, %v4366_v45  ;;  %4615 = vadd.xlane.f32.xlu1 %v4614_v21 }
 0xd04   :  { %v4565_v5 = vpop.xlane.xlu0 %4564 }
 0xd05   :  { %v4535_v51 = vmul.f32 %v13503_v19, %v13503_v19  ;;  %v4536_v7 = vmul.f32 %v13506_v2, %v13506_v2  ;;  %v13513_v56 = vsub.f32 %v13212_v39, %v4422_v54  ;;  %v13516_v16 = vsub.f32 %v13215_v52, %v4422_v54 }
 0xd06   :  { %v4659_v1 = vmul.f32 0.00390625, %v4565_v5  ;;  %v4568_v48 = vpop.xlane.xlu1 %4567 }
 0xd07   :  { %v4537_v42 = vmul.f32 %v13513_v56, %v13513_v56  ;;  %v4538_v53 = vmul.f32 %v13516_v16, %v13516_v16  ;;  %v4660_v27 = vmul.f32 0.00390625, %v4568_v48  ;;  %v4617_v3 = vadd.f32 %v4536_v7, %v4535_v51 }
 0xd08   :  { %v4691_v25 = vadd.f32 1e-05, %v4659_v1  ;;  %v4369_v21 = vpop.xlane.xlu0 %4368 }
 0xd09   :  { %v4692_v45 = vadd.f32 1e-05, %v4660_v27  ;;  %v4423_v35 = vmul.f32 0.00390625, %v4369_v21  ;;  %4618 = vadd.xlane.f32.xlu0 %v4617_v3  ;;  %v4620_v39 = vadd.f32 %v4538_v53, %v4537_v42 }
 0xd0a   :  { %10443 = vrsqrt.f32 %v4691_v25  ;;  %v4372_v57 = vpop.xlane.xlu1 %4371  ;;  %v4895_v25 = vld [vmem:[%s14920_s7] sm:$0x3] }
 0xd0b   :  { %10445 = vrsqrt.f32 %v4692_v45  ;;  %v13523_v54 = vsub.f32 %v13242_v33, %v4423_v35  ;;  %v13526_v5 = vsub.f32 %v13245_v32, %v4423_v35  ;;  %v4424_v52 = vmul.f32 0.00390625, %v4372_v57  ;;  %4621 = vadd.xlane.f32.xlu1 %v4620_v39  ;;  %v4819_v57 = vld [vmem:[%s14919_s6] sm:$0x3]  ;;  %v13550_v32 = vld [vmem:[#allocation9 + $0x70] sm:$0xff] }
 0xd0c   :  { %v4571_v0 = vpop.xlane.xlu0 %4570  ;;  %v13552_v33 = vld [vmem:[#allocation9 + $0x90] sm:$0xff]  ;;  %v13563_v23 = vrot.slane %v4895_v25, %v15475_v11 }
 0xd0d   :  { %v4539_v51 = vmul.f32 %v13523_v54, %v13523_v54  ;;  %v4540_v7 = vmul.f32 %v13526_v5, %v13526_v5  ;;  %v13533_v1 = vsub.f32 %v13250_v41, %v4424_v52  ;;  %v13536_v48 = vsub.f32 %v13259_v43, %v4424_v52 }
 0xd0e   :  { %v4661_v42 = vmul.f32 0.00390625, %v4571_v0  ;;  %v4574_v53 = vpop.xlane.xlu1 %4573  ;;  %v13548_v0 = vld [vmem:[#allocation9 + $0x50] sm:$0xff] }
 0xd0f   :  { %v4541_v39 = vmul.f32 %v13533_v1, %v13533_v1  ;;  %v4542_v35 = vmul.f32 %v13536_v48, %v13536_v48  ;;  %v4662_v27 = vmul.f32 0.00390625, %v4574_v53  ;;  %v4623_v3 = vadd.f32 %v4540_v7, %v4539_v51  ;;  %v15566_v53 = vld [vmem:[#allocation36_spill] sm:$0xff] }
 0xd10   :  { %v4693_v52 = vadd.f32 1e-05, %v4661_v42  ;;  %v4375_v21 = vpop.xlane.xlu0 %4374  ;;  %v13557_v51 = vrot.slane %v4819_v57, %v15475_v11  ;;  %v13560_v42 = vrot.slane %v4819_v57, %v15566_v53  ;;  %v15571_v57 = vld [vmem:[#allocation27_spill] sm:$0xff] }
 0xd11   :  { %v4694_v45 = vadd.f32 1e-05, %v4662_v27  ;;  %v4425_v43 = vmul.f32 0.00390625, %v4375_v21  ;;  %4624 = vadd.xlane.f32.xlu0 %v4623_v3  ;;  %v4626_v41 = vadd.f32 %v4542_v35, %v4541_v39  ;;  %v15567_v35 = vld [vmem:[#allocation23_spill] sm:$0xff] }
 0xd12   :  { %10447 = vrsqrt.f32 %v4693_v52  ;;  %v4378_v7 = vpop.xlane.xlu1 %4377  ;;  %v13572_v52 = vrot.slane %v4895_v25, %v15566_v53 }
 0xd13   :  { %10449 = vrsqrt.f32 %v4694_v45  ;;  %v13566_v39 = vsub.f32 %v13278_v29, %v4425_v43  ;;  %v13569_v27 = vsub.f32 %v15567_v35, %v4425_v43  ;;  %v4426_v3 = vmul.f32 0.00390625, %v4378_v7  ;;  %4627 = vadd.xlane.f32.xlu1 %v4626_v41  ;;  %v15569_v35 = vld [vmem:[#allocation58_spill] sm:$0xff] }
 0xd14   :  { %v10444_v21 = vpop.eup %10443  ;;  %v4577_v58 = vpop.xlane.xlu0 %4576 }
 0xd15   :  { %v10446_v29 = vpop.eup %10445  ;;  %v4755_v43 = vmul.f32 %v10444_v21, %v15568_v28  ;;  %v4756_v7 = vmul.f32 %v10444_v21, %v15569_v35  ;;  %v4543_v41 = vmul.f32 %v13566_v39, %v13566_v39  ;;  %v4544_v25 = vmul.f32 %v13569_v27, %v13569_v27 }
 0xd16   :  { %v4757_v8 = vmul.f32 %v10446_v29, %v15570_v13  ;;  %v4758_v17 = vmul.f32 %v10446_v29, %v15571_v57  ;;  %v13589_v14 = vsub.f32 %v13290_v34, %v4426_v3  ;;  %v13592_v45 = vsub.f32 %v13295_v37, %v4426_v3  ;;  %v4580_v40 = vpop.xlane.xlu1 %4579 }
 0xd17   :  { %v4831_v28 = vmul.f32 %v13557_v51, %v4755_v43  ;;  %v4663_v35 = vmul.f32 0.00390625, %v4577_v58  ;;  %v4664_v21 = vmul.f32 0.00390625, %v4580_v40  ;;  %v4629_v24 = vadd.f32 %v4544_v25, %v4543_v41 }
 0xd18   :  { %15572 = vst [vmem:[#allocation57_spill] sm:$0xff] %v13589_v14  ;;  %15573 = vst [vmem:[#allocation58_spill] sm:$0xff] %v13592_v45  ;;  %v4833_v4 = vmul.f32 %v13557_v51, %v4757_v8  ;;  %v4545_v53 = vmul.f32 %v13589_v14, %v13589_v14  ;;  %v4546_v13 = vmul.f32 %v13592_v45, %v13592_v45  ;;  %v4381_v29 = vpop.xlane.xlu0 %4380 }
 0xd19   :  { %v4832_v57 = vmul.f32 %v13560_v42, %v4756_v7  ;;  %v4695_v34 = vadd.f32 1e-05, %v4663_v35  ;;  %v4696_v3 = vadd.f32 1e-05, %v4664_v21  ;;  %v4427_v37 = vmul.f32 0.00390625, %v4381_v29  ;;  %4630 = vadd.xlane.f32.xlu0 %v4629_v24  ;;  %v15578_v29 = vld [vmem:[#allocation30_spill] sm:$0xff] }
 0xd1a   :  { %v4834_v43 = vmul.f32 %v13560_v42, %v4758_v17  ;;  %v4384_v58 = vpop.xlane.xlu1 %4383  ;;  %v4632_v40 = vadd.f32 %v4546_v13, %v4545_v53  ;;  %v4907_v41 = vadd.f32 %v13563_v23, %v4831_v28  ;;  %v4909_v8 = vadd.f32 %v13563_v23, %v4833_v4  ;;  %v15577_v13 = vld [vmem:[#allocation33_spill] sm:$0xff] }
 0xd1b   :  { %10451 = vrsqrt.f32 %v4695_v34  ;;  %v13607_v11 = vsub.f32 %v13316_v22, %v4427_v37  ;;  %v13610_v7 = vsub.f32 %v13319_v46, %v4427_v37  ;;  %v4428_v35 = vmul.f32 0.00390625, %v4384_v58  ;;  %v15580_v46 = vld [vmem:[#allocation34_spill] sm:$0xff] }
 0xd1c   :  { %v10448_v24 = vpop.eup %10447  ;;  %10453 = vrsqrt.f32 %v4696_v3  ;;  %4633 = vadd.xlane.f32.xlu1 %v4632_v40  ;;  %v4583_v17 = vpop.xlane.xlu0 %4582  ;;  %v4908_v53 = vadd.f32 %v13572_v52, %v4832_v57  ;;  %v4910_v28 = vadd.f32 %v13572_v52, %v4834_v43  ;;  %v13614_v4 = vpack.c.bf16 %v4909_v8, %v4907_v41  ;;  %v15579_v3 = vld [vmem:[#allocation37_spill] sm:$0xff]  ;;  %v15581_v57 = vld [vmem:[#allocation32_spill] sm:$0xff] }
 0xd1d   :  { %15574 = vst [vmem:[#allocation60_spill] sm:$0xff] %v13607_v11  ;;  %15575 = vst [vmem:[#allocation27_spill] sm:$0xff] %v13610_v7  ;;  %v10450_v21 = vpop.eup %10449  ;;  %v4759_v34 = vmul.f32 %v10448_v24, %v15577_v13  ;;  %v4760_v25 = vmul.f32 %v10448_v24, %v15578_v29  ;;  %v4547_v37 = vmul.f32 %v13607_v11, %v13607_v11  ;;  %v15582_v43 = vld [vmem:[#allocation65_spill] sm:$0xff]  ;;  %v4665_v13 = vmul.f32 0.00390625, %v4583_v17 }
 0xd1e   :  { %15576 = vst [vmem:[#allocation108_spill] sm:$0xff] %v13614_v4  ;;  %v4548_v58 = vmul.f32 %v13610_v7, %v13610_v7  ;;  %v4761_v40 = vmul.f32 %v10450_v21, %v15579_v3  ;;  %v4762_v22 = vmul.f32 %v10450_v21, %v15580_v46  ;;  %v13625_v45 = vsub.f32 %v15581_v57, %v4428_v35  ;;  %v4586_v8 = vpop.xlane.xlu1 %4585 }
 0xd1f   :  { %v13628_v41 = vsub.f32 %v15582_v43, %v4428_v35  ;;  %v13630_v14 = vpack.c.bf16 %v4910_v28, %v4908_v53  ;;  %v4666_v24 = vmul.f32 0.00390625, %v4586_v8  ;;  %v4836_v46 = vmul.f32 %v13560_v42, %v4760_v25 }
 0xd20   :  { %v4635_v29 = vadd.f32 %v4548_v58, %v4547_v37  ;;  %v4549_v11 = vmul.f32 %v13625_v45, %v13625_v45  ;;  %v4387_v7 = vpop.xlane.xlu0 %4386  ;;  %v4838_v21 = vmul.f32 %v13560_v42, %v4762_v22  ;;  %v4697_v57 = vadd.f32 1e-05, %v4665_v13  ;;  %v15584_v22 = vld [vmem:[#allocation92_spill] sm:$0xff]  ;;  %v15585_v13 = vld [vmem:[#allocation93_spill] sm:$0xff] }
 0xd21   :  { %15583 = vst [vmem:[#allocation33_spill] sm:$0xff] %v13630_v14  ;;  %v4550_v3 = vmul.f32 %v13628_v41, %v13628_v41  ;;  %5845 = vmatprep.mubr.bf16.mxu0 %v13630_v14  ;;  %v4698_v35 = vadd.f32 1e-05, %v4666_v24  ;;  %6038 = vmatprep.mubr.bf16.mxu1 %v13630_v14  ;;  %v4429_v17 = vmul.f32 0.00390625, %v4387_v7  ;;  %v4835_v53 = vmul.f32 %v13557_v51, %v4759_v34 }
 0xd22   :  { %5846 = vmatmul.mubr.bf16.vlgmr.msra.gmra.mrb[72].mxu0 %v13614_v4  ;;  %6039 = vmatmul.mubr.bf16.vlgmr.msra.gmra.mrb[56].mxu1 %v13614_v4  ;;  %v4390_v28 = vpop.xlane.xlu1 %4389  ;;  %v4912_v58 = vadd.f32 %v13572_v52, %v4836_v46  ;;  %v4914_v25 = vadd.f32 %v13572_v52, %v4838_v21  ;;  %10455 = vrsqrt.f32 %v4697_v57  ;;  %v15586_v34 = vcombine.low %v13474_v47, %v13476_v30 }
 0xd23   :  { %v4638_v37 = vadd.f32 %v4550_v3, %v4549_v11  ;;  %v13646_v8 = vsub.f32 %v15584_v22, %v4429_v17  ;;  %v13649_v24 = vsub.f32 %v15585_v13, %v4429_v17  ;;  %4636 = vadd.xlane.f32.xlu0 %v4635_v29  ;;  %v4430_v7 = vmul.f32 0.00390625, %v4390_v28  ;;  %v15590_v28 = vld [vmem:[#allocation48_spill] sm:$0xff] }
 0xd24   :  { %6200 = vmatpush1.bf16.msra.mxu0 %v15586_v34  ;;  %10457 = vrsqrt.f32 %v4698_v35  ;;  %v4589_v11 = vpop.xlane.xlu0 %4588  ;;  %v13654_v3 = vpack.c.bf16 %v4914_v25, %v4912_v58  ;;  %v4837_v46 = vmul.f32 %v13557_v51, %v4761_v40  ;;  %v4911_v57 = vadd.f32 %v13563_v23, %v4835_v53  ;;  %v15592_v13 = vld [vmem:[#allocation52_spill] sm:$0xff] }
 0xd25   :  { %4639 = vadd.xlane.f32.xlu1 %v4638_v37  ;;  %v15588_v21 = vcombine.high %v13548_v0, %v13550_v32  ;;  %v10452_v17 = vpop.eup %10451  ;;  %v4551_v29 = vmul.f32 %v13646_v8, %v13646_v8  ;;  %v4552_v47 = vmul.f32 %v13649_v24, %v13649_v24  ;;  %v13666_v30 = vsub.f32 %v13360_v31, %v4430_v7  ;;  %v15591_v37 = vld [vmem:[#allocation46_spill] sm:$0xff] }
 0xd26   :  { %15587 = vst [vmem:[#allocation30_spill] sm:$0xff] %v13654_v3  ;;  %v13669_v35 = vsub.f32 %v13367_v26, %v4430_v7  ;;  %v10454_v40 = vpop.eup %10453  ;;  %v4763_v53 = vmul.f32 %v10452_v17, %v15590_v28  ;;  %v4764_v58 = vmul.f32 %v10452_v17, %v15591_v37  ;;  %v4667_v25 = vmul.f32 0.00390625, %v4589_v11  ;;  %5855 = vmatprep.mubr.bf16.mxu0 %v13654_v3  ;;  %v4592_v34 = vpop.xlane.xlu1 %4591  ;;  %v15593_v31 = vld [vmem:[#allocation50_spill] sm:$0xff] }
 0xd27   :  { %6201 = vmatprep.subr.bf16.mxu0 %v15588_v21  ;;  %6048 = vmatprep.mubr.bf16.mxu1 %v13654_v3  ;;  %v4913_v21 = vadd.f32 %v13563_v23, %v4837_v46  ;;  %v4765_v22 = vmul.f32 %v10454_v40, %v15592_v13  ;;  %v4766_v43 = vmul.f32 %v10454_v40, %v15593_v31  ;;  %v4668_v37 = vmul.f32 0.00390625, %v4592_v34 }
 0xd28   :  { %15589 = vst [vmem:[#allocation37_spill] sm:$0xff] %v13669_v35  ;;  %v4553_v7 = vmul.f32 %v13666_v30, %v13666_v30  ;;  %v4554_v28 = vmul.f32 %v13669_v35, %v13669_v35  ;;  %v15594_v11 = vcombine.low %v13548_v0, %v13550_v32  ;;  %v4699_v17 = vadd.f32 1e-05, %v4667_v25  ;;  %v4393_v3 = vpop.xlane.xlu0 %4392 }
 0xd29   :  { %v13685_v26 = vpack.c.bf16 %v4913_v21, %v4911_v57  ;;  %v4641_v46 = vadd.f32 %v4552_v47, %v4551_v29  ;;  %v15596_v13 = vcombine.high %v13552_v33, %v13554_v50  ;;  %v4431_v31 = vmul.f32 0.00390625, %v4393_v3  ;;  %v15597_v3 = vld [vmem:[#allocation99_spill] sm:$0xff] }
 0xd2a   :  { %6202 = vmatpush1.bf16.msra.mxu0 %v15594_v11  ;;  %v4644_v40 = vadd.f32 %v4554_v28, %v4553_v7  ;;  %v4840_v4 = vmul.f32 %v13560_v42, %v4764_v58  ;;  %v4842_v14 = vmul.f32 %v13560_v42, %v4766_v43  ;;  %10459 = vrsqrt.f32 %v4699_v17  ;;  %v4396_v32 = vpop.xlane.xlu1 %4395  ;;  %v15599_v11 = vld [vmem:[#allocation101_spill] sm:$0xff] }
 0xd2b   :  { %15595 = vst [vmem:[#allocation34_spill] sm:$0xff] %v13685_v26  ;;  %6203 = vmatprep.subr.bf16.mxu0 %v15596_v13  ;;  %v4700_v35 = vadd.f32 1e-05, %v4668_v37  ;;  %5856 = vmatmul.mubr.bf16.gmra.mrb[76].mxu0 %v13685_v26  ;;  %v4839_v0 = vmul.f32 %v13557_v51, %v4763_v53  ;;  %v4841_v57 = vmul.f32 %v13557_v51, %v4765_v22  ;;  %v4432_v58 = vmul.f32 0.00390625, %v4396_v32  ;;  %v15601_v37 = vld [vmem:[#allocation63_spill] sm:$0xff]  ;;  %v15602_v13 = vld [vmem:[#allocation26_spill] sm:$0xff] }
 0xd2c   :  { %6049 = vmatmul.mubr.bf16.gmra.mrb[60].mxu1 %v13685_v26  ;;  %v13697_v29 = vsub.f32 %v13374_v49, %v4431_v31  ;;  %v13700_v47 = vsub.f32 %v15597_v3, %v4431_v31  ;;  %4642 = vadd.xlane.f32.xlu0 %v4641_v46  ;;  %v4916_v43 = vadd.f32 %v13572_v52, %v4840_v4  ;;  %v10456_v21 = vpop.eup %10455 }
 0xd2d   :  { %4645 = vadd.xlane.f32.xlu1 %v4644_v40  ;;  %10461 = vrsqrt.f32 %v4700_v35  ;;  %v4918_v25 = vadd.f32 %v13572_v52, %v4842_v14  ;;  %v4915_v34 = vadd.f32 %v13563_v23, %v4839_v0  ;;  %v4917_v53 = vadd.f32 %v13563_v23, %v4841_v57  ;;  %v15600_v35 = vld [vmem:[#allocation103_spill] sm:$0xff]  ;;  %v15605_v40 = vld [vmem:[#allocation24_spill] sm:$0xff]  ;;  %v15606_v0 = vld [vmem:[#allocation22_spill] sm:$0xff] }
 0xd2e   :  { %v15598_v22 = vcombine.low %v13552_v33, %v13554_v50  ;;  %v4555_v7 = vmul.f32 %v13697_v29, %v13697_v29  ;;  %v4556_v28 = vmul.f32 %v13700_v47, %v13700_v47  ;;  %v13714_v4 = vsub.f32 %v15599_v11, %v4432_v58  ;;  %v10458_v17 = vpop.eup %10457 }
 0xd2f   :  { %v13717_v14 = vsub.f32 %v15600_v35, %v4432_v58  ;;  %v4767_v46 = vmul.f32 %v10456_v21, %v15601_v37  ;;  %v4768_v31 = vmul.f32 %v10456_v21, %v15602_v13  ;;  %v13721_v50 = vpack.c.bf16 %v4918_v25, %v4916_v43 }
 0xd30   :  { %6204 = vmatpush1.bf16.msra.mxu0 %v15598_v22  ;;  %v13723_v33 = vpack.c.bf16 %v4917_v53, %v4915_v34  ;;  %v4769_v32 = vmul.f32 %v10458_v17, %v15605_v40  ;;  %v4770_v57 = vmul.f32 %v10458_v17, %v15606_v0  ;;  %v4557_v22 = vmul.f32 %v13714_v4, %v13714_v4  ;;  %v4399_v35 = vpop.xlane.xlu0 %4398 }
 0xd31   :  { %15603 = vst [vmem:[#allocation48_spill] sm:$0xff] %v13721_v50  ;;  %v4558_v58 = vmul.f32 %v13717_v14, %v13717_v14  ;;  %5865 = vmatprep.mubr.bf16.mxu0 %v13721_v50  ;;  %6058 = vmatprep.mubr.bf16.mxu1 %v13721_v50  ;;  %v4433_v21 = vmul.f32 0.00390625, %v4399_v35  ;;  %v4647_v43 = vadd.f32 %v4556_v28, %v4555_v7 }
 0xd32   :  { %15604 = vst [vmem:[#allocation46_spill] sm:$0xff] %v13723_v33  ;;  %v4844_v25 = vmul.f32 %v13560_v42, %v4768_v31  ;;  %v4843_v34 = vmul.f32 %v13557_v51, %v4767_v46  ;;  %v4402_v53 = vpop.xlane.xlu1 %4401  ;;  %v4846_v17 = vmul.f32 %v13560_v42, %v4770_v57  ;;  %v4845_v13 = vmul.f32 %v13557_v51, %v4769_v32 }
 0xd33   :  { %v4650_v37 = vadd.f32 %v4558_v58, %v4557_v22  ;;  %5866 = vmatmul.mubr.bf16.gmra.mrb[80].mxu0 %v13723_v33  ;;  %v13740_v40 = vsub.f32 %v13419_v18, %v4433_v21  ;;  %v13743_v35 = vsub.f32 %v13425_v61, %v4433_v21  ;;  %v4434_v7 = vmul.f32 0.00390625, %v4402_v53  ;;  %4648 = vadd.xlane.f32.xlu0 %v4647_v43 }
 0xd34   :  { %6059 = vmatmul.mubr.bf16.gmra.mrb[64].mxu1 %v13723_v33  ;;  %v4920_v28 = vadd.f32 %v13572_v52, %v4844_v25  ;;  %v4595_v46 = vpop.xlane.xlu0 %4594  ;;  %v4922_v31 = vadd.f32 %v13572_v52, %v4846_v17  ;;  %v4919_v32 = vadd.f32 %v13563_v23, %v4843_v34  ;;  %v4921_v0 = vadd.f32 %v13563_v23, %v4845_v13  ;;  %v10460_v57 = vpop.eup %10459  ;;  %v15610_v25 = vld [vmem:[#allocation43_spill] sm:$0xff]  ;;  %v15615_v33 = vld [vmem:[#allocation40_spill] sm:$0xff] }
 0xd35   :  { %15607 = vst [vmem:[#allocation52_spill] sm:$0xff] %v13743_v35  ;;  %4651 = vadd.xlane.f32.xlu1 %v4650_v37  ;;  %v4559_v22 = vmul.f32 %v13740_v40, %v13740_v40  ;;  %v4560_v58 = vmul.f32 %v13743_v35, %v13743_v35  ;;  %v13754_v21 = vsub.f32 %v13428_v59, %v4434_v7  ;;  %v15611_v37 = vld [vmem:[#allocation67_spill] sm:$0xff]  ;;  %v4669_v34 = vmul.f32 0.00390625, %v4595_v46 }
 0xd36   :  { %v13757_v43 = vsub.f32 %v13431_v9, %v4434_v7  ;;  %v4771_v53 = vmul.f32 %v10460_v57, %v15610_v25  ;;  %v4772_v17 = vmul.f32 %v10460_v57, %v15611_v37  ;;  %v13761_v61 = vpack.c.bf16 %v4922_v31, %v4920_v28  ;;  %v4598_v13 = vpop.xlane.xlu1 %4597  ;;  %v15614_v7 = vld [vmem:[#allocation69_spill] sm:$0xff]  ;;  %v5029_v31 = vld [vmem:[#allocation9 + $0xd0] sm:$0xff] }
 0xd37   :  { %15608 = vst [vmem:[#allocation50_spill] sm:$0xff] %v13754_v21  ;;  %v10462_v18 = vpop.eup %10461  ;;  %v4561_v11 = vmul.f32 %v13754_v21, %v13754_v21  ;;  %v4670_v59 = vmul.f32 0.00390625, %v4598_v13  ;;  %v13767_v49 = vpack.c.bf16 %v4921_v0, %v4919_v32  ;;  %v4701_v50 = vadd.f32 1e-05, %v4669_v34  ;;  %v5033_v57 = vld [vmem:[#allocation9 + $0xf0] sm:$0xff] }
 0xd38   :  { %15609 = vst [vmem:[#allocation63_spill] sm:$0xff] %v13757_v43  ;;  %15612 = vst [vmem:[#allocation26_spill] sm:$0xff] %v13761_v61  ;;  %v4562_v3 = vmul.f32 %v13757_v43, %v13757_v43  ;;  %v4773_v9 = vmul.f32 %v10462_v18, %v15614_v7  ;;  %v4774_v25 = vmul.f32 %v10462_v18, %v15615_v33  ;;  %5875 = vmatprep.mubr.bf16.mxu0 %v13761_v61  ;;  %v4601_v28 = vpop.xlane.xlu0 %4600  ;;  %v5065_v35 = vld [vmem:[#allocation9 + $0x1f0] sm:$0xff] }
 0xd39   :  { %15613 = vst [vmem:[#allocation24_spill] sm:$0xff] %v13767_v49  ;;  %6068 = vmatprep.mubr.bf16.mxu1 %v13761_v61  ;;  %v4653_v46 = vadd.f32 %v4560_v58, %v4559_v22  ;;  %v4702_v37 = vadd.f32 1e-05, %v4670_v59  ;;  %v4671_v26 = vmul.f32 0.00390625, %v4601_v28  ;;  %v4848_v13 = vmul.f32 %v13560_v42, %v4772_v17  ;;  %v5010_v61 = vld [vmem:[#allocation9 + $0x38] sm:$0xff] }
 0xd3a   :  { %v4656_v21 = vadd.f32 %v4562_v3, %v4561_v11  ;;  %10463 = vrsqrt.f32 %v4701_v50  ;;  %v4604_v32 = vpop.xlane.xlu1 %4603  ;;  %v4850_v0 = vmul.f32 %v13560_v42, %v4774_v25  ;;  %v4847_v18 = vmul.f32 %v13557_v51, %v4771_v53  ;;  %v5037_v3 = vld [vmem:[#allocation9 + $0x110] sm:$0xff] }
 0xd3b   :  { %4654 = vadd.xlane.f32.xlu0 %v4653_v46  ;;  %v4849_v33 = vmul.f32 %v13557_v51, %v4773_v9  ;;  %10465 = vrsqrt.f32 %v4702_v37  ;;  %5876 = vmatmul.mubr.bf16.gmra.mrb[84].mxu0 %v13767_v49  ;;  %v4703_v22 = vadd.f32 1e-05, %v4671_v26  ;;  %v4672_v59 = vmul.f32 0.00390625, %v4604_v32  ;;  %v5041_v11 = vld [vmem:[#allocation9 + $0x130] sm:$0xff] }
 0xd3c   :  { %6069 = vmatmul.mubr.bf16.gmra.mrb[68].mxu1 %v13767_v49  ;;  %v8824_v58 = vcombine.low %v5029_v31, %v5033_v57  ;;  %4657 = vadd.xlane.f32.xlu1 %v4656_v21  ;;  %v4607_v50 = vpop.xlane.xlu0 %4606  ;;  %v4924_v17 = vadd.f32 %v13572_v52, %v4848_v13  ;;  %v4926_v34 = vadd.f32 %v13572_v52, %v4850_v0  ;;  %v5045_v46 = vld [vmem:[#allocation9 + $0x150] sm:$0xff]  ;;  %v5006_v49 = vld [vmem:[#allocation9 + $0x18] sm:$0xff] }
 0xd3d   :  { %v4925_v53 = vadd.f32 %v13563_v23, %v4849_v33  ;;  %v8825_v7 = vcombine.high %v5029_v31, %v5033_v57  ;;  %10467 = vrsqrt.f32 %v4703_v22  ;;  %v4704_v9 = vadd.f32 1e-05, %v4672_v59  ;;  %v5049_v26 = vld [vmem:[#allocation9 + $0x170] sm:$0xff]  ;;  %v5014_v31 = vld [vmem:[#allocation9 + $0x58] sm:$0xff] }
 0xd3e   :  { %v4673_v25 = vmul.f32 0.00390625, %v4607_v50  ;;  %v4923_v28 = vadd.f32 %v13563_v23, %v4847_v18  ;;  %v13783_v37 = vpack.c.bf16 %v4926_v34, %v4924_v17  ;;  %v4610_v32 = vpop.xlane.xlu1 %4609  ;;  %v8833_v21 = vcombine.high %v5037_v3, %v5041_v11  ;;  %v5018_v57 = vld [vmem:[#allocation9 + $0x78] sm:$0xff]  ;;  %v5053_v59 = vld [vmem:[#allocation9 + $0x190] sm:$0xff] }
 0xd3f   :  { %6205 = vmatprep.subr.bf16.mxu0 %v8825_v7  ;;  %10469 = vrsqrt.f32 %v4704_v9  ;;  %v4674_v0 = vmul.f32 0.00390625, %v4610_v32  ;;  %v8832_v18 = vcombine.low %v5037_v3, %v5041_v11  ;;  %v8841_v33 = vcombine.high %v5045_v46, %v5049_v26  ;;  %v5057_v50 = vld [vmem:[#allocation9 + $0x1b0] sm:$0xff] }
 0xd40   :  { %15616 = vst [vmem:[#allocation22_spill] sm:$0xff] %v13783_v37  ;;  %v4705_v13 = vadd.f32 1e-05, %v4673_v25  ;;  %v13785_v43 = vpack.c.bf16 %v4925_v53, %v4923_v28  ;;  %6206 = vmatpush1.bf16.msra.mxu0 %v8824_v58  ;;  %5885 = vmatprep.mubr.bf16.mxu0 %v13783_v37  ;;  %v8802_v17 = vcombine.low %v5006_v49, %v5010_v61  ;;  %v13791_v58 = vld [vmem:[#allocation9 + $0x98] sm:$0xff]  ;;  %v15618_v28 = vld [vmem:[#allocation97_spill] sm:$0xff] }
 0xd41   :  { %6078 = vmatprep.mubr.bf16.mxu1 %v13783_v37  ;;  %v4706_v22 = vadd.f32 1e-05, %v4674_v0  ;;  %6207 = vmatprep.subr.bf16.mxu0 %v8833_v21  ;;  %v8803_v34 = vcombine.high %v5006_v49, %v5010_v61  ;;  %v8811_v7 = vcombine.high %v5014_v31, %v5018_v57  ;;  %v13793_v53 = vld [vmem:[#allocation9 + $0xb8] sm:$0xff]  ;;  %v8840_v3 = vcombine.low %v5045_v46, %v5049_v26  ;;  %v15619_v21 = vld [vmem:[#allocation98_spill] sm:$0xff]  ;;  %v5061_v37 = vld [vmem:[#allocation9 + $0x1d0] sm:$0xff] }
 0xd42   :  { %15617 = vst [vmem:[#allocation43_spill] sm:$0xff] %v13785_v43  ;;  %10471 = vrsqrt.f32 %v4705_v13  ;;  %v8849_v11 = vcombine.high %v5053_v59, %v5057_v50  ;;  %v8810_v61 = vcombine.low %v5014_v31, %v5018_v57  ;;  %v15620_v13 = vld [vmem:[#allocation100_spill] sm:$0xff]  ;;  %v8819_v46 = vcombine.high %v13791_v58, %v13793_v53 }
 0xd43   :  { %10473 = vrsqrt.f32 %v4706_v22  ;;  %5886 = vmatmul.mubr.bf16.gmra.mrb[88].mxu0 %v13785_v43  ;;  %6392 = vmatprep.subr.bf16.mxu1 %v8803_v34  ;;  %v15621_v22 = vld [vmem:[#allocation102_spill] sm:$0xff]  ;;  %v8848_v57 = vcombine.low %v5053_v59, %v5057_v50  ;;  %v5069_v59 = vld [vmem:[#allocation9 + $0x210] sm:$0xff] }
 0xd44   :  { %6079 = vmatmul.mubr.bf16.gmra.mrb[72].mxu1 %v13785_v43  ;;  %v10464_v9 = vpop.eup %10463  ;;  %6208 = vmatpush1.bf16.msra.mxu0 %v8832_v18  ;;  %v5073_v50 = vld [vmem:[#allocation9 + $0x230] sm:$0xff] }
 0xd45   :  { %v10466_v25 = vpop.eup %10465  ;;  %v4775_v32 = vmul.f32 %v10464_v9, %v15618_v28  ;;  %v4776_v49 = vmul.f32 %v10464_v9, %v15619_v21  ;;  %6209 = vmatprep.subr.bf16.mxu0 %v8841_v33  ;;  %6393 = vmatpush1.bf16.msra.mxu1 %v8802_v17  ;;  %v8857_v28 = vcombine.high %v5061_v37, %v5065_v35  ;;  %v5030_v21 = vld [vmem:[#allocation9 + $0xd8] sm:$0xff] }
 0xd46   :  { %v4777_v0 = vmul.f32 %v10466_v25, %v15620_v13  ;;  %v4778_v43 = vmul.f32 %v10466_v25, %v15621_v22  ;;  %6394 = vmatprep.subr.bf16.mxu1 %v8811_v7  ;;  %v13816_v22 = vld [vmem:[#allocation9 + $0x118] sm:$0xff] }
 0xd47   :  { %v10468_v26 = vpop.eup %10467  ;;  %v4852_v18 = vmul.f32 %v13560_v42, %v4776_v49  ;;  %v4851_v34 = vmul.f32 %v13557_v51, %v4775_v32 }
 0xd48   :  { %v4780_v9 = vmul.f32 %v10468_v26, %v13422_v62  ;;  %v4854_v33 = vmul.f32 %v13560_v42, %v4778_v43  ;;  %v4853_v31 = vmul.f32 %v13557_v51, %v4777_v0  ;;  %6210 = vmatpush1.bf16.msra.mxu0 %v8840_v3  ;;  %v5034_v3 = vld [vmem:[#allocation9 + $0xf8] sm:$0xff]  ;;  %v4779_v0 = vmul.f32 %v10468_v26, %v13416_v20 }
 0xd49   :  { %v10470_v17 = vpop.eup %10469  ;;  %v4928_v7 = vadd.f32 %v13572_v52, %v4852_v18  ;;  %v4927_v25 = vadd.f32 %v13563_v23, %v4851_v34  ;;  %6211 = vmatprep.subr.bf16.mxu0 %v8849_v11  ;;  %6395 = vmatpush1.bf16.msra.mxu1 %v8810_v61  ;;  %v8818_v61 = vcombine.low %v13791_v58, %v13793_v53 }
 0xd4a   :  { %v4781_v49 = vmul.f32 %v10470_v17, %v13436_v36  ;;  %v4782_v32 = vmul.f32 %v10470_v17, %v13439_v38  ;;  %v4930_v62 = vadd.f32 %v13572_v52, %v4854_v33  ;;  %v4929_v43 = vadd.f32 %v13563_v23, %v4853_v31  ;;  %6396 = vmatprep.subr.bf16.mxu1 %v8819_v46  ;;  %v13818_v36 = vld [vmem:[#allocation9 + $0x138] sm:$0xff]  ;;  %v5077_v17 = vld [vmem:[#allocation9 + $0x250] sm:$0xff] }
 0xd4b   :  { %v4856_v11 = vmul.f32 %v13560_v42, %v4780_v9  ;;  %v8856_v34 = vcombine.low %v5061_v37, %v5065_v35  ;;  %v8827_v9 = vcombine.high %v5030_v21, %v5034_v3  ;;  %v8865_v58 = vcombine.high %v5069_v59, %v5073_v50 }
 0xd4c   :  { %v10472_v13 = vpop.eup %10471  ;;  %v13821_v18 = vpack.c.bf16 %v4930_v62, %v4928_v7  ;;  %v13823_v46 = vpack.c.bf16 %v4929_v43, %v4927_v25  ;;  %6212 = vmatpush1.bf16.msra.mxu0 %v8848_v57  ;;  %v4858_v20 = vmul.f32 %v13560_v42, %v4782_v32  ;;  %v4857_v26 = vmul.f32 %v13557_v51, %v4781_v49  ;;  %v5046_v43 = vld [vmem:[#allocation9 + $0x158] sm:$0xff] }
 0xd4d   :  { %v4784_v38 = vmul.f32 %v10472_v13, %v13453_v6  ;;  %v10474_v33 = vpop.eup %10473  ;;  %6213 = vmatprep.subr.bf16.mxu0 %v8857_v28  ;;  %v8826_v6 = vcombine.low %v5030_v21, %v5034_v3  ;;  %v8835_v31 = vcombine.high %v13816_v22, %v13818_v36  ;;  %v4932_v35 = vadd.f32 %v13572_v52, %v4856_v11  ;;  %v5089_v11 = vld [vmem:[#allocation9 + $0x2b0] sm:$0xff] }
 0xd4e   :  { %v4786_v53 = vmul.f32 %v10474_v33, %v13464_v10  ;;  %5895 = vmatprep.mubr.bf16.mxu0 %v13821_v18  ;;  %6088 = vmatprep.mubr.bf16.mxu1 %v13821_v18  ;;  %v4934_v37 = vadd.f32 %v13572_v52, %v4858_v20  ;;  %v4855_v57 = vmul.f32 %v13557_v51, %v4779_v0  ;;  %v5081_v10 = vld [vmem:[#allocation9 + $0x270] sm:$0xff] }
 0xd4f   :  { %5896 = vmatmul.mubr.bf16.gmra.mrb[92].mxu0 %v13823_v46  ;;  %6089 = vmatmul.mubr.bf16.gmra.mrb[76].mxu1 %v13823_v46  ;;  %v4860_v7 = vmul.f32 %v13560_v42, %v4784_v38  ;;  %v8864_v28 = vcombine.low %v5069_v59, %v5073_v50  ;;  %v4785_v21 = vmul.f32 %v10474_v33, %v13461_v15  ;;  %v5050_v50 = vld [vmem:[#allocation9 + $0x178] sm:$0xff]  ;;  %v5085_v15 = vld [vmem:[#allocation9 + $0x290] sm:$0xff] }
 0xd50   :  { %v4862_v25 = vmul.f32 %v13560_v42, %v4786_v53  ;;  %6214 = vmatpush1.bf16.msra.mxu0 %v8856_v34  ;;  %6397 = vmatpush1.bf16.msra.mxu1 %v8818_v61  ;;  %v13840_v49 = vpack.c.bf16 %v4934_v37, %v4932_v35  ;;  %v4933_v32 = vadd.f32 %v13563_v23, %v4857_v26  ;;  %v5054_v26 = vld [vmem:[#allocation9 + $0x198] sm:$0xff]  ;;  %v5097_v53 = vld [vmem:[#allocation9 + $0x2f0] sm:$0xff] }
 0xd51   :  { %6398 = vmatprep.subr.bf16.mxu1 %v8827_v9  ;;  %6215 = vmatprep.subr.bf16.mxu0 %v8865_v58  ;;  %v8873_v3 = vcombine.high %v5077_v17, %v5081_v10  ;;  %v4783_v0 = vmul.f32 %v10472_v13, %v13450_v44  ;;  %v4931_v59 = vadd.f32 %v13563_v23, %v4855_v57  ;;  %v5062_v57 = vld [vmem:[#allocation9 + $0x1d8] sm:$0xff] }
 0xd52   :  { %v4938_v62 = vadd.f32 %v13572_v52, %v4862_v25  ;;  %5905 = vmatprep.mubr.bf16.mxu0 %v13840_v49  ;;  %6098 = vmatprep.mubr.bf16.mxu1 %v13840_v49  ;;  %v4936_v61 = vadd.f32 %v13572_v52, %v4860_v7  ;;  %v8834_v38 = vcombine.low %v13816_v22, %v13818_v36  ;;  %v5058_v22 = vld [vmem:[#allocation9 + $0x1b8] sm:$0xff]  ;;  %v5093_v36 = vld [vmem:[#allocation9 + $0x2d0] sm:$0xff] }
 0xd53   :  { %v13851_v34 = vpack.c.bf16 %v4933_v32, %v4931_v59  ;;  %v4861_v44 = vmul.f32 %v13557_v51, %v4785_v21  ;;  %v8872_v13 = vcombine.low %v5077_v17, %v5081_v10  ;;  %v8843_v20 = vcombine.high %v5046_v43, %v5050_v50  ;;  %v5066_v7 = vld [vmem:[#allocation9 + $0x1f8] sm:$0xff]  ;;  %v5101_v25 = vld [vmem:[#allocation9 + $0x310] sm:$0xff] }
 0xd54   :  { %6399 = vmatpush1.bf16.msra.mxu1 %v8826_v6  ;;  %6216 = vmatpush1.bf16.msra.mxu0 %v8864_v28  ;;  %v13854_v33 = vpack.c.bf16 %v4938_v62, %v4936_v61  ;;  %v8881_v9 = vcombine.high %v5085_v15, %v5089_v11  ;;  %v4859_v58 = vmul.f32 %v13557_v51, %v4783_v0  ;;  %v5105_v28 = vld [vmem:[#allocation9 + $0x330] sm:$0xff]  ;;  %v5074_v59 = vld [vmem:[#allocation9 + $0x238] sm:$0xff] }
 0xd55   :  { %6400 = vmatprep.subr.bf16.mxu1 %v8835_v31  ;;  %6217 = vmatprep.subr.bf16.mxu0 %v8873_v3  ;;  %v4937_v6 = vadd.f32 %v13563_v23, %v4861_v44  ;;  %v8842_v31 = vcombine.low %v5046_v43, %v5050_v50  ;;  %v8880_v35 = vcombine.low %v5085_v15, %v5089_v11  ;;  %v5070_v3 = vld [vmem:[#allocation9 + $0x218] sm:$0xff]  ;;  %v5109_v50 = vld [vmem:[#allocation9 + $0x350] sm:$0xff] }
 0xd56   :  { %v8851_v37 = vcombine.high %v5054_v26, %v5058_v22  ;;  %v8889_v17 = vcombine.high %v5093_v36, %v5097_v53  ;;  %v4935_v10 = vadd.f32 %v13563_v23, %v4859_v58  ;;  %v8850_v32 = vcombine.low %v5054_v26, %v5058_v22  ;;  %v5113_v15 = vld [vmem:[#allocation9 + $0x370] sm:$0xff]  ;;  %v5078_v44 = vld [vmem:[#allocation9 + $0x258] sm:$0xff] }
 0xd57   :  { %5906 = vmatmul.mubr.bf16.gmra.mrb[96].mxu0 %v13851_v34  ;;  %6099 = vmatmul.mubr.bf16.gmra.mrb[80].mxu1 %v13851_v34  ;;  %v8888_v62 = vcombine.low %v5093_v36, %v5097_v53  ;;  %v8859_v43 = vcombine.high %v5062_v57, %v5066_v7  ;;  %v8897_v0 = vcombine.high %v5101_v25, %v5105_v28  ;;  %v5117_v26 = vld [vmem:[#allocation9 + $0x390] sm:$0xff]  ;;  %v5086_v53 = vld [vmem:[#allocation9 + $0x298] sm:$0xff] }
 0xd58   :  { %5915 = vmatprep.mubr.bf16.mxu0 %v13854_v33  ;;  %6108 = vmatprep.mubr.bf16.mxu1 %v13854_v33  ;;  %v13863_v21 = vpack.c.bf16 %v4937_v6, %v4935_v10  ;;  %v8858_v11 = vcombine.low %v5062_v57, %v5066_v7  ;;  %v8896_v61 = vcombine.low %v5101_v25, %v5105_v28  ;;  %v5094_v25 = vld [vmem:[#allocation9 + $0x2d8] sm:$0xff] }
 0xd59   :  { %6401 = vmatpush1.bf16.msra.mxu1 %v8834_v38  ;;  %6218 = vmatpush1.bf16.msra.mxu0 %v8872_v13  ;;  %v8867_v38 = vcombine.high %v5070_v3, %v5074_v59  ;;  %v8905_v13 = vcombine.high %v5109_v50, %v5113_v15  ;;  %v8866_v58 = vcombine.low %v5070_v3, %v5074_v59  ;;  %v5098_v28 = vld [vmem:[#allocation9 + $0x2f8] sm:$0xff] }
 0xd5a   :  { %6402 = vmatprep.subr.bf16.mxu1 %v8843_v20  ;;  %6219 = vmatprep.subr.bf16.mxu0 %v8881_v9  ;;  %v5082_v20 = vld [vmem:[#allocation9 + $0x278] sm:$0xff]  ;;  %v5121_v9 = vld [vmem:[#allocation9 + $0x3b0] sm:$0xff]  ;;  %v8904_v22 = vcombine.low %v5109_v50, %v5113_v15  ;;  %v8890_v59 = vcombine.low %v5094_v25, %v5098_v28 }
 0xd5b   :  { %v8875_v36 = vcombine.high %v5078_v44, %v5082_v20  ;;  %v8913_v6 = vcombine.high %v5117_v26, %v5121_v9  ;;  %v8874_v57 = vcombine.low %v5078_v44, %v5082_v20  ;;  %v5102_v3 = vld [vmem:[#allocation9 + $0x318] sm:$0xff] }
 0xd5c   :  { %v5110_v15 = vld [vmem:[#allocation9 + $0x358] sm:$0xff] }
 0xd5d   :  { %6403 = vmatpush1.bf16.msra.mxu1 %v8842_v31  ;;  %6220 = vmatpush1.bf16.msra.mxu0 %v8880_v35  ;;  %v5090_v31 = vld [vmem:[#allocation9 + $0x2b8] sm:$0xff]  ;;  %v5125_v35 = vld [vmem:[#allocation9 + $0x3d0] sm:$0xff] }
 0xd5e   :  { %6404 = vmatprep.subr.bf16.mxu1 %v8851_v37  ;;  %6221 = vmatprep.subr.bf16.mxu0 %v8889_v17  ;;  %v5129_v37 = vld [vmem:[#allocation9 + $0x3f0] sm:$0xff]  ;;  %v8912_v17 = vcombine.low %v5117_v26, %v5121_v9  ;;  %v8883_v10 = vcombine.high %v5086_v53, %v5090_v31  ;;  %v5118_v44 = vld [vmem:[#allocation9 + $0x398] sm:$0xff] }
 0xd5f   :  { %5916 = vmatmul.mubr.bf16.gmra.mrb[100].mxu0 %v13863_v21  ;;  %6109 = vmatmul.mubr.bf16.gmra.mrb[84].mxu1 %v13863_v21  ;;  %v8921_v7 = vcombine.high %v5125_v35, %v5129_v37  ;;  %v5126_v9 = vld [vmem:[#allocation9 + $0x3d8] sm:$0xff] }
 0xd61   :  { %6405 = vmatpush1.bf16.msra.mxu1 %v8850_v32  ;;  %6222 = vmatpush1.bf16.msra.mxu0 %v8888_v62  ;;  %v8882_v32 = vcombine.low %v5086_v53, %v5090_v31  ;;  %v8920_v62 = vcombine.low %v5125_v35, %v5129_v37  ;;  %v9933_v53 = vld [vmem:[#allocation11 + $0x4] ss:$8 sps:$4 sm:$0xff]  }
 0xd62   :  { %6406 = vmatprep.subr.bf16.mxu1 %v8859_v43  ;;  %6223 = vmatprep.subr.bf16.mxu0 %v8897_v0  ;;  %v8891_v43 = vcombine.high %v5094_v25, %v5098_v28  ;;  %v5106_v0 = vld [vmem:[#allocation9 + $0x338] sm:$0xff] }
 0xd63   :  { %v8899_v50 = vcombine.high %v5102_v3, %v5106_v0 }
 0xd65   :  { %6407 = vmatpush1.bf16.msra.mxu1 %v8858_v11  ;;  %6224 = vmatpush1.bf16.msra.mxu0 %v8896_v61  ;;  %v5114_v11 = vld [vmem:[#allocation9 + $0x378] sm:$0xff]  ;;  %v8898_v61 = vcombine.low %v5102_v3, %v5106_v0 }
 0xd66   :  { %6408 = vmatprep.subr.bf16.mxu1 %v8867_v38  ;;  %6225 = vmatprep.subr.bf16.mxu0 %v8905_v13  ;;  %v8907_v38 = vcombine.high %v5110_v15, %v5114_v11  ;;  %v5122_v13 = vld [vmem:[#allocation9 + $0x3b8] sm:$0xff]  ;;  %v8906_v20 = vcombine.low %v5110_v15, %v5114_v11 }
 0xd67   :  { %v8915_v26 = vcombine.high %v5118_v44, %v5122_v13 }
 0xd69   :  { %6409 = vmatpush1.bf16.msra.mxu1 %v8866_v58  ;;  %6226 = vmatpush1.bf16.msra.mxu0 %v8904_v22  ;;  %v5130_v58 = vld [vmem:[#allocation9 + $0x3f8] sm:$0xff]  ;;  %v8914_v22 = vcombine.low %v5118_v44, %v5122_v13 }
 0xd6a   :  { %6410 = vmatprep.subr.bf16.mxu1 %v8875_v36  ;;  %6227 = vmatprep.subr.bf16.mxu0 %v8913_v6  ;;  %v8923_v36 = vcombine.high %v5126_v9, %v5130_v58  ;;  %v8922_v6 = vcombine.low %v5126_v9, %v5130_v58 }
 0xd6d   :  { %6411 = vmatpush1.bf16.msra.mxu1 %v8874_v57  ;;  %6228 = vmatpush1.bf16.msra.mxu0 %v8912_v17 }
 0xd6e   :  { %6412 = vmatprep.subr.bf16.mxu1 %v8883_v10  ;;  %6229 = vmatprep.subr.bf16.mxu0 %v8921_v7 }
 0xd71   :  { %6413 = vmatpush1.bf16.msra.mxu1 %v8882_v32  ;;  %6230 = vmatpush1.bf16.msra.mxu0 %v8920_v62 }
 0xd72   :  { %6414 = vmatprep.subr.bf16.mxu1 %v8891_v43  ;;  %7749 = vmatprep.subr.bf16.mxu0 %v9933_v53 }
 0xd75   :  { %6415 = vmatpush1.bf16.msra.mxu1 %v8890_v59 }
 0xd76   :  { %6416 = vmatprep.subr.bf16.mxu1 %v8899_v50 }
 0xd79   :  { %6417 = vmatpush1.bf16.msra.mxu1 %v8898_v61 }
 0xd7a   :  { %6418 = vmatprep.subr.bf16.mxu1 %v8907_v38 }
 0xd7d   :  { %6419 = vmatpush1.bf16.msra.mxu1 %v8906_v20 }
 0xd7e   :  { %6420 = vmatprep.subr.bf16.mxu1 %v8915_v26 }
 0xd81   :  { %6421 = vmatpush1.bf16.msra.mxu1 %v8914_v22 }
 0xd82   :  { %6422 = vmatprep.subr.bf16.mxu1 %v8923_v36 }
 0xd85   :  { %6423 = vmatpush1.bf16.msra.mxu1 %v8922_v6 }
 0xd8e   :  { %v4613_v31 = vpop.xlane.xlu0 %4612 }
 0xd8f   :  { %v4675_v35 = vmul.f32 0.00390625, %v4613_v31 }
 0xd90   :  { %v4616_v37 = vpop.xlane.xlu1 %4615 }
 0xd91   :  { %v4707_v57 = vadd.f32 1e-05, %v4675_v35  ;;  %v4676_v17 = vmul.f32 0.00390625, %v4616_v37 }
 0xd93   :  { %10475 = vrsqrt.f32 %v4707_v57  ;;  %v4708_v10 = vadd.f32 1e-05, %v4676_v17 }
 0xd95   :  { %10477 = vrsqrt.f32 %v4708_v10 }
 0xd96   :  { %v4619_v7 = vpop.xlane.xlu0 %4618 }
 0xd97   :  { %v4677_v25 = vmul.f32 0.00390625, %v4619_v7 }
 0xd98   :  { %v4622_v28 = vpop.xlane.xlu1 %4621 }
 0xd99   :  { %v4709_v32 = vadd.f32 1e-05, %v4677_v25  ;;  %v4678_v62 = vmul.f32 0.00390625, %v4622_v28 }
 0xd9b   :  { %10479 = vrsqrt.f32 %v4709_v32  ;;  %v4710_v43 = vadd.f32 1e-05, %v4678_v62 }
 0xd9d   :  { %v10476_v3 = vpop.eup %10475  ;;  %10481 = vrsqrt.f32 %v4710_v43 }
 0xd9e   :  { %v4787_v0 = vmul.f32 %v10476_v3, %v13483_v60  ;;  %v4788_v59 = vmul.f32 %v10476_v3, %v13486_v12  ;;  %v4625_v50 = vpop.xlane.xlu0 %4624 }
 0xd9f   :  { %v10478_v15 = vpop.eup %10477  ;;  %v4679_v11 = vmul.f32 0.00390625, %v4625_v50 }
 0xda0   :  { %v4789_v61 = vmul.f32 %v10478_v15, %v13493_v63  ;;  %v4790_v38 = vmul.f32 %v10478_v15, %v13496_v55  ;;  %v4628_v44 = vpop.xlane.xlu1 %4627  ;;  %v4864_v13 = vmul.f32 %v13560_v42, %v4788_v59  ;;  %v4863_v20 = vmul.f32 %v13557_v51, %v4787_v0 }
 0xda1   :  { %v4711_v26 = vadd.f32 1e-05, %v4679_v11  ;;  %v4680_v9 = vmul.f32 0.00390625, %v4628_v44 }
 0xda2   :  { %v4866_v58 = vmul.f32 %v13560_v42, %v4790_v38  ;;  %v4865_v60 = vmul.f32 %v13557_v51, %v4789_v61  ;;  %v4940_v22 = vadd.f32 %v13572_v52, %v4864_v13  ;;  %v4939_v63 = vadd.f32 %v13563_v23, %v4863_v20 }
 0xda3   :  { %10483 = vrsqrt.f32 %v4711_v26  ;;  %v4712_v12 = vadd.f32 1e-05, %v4680_v9 }
 0xda4   :  { %v4942_v36 = vadd.f32 %v13572_v52, %v4866_v58  ;;  %v4941_v55 = vadd.f32 %v13563_v23, %v4865_v60 }
 0xda5   :  { %v10480_v53 = vpop.eup %10479  ;;  %10485 = vrsqrt.f32 %v4712_v12 }
 0xda6   :  { %v4791_v6 = vmul.f32 %v10480_v53, %v13503_v19  ;;  %v4792_v31 = vmul.f32 %v10480_v53, %v13506_v2  ;;  %v4631_v35 = vpop.xlane.xlu0 %4630  ;;  %v13881_v37 = vpack.c.bf16 %v4942_v36, %v4940_v22  ;;  %v13883_v57 = vpack.c.bf16 %v4941_v55, %v4939_v63 }
 0xda7   :  { %v10482_v17 = vpop.eup %10481  ;;  %v4681_v10 = vmul.f32 0.00390625, %v4631_v35 }
 0xda8   :  { %v4793_v7 = vmul.f32 %v10482_v17, %v13513_v56  ;;  %v4794_v25 = vmul.f32 %v10482_v17, %v13516_v16  ;;  %5925 = vmatprep.mubr.bf16.mxu0 %v13881_v37  ;;  %6118 = vmatprep.mubr.bf16.mxu1 %v13881_v37  ;;  %v4868_v28 = vmul.f32 %v13560_v42, %v4792_v31 }
 0xda9   :  { %v4713_v19 = vadd.f32 1e-05, %v4681_v10  ;;  %v4634_v32 = vpop.xlane.xlu1 %4633  ;;  %5926 = vmatmul.mubr.bf16.gmra.mrb[104].mxu0 %v13883_v57  ;;  %6119 = vmatmul.mubr.bf16.gmra.mrb[88].mxu1 %v13883_v57  ;;  %v4867_v2 = vmul.f32 %v13557_v51, %v4791_v6 }
 0xdaa   :  { %v4682_v62 = vmul.f32 0.00390625, %v4634_v32  ;;  %v4870_v43 = vmul.f32 %v13560_v42, %v4794_v25  ;;  %v4869_v56 = vmul.f32 %v13557_v51, %v4793_v7  ;;  %v4944_v3 = vadd.f32 %v13572_v52, %v4868_v28 }
 0xdab   :  { %10487 = vrsqrt.f32 %v4713_v19  ;;  %v4943_v15 = vadd.f32 %v13563_v23, %v4867_v2 }
 0xdac   :  { %v4714_v16 = vadd.f32 1e-05, %v4682_v62  ;;  %v4946_v0 = vadd.f32 %v13572_v52, %v4870_v43  ;;  %v4945_v59 = vadd.f32 %v13563_v23, %v4869_v56  ;;  %v15622_v62 = vld [vmem:[#allocation57_spill] sm:$0xff]  ;;  %v15623_v43 = vld [vmem:[#allocation58_spill] sm:$0xff] }
 0xdad   :  { %v10484_v50 = vpop.eup %10483 }
 0xdae   :  { %v4795_v11 = vmul.f32 %v10484_v50, %v13523_v54  ;;  %v4796_v61 = vmul.f32 %v10484_v50, %v13526_v5  ;;  %10489 = vrsqrt.f32 %v4714_v16  ;;  %v13901_v38 = vpack.c.bf16 %v4946_v0, %v4944_v3 }
 0xdaf   :  { %v10486_v44 = vpop.eup %10485  ;;  %v13903_v13 = vpack.c.bf16 %v4945_v59, %v4943_v15 }
 0xdb0   :  { %v4797_v20 = vmul.f32 %v10486_v44, %v13533_v1  ;;  %v4798_v26 = vmul.f32 %v10486_v44, %v13536_v48  ;;  %v4637_v9 = vpop.xlane.xlu0 %4636  ;;  %5935 = vmatprep.mubr.bf16.mxu0 %v13901_v38  ;;  %6128 = vmatprep.mubr.bf16.mxu1 %v13901_v38  ;;  %v4872_v58 = vmul.f32 %v13560_v42, %v4796_v61 }
 0xdb1   :  { %v4683_v54 = vmul.f32 0.00390625, %v4637_v9  ;;  %5936 = vmatmul.mubr.bf16.gmra.mrb[108].mxu0 %v13903_v13  ;;  %6129 = vmatmul.mubr.bf16.gmra.mrb[92].mxu1 %v13903_v13  ;;  %v4871_v5 = vmul.f32 %v13557_v51, %v4795_v11 }
 0xdb2   :  { %v4640_v60 = vpop.xlane.xlu1 %4639  ;;  %v4874_v1 = vmul.f32 %v13560_v42, %v4798_v26  ;;  %v4873_v48 = vmul.f32 %v13557_v51, %v4797_v20  ;;  %v4948_v63 = vadd.f32 %v13572_v52, %v4872_v58 }
 0xdb3   :  { %v4684_v12 = vmul.f32 0.00390625, %v4640_v60  ;;  %v4715_v22 = vadd.f32 1e-05, %v4683_v54  ;;  %v4947_v31 = vadd.f32 %v13563_v23, %v4871_v5  ;;  %v15624_v54 = vld [vmem:[#allocation60_spill] sm:$0xff]  ;;  %v15625_v5 = vld [vmem:[#allocation27_spill] sm:$0xff] }
 0xdb4   :  { %v4950_v55 = vadd.f32 %v13572_v52, %v4874_v1  ;;  %v4949_v53 = vadd.f32 %v13563_v23, %v4873_v48 }
 0xdb5   :  { %v4716_v36 = vadd.f32 1e-05, %v4684_v12  ;;  %v10488_v6 = vpop.eup %10487  ;;  %10491 = vrsqrt.f32 %v4715_v22 }
 0xdb6   :  { %v4799_v35 = vmul.f32 %v10488_v6, %v13566_v39  ;;  %v4800_v17 = vmul.f32 %v10488_v6, %v13569_v27  ;;  %v13921_v10 = vpack.c.bf16 %v4950_v55, %v4948_v63  ;;  %v13923_v7 = vpack.c.bf16 %v4949_v53, %v4947_v31 }
 0xdb7   :  { %10493 = vrsqrt.f32 %v4716_v36 }
 0xdb8   :  { %v10490_v25 = vpop.eup %10489  ;;  %5945 = vmatprep.mubr.bf16.mxu0 %v13921_v10  ;;  %6138 = vmatprep.mubr.bf16.mxu1 %v13921_v10  ;;  %v4876_v32 = vmul.f32 %v13560_v42, %v4800_v17  ;;  %v4875_v2 = vmul.f32 %v13557_v51, %v4799_v35 }
 0xdb9   :  { %v4643_v28 = vpop.xlane.xlu0 %4642  ;;  %v4801_v39 = vmul.f32 %v10490_v25, %v15622_v62  ;;  %v4802_v27 = vmul.f32 %v10490_v25, %v15623_v43  ;;  %5946 = vmatmul.mubr.bf16.gmra.mrb[112].mxu0 %v13923_v7  ;;  %6139 = vmatmul.mubr.bf16.gmra.mrb[96].mxu1 %v13923_v7 }
 0xdba   :  { %v4646_v19 = vpop.xlane.xlu1 %4645  ;;  %v4685_v56 = vmul.f32 0.00390625, %v4643_v28  ;;  %v4952_v15 = vadd.f32 %v13572_v52, %v4876_v32  ;;  %v4951_v61 = vadd.f32 %v13563_v23, %v4875_v2 }
 0xdbb   :  { %v4686_v16 = vmul.f32 0.00390625, %v4646_v19  ;;  %v4878_v59 = vmul.f32 %v13560_v42, %v4802_v27  ;;  %v4877_v50 = vmul.f32 %v13557_v51, %v4801_v39 }
 0xdbc   :  { %v4717_v3 = vadd.f32 1e-05, %v4685_v56 }
 0xdbd   :  { %v4718_v0 = vadd.f32 1e-05, %v4686_v16  ;;  %v4954_v11 = vadd.f32 %v13572_v52, %v4878_v59  ;;  %v4953_v44 = vadd.f32 %v13563_v23, %v4877_v50  ;;  %v15626_v59 = vld [vmem:[#allocation37_spill] sm:$0xff] }
 0xdbe   :  { %10495 = vrsqrt.f32 %v4717_v3 }
 0xdbf   :  { %10497 = vrsqrt.f32 %v4718_v0  ;;  %v10492_v20 = vpop.eup %10491  ;;  %v13939_v26 = vpack.c.bf16 %v4954_v11, %v4952_v15  ;;  %v13941_v9 = vpack.c.bf16 %v4953_v44, %v4951_v61 }
 0xdc0   :  { %v4803_v60 = vmul.f32 %v10492_v20, %v15624_v54  ;;  %v4804_v12 = vmul.f32 %v10492_v20, %v15625_v5  ;;  %v4649_v1 = vpop.xlane.xlu0 %4648 }
 0xdc1   :  { %v10494_v58 = vpop.eup %10493  ;;  %v4687_v63 = vmul.f32 0.00390625, %v4649_v1  ;;  %5955 = vmatprep.mubr.bf16.mxu0 %v13939_v26  ;;  %6148 = vmatprep.mubr.bf16.mxu1 %v13939_v26 }
 0xdc2   :  { %v4652_v48 = vpop.xlane.xlu1 %4651  ;;  %v4805_v22 = vmul.f32 %v10494_v58, %v13625_v45  ;;  %v4806_v36 = vmul.f32 %v10494_v58, %v13628_v41  ;;  %5956 = vmatmul.mubr.bf16.gmra.mrb[116].mxu0 %v13941_v9  ;;  %6149 = vmatmul.mubr.bf16.gmra.mrb[100].mxu1 %v13941_v9  ;;  %v4880_v53 = vmul.f32 %v13560_v42, %v4804_v12 }
 0xdc3   :  { %v4688_v55 = vmul.f32 0.00390625, %v4652_v48  ;;  %v4879_v6 = vmul.f32 %v13557_v51, %v4803_v60  ;;  %v4719_v31 = vadd.f32 1e-05, %v4687_v63 }
 0xdc4   :  { %v4882_v45 = vmul.f32 %v13560_v42, %v4806_v36  ;;  %v4881_v41 = vmul.f32 %v13557_v51, %v4805_v22  ;;  %v4956_v17 = vadd.f32 %v13572_v52, %v4880_v53 }
 0xdc5   :  { %v4720_v35 = vadd.f32 1e-05, %v4688_v55  ;;  %10499 = vrsqrt.f32 %v4719_v31  ;;  %v4955_v28 = vadd.f32 %v13563_v23, %v4879_v6 }
 0xdc6   :  { %v4958_v25 = vadd.f32 %v13572_v52, %v4882_v45  ;;  %v4957_v19 = vadd.f32 %v13563_v23, %v4881_v41 }
 0xdc7   :  { %10501 = vrsqrt.f32 %v4720_v35 }
 0xdc8   :  { %v4655_v32 = vpop.xlane.xlu0 %4654  ;;  %v10496_v2 = vpop.eup %10495  ;;  %v13959_v39 = vpack.c.bf16 %v4958_v25, %v4956_v17  ;;  %v13961_v43 = vpack.c.bf16 %v4957_v19, %v4955_v28  ;;  %v15627_v17 = vld [vmem:[#allocation52_spill] sm:$0xff] }
 0xdc9   :  { %v4689_v62 = vmul.f32 0.00390625, %v4655_v32  ;;  %v10498_v27 = vpop.eup %10497  ;;  %v4807_v56 = vmul.f32 %v10496_v2, %v13646_v8  ;;  %v4808_v16 = vmul.f32 %v10496_v2, %v13649_v24  ;;  %v4658_v3 = vpop.xlane.xlu1 %4657  ;;  %v15628_v2 = vld [vmem:[#allocation50_spill] sm:$0xff] }
 0xdca   :  { %v4809_v0 = vmul.f32 %v10498_v27, %v13666_v30  ;;  %v4810_v50 = vmul.f32 %v10498_v27, %v15626_v59  ;;  %5965 = vmatprep.mubr.bf16.mxu0 %v13959_v39  ;;  %6158 = vmatprep.mubr.bf16.mxu1 %v13959_v39  ;;  %v4690_v11 = vmul.f32 0.00390625, %v4658_v3  ;;  %v15629_v27 = vld [vmem:[#allocation63_spill] sm:$0xff] }
 0xdcb   :  { %v4721_v15 = vadd.f32 1e-05, %v4689_v62  ;;  %5966 = vmatmul.mubr.bf16.gmra.mrb[120].mxu0 %v13961_v43  ;;  %6159 = vmatmul.mubr.bf16.gmra.mrb[104].mxu1 %v13961_v43  ;;  %v4884_v61 = vmul.f32 %v13560_v42, %v4808_v16  ;;  %v4883_v8 = vmul.f32 %v13557_v51, %v4807_v56 }
 0xdcc   :  { %v4722_v24 = vadd.f32 1e-05, %v4690_v11  ;;  %v4886_v30 = vmul.f32 %v13560_v42, %v4810_v50  ;;  %v4885_v44 = vmul.f32 %v13557_v51, %v4809_v0 }
 0xdcd   :  { %10503 = vrsqrt.f32 %v4721_v15  ;;  %v4960_v20 = vadd.f32 %v13572_v52, %v4884_v61  ;;  %v4959_v54 = vadd.f32 %v13563_v23, %v4883_v8 }
 0xdce   :  { %10505 = vrsqrt.f32 %v4722_v24  ;;  %v4962_v58 = vadd.f32 %v13572_v52, %v4886_v30  ;;  %v4961_v60 = vadd.f32 %v13563_v23, %v4885_v44  ;;  %v15631_v24 = vld [vmem:[#allocation108_spill] sm:$0xff]  ;;  %v9939_v44 = vld [vmem:[#allocation11 + $0x24] ss:$8 sps:$4 sm:$0xff]  }
 0xdcf   :  { %v10500_v5 = vpop.eup %10499  ;;  %v9934_v30 = vld [vmem:[#allocation11 + $0x10] ss:$8 sps:$4 sm:$0xff]  }
 0xdd0   :  { %v13979_v12 = vpack.c.bf16 %v4962_v58, %v4960_v20  ;;  %v13981_v1 = vpack.c.bf16 %v4961_v60, %v4959_v54  ;;  %v4811_v22 = vmul.f32 %v10500_v5, %v13697_v29  ;;  %v4812_v36 = vmul.f32 %v10500_v5, %v13700_v47  ;;  %v15633_v20 = vld [vmem:[#allocation35_spill] sm:$0xff]  ;;  %v5131_v54 = vld [vmem:[%s14922_s9] sm:$0xff] }
 0xdd1   :  { %v10502_v48 = vpop.eup %10501  ;;  %v5143_v58 = vsub.s32 2, %v15633_v20  ;;  %v5147_v60 = vsub.s32 3, %v15633_v20  ;;  %v9937_v5 = vld [vmem:[#allocation11 + $0x20] ss:$8 sps:$4 sm:$0xff]  }
 0xdd2   :  { %v4813_v63 = vmul.f32 %v10502_v48, %v13714_v4  ;;  %v4814_v55 = vmul.f32 %v10502_v48, %v13717_v14  ;;  %5975 = vmatprep.mubr.bf16.mxu0 %v13979_v12  ;;  %6168 = vmatprep.mubr.bf16.mxu1 %v13979_v12  ;;  %v4888_v53 = vmul.f32 %v13560_v42, %v4812_v36  ;;  %v9942_v48 = vld [vmem:[#allocation11 + $0x34] ss:$8 sps:$4 sm:$0xff]  }
 0xdd3   :  { %5976 = vmatmul.mubr.bf16.gmra.mrb[124].mxu0 %v13981_v1  ;;  %6169 = vmatmul.mubr.bf16.gmra.mrb[108].mxu1 %v13981_v1  ;;  %v4887_v6 = vmul.f32 %v13557_v51, %v4811_v22  ;;  %v15634_v22 = vld [vmem:[#allocation34_spill] sm:$0xff]  ;;  %v15635_v36 = vld [vmem:[#allocation39_spill] sm:$0xff] }
 0xdd4   :  { %v4890_v29 = vmul.f32 %v13560_v42, %v4814_v55  ;;  %v4889_v47 = vmul.f32 %v13557_v51, %v4813_v63  ;;  %v4964_v4 = vadd.f32 %v13572_v52, %v4888_v53  ;;  %v14041_v63 = vrot.slane %v5131_v54, %v15635_v36  ;;  %v15636_v53 = vld [vmem:[#allocation48_spill] sm:$0xff] }
 0xdd5   :  { %v4963_v35 = vadd.f32 %v13563_v23, %v4887_v6  ;;  %v14043_v55 = vrot.slane %v5131_v54, %v5143_v58  ;;  %v15637_v6 = vld [vmem:[#allocation36_spill] sm:$0xff] }
 0xdd6   :  { %v4966_v14 = vadd.f32 %v13572_v52, %v4890_v29  ;;  %v4965_v45 = vadd.f32 %v13563_v23, %v4889_v47  ;;  %v14048_v29 = vrot.slane %v5131_v54, %v15637_v6  ;;  %v14050_v47 = vrot.slane %v5131_v54, %v5147_v60  ;;  %v15639_v54 = vld [vmem:[#allocation26_spill] sm:$0xff] }
 0xdd7   :  { %v10504_v31 = vpop.eup %10503 }
 0xdd8   :  { %v4815_v41 = vmul.f32 %v10504_v31, %v13740_v40  ;;  %v4816_v25 = vmul.f32 %v10504_v31, %v15627_v17  ;;  %v10506_v28 = vpop.eup %10505  ;;  %v14001_v19 = vpack.c.bf16 %v4966_v14, %v4964_v4  ;;  %v14003_v32 = vpack.c.bf16 %v4965_v45, %v4963_v35  ;;  %v9940_v31 = vld [vmem:[#allocation11 + $0x30] ss:$8 sps:$4 sm:$0xff]   ;;  %v9945_v35 = vld [vmem:[#allocation11 + $0x44] ss:$8 sps:$4 sm:$0xff]  }
 0xdd9   :  { %v4817_v62 = vmul.f32 %v10506_v28, %v15628_v2  ;;  %v4818_v56 = vmul.f32 %v10506_v28, %v15629_v27 }
 0xdda   :  { %v4892_v16 = vmul.f32 %v13560_v42, %v4816_v25  ;;  %v4891_v3 = vmul.f32 %v13557_v51, %v4815_v41  ;;  %5985 = vmatprep.mubr.bf16.mxu0 %v14001_v19  ;;  %6178 = vmatprep.mubr.bf16.mxu1 %v14001_v19 }
 0xddb   :  { %5986 = vmatmul.mubr.bf16.gmra.mrb[128].mxu0 %v14003_v32  ;;  %6179 = vmatmul.mubr.bf16.gmra.mrb[112].mxu1 %v14003_v32  ;;  %v4894_v40 = vmul.f32 %v13560_v42, %v4818_v56  ;;  %v4893_v0 = vmul.f32 %v13557_v51, %v4817_v62  ;;  %v15630_v51 = vld [vmem:[#allocation33_spill] sm:$0xff] }
 0xddc   :  { %v4968_v59 = vadd.f32 %v13572_v52, %v4892_v16  ;;  %v4967_v15 = vadd.f32 %v13563_v23, %v4891_v3  ;;  %v9931_v42 = vld [vmem:[#allocation11] ss:$8 sps:$4 sm:$0xff]  }
 0xddd   :  { %v4970_v50 = vadd.f32 %v13572_v52, %v4894_v40  ;;  %v4969_v11 = vadd.f32 %v13563_v23, %v4893_v0  ;;  %v9936_v52 = vld [vmem:[#allocation11 + $0x14] ss:$8 sps:$4 sm:$0xff]   ;;  %v15632_v23 = vld [vmem:[#allocation30_spill] sm:$0xff] }
 0xdde   :  { %v9943_v0 = vld [vmem:[#allocation11 + $0x40] ss:$8 sps:$4 sm:$0xff]  }
 0xddf   :  { %v14019_v61 = vpack.c.bf16 %v4970_v50, %v4968_v59  ;;  %v14021_v8 = vpack.c.bf16 %v4969_v11, %v4967_v15  ;;  %v9948_v15 = vld [vmem:[#allocation11 + $0x54] ss:$8 sps:$4 sm:$0xff]  }
 0xde1   :  { %5995 = vmatprep.mubr.bf16.mxu0 %v14019_v61  ;;  %6188 = vmatprep.mubr.bf16.mxu1 %v14019_v61 }
 0xde3   :  { %5996 = vmatmul.mubr.bf16.gmra.mrb[132].mxu0 %v14021_v8  ;;  %6189 = vmatmul.mubr.bf16.gmra.mrb[116].mxu1 %v14021_v8 }
 0xde4   :  { %6231 = vmatprep.mubr.bf16.mxu0 %v15630_v51  ;;  %6424 = vmatprep.mubr.bf16.mxu1 %v15630_v51 }
 0xdeb   :  { %6232 = vmatmul.mubr.bf16.vlgmr.msra.gmra.mrb[136].mxu0 %v15631_v24  ;;  %6425 = vmatmul.mubr.bf16.vlgmr.msra.gmra.mrb[120].mxu1 %v15631_v24  ;;  %v15638_v24 = vld [vmem:[#allocation46_spill] sm:$0xff] }
 0xdec   :  { %6241 = vmatprep.mubr.bf16.mxu0 %v15632_v23  ;;  %6434 = vmatprep.mubr.bf16.mxu1 %v15632_v23 }
 0xded   :  { %7750 = vmatpush1.bf16.msra.mxu0 %v9931_v42 }
 0xdee   :  { %7751 = vmatprep.subr.bf16.mxu0 %v9936_v52 }
 0xdf1   :  { %7752 = vmatpush1.bf16.msra.mxu0 %v9934_v30 }
 0xdf2   :  { %7753 = vmatprep.subr.bf16.mxu0 %v9939_v44 }
 0xdf3   :  { %6242 = vmatmul.mubr.bf16.gmra.mrb[140].mxu0 %v15634_v22  ;;  %6435 = vmatmul.mubr.bf16.gmra.mrb[124].mxu1 %v15634_v22 }
 0xdf4   :  { %6251 = vmatprep.mubr.bf16.mxu0 %v15636_v53  ;;  %6444 = vmatprep.mubr.bf16.mxu1 %v15636_v53 }
 0xdf5   :  { %7754 = vmatpush1.bf16.msra.mxu0 %v9937_v5  ;;  %v5847_v4 = vpop.f32.mrb[72].mxu0  ;;  %v6040_v14 = vpop.f32.mrb[56].mxu1 }
 0xdf6   :  { %7755 = vmatprep.subr.bf16.mxu0 %v9942_v48  ;;  %v5848_v45 = vadd.f32 %v5847_v4, %v14041_v63  ;;  %v6041_v41 = vadd.f32 %v6040_v14, %v14043_v55  ;;  %v5849_v17 = vpop.f32.mrb[73].mxu0  ;;  %v6042_v25 = vpop.f32.mrb[57].mxu1  ;;  %v9946_v48 = vld [vmem:[#allocation11 + $0x50] ss:$8 sps:$4 sm:$0xff]   ;;  %v9951_v14 = vld [vmem:[#allocation11 + $0x64] ss:$8 sps:$4 sm:$0xff]  }
 0xdf7   :  { %v5850_v28 = vadd.f32 %v5849_v17, %v14048_v29  ;;  %v6043_v2 = vadd.f32 %v6042_v25, %v14050_v47  ;;  %v5851_v62 = vpop.f32.mrb[74].mxu0  ;;  %v6044_v27 = vpop.f32.mrb[58].mxu1 }
 0xdf8   :  { %v5852_v56 = vadd.f32 %v5851_v62, %v14041_v63  ;;  %v6045_v16 = vadd.f32 %v6044_v27, %v14043_v55  ;;  %v5853_v3 = vpop.f32.mrb[75].mxu0  ;;  %v6046_v40 = vpop.f32.mrb[59].mxu1  ;;  %v6585_v11 = vmax.f32 %v5848_v45, 0.0  ;;  %v6587_v51 = vmax.f32 %v6041_v41, 0.0 }
 0xdf9   :  { %7756 = vmatpush1.bf16.msra.mxu0 %v9940_v31  ;;  %v5854_v59 = vadd.f32 %v5853_v3, %v14048_v29  ;;  %v6047_v50 = vadd.f32 %v6046_v40, %v14050_v47  ;;  %v6586_v23 = vmax.f32 %v5850_v28, 0.0  ;;  %v6588_v30 = vmax.f32 %v6043_v2, 0.0  ;;  %v9949_v40 = vld [vmem:[#allocation11 + $0x60] ss:$8 sps:$4 sm:$0xff]  }
 0xdfa   :  { %7757 = vmatprep.subr.bf16.mxu0 %v9945_v35  ;;  %v6593_v42 = vmax.f32 %v5852_v56, 0.0  ;;  %v6595_v52 = vmax.f32 %v6045_v16, 0.0 }
 0xdfb   :  { %6252 = vmatmul.mubr.bf16.gmra.mrb[144].mxu0 %v15638_v24  ;;  %6445 = vmatmul.mubr.bf16.gmra.mrb[128].mxu1 %v15638_v24  ;;  %v6594_v44 = vmax.f32 %v5854_v59, 0.0  ;;  %v6596_v58 = vmax.f32 %v6047_v50, 0.0  ;;  %v9954_v50 = vld [vmem:[#allocation11 + $0x74] ss:$8 sps:$4 sm:$0xff]  }
 0xdfc   :  { %6261 = vmatprep.mubr.bf16.mxu0 %v15639_v54  ;;  %6454 = vmatprep.mubr.bf16.mxu1 %v15639_v54  ;;  %v14064_v60 = vpack.c.bf16 %v6593_v42, %v6585_v11  ;;  %v14066_v5 = vpack.c.bf16 %v6595_v52, %v6587_v51  ;;  %v15640_v52 = vld [vmem:[#allocation24_spill] sm:$0xff] }
 0xdfd   :  { %7758 = vmatpush1.bf16.msra.mxu0 %v9943_v0  ;;  %v14068_v22 = vpack.c.bf16 %v6594_v44, %v6586_v23  ;;  %v14070_v53 = vpack.c.bf16 %v6596_v58, %v6588_v30  ;;  %v15641_v58 = vld [vmem:[#allocation22_spill] sm:$0xff] }
 0xdfe   :  { %v5857_v31 = vpop.f32.mrb[76].mxu0  ;;  %7759 = vmatprep.subr.bf16.mxu0 %v9948_v15 }
 0xdff   :  { %v6050_v4 = vpop.f32.mrb[60].mxu1  ;;  %v5858_v35 = vadd.f32 %v5857_v31, %v14041_v63  ;;  %v5859_v41 = vpop.f32.mrb[77].mxu0  ;;  %v9952_v31 = vld [vmem:[#allocation11 + $0x70] ss:$8 sps:$4 sm:$0xff]  }
 0xe00   :  { %v6051_v45 = vadd.f32 %v6050_v4, %v14043_v55  ;;  %v6052_v17 = vpop.f32.mrb[61].mxu1  ;;  %v5860_v25 = vadd.f32 %v5859_v41, %v14048_v29  ;;  %v5861_v2 = vpop.f32.mrb[78].mxu0  ;;  %v9957_v41 = vld [vmem:[#allocation11 + $0x84] ss:$8 sps:$4 sm:$0xff]  }
 0xe01   :  { %v6053_v28 = vadd.f32 %v6052_v17, %v14050_v47  ;;  %v6054_v62 = vpop.f32.mrb[62].mxu1  ;;  %v5862_v27 = vadd.f32 %v5861_v2, %v14041_v63  ;;  %v5863_v16 = vpop.f32.mrb[79].mxu0  ;;  %7760 = vmatpush1.bf16.msra.mxu0 %v9946_v48  ;;  %v6601_v15 = vmax.f32 %v5858_v35, 0.0 }
 0xe02   :  { %v6055_v56 = vadd.f32 %v6054_v62, %v14043_v55  ;;  %v6056_v3 = vpop.f32.mrb[63].mxu1  ;;  %v5864_v0 = vadd.f32 %v5863_v16, %v14048_v29  ;;  %7761 = vmatprep.subr.bf16.mxu0 %v9951_v14  ;;  %v6603_v11 = vmax.f32 %v6051_v45, 0.0  ;;  %v6602_v24 = vmax.f32 %v5860_v25, 0.0 }
 0xe03   :  { %v6057_v59 = vadd.f32 %v6056_v3, %v14050_v47  ;;  %v6609_v51 = vmax.f32 %v5862_v27, 0.0  ;;  %6262 = vmatmul.mubr.bf16.gmra.mrb[148].mxu0 %v15640_v52  ;;  %6455 = vmatmul.mubr.bf16.gmra.mrb[132].mxu1 %v15640_v52  ;;  %v6604_v23 = vmax.f32 %v6053_v28, 0.0 }
 0xe04   :  { %v6611_v42 = vmax.f32 %v6055_v56, 0.0  ;;  %v6610_v30 = vmax.f32 %v5864_v0, 0.0  ;;  %6271 = vmatprep.mubr.bf16.mxu0 %v15641_v58  ;;  %6464 = vmatprep.mubr.bf16.mxu1 %v15641_v58 }
 0xe05   :  { %v6612_v44 = vmax.f32 %v6057_v59, 0.0  ;;  %v14084_v54 = vpack.c.bf16 %v6609_v51, %v6601_v15  ;;  %7762 = vmatpush1.bf16.msra.mxu0 %v9949_v40  ;;  %v9960_v51 = vld [vmem:[#allocation11 + $0x94] ss:$8 sps:$4 sm:$0xff]  }
 0xe06   :  { %v14086_v48 = vpack.c.bf16 %v6611_v42, %v6603_v11  ;;  %v14088_v4 = vpack.c.bf16 %v6610_v30, %v6602_v24  ;;  %v5867_v35 = vpop.f32.mrb[80].mxu0  ;;  %7763 = vmatprep.subr.bf16.mxu0 %v9954_v50  ;;  %v9955_v50 = vld [vmem:[#allocation11 + $0x80] ss:$8 sps:$4 sm:$0xff]   ;;  %v15642_v30 = vld [vmem:[#allocation43_spill] sm:$0xff] }
 0xe07   :  { %v14090_v14 = vpack.c.bf16 %v6612_v44, %v6604_v23  ;;  %v6060_v45 = vpop.f32.mrb[64].mxu1  ;;  %v5868_v17 = vadd.f32 %v5867_v35, %v14041_v63  ;;  %v5869_v28 = vpop.f32.mrb[81].mxu0 }
 0xe08   :  { %v6061_v25 = vadd.f32 %v6060_v45, %v14043_v55  ;;  %v6062_v2 = vpop.f32.mrb[65].mxu1  ;;  %v5870_v62 = vadd.f32 %v5869_v28, %v14048_v29  ;;  %v5871_v56 = vpop.f32.mrb[82].mxu0 }
 0xe09   :  { %v6063_v27 = vadd.f32 %v6062_v2, %v14050_v47  ;;  %v6064_v16 = vpop.f32.mrb[66].mxu1  ;;  %v5872_v3 = vadd.f32 %v5871_v56, %v14041_v63  ;;  %v5873_v0 = vpop.f32.mrb[83].mxu0  ;;  %7764 = vmatpush1.bf16.msra.mxu0 %v9952_v31  ;;  %v6617_v42 = vmax.f32 %v5868_v17, 0.0  ;;  %v9958_v17 = vld [vmem:[#allocation11 + $0x90] ss:$8 sps:$4 sm:$0xff]  }
 0xe0a   :  { %v6065_v40 = vadd.f32 %v6064_v16, %v14043_v55  ;;  %v6066_v59 = vpop.f32.mrb[67].mxu1  ;;  %v5874_v15 = vadd.f32 %v5873_v0, %v14048_v29  ;;  %7765 = vmatprep.subr.bf16.mxu0 %v9957_v41  ;;  %v6619_v52 = vmax.f32 %v6061_v25, 0.0  ;;  %v6618_v44 = vmax.f32 %v5870_v62, 0.0  ;;  %v9963_v62 = vld [vmem:[#allocation11 + $0xa4] ss:$8 sps:$4 sm:$0xff]  }
 0xe0b   :  { %v6067_v11 = vadd.f32 %v6066_v59, %v14050_v47  ;;  %v6625_v24 = vmax.f32 %v5872_v3, 0.0  ;;  %6272 = vmatmul.mubr.bf16.gmra.mrb[152].mxu0 %v15642_v30  ;;  %6465 = vmatmul.mubr.bf16.gmra.mrb[136].mxu1 %v15642_v30  ;;  %v6620_v58 = vmax.f32 %v6063_v27, 0.0  ;;  %v9966_v30 = vld [vmem:[#allocation11 + $0xb4] ss:$8 sps:$4 sm:$0xff]  }
 0xe0c   :  { %v6627_v23 = vmax.f32 %v6065_v40, 0.0  ;;  %v6626_v35 = vmax.f32 %v5874_v15, 0.0  ;;  %6281 = vmatprep.mubr.bf16.mxu0 %v13821_v18  ;;  %6474 = vmatprep.mubr.bf16.mxu1 %v13821_v18 }
 0xe0d   :  { %v6628_v45 = vmax.f32 %v6067_v11, 0.0  ;;  %v14104_v31 = vpack.c.bf16 %v6625_v24, %v6617_v42  ;;  %7766 = vmatpush1.bf16.msra.mxu0 %v9955_v50 }
 0xe0e   :  { %v14106_v41 = vpack.c.bf16 %v6627_v23, %v6619_v52  ;;  %v14108_v25 = vpack.c.bf16 %v6626_v35, %v6618_v44  ;;  %v5877_v2 = vpop.f32.mrb[84].mxu0  ;;  %7767 = vmatprep.subr.bf16.mxu0 %v9960_v51  ;;  %v9961_v51 = vld [vmem:[#allocation11 + $0xa0] ss:$8 sps:$4 sm:$0xff]  }
 0xe0f   :  { %v14110_v28 = vpack.c.bf16 %v6628_v45, %v6620_v58  ;;  %v6070_v56 = vpop.f32.mrb[68].mxu1  ;;  %v5878_v27 = vadd.f32 %v5877_v2, %v14041_v63  ;;  %v5879_v3 = vpop.f32.mrb[85].mxu0 }
 0xe10   :  { %v6071_v16 = vadd.f32 %v6070_v56, %v14043_v55  ;;  %v6072_v18 = vpop.f32.mrb[69].mxu1  ;;  %v5880_v40 = vadd.f32 %v5879_v3, %v14048_v29  ;;  %v5881_v59 = vpop.f32.mrb[86].mxu0 }
 0xe11   :  { %v6073_v0 = vadd.f32 %v6072_v18, %v14050_v47  ;;  %v6074_v50 = vpop.f32.mrb[70].mxu1  ;;  %v5882_v15 = vadd.f32 %v5881_v59, %v14041_v63  ;;  %v5883_v42 = vpop.f32.mrb[87].mxu0  ;;  %7768 = vmatpush1.bf16.msra.mxu0 %v9958_v17  ;;  %v6633_v44 = vmax.f32 %v5878_v27, 0.0  ;;  %v9964_v27 = vld [vmem:[#allocation11 + $0xb0] ss:$8 sps:$4 sm:$0xff]  }
 0xe12   :  { %v6075_v11 = vadd.f32 %v6074_v50, %v14043_v55  ;;  %v6076_v52 = vpop.f32.mrb[71].mxu1  ;;  %v5884_v24 = vadd.f32 %v5883_v42, %v14048_v29  ;;  %7769 = vmatprep.subr.bf16.mxu0 %v9963_v62  ;;  %v6635_v58 = vmax.f32 %v6071_v16, 0.0  ;;  %v6634_v2 = vmax.f32 %v5880_v40, 0.0  ;;  %v9969_v40 = vld [vmem:[#allocation11 + $0xc4] ss:$8 sps:$4 sm:$0xff]  }
 0xe13   :  { %v6077_v23 = vadd.f32 %v6076_v52, %v14050_v47  ;;  %v6641_v35 = vmax.f32 %v5882_v15, 0.0  ;;  %6282 = vmatmul.mubr.bf16.gmra.mrb[156].mxu0 %v13823_v46  ;;  %6475 = vmatmul.mubr.bf16.gmra.mrb[140].mxu1 %v13823_v46  ;;  %v6636_v56 = vmax.f32 %v6073_v0, 0.0 }
 0xe14   :  { %v6643_v45 = vmax.f32 %v6075_v11, 0.0  ;;  %v6642_v3 = vmax.f32 %v5884_v24, 0.0  ;;  %6291 = vmatprep.mubr.bf16.mxu0 %v13840_v49  ;;  %6484 = vmatprep.mubr.bf16.mxu1 %v13840_v49 }
 0xe15   :  { %v6644_v18 = vmax.f32 %v6077_v23, 0.0  ;;  %v14124_v17 = vpack.c.bf16 %v6641_v35, %v6633_v44  ;;  %7770 = vmatpush1.bf16.msra.mxu0 %v9961_v51 }
 0xe16   :  { %v14126_v62 = vpack.c.bf16 %v6643_v45, %v6635_v58  ;;  %v14128_v16 = vpack.c.bf16 %v6642_v3, %v6634_v2  ;;  %v5887_v50 = vpop.f32.mrb[88].mxu0  ;;  %7771 = vmatprep.subr.bf16.mxu0 %v9966_v30  ;;  %v9967_v30 = vld [vmem:[#allocation11 + $0xc0] ss:$8 sps:$4 sm:$0xff]  }
 0xe17   :  { %v14130_v59 = vpack.c.bf16 %v6644_v18, %v6636_v56  ;;  %v6080_v46 = vpop.f32.mrb[72].mxu1  ;;  %v5888_v0 = vadd.f32 %v5887_v50, %v14041_v63  ;;  %v5889_v11 = vpop.f32.mrb[89].mxu0  ;;  %v9972_v56 = vld [vmem:[#allocation11 + $0xd4] ss:$8 sps:$4 sm:$0xff]  }
 0xe18   :  { %v6081_v15 = vadd.f32 %v6080_v46, %v14043_v55  ;;  %v6082_v49 = vpop.f32.mrb[73].mxu1  ;;  %v5890_v42 = vadd.f32 %v5889_v11, %v14048_v29  ;;  %v5891_v51 = vpop.f32.mrb[90].mxu0 }
 0xe19   :  { %v6083_v52 = vadd.f32 %v6082_v49, %v14050_v47  ;;  %v6084_v24 = vpop.f32.mrb[74].mxu1  ;;  %v5892_v23 = vadd.f32 %v5891_v51, %v14041_v63  ;;  %v5893_v58 = vpop.f32.mrb[91].mxu0  ;;  %7772 = vmatpush1.bf16.msra.mxu0 %v9964_v27  ;;  %v6649_v3 = vmax.f32 %v5888_v0, 0.0  ;;  %v9970_v0 = vld [vmem:[#allocation11 + $0xd0] ss:$8 sps:$4 sm:$0xff]  }
 0xe1a   :  { %v6085_v44 = vadd.f32 %v6084_v24, %v14043_v55  ;;  %v6086_v35 = vpop.f32.mrb[75].mxu1  ;;  %v5894_v45 = vadd.f32 %v5893_v58, %v14048_v29  ;;  %7773 = vmatprep.subr.bf16.mxu0 %v9969_v40  ;;  %v6651_v18 = vmax.f32 %v6081_v15, 0.0  ;;  %v6650_v11 = vmax.f32 %v5890_v42, 0.0  ;;  %v9973_v42 = vld [vmem:[#allocation11 + $0xe0] ss:$8 sps:$4 sm:$0xff]  }
 0xe1b   :  { %v6087_v2 = vadd.f32 %v6086_v35, %v14050_v47  ;;  %v6657_v50 = vmax.f32 %v5892_v23, 0.0  ;;  %6292 = vmatmul.mubr.bf16.gmra.mrb[160].mxu0 %v13851_v34  ;;  %6485 = vmatmul.mubr.bf16.gmra.mrb[144].mxu1 %v13851_v34  ;;  %v6652_v49 = vmax.f32 %v6083_v52, 0.0  ;;  %v9975_v34 = vld [vmem:[#allocation11 + $0xe4] ss:$8 sps:$4 sm:$0xff]   ;;  %v9978_v58 = vld [vmem:[#allocation11 + $0xf4] ss:$8 sps:$4 sm:$0xff]  }
 0xe1c   :  { %v6659_v46 = vmax.f32 %v6085_v44, 0.0  ;;  %v6658_v51 = vmax.f32 %v5894_v45, 0.0  ;;  %6301 = vmatprep.mubr.bf16.mxu0 %v13854_v33  ;;  %6494 = vmatprep.mubr.bf16.mxu1 %v13854_v33 }
 0xe1d   :  { %v6660_v24 = vmax.f32 %v6087_v2, 0.0  ;;  %v14144_v27 = vpack.c.bf16 %v6657_v50, %v6649_v3  ;;  %7774 = vmatpush1.bf16.msra.mxu0 %v9967_v30 }
 0xe1e   :  { %v14146_v40 = vpack.c.bf16 %v6659_v46, %v6651_v18  ;;  %v14148_v15 = vpack.c.bf16 %v6658_v51, %v6650_v11  ;;  %7775 = vmatprep.subr.bf16.mxu0 %v9972_v56 }
 0xe1f   :  { %v14150_v23 = vpack.c.bf16 %v6660_v24, %v6652_v49  ;;  %v9976_v49 = vld [vmem:[#allocation11 + $0xf0] ss:$8 sps:$4 sm:$0xff]  }
 0xe21   :  { %7776 = vmatpush1.bf16.msra.mxu0 %v9970_v0 }
 0xe22   :  { %v5897_v52 = vpop.f32.mrb[92].mxu0  ;;  %v6090_v44 = vpop.f32.mrb[76].mxu1  ;;  %7777 = vmatprep.subr.bf16.mxu0 %v9975_v34 }
 0xe23   :  { %6302 = vmatmul.mubr.bf16.gmra.mrb[164].mxu0 %v13863_v21  ;;  %6495 = vmatmul.mubr.bf16.gmra.mrb[148].mxu1 %v13863_v21  ;;  %v5898_v33 = vadd.f32 %v5897_v52, %v14041_v63  ;;  %v6091_v35 = vadd.f32 %v6090_v44, %v14043_v55  ;;  %v5899_v30 = vpop.f32.mrb[93].mxu0  ;;  %v6092_v45 = vpop.f32.mrb[77].mxu1 }
 0xe24   :  { %6311 = vmatprep.mubr.bf16.mxu0 %v13881_v37  ;;  %6504 = vmatprep.mubr.bf16.mxu1 %v13881_v37  ;;  %v5900_v2 = vadd.f32 %v5899_v30, %v14048_v29  ;;  %v6093_v56 = vadd.f32 %v6092_v45, %v14050_v47  ;;  %v5901_v3 = vpop.f32.mrb[94].mxu0  ;;  %v6094_v18 = vpop.f32.mrb[78].mxu1  ;;  %v9981_v37 = vld [vmem:[#allocation11 + $0x104] ss:$8 sps:$4 sm:$0xff]  }
 0xe25   :  { %v5902_v50 = vadd.f32 %v5901_v3, %v14041_v63  ;;  %v6095_v21 = vadd.f32 %v6094_v18, %v14043_v55  ;;  %v5903_v46 = vpop.f32.mrb[95].mxu0  ;;  %v6096_v11 = vpop.f32.mrb[79].mxu1  ;;  %7778 = vmatpush1.bf16.msra.mxu0 %v9973_v42  ;;  %v6665_v0 = vmax.f32 %v5898_v33, 0.0  ;;  %v6667_v34 = vmax.f32 %v6091_v35, 0.0 }
 0xe26   :  { %v5904_v51 = vadd.f32 %v5903_v46, %v14048_v29  ;;  %v6097_v24 = vadd.f32 %v6096_v11, %v14050_v47  ;;  %7779 = vmatprep.subr.bf16.mxu0 %v9978_v58  ;;  %v6666_v30 = vmax.f32 %v5900_v2, 0.0  ;;  %v6668_v45 = vmax.f32 %v6093_v56, 0.0 }
 0xe27   :  { %v6673_v52 = vmax.f32 %v5902_v50, 0.0  ;;  %v6675_v44 = vmax.f32 %v6095_v21, 0.0 }
 0xe28   :  { %v6674_v6 = vmax.f32 %v5904_v51, 0.0  ;;  %v6676_v3 = vmax.f32 %v6097_v24, 0.0 }
 0xe29   :  { %v14164_v36 = vpack.c.bf16 %v6673_v52, %v6665_v0  ;;  %v14166_v18 = vpack.c.bf16 %v6675_v44, %v6667_v34  ;;  %7780 = vmatpush1.bf16.msra.mxu0 %v9976_v49 }
 0xe2a   :  { %v14168_v42 = vpack.c.bf16 %v6674_v6, %v6666_v30  ;;  %v14170_v46 = vpack.c.bf16 %v6676_v3, %v6668_v45  ;;  %v5907_v11 = vpop.f32.mrb[96].mxu0  ;;  %v6100_v58 = vpop.f32.mrb[80].mxu1  ;;  %7942 = vmatprep.subr.bf16.mxu0 %v9981_v37 }
 0xe2b   :  { %15643 = vst [vmem:[#allocation67_spill] sm:$0xff] %v14166_v18  ;;  %6312 = vmatmul.mubr.bf16.gmra.mrb[168].mxu0 %v13883_v57  ;;  %6505 = vmatmul.mubr.bf16.gmra.mrb[152].mxu1 %v13883_v57  ;;  %v5908_v33 = vadd.f32 %v5907_v11, %v14041_v63  ;;  %v6101_v35 = vadd.f32 %v6100_v58, %v14043_v55  ;;  %v5909_v2 = vpop.f32.mrb[97].mxu0  ;;  %v6102_v56 = vpop.f32.mrb[81].mxu1 }
 0xe2c   :  { %6321 = vmatprep.mubr.bf16.mxu0 %v13901_v38  ;;  %6514 = vmatprep.mubr.bf16.mxu1 %v13901_v38  ;;  %v5910_v6 = vadd.f32 %v5909_v2, %v14048_v29  ;;  %v6103_v50 = vadd.f32 %v6102_v56, %v14050_v47  ;;  %v5911_v21 = vpop.f32.mrb[98].mxu0  ;;  %v6104_v49 = vpop.f32.mrb[82].mxu1 }
 0xe2d   :  { %v5912_v51 = vadd.f32 %v5911_v21, %v14041_v63  ;;  %v6105_v57 = vadd.f32 %v6104_v49, %v14043_v55  ;;  %v5913_v24 = vpop.f32.mrb[99].mxu0  ;;  %v6106_v37 = vpop.f32.mrb[83].mxu1  ;;  %v6681_v52 = vmax.f32 %v5908_v33, 0.0  ;;  %v6683_v44 = vmax.f32 %v6101_v35, 0.0 }
 0xe2e   :  { %v5914_v0 = vadd.f32 %v5913_v24, %v14048_v29  ;;  %v6107_v34 = vadd.f32 %v6106_v37, %v14050_v47  ;;  %v6682_v45 = vmax.f32 %v5910_v6, 0.0  ;;  %v6684_v3 = vmax.f32 %v6103_v50, 0.0 }
 0xe2f   :  { %v6689_v30 = vmax.f32 %v5912_v51, 0.0  ;;  %v6691_v38 = vmax.f32 %v6105_v57, 0.0 }
 0xe30   :  { %v6690_v11 = vmax.f32 %v5914_v0, 0.0  ;;  %v6692_v58 = vmax.f32 %v6107_v34, 0.0 }
 0xe31   :  { %v14184_v2 = vpack.c.bf16 %v6689_v30, %v6681_v52  ;;  %v14186_v56 = vpack.c.bf16 %v6691_v38, %v6683_v44 }
 0xe32   :  { %v14188_v21 = vpack.c.bf16 %v6690_v11, %v6682_v45  ;;  %v14190_v49 = vpack.c.bf16 %v6692_v58, %v6684_v3  ;;  %v5917_v18 = vpop.f32.mrb[100].mxu0  ;;  %v6110_v24 = vpop.f32.mrb[84].mxu1 }
 0xe33   :  { %15644 = vst [vmem:[#allocation69_spill] sm:$0xff] %v14186_v56  ;;  %6322 = vmatmul.mubr.bf16.gmra.mrb[172].mxu0 %v13903_v13  ;;  %6515 = vmatmul.mubr.bf16.gmra.mrb[156].mxu1 %v13903_v13  ;;  %v5918_v33 = vadd.f32 %v5917_v18, %v14041_v63  ;;  %v6111_v35 = vadd.f32 %v6110_v24, %v14043_v55  ;;  %v5919_v6 = vpop.f32.mrb[101].mxu0  ;;  %v6112_v50 = vpop.f32.mrb[85].mxu1 }
 0xe34   :  { %6331 = vmatprep.mubr.bf16.mxu0 %v13921_v10  ;;  %6524 = vmatprep.mubr.bf16.mxu1 %v13921_v10  ;;  %v5920_v51 = vadd.f32 %v5919_v6, %v14048_v29  ;;  %v6113_v57 = vadd.f32 %v6112_v50, %v14050_v47  ;;  %v5921_v37 = vpop.f32.mrb[102].mxu0  ;;  %v6114_v0 = vpop.f32.mrb[86].mxu1 }
 0xe35   :  { %v5922_v34 = vadd.f32 %v5921_v37, %v14041_v63  ;;  %v6115_v13 = vadd.f32 %v6114_v0, %v14043_v55  ;;  %v5923_v52 = vpop.f32.mrb[103].mxu0  ;;  %v6116_v18 = vpop.f32.mrb[87].mxu1  ;;  %v6697_v38 = vmax.f32 %v5918_v33, 0.0  ;;  %v6699_v45 = vmax.f32 %v6111_v35, 0.0 }
 0xe36   :  { %v5924_v44 = vadd.f32 %v5923_v52, %v14048_v29  ;;  %v6117_v30 = vadd.f32 %v6116_v18, %v14050_v47  ;;  %v6698_v11 = vmax.f32 %v5920_v51, 0.0  ;;  %v6700_v58 = vmax.f32 %v6113_v57, 0.0 }
 0xe37   :  { %v6705_v3 = vmax.f32 %v5922_v34, 0.0  ;;  %v6707_v10 = vmax.f32 %v6115_v13, 0.0 }
 0xe38   :  { %v6706_v24 = vmax.f32 %v5924_v44, 0.0  ;;  %v6708_v6 = vmax.f32 %v6117_v30, 0.0  ;;  %v9997_v44 = vld [vmem:[#allocation11 + $0x160] ss:$8 sps:$4 sm:$0xff]  }
 0xe39   :  { %v14204_v50 = vpack.c.bf16 %v6705_v3, %v6697_v38  ;;  %v14206_v56 = vpack.c.bf16 %v6707_v10, %v6699_v45  ;;  %v10002_v45 = vld [vmem:[#allocation11 + $0x174] ss:$8 sps:$4 sm:$0xff]  }
 0xe3a   :  { %v14208_v37 = vpack.c.bf16 %v6706_v24, %v6698_v11  ;;  %v14210_v0 = vpack.c.bf16 %v6708_v6, %v6700_v58 }
 0xe3b   :  { %6332 = vmatmul.mubr.bf16.gmra.mrb[176].mxu0 %v13923_v7  ;;  %6525 = vmatmul.mubr.bf16.gmra.mrb[160].mxu1 %v13923_v7  ;;  %v9979_v7 = vld [vmem:[#allocation11 + $0x100] ss:$8 sps:$4 sm:$0xff]  }
 0xe3c   :  { %6341 = vmatprep.mubr.bf16.mxu0 %v13939_v26  ;;  %6534 = vmatprep.mubr.bf16.mxu1 %v13939_v26  ;;  %v9984_v26 = vld [vmem:[#allocation11 + $0x114] ss:$8 sps:$4 sm:$0xff]  }
 0xe43   :  { %6342 = vmatmul.mubr.bf16.gmra.mrb[180].mxu0 %v13941_v9  ;;  %6535 = vmatmul.mubr.bf16.gmra.mrb[164].mxu1 %v13941_v9  ;;  %v9982_v9 = vld [vmem:[#allocation11 + $0x110] ss:$8 sps:$4 sm:$0xff]  }
 0xe44   :  { %6351 = vmatprep.mubr.bf16.mxu0 %v13959_v39  ;;  %6544 = vmatprep.mubr.bf16.mxu1 %v13959_v39  ;;  %v9987_v39 = vld [vmem:[#allocation11 + $0x124] ss:$8 sps:$4 sm:$0xff]  }
 0xe4b   :  { %6352 = vmatmul.mubr.bf16.gmra.mrb[184].mxu0 %v13961_v43  ;;  %6545 = vmatmul.mubr.bf16.gmra.mrb[168].mxu1 %v13961_v43  ;;  %v9985_v43 = vld [vmem:[#allocation11 + $0x120] ss:$8 sps:$4 sm:$0xff]  }
 0xe4c   :  { %6361 = vmatprep.mubr.bf16.mxu0 %v13979_v12  ;;  %6554 = vmatprep.mubr.bf16.mxu1 %v13979_v12  ;;  %v9990_v12 = vld [vmem:[#allocation11 + $0x134] ss:$8 sps:$4 sm:$0xff]  }
 0xe53   :  { %6362 = vmatmul.mubr.bf16.gmra.mrb[188].mxu0 %v13981_v1  ;;  %6555 = vmatmul.mubr.bf16.gmra.mrb[172].mxu1 %v13981_v1  ;;  %v9988_v1 = vld [vmem:[#allocation11 + $0x130] ss:$8 sps:$4 sm:$0xff]  }
 0xe54   :  { %6371 = vmatprep.mubr.bf16.mxu0 %v14001_v19  ;;  %6564 = vmatprep.mubr.bf16.mxu1 %v14001_v19  ;;  %v9993_v19 = vld [vmem:[#allocation11 + $0x144] ss:$8 sps:$4 sm:$0xff]  }
 0xe5b   :  { %6372 = vmatmul.mubr.bf16.gmra.mrb[192].mxu0 %v14003_v32  ;;  %6565 = vmatmul.mubr.bf16.gmra.mrb[176].mxu1 %v14003_v32  ;;  %v9991_v32 = vld [vmem:[#allocation11 + $0x140] ss:$8 sps:$4 sm:$0xff]  }
 0xe5c   :  { %6381 = vmatprep.mubr.bf16.mxu0 %v14019_v61  ;;  %6574 = vmatprep.mubr.bf16.mxu1 %v14019_v61  ;;  %v9996_v61 = vld [vmem:[#allocation11 + $0x154] ss:$8 sps:$4 sm:$0xff]  }
 0xe63   :  { %6382 = vmatmul.mubr.bf16.gmra.mrb[196].mxu0 %v14021_v8  ;;  %6575 = vmatmul.mubr.bf16.gmra.mrb[180].mxu1 %v14021_v8  ;;  %v9994_v8 = vld [vmem:[#allocation11 + $0x150] ss:$8 sps:$4 sm:$0xff]  }
 0xe64   :  { %7781 = vmatprep.mubr.bf16.mxu0 %v14068_v22 }
 0xe6b   :  { %7782 = vmatmul.mubr.bf16.vlgmr.msra.gmra.mrb[200].mxu0 %v14064_v60 }
 0xe6c   :  { %7791 = vmatprep.mubr.bf16.mxu0 %v14088_v4  ;;  %7943 = vmatpush1.bf16.msra.mxu0 %v9979_v7 }
 0xe6d   :  { %7944 = vmatprep.subr.bf16.mxu0 %v9984_v26 }
 0xe70   :  { %7945 = vmatpush1.bf16.msra.mxu0 %v9982_v9 }
 0xe71   :  { %7946 = vmatprep.subr.bf16.mxu0 %v9987_v39 }
 0xe73   :  { %7792 = vmatmul.mubr.bf16.gmra.mrb[204].mxu0 %v14084_v54  ;;  %v9999_v54 = vld [vmem:[#allocation11 + $0x164] ss:$8 sps:$4 sm:$0xff]  }
 0xe74   :  { %7801 = vmatprep.mubr.bf16.mxu0 %v14108_v25  ;;  %7947 = vmatpush1.bf16.msra.mxu0 %v9985_v43  ;;  %v10000_v43 = vld [vmem:[#allocation11 + $0x170] ss:$8 sps:$4 sm:$0xff]  }
 0xe75   :  { %7948 = vmatprep.subr.bf16.mxu0 %v9990_v12 }
 0xe78   :  { %7949 = vmatpush1.bf16.msra.mxu0 %v9988_v1 }
 0xe79   :  { %7950 = vmatprep.subr.bf16.mxu0 %v9993_v19 }
 0xe7b   :  { %7802 = vmatmul.mubr.bf16.gmra.mrb[208].mxu0 %v14104_v31 }
 0xe7c   :  { %7811 = vmatprep.mubr.bf16.mxu0 %v14128_v16  ;;  %7951 = vmatpush1.bf16.msra.mxu0 %v9991_v32  ;;  %v5927_v60 = vpop.f32.mrb[104].mxu0  ;;  %v6120_v22 = vpop.f32.mrb[88].mxu1 }
 0xe7d   :  { %7952 = vmatprep.subr.bf16.mxu0 %v9996_v61  ;;  %v5928_v4 = vadd.f32 %v5927_v60, %v14041_v63  ;;  %v6121_v25 = vadd.f32 %v6120_v22, %v14043_v55  ;;  %v5929_v33 = vpop.f32.mrb[105].mxu0  ;;  %v6122_v35 = vpop.f32.mrb[89].mxu1  ;;  %v10005_v61 = vld [vmem:[#allocation11 + $0x184] ss:$8 sps:$4 sm:$0xff]  }
 0xe7e   :  { %v5930_v51 = vadd.f32 %v5929_v33, %v14048_v29  ;;  %v6123_v57 = vadd.f32 %v6122_v35, %v14050_v47  ;;  %v5931_v34 = vpop.f32.mrb[106].mxu0  ;;  %v6124_v31 = vpop.f32.mrb[90].mxu1 }
 0xe7f   :  { %v5932_v16 = vadd.f32 %v5931_v34, %v14041_v63  ;;  %v6125_v13 = vadd.f32 %v6124_v31, %v14043_v55  ;;  %v5933_v52 = vpop.f32.mrb[107].mxu0  ;;  %v6126_v18 = vpop.f32.mrb[91].mxu1  ;;  %v6713_v3 = vmax.f32 %v5928_v4, 0.0  ;;  %v6715_v10 = vmax.f32 %v6121_v25, 0.0  ;;  %v10003_v34 = vld [vmem:[#allocation11 + $0x180] ss:$8 sps:$4 sm:$0xff]  }
 0xe80   :  { %7953 = vmatpush1.bf16.msra.mxu0 %v9994_v8  ;;  %v5934_v30 = vadd.f32 %v5933_v52, %v14048_v29  ;;  %v6127_v38 = vadd.f32 %v6126_v18, %v14050_v47  ;;  %v6714_v24 = vmax.f32 %v5930_v51, 0.0  ;;  %v6716_v6 = vmax.f32 %v6123_v57, 0.0 }
 0xe81   :  { %7954 = vmatprep.subr.bf16.mxu0 %v9999_v54  ;;  %v6721_v11 = vmax.f32 %v5932_v16, 0.0  ;;  %v6723_v58 = vmax.f32 %v6125_v13, 0.0  ;;  %v10008_v13 = vld [vmem:[#allocation11 + $0x194] ss:$8 sps:$4 sm:$0xff]  }
 0xe82   :  { %v6722_v7 = vmax.f32 %v5934_v30, 0.0  ;;  %v6724_v26 = vmax.f32 %v6127_v38, 0.0 }
 0xe83   :  { %7812 = vmatmul.mubr.bf16.gmra.mrb[212].mxu0 %v14124_v17  ;;  %v14250_v9 = vpack.c.bf16 %v6721_v11, %v6713_v3  ;;  %v14252_v39 = vpack.c.bf16 %v6723_v58, %v6715_v10 }
 0xe84   :  { %7821 = vmatprep.mubr.bf16.mxu0 %v14148_v15  ;;  %7955 = vmatpush1.bf16.msra.mxu0 %v9997_v44  ;;  %v14255_v12 = vpack.c.bf16 %v6722_v7, %v6714_v24  ;;  %v14257_v1 = vpack.c.bf16 %v6724_v26, %v6716_v6  ;;  %v5937_v19 = vpop.f32.mrb[108].mxu0  ;;  %v6130_v32 = vpop.f32.mrb[92].mxu1  ;;  %v10006_v24 = vld [vmem:[#allocation11 + $0x190] ss:$8 sps:$4 sm:$0xff]  }
 0xe85   :  { %7956 = vmatprep.subr.bf16.mxu0 %v10002_v45  ;;  %v5938_v8 = vadd.f32 %v5937_v19, %v14041_v63  ;;  %v6131_v17 = vadd.f32 %v6130_v32, %v14043_v55  ;;  %v5939_v60 = vpop.f32.mrb[109].mxu0  ;;  %v6132_v22 = vpop.f32.mrb[93].mxu1  ;;  %v10011_v19 = vld [vmem:[#allocation11 + $0x1a4] ss:$8 sps:$4 sm:$0xff]  }
 0xe86   :  { %v5940_v54 = vadd.f32 %v5939_v60, %v14048_v29  ;;  %v6133_v15 = vadd.f32 %v6132_v22, %v14050_v47  ;;  %v5941_v4 = vpop.f32.mrb[110].mxu0  ;;  %v6134_v25 = vpop.f32.mrb[94].mxu1 }
 0xe87   :  { %v5942_v33 = vadd.f32 %v5941_v4, %v14041_v63  ;;  %v6135_v35 = vadd.f32 %v6134_v25, %v14043_v55  ;;  %v5943_v51 = vpop.f32.mrb[111].mxu0  ;;  %v6136_v57 = vpop.f32.mrb[95].mxu1  ;;  %v6729_v52 = vmax.f32 %v5938_v8, 0.0  ;;  %v6731_v18 = vmax.f32 %v6131_v17, 0.0 }
 0xe88   :  { %7957 = vmatpush1.bf16.msra.mxu0 %v10000_v43  ;;  %v5944_v31 = vadd.f32 %v5943_v51, %v14048_v29  ;;  %v6137_v16 = vadd.f32 %v6136_v57, %v14050_v47  ;;  %v6730_v38 = vmax.f32 %v5940_v54, 0.0  ;;  %v6732_v45 = vmax.f32 %v6133_v15, 0.0  ;;  %v10014_v57 = vld [vmem:[#allocation11 + $0x1b4] ss:$8 sps:$4 sm:$0xff]  }
 0xe89   :  { %7958 = vmatprep.subr.bf16.mxu0 %v10005_v61  ;;  %v6737_v44 = vmax.f32 %v5942_v33, 0.0  ;;  %v6739_v30 = vmax.f32 %v6135_v35, 0.0  ;;  %v10009_v33 = vld [vmem:[#allocation11 + $0x1a0] ss:$8 sps:$4 sm:$0xff]  }
 0xe8a   :  { %v6738_v3 = vmax.f32 %v5944_v31, 0.0  ;;  %v6740_v10 = vmax.f32 %v6137_v16, 0.0 }
 0xe8b   :  { %7822 = vmatmul.mubr.bf16.gmra.mrb[216].mxu0 %v14144_v27  ;;  %v14268_v11 = vpack.c.bf16 %v6737_v44, %v6729_v52  ;;  %v14270_v58 = vpack.c.bf16 %v6739_v30, %v6731_v18 }
 0xe8c   :  { %7831 = vmatprep.mubr.bf16.mxu0 %v14168_v42  ;;  %7959 = vmatpush1.bf16.msra.mxu0 %v10003_v34  ;;  %v14273_v6 = vpack.c.bf16 %v6738_v3, %v6730_v38  ;;  %v14275_v7 = vpack.c.bf16 %v6740_v10, %v6732_v45  ;;  %v5947_v26 = vpop.f32.mrb[112].mxu0  ;;  %v6140_v43 = vpop.f32.mrb[96].mxu1  ;;  %v10012_v3 = vld [vmem:[#allocation11 + $0x1b0] ss:$8 sps:$4 sm:$0xff]  }
 0xe8d   :  { %7960 = vmatprep.subr.bf16.mxu0 %v10008_v13  ;;  %v5948_v32 = vadd.f32 %v5947_v26, %v14041_v63  ;;  %v6141_v27 = vadd.f32 %v6140_v43, %v14043_v55  ;;  %v5949_v61 = vpop.f32.mrb[113].mxu0  ;;  %v6142_v8 = vpop.f32.mrb[97].mxu1  ;;  %v10017_v26 = vld [vmem:[#allocation11 + $0x1c4] ss:$8 sps:$4 sm:$0xff]  }
 0xe8e   :  { %v5950_v17 = vadd.f32 %v5949_v61, %v14048_v29  ;;  %v6143_v42 = vadd.f32 %v6142_v8, %v14050_v47  ;;  %v5951_v60 = vpop.f32.mrb[114].mxu0  ;;  %v6144_v22 = vpop.f32.mrb[98].mxu1 }
 0xe8f   :  { %v5952_v54 = vadd.f32 %v5951_v60, %v14041_v63  ;;  %v6145_v15 = vadd.f32 %v6144_v22, %v14043_v55  ;;  %v5953_v4 = vpop.f32.mrb[115].mxu0  ;;  %v6146_v25 = vpop.f32.mrb[99].mxu1  ;;  %v6745_v34 = vmax.f32 %v5948_v32, 0.0  ;;  %v6747_v31 = vmax.f32 %v6141_v27, 0.0  ;;  %v10015_v60 = vld [vmem:[#allocation11 + $0x1c0] ss:$8 sps:$4 sm:$0xff]  }
 0xe90   :  { %7961 = vmatpush1.bf16.msra.mxu0 %v10006_v24  ;;  %v5954_v35 = vadd.f32 %v5953_v4, %v14048_v29  ;;  %v6147_v51 = vadd.f32 %v6146_v25, %v14050_v47  ;;  %v6746_v52 = vmax.f32 %v5950_v17, 0.0  ;;  %v6748_v18 = vmax.f32 %v6143_v42, 0.0  ;;  %v10020_v25 = vld [vmem:[#allocation11 + $0x1d4] ss:$8 sps:$4 sm:$0xff]  }
 0xe91   :  { %7962 = vmatprep.subr.bf16.mxu0 %v10011_v19  ;;  %v6753_v16 = vmax.f32 %v5952_v54, 0.0  ;;  %v6755_v13 = vmax.f32 %v6145_v15, 0.0 }
 0xe92   :  { %v6754_v44 = vmax.f32 %v5954_v35, 0.0  ;;  %v6756_v30 = vmax.f32 %v6147_v51, 0.0 }
 0xe93   :  { %7832 = vmatmul.mubr.bf16.gmra.mrb[220].mxu0 %v14164_v36  ;;  %v14286_v38 = vpack.c.bf16 %v6753_v16, %v6745_v34  ;;  %v14288_v45 = vpack.c.bf16 %v6755_v13, %v6747_v31 }
 0xe94   :  { %7841 = vmatprep.mubr.bf16.mxu0 %v14188_v21  ;;  %7963 = vmatpush1.bf16.msra.mxu0 %v10009_v33  ;;  %v14291_v10 = vpack.c.bf16 %v6754_v44, %v6746_v52  ;;  %v14293_v24 = vpack.c.bf16 %v6756_v30, %v6748_v18  ;;  %v10018_v44 = vld [vmem:[#allocation11 + $0x1d0] ss:$8 sps:$4 sm:$0xff]  }
 0xe95   :  { %7964 = vmatprep.subr.bf16.mxu0 %v10014_v57  ;;  %v5957_v43 = vpop.f32.mrb[116].mxu0  ;;  %v6150_v19 = vpop.f32.mrb[100].mxu1 }
 0xe96   :  { %v5958_v32 = vadd.f32 %v5957_v43, %v14041_v63  ;;  %v6151_v36 = vadd.f32 %v6150_v19, %v14043_v55  ;;  %v5959_v27 = vpop.f32.mrb[117].mxu0  ;;  %v6152_v61 = vpop.f32.mrb[101].mxu1 }
 0xe97   :  { %v5960_v8 = vadd.f32 %v5959_v27, %v14048_v29  ;;  %v6153_v21 = vadd.f32 %v6152_v61, %v14050_v47  ;;  %v5961_v17 = vpop.f32.mrb[118].mxu0  ;;  %v6154_v42 = vpop.f32.mrb[102].mxu1 }
 0xe98   :  { %7965 = vmatpush1.bf16.msra.mxu0 %v10012_v3  ;;  %v5962_v22 = vadd.f32 %v5961_v17, %v14041_v63  ;;  %v6155_v54 = vadd.f32 %v6154_v42, %v14043_v55  ;;  %v5963_v15 = vpop.f32.mrb[119].mxu0  ;;  %v6156_v4 = vpop.f32.mrb[103].mxu1  ;;  %v6761_v51 = vmax.f32 %v5958_v32, 0.0  ;;  %v6763_v57 = vmax.f32 %v6151_v36, 0.0 }
 0xe99   :  { %7966 = vmatprep.subr.bf16.mxu0 %v10017_v26  ;;  %v5964_v33 = vadd.f32 %v5963_v15, %v14048_v29  ;;  %v6157_v35 = vadd.f32 %v6156_v4, %v14050_v47  ;;  %v6762_v16 = vmax.f32 %v5960_v8, 0.0  ;;  %v6764_v13 = vmax.f32 %v6153_v21, 0.0  ;;  %v10023_v26 = vld [vmem:[#allocation11 + $0x1e4] ss:$8 sps:$4 sm:$0xff]  }
 0xe9a   :  { %v6769_v34 = vmax.f32 %v5962_v22, 0.0  ;;  %v6771_v31 = vmax.f32 %v6155_v54, 0.0 }
 0xe9b   :  { %7842 = vmatmul.mubr.bf16.gmra.mrb[224].mxu0 %v14184_v2  ;;  %v6770_v52 = vmax.f32 %v5964_v33, 0.0  ;;  %v6772_v18 = vmax.f32 %v6157_v35, 0.0 }
 0xe9c   :  { %7851 = vmatprep.mubr.bf16.mxu0 %v14208_v37  ;;  %7967 = vmatpush1.bf16.msra.mxu0 %v10015_v60  ;;  %v14305_v30 = vpack.c.bf16 %v6769_v34, %v6761_v51  ;;  %v14307_v3 = vpack.c.bf16 %v6771_v31, %v6763_v57  ;;  %v10021_v60 = vld [vmem:[#allocation11 + $0x1e0] ss:$8 sps:$4 sm:$0xff]  }
 0xe9d   :  { %7968 = vmatprep.subr.bf16.mxu0 %v10020_v25  ;;  %v14309_v43 = vpack.c.bf16 %v6770_v52, %v6762_v16  ;;  %v14311_v19 = vpack.c.bf16 %v6772_v18, %v6764_v13  ;;  %v10026_v25 = vld [vmem:[#allocation11 + $0x1f4] ss:$8 sps:$4 sm:$0xff]  }
 0xe9e   :  { %v5967_v32 = vpop.f32.mrb[120].mxu0  ;;  %v6160_v2 = vpop.f32.mrb[104].mxu1 }
 0xe9f   :  { %v5968_v36 = vadd.f32 %v5967_v32, %v14041_v63  ;;  %v6161_v27 = vadd.f32 %v6160_v2, %v14043_v55  ;;  %v5969_v61 = vpop.f32.mrb[121].mxu0  ;;  %v6162_v37 = vpop.f32.mrb[105].mxu1  ;;  %v10029_v2 = vld [vmem:[#allocation11 + $0x204] ss:$8 sps:$4 sm:$0xff]  }
 0xea0   :  { %v5970_v8 = vadd.f32 %v5969_v61, %v14048_v29  ;;  %v6163_v21 = vadd.f32 %v6162_v37, %v14050_v47  ;;  %v5971_v17 = vpop.f32.mrb[122].mxu0  ;;  %v6164_v42 = vpop.f32.mrb[106].mxu1  ;;  %7969 = vmatpush1.bf16.msra.mxu0 %v10018_v44  ;;  %v10024_v44 = vld [vmem:[#allocation11 + $0x1f0] ss:$8 sps:$4 sm:$0xff]  }
 0xea1   :  { %v5972_v22 = vadd.f32 %v5971_v17, %v14041_v63  ;;  %v6165_v54 = vadd.f32 %v6164_v42, %v14043_v55  ;;  %v5973_v15 = vpop.f32.mrb[123].mxu0  ;;  %v6166_v4 = vpop.f32.mrb[107].mxu1  ;;  %7970 = vmatprep.subr.bf16.mxu0 %v10023_v26  ;;  %v6777_v51 = vmax.f32 %v5968_v36, 0.0  ;;  %v6779_v57 = vmax.f32 %v6161_v27, 0.0 }
 0xea2   :  { %v5974_v33 = vadd.f32 %v5973_v15, %v14048_v29  ;;  %v6167_v35 = vadd.f32 %v6166_v4, %v14050_v47  ;;  %v6778_v16 = vmax.f32 %v5970_v8, 0.0  ;;  %v6780_v13 = vmax.f32 %v6163_v21, 0.0 }
 0xea3   :  { %v6785_v34 = vmax.f32 %v5972_v22, 0.0  ;;  %v6787_v31 = vmax.f32 %v6165_v54, 0.0  ;;  %7852 = vmatmul.mubr.bf16.gmra.mrb[228].mxu0 %v14204_v50 }
 0xea4   :  { %v6786_v52 = vmax.f32 %v5974_v33, 0.0  ;;  %v6788_v18 = vmax.f32 %v6167_v35, 0.0  ;;  %7861 = vmatprep.mubr.bf16.mxu0 %v14255_v12  ;;  %7971 = vmatpush1.bf16.msra.mxu0 %v10021_v60 }
 0xea5   :  { %v14323_v26 = vpack.c.bf16 %v6785_v34, %v6777_v51  ;;  %v14325_v32 = vpack.c.bf16 %v6787_v31, %v6779_v57  ;;  %7972 = vmatprep.subr.bf16.mxu0 %v10026_v25 }
 0xea6   :  { %v14327_v36 = vpack.c.bf16 %v6786_v52, %v6778_v16  ;;  %v14329_v27 = vpack.c.bf16 %v6788_v18, %v6780_v13  ;;  %v5977_v61 = vpop.f32.mrb[124].mxu0  ;;  %v6170_v50 = vpop.f32.mrb[108].mxu1 }
 0xea7   :  { %v5978_v37 = vadd.f32 %v5977_v61, %v14041_v63  ;;  %v6171_v8 = vadd.f32 %v6170_v50, %v14043_v55  ;;  %v5979_v21 = vpop.f32.mrb[125].mxu0  ;;  %v6172_v12 = vpop.f32.mrb[109].mxu1 }
 0xea8   :  { %v5980_v17 = vadd.f32 %v5979_v21, %v14048_v29  ;;  %v6173_v42 = vadd.f32 %v6172_v12, %v14050_v47  ;;  %v5981_v60 = vpop.f32.mrb[126].mxu0  ;;  %v6174_v22 = vpop.f32.mrb[110].mxu1  ;;  %7973 = vmatpush1.bf16.msra.mxu0 %v10024_v44 }
 0xea9   :  { %v5982_v54 = vadd.f32 %v5981_v60, %v14041_v63  ;;  %v6175_v15 = vadd.f32 %v6174_v22, %v14043_v55  ;;  %v5983_v4 = vpop.f32.mrb[127].mxu0  ;;  %v6176_v25 = vpop.f32.mrb[111].mxu1  ;;  %8135 = vmatprep.subr.bf16.mxu0 %v10029_v2  ;;  %v6793_v51 = vmax.f32 %v5978_v37, 0.0  ;;  %v6795_v57 = vmax.f32 %v6171_v8, 0.0 }
 0xeaa   :  { %v5984_v33 = vadd.f32 %v5983_v4, %v14048_v29  ;;  %v6177_v35 = vadd.f32 %v6176_v25, %v14050_v47  ;;  %v6794_v16 = vmax.f32 %v5980_v17, 0.0  ;;  %v6796_v13 = vmax.f32 %v6173_v42, 0.0 }
 0xeab   :  { %v6801_v34 = vmax.f32 %v5982_v54, 0.0  ;;  %v6803_v31 = vmax.f32 %v6175_v15, 0.0  ;;  %7862 = vmatmul.mubr.bf16.gmra.mrb[232].mxu0 %v14250_v9 }
 0xeac   :  { %v6802_v52 = vmax.f32 %v5984_v33, 0.0  ;;  %v6804_v18 = vmax.f32 %v6177_v35, 0.0  ;;  %7871 = vmatprep.mubr.bf16.mxu0 %v14273_v6 }
 0xead   :  { %v14341_v44 = vpack.c.bf16 %v6801_v34, %v6793_v51  ;;  %v14343_v61 = vpack.c.bf16 %v6803_v31, %v6795_v57 }
 0xeae   :  { %v14345_v2 = vpack.c.bf16 %v6802_v52, %v6794_v16  ;;  %v14347_v50 = vpack.c.bf16 %v6804_v18, %v6796_v13  ;;  %v5987_v37 = vpop.f32.mrb[128].mxu0  ;;  %v6180_v8 = vpop.f32.mrb[112].mxu1 }
 0xeaf   :  { %v5988_v21 = vadd.f32 %v5987_v37, %v14041_v63  ;;  %v6181_v9 = vadd.f32 %v6180_v8, %v14043_v55  ;;  %v5989_v12 = vpop.f32.mrb[129].mxu0  ;;  %v6182_v17 = vpop.f32.mrb[113].mxu1 }
 0xeb0   :  { %v5990_v42 = vadd.f32 %v5989_v12, %v14048_v29  ;;  %v6183_v6 = vadd.f32 %v6182_v17, %v14050_v47  ;;  %v5991_v60 = vpop.f32.mrb[130].mxu0  ;;  %v6184_v22 = vpop.f32.mrb[114].mxu1  ;;  %v5151_v12 = vsub.s32 4, %v15633_v20  ;;  %v5159_v17 = vsub.s32 6, %v15633_v20 }
 0xeb1   :  { %v5992_v54 = vadd.f32 %v5991_v60, %v14041_v63  ;;  %v6185_v15 = vadd.f32 %v6184_v22, %v14043_v55  ;;  %v5993_v4 = vpop.f32.mrb[131].mxu0  ;;  %v6186_v25 = vpop.f32.mrb[115].mxu1  ;;  %v6809_v51 = vmax.f32 %v5988_v21, 0.0  ;;  %v6811_v57 = vmax.f32 %v6181_v9, 0.0 }
 0xeb2   :  { %v5994_v33 = vadd.f32 %v5993_v4, %v14048_v29  ;;  %v6187_v35 = vadd.f32 %v6186_v25, %v14050_v47  ;;  %v6810_v16 = vmax.f32 %v5990_v42, 0.0  ;;  %v6812_v13 = vmax.f32 %v6183_v6, 0.0 }
 0xeb3   :  { %v6817_v34 = vmax.f32 %v5992_v54, 0.0  ;;  %v6819_v31 = vmax.f32 %v6185_v15, 0.0  ;;  %7872 = vmatmul.mubr.bf16.gmra.mrb[236].mxu0 %v14268_v11  ;;  %v5155_v42 = vsub.s32 5, %v15633_v20  ;;  %v5163_v6 = vsub.s32 7, %v15633_v20  ;;  %v10627_v20 = vld [vmem:[%s14922_s9] sm:$0xff] }
 0xeb4   :  { %v6818_v52 = vmax.f32 %v5994_v33, 0.0  ;;  %v6820_v18 = vmax.f32 %v6187_v35, 0.0  ;;  %7881 = vmatprep.mubr.bf16.mxu0 %v14291_v10 }
 0xeb5   :  { %v14359_v37 = vpack.c.bf16 %v6817_v34, %v6809_v51  ;;  %v14361_v8 = vpack.c.bf16 %v6819_v31, %v6811_v57 }
 0xeb6   :  { %v14365_v21 = vpack.c.bf16 %v6818_v52, %v6810_v16  ;;  %v14367_v9 = vpack.c.bf16 %v6820_v18, %v6812_v13  ;;  %v5997_v60 = vpop.f32.mrb[132].mxu0  ;;  %v6190_v11 = vpop.f32.mrb[116].mxu1  ;;  %v14380_v16 = vrot.slane %v10627_v20, %v5151_v12  ;;  %v14382_v13 = vrot.slane %v10627_v20, %v5159_v17 }
 0xeb7   :  { %15645 = vst [vmem:[#allocation40_spill] sm:$0xff] %v14361_v8  ;;  %v5998_v10 = vadd.f32 %v5997_v60, %v14041_v63  ;;  %v6191_v22 = vadd.f32 %v6190_v11, %v14043_v55  ;;  %v5999_v54 = vpop.f32.mrb[133].mxu0  ;;  %v6192_v15 = vpop.f32.mrb[117].mxu1  ;;  %v14386_v60 = vrot.slane %v10627_v20, %v5155_v42  ;;  %v14388_v11 = vrot.slane %v10627_v20, %v5163_v6 }
 0xeb8   :  { %v6000_v4 = vadd.f32 %v5999_v54, %v14048_v29  ;;  %v6193_v25 = vadd.f32 %v6192_v15, %v14050_v47  ;;  %v6001_v33 = vpop.f32.mrb[134].mxu0  ;;  %v6194_v35 = vpop.f32.mrb[118].mxu1 }
 0xeb9   :  { %v6002_v51 = vadd.f32 %v6001_v33, %v14041_v63  ;;  %v6195_v57 = vadd.f32 %v6194_v35, %v14043_v55  ;;  %v6003_v34 = vpop.f32.mrb[135].mxu0  ;;  %v6196_v31 = vpop.f32.mrb[119].mxu1  ;;  %v6825_v63 = vmax.f32 %v5998_v10, 0.0  ;;  %v6827_v55 = vmax.f32 %v6191_v22, 0.0 }
 0xeba   :  { %v6004_v52 = vadd.f32 %v6003_v34, %v14048_v29  ;;  %v6197_v18 = vadd.f32 %v6196_v31, %v14050_v47  ;;  %v6826_v33 = vmax.f32 %v6000_v4, 0.0  ;;  %v6828_v35 = vmax.f32 %v6193_v25, 0.0 }
 0xebb   :  { %v6833_v54 = vmax.f32 %v6002_v51, 0.0  ;;  %v6835_v15 = vmax.f32 %v6195_v57, 0.0  ;;  %7882 = vmatmul.mubr.bf16.gmra.mrb[240].mxu0 %v14286_v38 }
 0xebc   :  { %v6834_v12 = vmax.f32 %v6004_v52, 0.0  ;;  %v6836_v8 = vmax.f32 %v6197_v18, 0.0  ;;  %7891 = vmatprep.mubr.bf16.mxu0 %v14309_v43 }
 0xebd   :  { %v14392_v17 = vpack.c.bf16 %v6833_v54, %v6825_v63  ;;  %v14394_v29 = vpack.c.bf16 %v6835_v15, %v6827_v55 }
 0xebe   :  { %v14396_v47 = vpack.c.bf16 %v6834_v12, %v6826_v33  ;;  %v14398_v42 = vpack.c.bf16 %v6836_v8, %v6828_v35  ;;  %v6233_v6 = vpop.f32.mrb[136].mxu0  ;;  %v6426_v10 = vpop.f32.mrb[120].mxu1 }
 0xebf   :  { %v6234_v22 = vadd.f32 %v6233_v6, %v14380_v16  ;;  %v6427_v38 = vadd.f32 %v6426_v10, %v14382_v13  ;;  %v6235_v4 = vpop.f32.mrb[137].mxu0  ;;  %v6428_v25 = vpop.f32.mrb[121].mxu1 }
 0xec0   :  { %v6236_v51 = vadd.f32 %v6235_v4, %v14386_v60  ;;  %v6429_v43 = vadd.f32 %v6428_v25, %v14388_v11  ;;  %v6237_v57 = vpop.f32.mrb[138].mxu0  ;;  %v6430_v34 = vpop.f32.mrb[122].mxu1 }
 0xec1   :  { %v6238_v31 = vadd.f32 %v6237_v57, %v14380_v16  ;;  %v6431_v20 = vadd.f32 %v6430_v34, %v14382_v13  ;;  %v6239_v8 = vpop.f32.mrb[139].mxu0  ;;  %v6432_v52 = vpop.f32.mrb[123].mxu1  ;;  %v6589_v55 = vmax.f32 %v6234_v22, 0.0  ;;  %v6591_v54 = vmax.f32 %v6427_v38, 0.0 }
 0xec2   :  { %v6240_v18 = vadd.f32 %v6239_v8, %v14386_v60  ;;  %v6433_v63 = vadd.f32 %v6432_v52, %v14388_v11  ;;  %v6590_v35 = vmax.f32 %v6236_v51, 0.0  ;;  %v6592_v12 = vmax.f32 %v6429_v43, 0.0 }
 0xec3   :  { %v6597_v15 = vmax.f32 %v6238_v31, 0.0  ;;  %v6599_v33 = vmax.f32 %v6431_v20, 0.0  ;;  %7892 = vmatmul.mubr.bf16.gmra.mrb[244].mxu0 %v14305_v30 }
 0xec4   :  { %v6598_v6 = vmax.f32 %v6240_v18, 0.0  ;;  %v6600_v10 = vmax.f32 %v6433_v63, 0.0  ;;  %7901 = vmatprep.mubr.bf16.mxu0 %v14327_v36 }
 0xec5   :  { %v14410_v4 = vpack.c.bf16 %v6597_v15, %v6589_v55  ;;  %v14412_v25 = vpack.c.bf16 %v6599_v33, %v6591_v54 }
 0xec6   :  { %v14414_v57 = vpack.c.bf16 %v6598_v6, %v6590_v35  ;;  %v14416_v34 = vpack.c.bf16 %v6600_v10, %v6592_v12  ;;  %v6243_v22 = vpop.f32.mrb[140].mxu0  ;;  %v6436_v38 = vpop.f32.mrb[124].mxu1 }
 0xec7   :  { %15646 = vst [vmem:[#allocation97_spill] sm:$0xff] %v14412_v25  ;;  %v6244_v31 = vadd.f32 %v6243_v22, %v14380_v16  ;;  %v6437_v30 = vadd.f32 %v6436_v38, %v14382_v13  ;;  %v6245_v51 = vpop.f32.mrb[141].mxu0  ;;  %v6438_v43 = vpop.f32.mrb[125].mxu1 }
 0xec8   :  { %15647 = vst [vmem:[#allocation98_spill] sm:$0xff] %v14416_v34  ;;  %v6246_v20 = vadd.f32 %v6245_v51, %v14386_v60  ;;  %v6439_v36 = vadd.f32 %v6438_v43, %v14388_v11  ;;  %v6247_v8 = vpop.f32.mrb[142].mxu0  ;;  %v6440_v52 = vpop.f32.mrb[126].mxu1 }
 0xec9   :  { %v6248_v18 = vadd.f32 %v6247_v8, %v14380_v16  ;;  %v6441_v63 = vadd.f32 %v6440_v52, %v14382_v13  ;;  %v6249_v55 = vpop.f32.mrb[143].mxu0  ;;  %v6442_v54 = vpop.f32.mrb[127].mxu1  ;;  %v6605_v35 = vmax.f32 %v6244_v31, 0.0  ;;  %v6607_v12 = vmax.f32 %v6437_v30, 0.0 }
 0xeca   :  { %v6250_v15 = vadd.f32 %v6249_v55, %v14386_v60  ;;  %v6443_v33 = vadd.f32 %v6442_v54, %v14388_v11  ;;  %v6606_v22 = vmax.f32 %v6246_v20, 0.0  ;;  %v6608_v38 = vmax.f32 %v6439_v36, 0.0 }
 0xecb   :  { %v6613_v6 = vmax.f32 %v6248_v18, 0.0  ;;  %v6615_v10 = vmax.f32 %v6441_v63, 0.0  ;;  %7902 = vmatmul.mubr.bf16.gmra.mrb[248].mxu0 %v14323_v26 }
 0xecc   :  { %v6614_v51 = vmax.f32 %v6250_v15, 0.0  ;;  %v6616_v43 = vmax.f32 %v6443_v33, 0.0  ;;  %7911 = vmatprep.mubr.bf16.mxu0 %v14345_v2 }
 0xecd   :  { %v14428_v8 = vpack.c.bf16 %v6613_v6, %v6605_v35  ;;  %v14430_v52 = vpack.c.bf16 %v6615_v10, %v6607_v12 }
 0xece   :  { %v14432_v25 = vpack.c.bf16 %v6614_v51, %v6606_v22  ;;  %v14434_v55 = vpack.c.bf16 %v6616_v43, %v6608_v38  ;;  %v6253_v31 = vpop.f32.mrb[144].mxu0  ;;  %v6446_v30 = vpop.f32.mrb[128].mxu1 }
 0xecf   :  { %15648 = vst [vmem:[#allocation100_spill] sm:$0xff] %v14430_v52  ;;  %v6254_v18 = vadd.f32 %v6253_v31, %v14380_v16  ;;  %v6447_v26 = vadd.f32 %v6446_v30, %v14382_v13  ;;  %v6255_v20 = vpop.f32.mrb[145].mxu0  ;;  %v6448_v36 = vpop.f32.mrb[129].mxu1 }
 0xed0   :  { %15649 = vst [vmem:[#allocation102_spill] sm:$0xff] %v14434_v55  ;;  %v6256_v63 = vadd.f32 %v6255_v20, %v14386_v60  ;;  %v6449_v2 = vadd.f32 %v6448_v36, %v14388_v11  ;;  %v6257_v54 = vpop.f32.mrb[146].mxu0  ;;  %v6450_v15 = vpop.f32.mrb[130].mxu1 }
 0xed1   :  { %v6258_v33 = vadd.f32 %v6257_v54, %v14380_v16  ;;  %v6451_v35 = vadd.f32 %v6450_v15, %v14382_v13  ;;  %v6259_v12 = vpop.f32.mrb[147].mxu0  ;;  %v6452_v6 = vpop.f32.mrb[131].mxu1  ;;  %v6621_v38 = vmax.f32 %v6254_v18, 0.0  ;;  %v6623_v51 = vmax.f32 %v6447_v26, 0.0 }
 0xed2   :  { %v6260_v10 = vadd.f32 %v6259_v12, %v14386_v60  ;;  %v6453_v22 = vadd.f32 %v6452_v6, %v14388_v11  ;;  %v6622_v30 = vmax.f32 %v6256_v63, 0.0  ;;  %v6624_v20 = vmax.f32 %v6449_v2, 0.0 }
 0xed3   :  { %v6629_v43 = vmax.f32 %v6258_v33, 0.0  ;;  %v6631_v31 = vmax.f32 %v6451_v35, 0.0  ;;  %7912 = vmatmul.mubr.bf16.gmra.mrb[252].mxu0 %v14341_v44 }
 0xed4   :  { %v6630_v36 = vmax.f32 %v6260_v10, 0.0  ;;  %v6632_v52 = vmax.f32 %v6453_v22, 0.0  ;;  %7921 = vmatprep.mubr.bf16.mxu0 %v14365_v21 }
 0xed5   :  { %v14446_v54 = vpack.c.bf16 %v6629_v43, %v6621_v38  ;;  %v14448_v15 = vpack.c.bf16 %v6631_v31, %v6623_v51 }
 0xed6   :  { %v14450_v55 = vpack.c.bf16 %v6630_v36, %v6622_v30  ;;  %v14452_v12 = vpack.c.bf16 %v6632_v52, %v6624_v20  ;;  %v6263_v18 = vpop.f32.mrb[148].mxu0  ;;  %v6456_v26 = vpop.f32.mrb[132].mxu1 }
 0xed7   :  { %15650 = vst [vmem:[#allocation57_spill] sm:$0xff] %v14448_v15  ;;  %v6264_v33 = vadd.f32 %v6263_v18, %v14380_v16  ;;  %v6457_v44 = vadd.f32 %v6456_v26, %v14382_v13  ;;  %v6265_v63 = vpop.f32.mrb[149].mxu0  ;;  %v6458_v2 = vpop.f32.mrb[133].mxu1 }
 0xed8   :  { %15651 = vst [vmem:[#allocation58_spill] sm:$0xff] %v14452_v12  ;;  %v6266_v35 = vadd.f32 %v6265_v63, %v14386_v60  ;;  %v6459_v21 = vadd.f32 %v6458_v2, %v14388_v11  ;;  %v6267_v6 = vpop.f32.mrb[150].mxu0  ;;  %v6460_v10 = vpop.f32.mrb[134].mxu1 }
 0xed9   :  { %v6268_v22 = vadd.f32 %v6267_v6, %v14380_v16  ;;  %v6461_v38 = vadd.f32 %v6460_v10, %v14382_v13  ;;  %v6269_v52 = vpop.f32.mrb[151].mxu0  ;;  %v6462_v51 = vpop.f32.mrb[135].mxu1  ;;  %v6637_v30 = vmax.f32 %v6264_v33, 0.0  ;;  %v6639_v20 = vmax.f32 %v6457_v44, 0.0 }
 0xeda   :  { %v6270_v43 = vadd.f32 %v6269_v52, %v14386_v60  ;;  %v6463_v31 = vadd.f32 %v6462_v51, %v14388_v11  ;;  %v6638_v26 = vmax.f32 %v6266_v35, 0.0  ;;  %v6640_v63 = vmax.f32 %v6459_v21, 0.0 }
 0xedb   :  { %v6645_v36 = vmax.f32 %v6268_v22, 0.0  ;;  %v6647_v18 = vmax.f32 %v6461_v38, 0.0  ;;  %7922 = vmatmul.mubr.bf16.gmra.mrb[0].mxu0 %v14359_v37 }
 0xedc   :  { %v6646_v2 = vmax.f32 %v6270_v43, 0.0  ;;  %v6648_v15 = vmax.f32 %v6463_v31, 0.0  ;;  %7931 = vmatprep.mubr.bf16.mxu0 %v14396_v47 }
 0xedd   :  { %v14464_v6 = vpack.c.bf16 %v6645_v36, %v6637_v30  ;;  %v14466_v10 = vpack.c.bf16 %v6647_v18, %v6639_v20 }
 0xede   :  { %v14468_v12 = vpack.c.bf16 %v6646_v2, %v6638_v26  ;;  %v14470_v52 = vpack.c.bf16 %v6648_v15, %v6640_v63  ;;  %v6273_v33 = vpop.f32.mrb[152].mxu0  ;;  %v6466_v44 = vpop.f32.mrb[136].mxu1 }
 0xedf   :  { %15652 = vst [vmem:[#allocation60_spill] sm:$0xff] %v14466_v10  ;;  %v6274_v22 = vadd.f32 %v6273_v33, %v14380_v16  ;;  %v6467_v37 = vadd.f32 %v6466_v44, %v14382_v13  ;;  %v6275_v35 = vpop.f32.mrb[153].mxu0  ;;  %v6468_v21 = vpop.f32.mrb[137].mxu1 }
 0xee0   :  { %15653 = vst [vmem:[#allocation27_spill] sm:$0xff] %v14470_v52  ;;  %v6276_v38 = vadd.f32 %v6275_v35, %v14386_v60  ;;  %v6469_v47 = vadd.f32 %v6468_v21, %v14388_v11  ;;  %v6277_v51 = vpop.f32.mrb[154].mxu0  ;;  %v6470_v43 = vpop.f32.mrb[138].mxu1 }
 0xee1   :  { %v6278_v31 = vadd.f32 %v6277_v51, %v14380_v16  ;;  %v6471_v30 = vadd.f32 %v6470_v43, %v14382_v13  ;;  %v6279_v15 = vpop.f32.mrb[155].mxu0  ;;  %v6472_v20 = vpop.f32.mrb[139].mxu1  ;;  %v6653_v26 = vmax.f32 %v6274_v22, 0.0  ;;  %v6655_v63 = vmax.f32 %v6467_v37, 0.0 }
 0xee2   :  { %v6280_v36 = vadd.f32 %v6279_v15, %v14386_v60  ;;  %v6473_v18 = vadd.f32 %v6472_v20, %v14388_v11  ;;  %v6654_v44 = vmax.f32 %v6276_v38, 0.0  ;;  %v6656_v35 = vmax.f32 %v6469_v47, 0.0 }
 0xee3   :  { %v6661_v2 = vmax.f32 %v6278_v31, 0.0  ;;  %v6663_v33 = vmax.f32 %v6471_v30, 0.0  ;;  %7932 = vmatmul.mubr.bf16.gmra.mrb[4].mxu0 %v14392_v17 }
 0xee4   :  { %v6662_v21 = vmax.f32 %v6280_v36, 0.0  ;;  %v6664_v10 = vmax.f32 %v6473_v18, 0.0  ;;  %7974 = vmatprep.mubr.bf16.mxu0 %v14070_v53  ;;  %v10027_v18 = vld [vmem:[#allocation11 + $0x200] ss:$8 sps:$4 sm:$0xff]  }
 0xee5   :  { %v14482_v51 = vpack.c.bf16 %v6661_v2, %v6653_v26  ;;  %v14484_v43 = vpack.c.bf16 %v6663_v33, %v6655_v63  ;;  %v10032_v33 = vld [vmem:[#allocation11 + $0x214] ss:$8 sps:$4 sm:$0xff]  }
 0xee6   :  { %v14486_v52 = vpack.c.bf16 %v6662_v21, %v6654_v44  ;;  %v14488_v15 = vpack.c.bf16 %v6664_v10, %v6656_v35  ;;  %v6283_v22 = vpop.f32.mrb[156].mxu0  ;;  %v6476_v37 = vpop.f32.mrb[140].mxu1 }
 0xee7   :  { %15654 = vst [vmem:[#allocation37_spill] sm:$0xff] %v14482_v51  ;;  %15655 = vst [vmem:[#allocation52_spill] sm:$0xff] %v14484_v43  ;;  %v6284_v31 = vadd.f32 %v6283_v22, %v14380_v16  ;;  %v6477_v17 = vadd.f32 %v6476_v37, %v14382_v13  ;;  %v6285_v38 = vpop.f32.mrb[157].mxu0  ;;  %v6478_v47 = vpop.f32.mrb[141].mxu1 }
 0xee8   :  { %15656 = vst [vmem:[#allocation50_spill] sm:$0xff] %v14488_v15  ;;  %v6286_v30 = vadd.f32 %v6285_v38, %v14386_v60  ;;  %v6479_v53 = vadd.f32 %v6478_v47, %v14388_v11  ;;  %v6287_v20 = vpop.f32.mrb[158].mxu0  ;;  %v6480_v36 = vpop.f32.mrb[142].mxu1 }
 0xee9   :  { %v6288_v26 = vadd.f32 %v6287_v20, %v14380_v16  ;;  %v6481_v10 = vadd.f32 %v6480_v36, %v14382_v13  ;;  %v6289_v63 = vpop.f32.mrb[159].mxu0  ;;  %v6482_v2 = vpop.f32.mrb[143].mxu1  ;;  %v6669_v21 = vmax.f32 %v6284_v31, 0.0  ;;  %v6671_v22 = vmax.f32 %v6477_v17, 0.0  ;;  %v10030_v20 = vld [vmem:[#allocation11 + $0x210] ss:$8 sps:$4 sm:$0xff]  }
 0xeea   :  { %v6290_v44 = vadd.f32 %v6289_v63, %v14386_v60  ;;  %v6483_v35 = vadd.f32 %v6482_v2, %v14388_v11  ;;  %v6670_v47 = vmax.f32 %v6286_v30, 0.0  ;;  %v6672_v43 = vmax.f32 %v6479_v53, 0.0  ;;  %v10035_v63 = vld [vmem:[#allocation11 + $0x224] ss:$8 sps:$4 sm:$0xff]  }
 0xeeb   :  { %v6677_v37 = vmax.f32 %v6288_v26, 0.0  ;;  %v6679_v38 = vmax.f32 %v6481_v10, 0.0  ;;  %7975 = vmatmul.mubr.bf16.vlgmr.msra.gmra.mrb[200].mxu0 %v14066_v5 }
 0xeec   :  { %v6678_v15 = vmax.f32 %v6290_v44, 0.0  ;;  %v6680_v34 = vmax.f32 %v6483_v35, 0.0  ;;  %7984 = vmatprep.mubr.bf16.mxu0 %v14090_v14  ;;  %8136 = vmatpush1.bf16.msra.mxu0 %v10027_v18 }
 0xeed   :  { %v14500_v36 = vpack.c.bf16 %v6677_v37, %v6669_v21  ;;  %v14502_v51 = vpack.c.bf16 %v6679_v38, %v6671_v22  ;;  %8137 = vmatprep.subr.bf16.mxu0 %v10032_v33  ;;  %v10033_v33 = vld [vmem:[#allocation11 + $0x220] ss:$8 sps:$4 sm:$0xff]   ;;  %v10038_v22 = vld [vmem:[#allocation11 + $0x234] ss:$8 sps:$4 sm:$0xff]  }
 0xeee   :  { %v14504_v31 = vpack.c.bf16 %v6678_v15, %v6670_v47  ;;  %v14506_v17 = vpack.c.bf16 %v6680_v34, %v6672_v43  ;;  %v6293_v26 = vpop.f32.mrb[160].mxu0  ;;  %v6486_v5 = vpop.f32.mrb[144].mxu1 }
 0xeef   :  { %15657 = vst [vmem:[#allocation63_spill] sm:$0xff] %v14502_v51  ;;  %v6294_v30 = vadd.f32 %v6293_v26, %v14380_v16  ;;  %v6487_v53 = vadd.f32 %v6486_v5, %v14382_v13  ;;  %v6295_v10 = vpop.f32.mrb[161].mxu0  ;;  %v6488_v14 = vpop.f32.mrb[145].mxu1 }
 0xef0   :  { %15658 = vst [vmem:[#allocation33_spill] sm:$0xff] %v14506_v17  ;;  %v6296_v18 = vadd.f32 %v6295_v10, %v14386_v60  ;;  %v6489_v2 = vadd.f32 %v6488_v14, %v14388_v11  ;;  %v6297_v44 = vpop.f32.mrb[162].mxu0  ;;  %v6490_v35 = vpop.f32.mrb[146].mxu1  ;;  %8138 = vmatpush1.bf16.msra.mxu0 %v10030_v20 }
 0xef1   :  { %v6298_v15 = vadd.f32 %v6297_v44, %v14380_v16  ;;  %v6491_v34 = vadd.f32 %v6490_v35, %v14382_v13  ;;  %v6299_v43 = vpop.f32.mrb[163].mxu0  ;;  %v6492_v21 = vpop.f32.mrb[147].mxu1  ;;  %8139 = vmatprep.subr.bf16.mxu0 %v10035_v63  ;;  %v6685_v47 = vmax.f32 %v6294_v30, 0.0  ;;  %v6687_v26 = vmax.f32 %v6487_v53, 0.0  ;;  %v10036_v35 = vld [vmem:[#allocation11 + $0x230] ss:$8 sps:$4 sm:$0xff]  }
 0xef2   :  { %v6300_v37 = vadd.f32 %v6299_v43, %v14386_v60  ;;  %v6493_v38 = vadd.f32 %v6492_v21, %v14388_v11  ;;  %v6686_v20 = vmax.f32 %v6296_v18, 0.0  ;;  %v6688_v14 = vmax.f32 %v6489_v2, 0.0  ;;  %v10041_v43 = vld [vmem:[#allocation11 + $0x244] ss:$8 sps:$4 sm:$0xff]  }
 0xef3   :  { %v6693_v5 = vmax.f32 %v6298_v15, 0.0  ;;  %v6695_v10 = vmax.f32 %v6491_v34, 0.0  ;;  %7985 = vmatmul.mubr.bf16.gmra.mrb[204].mxu0 %v14086_v48 }
 0xef4   :  { %v6694_v51 = vmax.f32 %v6300_v37, 0.0  ;;  %v6696_v44 = vmax.f32 %v6493_v38, 0.0  ;;  %7994 = vmatprep.mubr.bf16.mxu0 %v14110_v28  ;;  %8140 = vmatpush1.bf16.msra.mxu0 %v10033_v33 }
 0xef5   :  { %v14518_v63 = vpack.c.bf16 %v6693_v5, %v6685_v47  ;;  %v14520_v17 = vpack.c.bf16 %v6695_v10, %v6687_v26  ;;  %8141 = vmatprep.subr.bf16.mxu0 %v10038_v22  ;;  %v10039_v22 = vld [vmem:[#allocation11 + $0x240] ss:$8 sps:$4 sm:$0xff]   ;;  %v10044_v10 = vld [vmem:[#allocation11 + $0x254] ss:$8 sps:$4 sm:$0xff]  }
 0xef6   :  { %v14522_v30 = vpack.c.bf16 %v6694_v51, %v6686_v20  ;;  %v14524_v53 = vpack.c.bf16 %v6696_v44, %v6688_v14  ;;  %v6303_v15 = vpop.f32.mrb[164].mxu0  ;;  %v6496_v48 = vpop.f32.mrb[148].mxu1 }
 0xef7   :  { %15659 = vst [vmem:[#allocation108_spill] sm:$0xff] %v14520_v17  ;;  %v6304_v18 = vadd.f32 %v6303_v15, %v14380_v16  ;;  %v6497_v2 = vadd.f32 %v6496_v48, %v14382_v13  ;;  %v6305_v34 = vpop.f32.mrb[165].mxu0  ;;  %v6498_v28 = vpop.f32.mrb[149].mxu1 }
 0xef8   :  { %15660 = vst [vmem:[#allocation30_spill] sm:$0xff] %v14524_v53  ;;  %v6306_v33 = vadd.f32 %v6305_v34, %v14386_v60  ;;  %v6499_v21 = vadd.f32 %v6498_v28, %v14388_v11  ;;  %v6307_v37 = vpop.f32.mrb[166].mxu0  ;;  %v6500_v38 = vpop.f32.mrb[150].mxu1  ;;  %8142 = vmatpush1.bf16.msra.mxu0 %v10036_v35 }
 0xef9   :  { %v6308_v51 = vadd.f32 %v6307_v37, %v14380_v16  ;;  %v6501_v47 = vadd.f32 %v6500_v38, %v14382_v13  ;;  %v6309_v26 = vpop.f32.mrb[167].mxu0  ;;  %v6502_v5 = vpop.f32.mrb[151].mxu1  ;;  %8143 = vmatprep.subr.bf16.mxu0 %v10041_v43  ;;  %v6701_v44 = vmax.f32 %v6304_v18, 0.0  ;;  %v6703_v15 = vmax.f32 %v6497_v2, 0.0  ;;  %v10042_v38 = vld [vmem:[#allocation11 + $0x250] ss:$8 sps:$4 sm:$0xff]  }
 0xefa   :  { %v6310_v20 = vadd.f32 %v6309_v26, %v14386_v60  ;;  %v6503_v14 = vadd.f32 %v6502_v5, %v14388_v11  ;;  %v6702_v35 = vmax.f32 %v6306_v33, 0.0  ;;  %v6704_v28 = vmax.f32 %v6499_v21, 0.0  ;;  %v10047_v26 = vld [vmem:[#allocation11 + $0x264] ss:$8 sps:$4 sm:$0xff]  }
 0xefb   :  { %v6709_v48 = vmax.f32 %v6308_v51, 0.0  ;;  %v6711_v34 = vmax.f32 %v6501_v47, 0.0  ;;  %7995 = vmatmul.mubr.bf16.gmra.mrb[208].mxu0 %v14106_v41 }
 0xefc   :  { %v6710_v17 = vmax.f32 %v6310_v20, 0.0  ;;  %v6712_v37 = vmax.f32 %v6503_v14, 0.0  ;;  %8004 = vmatprep.mubr.bf16.mxu0 %v14130_v59  ;;  %8144 = vmatpush1.bf16.msra.mxu0 %v10039_v22 }
 0xefd   :  { %v14536_v43 = vpack.c.bf16 %v6709_v48, %v6701_v44  ;;  %v14538_v53 = vpack.c.bf16 %v6711_v34, %v6703_v15  ;;  %8145 = vmatprep.subr.bf16.mxu0 %v10044_v10  ;;  %v10045_v10 = vld [vmem:[#allocation11 + $0x260] ss:$8 sps:$4 sm:$0xff]   ;;  %v10050_v34 = vld [vmem:[#allocation11 + $0x274] ss:$8 sps:$4 sm:$0xff]  }
 0xefe   :  { %v14540_v18 = vpack.c.bf16 %v6710_v17, %v6702_v35  ;;  %v14542_v2 = vpack.c.bf16 %v6712_v37, %v6704_v28  ;;  %v6313_v51 = vpop.f32.mrb[168].mxu0  ;;  %v6506_v41 = vpop.f32.mrb[152].mxu1 }
 0xeff   :  { %15661 = vst [vmem:[#allocation35_spill] sm:$0xff] %v14538_v53  ;;  %v6314_v33 = vadd.f32 %v6313_v51, %v14380_v16  ;;  %v6507_v21 = vadd.f32 %v6506_v41, %v14382_v13  ;;  %v6315_v47 = vpop.f32.mrb[169].mxu0  ;;  %v6508_v59 = vpop.f32.mrb[153].mxu1 }
 0xf00   :  { %15662 = vst [vmem:[#allocation34_spill] sm:$0xff] %v14542_v2  ;;  %v6316_v22 = vadd.f32 %v6315_v47, %v14386_v60  ;;  %v6509_v5 = vadd.f32 %v6508_v59, %v14388_v11  ;;  %v6317_v20 = vpop.f32.mrb[170].mxu0  ;;  %v6510_v14 = vpop.f32.mrb[154].mxu1  ;;  %8146 = vmatpush1.bf16.msra.mxu0 %v10042_v38 }
 0xf01   :  { %v6318_v17 = vadd.f32 %v6317_v20, %v14380_v16  ;;  %v6511_v44 = vadd.f32 %v6510_v14, %v14382_v13  ;;  %v6319_v15 = vpop.f32.mrb[171].mxu0  ;;  %v6512_v48 = vpop.f32.mrb[155].mxu1  ;;  %8147 = vmatprep.subr.bf16.mxu0 %v10047_v26  ;;  %v6717_v37 = vmax.f32 %v6314_v33, 0.0  ;;  %v6719_v51 = vmax.f32 %v6507_v21, 0.0  ;;  %v10048_v14 = vld [vmem:[#allocation11 + $0x270] ss:$8 sps:$4 sm:$0xff]  }
 0xf02   :  { %v6320_v35 = vadd.f32 %v6319_v15, %v14386_v60  ;;  %v6513_v28 = vadd.f32 %v6512_v48, %v14388_v11  ;;  %v6718_v38 = vmax.f32 %v6316_v22, 0.0  ;;  %v6720_v59 = vmax.f32 %v6509_v5, 0.0  ;;  %v10053_v15 = vld [vmem:[#allocation11 + $0x284] ss:$8 sps:$4 sm:$0xff]  }
 0xf03   :  { %v6725_v41 = vmax.f32 %v6318_v17, 0.0  ;;  %v6727_v47 = vmax.f32 %v6511_v44, 0.0  ;;  %8005 = vmatmul.mubr.bf16.gmra.mrb[212].mxu0 %v14126_v62 }
 0xf04   :  { %v6726_v53 = vmax.f32 %v6320_v35, 0.0  ;;  %v6728_v20 = vmax.f32 %v6513_v28, 0.0  ;;  %8014 = vmatprep.mubr.bf16.mxu0 %v14150_v23  ;;  %8148 = vmatpush1.bf16.msra.mxu0 %v10045_v10 }
 0xf05   :  { %v14554_v26 = vpack.c.bf16 %v6725_v41, %v6717_v37  ;;  %v14556_v2 = vpack.c.bf16 %v6727_v47, %v6719_v51  ;;  %8149 = vmatprep.subr.bf16.mxu0 %v10050_v34  ;;  %v10051_v34 = vld [vmem:[#allocation11 + $0x280] ss:$8 sps:$4 sm:$0xff]   ;;  %v10056_v47 = vld [vmem:[#allocation11 + $0x294] ss:$8 sps:$4 sm:$0xff]  }
 0xf06   :  { %v14558_v33 = vpack.c.bf16 %v6726_v53, %v6718_v38  ;;  %v14560_v21 = vpack.c.bf16 %v6728_v20, %v6720_v59  ;;  %v6323_v17 = vpop.f32.mrb[172].mxu0  ;;  %v6516_v62 = vpop.f32.mrb[156].mxu1 }
 0xf07   :  { %15663 = vst [vmem:[#allocation48_spill] sm:$0xff] %v14556_v2  ;;  %v6324_v22 = vadd.f32 %v6323_v17, %v14380_v16  ;;  %v6517_v5 = vadd.f32 %v6516_v62, %v14382_v13  ;;  %v6325_v44 = vpop.f32.mrb[173].mxu0  ;;  %v6518_v23 = vpop.f32.mrb[157].mxu1 }
 0xf08   :  { %15664 = vst [vmem:[#allocation46_spill] sm:$0xff] %v14560_v21  ;;  %v6326_v10 = vadd.f32 %v6325_v44, %v14386_v60  ;;  %v6519_v48 = vadd.f32 %v6518_v23, %v14388_v11  ;;  %v6327_v35 = vpop.f32.mrb[174].mxu0  ;;  %v6520_v28 = vpop.f32.mrb[158].mxu1  ;;  %8150 = vmatpush1.bf16.msra.mxu0 %v10048_v14 }
 0xf09   :  { %v6328_v53 = vadd.f32 %v6327_v35, %v14380_v16  ;;  %v6521_v37 = vadd.f32 %v6520_v28, %v14382_v13  ;;  %v6329_v51 = vpop.f32.mrb[175].mxu0  ;;  %v6522_v41 = vpop.f32.mrb[159].mxu1  ;;  %8151 = vmatprep.subr.bf16.mxu0 %v10053_v15  ;;  %v6733_v20 = vmax.f32 %v6324_v22, 0.0  ;;  %v6735_v17 = vmax.f32 %v6517_v5, 0.0  ;;  %v10054_v28 = vld [vmem:[#allocation11 + $0x290] ss:$8 sps:$4 sm:$0xff]  }
 0xf0a   :  { %v6330_v38 = vadd.f32 %v6329_v51, %v14386_v60  ;;  %v6523_v59 = vadd.f32 %v6522_v41, %v14388_v11  ;;  %v6734_v14 = vmax.f32 %v6326_v10, 0.0  ;;  %v6736_v23 = vmax.f32 %v6519_v48, 0.0  ;;  %v10059_v51 = vld [vmem:[#allocation11 + $0x2a4] ss:$8 sps:$4 sm:$0xff]  }
 0xf0b   :  { %v6741_v62 = vmax.f32 %v6328_v53, 0.0  ;;  %v6743_v44 = vmax.f32 %v6521_v37, 0.0  ;;  %8015 = vmatmul.mubr.bf16.gmra.mrb[216].mxu0 %v14146_v40 }
 0xf0c   :  { %v6742_v2 = vmax.f32 %v6330_v38, 0.0  ;;  %v6744_v35 = vmax.f32 %v6523_v59, 0.0  ;;  %8024 = vmatprep.mubr.bf16.mxu0 %v14170_v46  ;;  %8152 = vmatpush1.bf16.msra.mxu0 %v10051_v34 }
 0xf0d   :  { %v14572_v15 = vpack.c.bf16 %v6741_v62, %v6733_v20  ;;  %v14574_v21 = vpack.c.bf16 %v6743_v44, %v6735_v17  ;;  %8153 = vmatprep.subr.bf16.mxu0 %v10056_v47  ;;  %v10057_v47 = vld [vmem:[#allocation11 + $0x2a0] ss:$8 sps:$4 sm:$0xff]   ;;  %v10062_v44 = vld [vmem:[#allocation11 + $0x2b4] ss:$8 sps:$4 sm:$0xff]  }
 0xf0e   :  { %v14576_v22 = vpack.c.bf16 %v6742_v2, %v6734_v14  ;;  %v14578_v5 = vpack.c.bf16 %v6744_v35, %v6736_v23  ;;  %v6333_v53 = vpop.f32.mrb[176].mxu0  ;;  %v6526_v40 = vpop.f32.mrb[160].mxu1 }
 0xf0f   :  { %15665 = vst [vmem:[#allocation26_spill] sm:$0xff] %v14572_v15  ;;  %15666 = vst [vmem:[#allocation24_spill] sm:$0xff] %v14574_v21  ;;  %v6334_v10 = vadd.f32 %v6333_v53, %v14380_v16  ;;  %v6527_v48 = vadd.f32 %v6526_v40, %v14382_v13  ;;  %v6335_v37 = vpop.f32.mrb[177].mxu0  ;;  %v6528_v46 = vpop.f32.mrb[161].mxu1 }
 0xf10   :  { %15667 = vst [vmem:[#allocation22_spill] sm:$0xff] %v14578_v5  ;;  %v6336_v34 = vadd.f32 %v6335_v37, %v14386_v60  ;;  %v6529_v41 = vadd.f32 %v6528_v46, %v14388_v11  ;;  %v6337_v38 = vpop.f32.mrb[178].mxu0  ;;  %v6530_v59 = vpop.f32.mrb[162].mxu1  ;;  %8154 = vmatpush1.bf16.msra.mxu0 %v10054_v28  ;;  %v15668_v46 = vld [vmem:[#allocation67_spill] sm:$0xff] }
 0xf11   :  { %v6338_v2 = vadd.f32 %v6337_v38, %v14380_v16  ;;  %v6531_v20 = vadd.f32 %v6530_v59, %v14382_v13  ;;  %v6339_v17 = vpop.f32.mrb[179].mxu0  ;;  %v6532_v62 = vpop.f32.mrb[163].mxu1  ;;  %8155 = vmatprep.subr.bf16.mxu0 %v10059_v51  ;;  %v6749_v35 = vmax.f32 %v6334_v10, 0.0  ;;  %v6751_v53 = vmax.f32 %v6527_v48, 0.0  ;;  %v10060_v59 = vld [vmem:[#allocation11 + $0x2b0] ss:$8 sps:$4 sm:$0xff]  }
 0xf12   :  { %v6340_v14 = vadd.f32 %v6339_v17, %v14386_v60  ;;  %v6533_v23 = vadd.f32 %v6532_v62, %v14388_v11  ;;  %v6750_v28 = vmax.f32 %v6336_v34, 0.0  ;;  %v6752_v21 = vmax.f32 %v6529_v41, 0.0  ;;  %v10065_v17 = vld [vmem:[#allocation11 + $0x2c4] ss:$8 sps:$4 sm:$0xff]  }
 0xf13   :  { %v6757_v40 = vmax.f32 %v6338_v2, 0.0  ;;  %v6759_v37 = vmax.f32 %v6531_v20, 0.0  ;;  %8025 = vmatmul.mubr.bf16.gmra.mrb[220].mxu0 %v15668_v46 }
 0xf14   :  { %v6758_v5 = vmax.f32 %v6340_v14, 0.0  ;;  %v6760_v38 = vmax.f32 %v6533_v23, 0.0  ;;  %8034 = vmatprep.mubr.bf16.mxu0 %v14190_v49  ;;  %8156 = vmatpush1.bf16.msra.mxu0 %v10057_v47 }
 0xf15   :  { %v14590_v51 = vpack.c.bf16 %v6757_v40, %v6749_v35  ;;  %v14592_v15 = vpack.c.bf16 %v6759_v37, %v6751_v53  ;;  %8157 = vmatprep.subr.bf16.mxu0 %v10062_v44  ;;  %v10063_v44 = vld [vmem:[#allocation11 + $0x2c0] ss:$8 sps:$4 sm:$0xff]   ;;  %v10068_v37 = vld [vmem:[#allocation11 + $0x2d4] ss:$8 sps:$4 sm:$0xff]  }
 0xf16   :  { %v14594_v10 = vpack.c.bf16 %v6758_v5, %v6750_v28  ;;  %v14596_v48 = vpack.c.bf16 %v6760_v38, %v6752_v21  ;;  %v6343_v2 = vpop.f32.mrb[180].mxu0  ;;  %v6536_v20 = vpop.f32.mrb[164].mxu1 }
 0xf17   :  { %15669 = vst [vmem:[#allocation43_spill] sm:$0xff] %v14590_v51  ;;  %15670 = vst [vmem:[#allocation67_spill] sm:$0xff] %v14592_v15  ;;  %v6344_v34 = vadd.f32 %v6343_v2, %v14380_v16  ;;  %v6537_v41 = vadd.f32 %v6536_v20, %v14382_v13  ;;  %v6345_v62 = vpop.f32.mrb[181].mxu0  ;;  %v6538_v49 = vpop.f32.mrb[165].mxu1 }
 0xf18   :  { %15671 = vst [vmem:[#allocation109_spill] sm:$0xff] %v14596_v48  ;;  %v6346_v47 = vadd.f32 %v6345_v62, %v14386_v60  ;;  %v6539_v14 = vadd.f32 %v6538_v49, %v14388_v11  ;;  %v6347_v23 = vpop.f32.mrb[182].mxu0  ;;  %v6540_v35 = vpop.f32.mrb[166].mxu1  ;;  %8158 = vmatpush1.bf16.msra.mxu0 %v10060_v59  ;;  %v15672_v49 = vld [vmem:[#allocation69_spill] sm:$0xff] }
 0xf19   :  { %v6348_v5 = vadd.f32 %v6347_v23, %v14380_v16  ;;  %v6541_v21 = vadd.f32 %v6540_v35, %v14382_v13  ;;  %v6349_v53 = vpop.f32.mrb[183].mxu0  ;;  %v6542_v40 = vpop.f32.mrb[167].mxu1  ;;  %8159 = vmatprep.subr.bf16.mxu0 %v10065_v17  ;;  %v6765_v38 = vmax.f32 %v6344_v34, 0.0  ;;  %v6767_v2 = vmax.f32 %v6537_v41, 0.0  ;;  %v10066_v35 = vld [vmem:[#allocation11 + $0x2d0] ss:$8 sps:$4 sm:$0xff]  }
 0xf1a   :  { %v6350_v46 = vadd.f32 %v6349_v53, %v14386_v60  ;;  %v6543_v28 = vadd.f32 %v6542_v40, %v14388_v11  ;;  %v6766_v59 = vmax.f32 %v6346_v47, 0.0  ;;  %v6768_v15 = vmax.f32 %v6539_v14, 0.0  ;;  %v10071_v53 = vld [vmem:[#allocation11 + $0x2e4] ss:$8 sps:$4 sm:$0xff]  }
 0xf1b   :  { %v6773_v20 = vmax.f32 %v6348_v5, 0.0  ;;  %v6775_v62 = vmax.f32 %v6541_v21, 0.0  ;;  %8035 = vmatmul.mubr.bf16.gmra.mrb[224].mxu0 %v15672_v49 }
 0xf1c   :  { %v6774_v48 = vmax.f32 %v6350_v46, 0.0  ;;  %v6776_v23 = vmax.f32 %v6543_v28, 0.0  ;;  %8044 = vmatprep.mubr.bf16.mxu0 %v14210_v0  ;;  %8160 = vmatpush1.bf16.msra.mxu0 %v10063_v44 }
 0xf1d   :  { %v14608_v17 = vpack.c.bf16 %v6773_v20, %v6765_v38  ;;  %v14610_v51 = vpack.c.bf16 %v6775_v62, %v6767_v2  ;;  %8161 = vmatprep.subr.bf16.mxu0 %v10068_v37  ;;  %v10069_v37 = vld [vmem:[#allocation11 + $0x2e0] ss:$8 sps:$4 sm:$0xff]   ;;  %v10074_v62 = vld [vmem:[#allocation11 + $0x2f4] ss:$8 sps:$4 sm:$0xff]  }
 0xf1e   :  { %v14612_v34 = vpack.c.bf16 %v6774_v48, %v6766_v59  ;;  %v14614_v41 = vpack.c.bf16 %v6776_v23, %v6768_v15  ;;  %v6353_v5 = vpop.f32.mrb[184].mxu0  ;;  %v6546_v21 = vpop.f32.mrb[168].mxu1 }
 0xf1f   :  { %15673 = vst [vmem:[#allocation69_spill] sm:$0xff] %v14610_v51  ;;  %v6354_v47 = vadd.f32 %v6353_v5, %v14380_v16  ;;  %v6547_v14 = vadd.f32 %v6546_v21, %v14382_v13  ;;  %v6355_v40 = vpop.f32.mrb[185].mxu0  ;;  %v6548_v0 = vpop.f32.mrb[169].mxu1 }
 0xf20   :  { %15674 = vst [vmem:[#allocation110_spill] sm:$0xff] %v14614_v41  ;;  %v6356_v44 = vadd.f32 %v6355_v40, %v14386_v60  ;;  %v6549_v46 = vadd.f32 %v6548_v0, %v14388_v11  ;;  %v6357_v28 = vpop.f32.mrb[186].mxu0  ;;  %v6550_v38 = vpop.f32.mrb[170].mxu1  ;;  %8162 = vmatpush1.bf16.msra.mxu0 %v10066_v35 }
 0xf21   :  { %v6358_v48 = vadd.f32 %v6357_v28, %v14380_v16  ;;  %v6551_v15 = vadd.f32 %v6550_v38, %v14382_v13  ;;  %v6359_v2 = vpop.f32.mrb[187].mxu0  ;;  %v6552_v20 = vpop.f32.mrb[171].mxu1  ;;  %8163 = vmatprep.subr.bf16.mxu0 %v10071_v53  ;;  %v6781_v23 = vmax.f32 %v6354_v47, 0.0  ;;  %v6783_v5 = vmax.f32 %v6547_v14, 0.0  ;;  %v10072_v38 = vld [vmem:[#allocation11 + $0x2f0] ss:$8 sps:$4 sm:$0xff]  }
 0xf22   :  { %v6360_v49 = vadd.f32 %v6359_v2, %v14386_v60  ;;  %v6553_v59 = vadd.f32 %v6552_v20, %v14388_v11  ;;  %v6782_v35 = vmax.f32 %v6356_v44, 0.0  ;;  %v6784_v0 = vmax.f32 %v6549_v46, 0.0  ;;  %v10077_v2 = vld [vmem:[#allocation11 + $0x304] ss:$8 sps:$4 sm:$0xff]  }
 0xf23   :  { %v6789_v21 = vmax.f32 %v6358_v48, 0.0  ;;  %v6791_v40 = vmax.f32 %v6551_v15, 0.0  ;;  %8045 = vmatmul.mubr.bf16.gmra.mrb[228].mxu0 %v14206_v56 }
 0xf24   :  { %v6790_v51 = vmax.f32 %v6360_v49, 0.0  ;;  %v6792_v28 = vmax.f32 %v6553_v59, 0.0  ;;  %8054 = vmatprep.mubr.bf16.mxu0 %v14257_v1  ;;  %8164 = vmatpush1.bf16.msra.mxu0 %v10069_v37 }
 0xf25   :  { %v14626_v53 = vpack.c.bf16 %v6789_v21, %v6781_v23  ;;  %v14628_v41 = vpack.c.bf16 %v6791_v40, %v6783_v5  ;;  %8165 = vmatprep.subr.bf16.mxu0 %v10074_v62 }
 0xf26   :  { %v14630_v47 = vpack.c.bf16 %v6790_v51, %v6782_v35  ;;  %v14632_v14 = vpack.c.bf16 %v6792_v28, %v6784_v0  ;;  %v6363_v48 = vpop.f32.mrb[188].mxu0  ;;  %v6556_v56 = vpop.f32.mrb[172].mxu1 }
 0xf27   :  { %v6364_v44 = vadd.f32 %v6363_v48, %v14380_v16  ;;  %v6557_v46 = vadd.f32 %v6556_v56, %v14382_v13  ;;  %v6365_v15 = vpop.f32.mrb[189].mxu0  ;;  %v6558_v1 = vpop.f32.mrb[173].mxu1 }
 0xf28   :  { %v6366_v37 = vadd.f32 %v6365_v15, %v14386_v60  ;;  %v6559_v20 = vadd.f32 %v6558_v1, %v14388_v11  ;;  %v6367_v49 = vpop.f32.mrb[190].mxu0  ;;  %v6560_v59 = vpop.f32.mrb[174].mxu1  ;;  %8166 = vmatpush1.bf16.msra.mxu0 %v10072_v38 }
 0xf29   :  { %v6368_v51 = vadd.f32 %v6367_v49, %v14380_v16  ;;  %v6561_v62 = vadd.f32 %v6560_v59, %v14382_v13  ;;  %v6369_v23 = vpop.f32.mrb[191].mxu0  ;;  %v6562_v5 = vpop.f32.mrb[175].mxu1  ;;  %8328 = vmatprep.subr.bf16.mxu0 %v10077_v2  ;;  %v6797_v35 = vmax.f32 %v6364_v44, 0.0  ;;  %v6799_v0 = vmax.f32 %v6557_v46, 0.0 }
 0xf2a   :  { %v6370_v21 = vadd.f32 %v6369_v23, %v14386_v60  ;;  %v6563_v40 = vadd.f32 %v6562_v5, %v14388_v11  ;;  %v6798_v56 = vmax.f32 %v6366_v37, 0.0  ;;  %v6800_v15 = vmax.f32 %v6559_v20, 0.0 }
 0xf2b   :  { %v6805_v28 = vmax.f32 %v6368_v51, 0.0  ;;  %v6807_v48 = vmax.f32 %v6561_v62, 0.0  ;;  %8055 = vmatmul.mubr.bf16.gmra.mrb[232].mxu0 %v14252_v39 }
 0xf2c   :  { %v6806_v38 = vmax.f32 %v6370_v21, 0.0  ;;  %v6808_v1 = vmax.f32 %v6563_v40, 0.0  ;;  %8064 = vmatprep.mubr.bf16.mxu0 %v14275_v7 }
 0xf2d   :  { %v14644_v49 = vpack.c.bf16 %v6805_v28, %v6797_v35  ;;  %v14646_v59 = vpack.c.bf16 %v6807_v48, %v6799_v0 }
 0xf2e   :  { %v14648_v2 = vpack.c.bf16 %v6806_v38, %v6798_v56  ;;  %v14650_v23 = vpack.c.bf16 %v6808_v1, %v6800_v15  ;;  %v6373_v44 = vpop.f32.mrb[192].mxu0  ;;  %v6566_v46 = vpop.f32.mrb[176].mxu1 }
 0xf2f   :  { %15675 = vst [vmem:[#allocation111_spill] sm:$0xff] %v14646_v59  ;;  %v6374_v51 = vadd.f32 %v6373_v44, %v14380_v16  ;;  %v6567_v39 = vadd.f32 %v6566_v46, %v14382_v13  ;;  %v6375_v37 = vpop.f32.mrb[193].mxu0  ;;  %v6568_v20 = vpop.f32.mrb[177].mxu1 }
 0xf30   :  { %15676 = vst [vmem:[#allocation112_spill] sm:$0xff] %v14650_v23  ;;  %v6376_v62 = vadd.f32 %v6375_v37, %v14386_v60  ;;  %v6569_v7 = vadd.f32 %v6568_v20, %v14388_v11  ;;  %v6377_v5 = vpop.f32.mrb[194].mxu0  ;;  %v6570_v21 = vpop.f32.mrb[178].mxu1 }
 0xf31   :  { %v6378_v40 = vadd.f32 %v6377_v5, %v14380_v16  ;;  %v6571_v35 = vadd.f32 %v6570_v21, %v14382_v13  ;;  %v6379_v0 = vpop.f32.mrb[195].mxu0  ;;  %v6572_v28 = vpop.f32.mrb[179].mxu1  ;;  %v6813_v15 = vmax.f32 %v6374_v51, 0.0  ;;  %v6815_v38 = vmax.f32 %v6567_v39, 0.0 }
 0xf32   :  { %v6380_v48 = vadd.f32 %v6379_v0, %v14386_v60  ;;  %v6573_v56 = vadd.f32 %v6572_v28, %v14388_v11  ;;  %v6814_v46 = vmax.f32 %v6376_v62, 0.0  ;;  %v6816_v37 = vmax.f32 %v6569_v7, 0.0 }
 0xf33   :  { %v6821_v1 = vmax.f32 %v6378_v40, 0.0  ;;  %v6823_v44 = vmax.f32 %v6571_v35, 0.0  ;;  %8065 = vmatmul.mubr.bf16.gmra.mrb[236].mxu0 %v14270_v58 }
 0xf34   :  { %v6822_v20 = vmax.f32 %v6380_v48, 0.0  ;;  %v6824_v59 = vmax.f32 %v6573_v56, 0.0  ;;  %8074 = vmatprep.mubr.bf16.mxu0 %v14293_v24 }
 0xf35   :  { %v14662_v5 = vpack.c.bf16 %v6821_v1, %v6813_v15  ;;  %v14664_v21 = vpack.c.bf16 %v6823_v44, %v6815_v38 }
 0xf36   :  { %v14666_v23 = vpack.c.bf16 %v6822_v20, %v6814_v46  ;;  %v14668_v0 = vpack.c.bf16 %v6824_v59, %v6816_v37  ;;  %v6383_v51 = vpop.f32.mrb[196].mxu0  ;;  %v6576_v39 = vpop.f32.mrb[180].mxu1 }
 0xf37   :  { %15677 = vst [vmem:[#allocation113_spill] sm:$0xff] %v14664_v21  ;;  %v6384_v40 = vadd.f32 %v6383_v51, %v14380_v16  ;;  %v6577_v58 = vadd.f32 %v6576_v39, %v14382_v13  ;;  %v6385_v62 = vpop.f32.mrb[197].mxu0  ;;  %v6578_v7 = vpop.f32.mrb[181].mxu1 }
 0xf38   :  { %v6386_v35 = vadd.f32 %v6385_v62, %v14386_v60  ;;  %v6579_v24 = vadd.f32 %v6578_v7, %v14388_v11  ;;  %v6387_v28 = vpop.f32.mrb[198].mxu0  ;;  %v6580_v48 = vpop.f32.mrb[182].mxu1 }
 0xf39   :  { %v6388_v56 = vadd.f32 %v6387_v28, %v14380_v16  ;;  %v6581_v15 = vadd.f32 %v6580_v48, %v14382_v13  ;;  %v6389_v59 = vpop.f32.mrb[199].mxu0  ;;  %v6582_v38 = vpop.f32.mrb[183].mxu1  ;;  %v6829_v46 = vmax.f32 %v6384_v40, 0.0  ;;  %v6831_v37 = vmax.f32 %v6577_v58, 0.0  ;;  %v15679_v40 = vld [vmem:[#allocation37_spill] sm:$0xff] }
 0xf3a   :  { %v6390_v1 = vadd.f32 %v6389_v59, %v14386_v60  ;;  %v6583_v44 = vadd.f32 %v6582_v38, %v14388_v11  ;;  %v6830_v39 = vmax.f32 %v6386_v35, 0.0  ;;  %v6832_v62 = vmax.f32 %v6579_v24, 0.0  ;;  %v10089_v11 = vld [vmem:[#allocation11 + $0x344] ss:$8 sps:$4 sm:$0xff]   ;;  %v10102_v58 = vld [vmem:[#allocation11 + $0x390] ss:$8 sps:$4 sm:$0xff]  }
 0xf3b   :  { %v6837_v20 = vmax.f32 %v6388_v56, 0.0  ;;  %v6839_v51 = vmax.f32 %v6581_v15, 0.0  ;;  %8075 = vmatmul.mubr.bf16.gmra.mrb[240].mxu0 %v14288_v45  ;;  %v15678_v45 = vld [vmem:[#allocation40_spill] sm:$0xff]  ;;  %v10107_v35 = vld [vmem:[#allocation11 + $0x3a4] ss:$8 sps:$4 sm:$0xff]  }
 0xf3c   :  { %v6838_v7 = vmax.f32 %v6390_v1, 0.0  ;;  %v6840_v21 = vmax.f32 %v6583_v44, 0.0  ;;  %8084 = vmatprep.mubr.bf16.mxu0 %v14311_v19  ;;  %v10075_v19 = vld [vmem:[#allocation11 + $0x300] ss:$8 sps:$4 sm:$0xff]   ;;  %v10108_v24 = vld [vmem:[#allocation11 + $0x3b0] ss:$8 sps:$4 sm:$0xff]  }
 0xf3d   :  { %v14680_v16 = vpack.c.bf16 %v6837_v20, %v6829_v46  ;;  %v14682_v13 = vpack.c.bf16 %v6839_v51, %v6831_v37  ;;  %v10113_v48 = vld [vmem:[#allocation11 + $0x3c4] ss:$8 sps:$4 sm:$0xff]   ;;  %v10111_v56 = vld [vmem:[#allocation11 + $0x3c0] ss:$8 sps:$4 sm:$0xff]   ;;  %v10114_v15 = vld [vmem:[#allocation11 + $0x3d0] ss:$8 sps:$4 sm:$0xff]  }
 0xf3e   :  { %v14684_v28 = vpack.c.bf16 %v6838_v7, %v6830_v39  ;;  %v14686_v60 = vpack.c.bf16 %v6840_v21, %v6832_v62  ;;  %v10101_v21 = vld [vmem:[#allocation11 + $0x384] ss:$8 sps:$4 sm:$0xff]   ;;  %v10120_v38 = vld [vmem:[#allocation11 + $0x3f0] ss:$8 sps:$4 sm:$0xff]  }
 0xf3f   :  { %v10119_v59 = vld [vmem:[#allocation11 + $0x3e4] ss:$8 sps:$4 sm:$0xff]   ;;  %v15695_v1 = vld [vmem:[#allocation108_spill] sm:$0xff]  ;;  %v15697_v46 = vld [vmem:[#allocation35_spill] sm:$0xff] }
 0xf40   :  { %v15696_v44 = vld [vmem:[#allocation34_spill] sm:$0xff]  ;;  %v15699_v20 = vld [vmem:[#allocation48_spill] sm:$0xff]  ;;  %v15702_v62 = vld [vmem:[#allocation109_spill] sm:$0xff] }
 0xf41   :  { %v15698_v37 = vld [vmem:[#allocation46_spill] sm:$0xff]  ;;  %v15701_v39 = vld [vmem:[#allocation24_spill] sm:$0xff]  ;;  %v15703_v7 = vld [vmem:[#allocation67_spill] sm:$0xff] }
 0xf42   :  { %v15700_v51 = vld [vmem:[#allocation22_spill] sm:$0xff] }
 0xf43   :  { %8085 = vmatmul.mubr.bf16.gmra.mrb[244].mxu0 %v14307_v3  ;;  %v10080_v3 = vld [vmem:[#allocation11 + $0x314] ss:$8 sps:$4 sm:$0xff]  }
 0xf44   :  { %8094 = vmatprep.mubr.bf16.mxu0 %v14329_v27  ;;  %v10083_v27 = vld [vmem:[#allocation11 + $0x324] ss:$8 sps:$4 sm:$0xff]  }
 0xf4b   :  { %8095 = vmatmul.mubr.bf16.gmra.mrb[248].mxu0 %v14325_v32  ;;  %v10078_v32 = vld [vmem:[#allocation11 + $0x310] ss:$8 sps:$4 sm:$0xff]  }
 0xf4c   :  { %8104 = vmatprep.mubr.bf16.mxu0 %v14347_v50  ;;  %v10086_v50 = vld [vmem:[#allocation11 + $0x334] ss:$8 sps:$4 sm:$0xff]  }
 0xf53   :  { %8105 = vmatmul.mubr.bf16.gmra.mrb[252].mxu0 %v14343_v61  ;;  %v10081_v61 = vld [vmem:[#allocation11 + $0x320] ss:$8 sps:$4 sm:$0xff]  }
 0xf54   :  { %8114 = vmatprep.mubr.bf16.mxu0 %v14367_v9  ;;  %v10084_v9 = vld [vmem:[#allocation11 + $0x330] ss:$8 sps:$4 sm:$0xff]  }
 0xf5b   :  { %8115 = vmatmul.mubr.bf16.gmra.mrb[0].mxu0 %v15678_v45  ;;  %v15706_v45 = vld [vmem:[#allocation112_spill] sm:$0xff] }
 0xf5c   :  { %8124 = vmatprep.mubr.bf16.mxu0 %v14398_v42  ;;  %v10092_v42 = vld [vmem:[#allocation11 + $0x354] ss:$8 sps:$4 sm:$0xff]  }
 0xf63   :  { %8125 = vmatmul.mubr.bf16.gmra.mrb[4].mxu0 %v14394_v29  ;;  %v10087_v29 = vld [vmem:[#allocation11 + $0x340] ss:$8 sps:$4 sm:$0xff]  }
 0xf64   :  { %8167 = vmatprep.mubr.bf16.mxu0 %v14414_v57  ;;  %v10093_v57 = vld [vmem:[#allocation11 + $0x360] ss:$8 sps:$4 sm:$0xff]  }
 0xf6b   :  { %8168 = vmatmul.mubr.bf16.vlgmr.msra.gmra.mrb[200].mxu0 %v14410_v4  ;;  %v10090_v4 = vld [vmem:[#allocation11 + $0x350] ss:$8 sps:$4 sm:$0xff]  }
 0xf6c   :  { %8177 = vmatprep.mubr.bf16.mxu0 %v14432_v25  ;;  %8329 = vmatpush1.bf16.msra.mxu0 %v10075_v19  ;;  %v10095_v25 = vld [vmem:[#allocation11 + $0x364] ss:$8 sps:$4 sm:$0xff]   ;;  %v15707_v19 = vld [vmem:[#allocation111_spill] sm:$0xff] }
 0xf6d   :  { %8330 = vmatprep.subr.bf16.mxu0 %v10080_v3  ;;  %v15708_v3 = vld [vmem:[#allocation113_spill] sm:$0xff] }
 0xf70   :  { %8331 = vmatpush1.bf16.msra.mxu0 %v10078_v32  ;;  %v7097_v32 = vld [vmem:[%s14924_s11] sm:$0x3]  ;;  %s10782_s11 = smov [#allocation12]  }
 0xf71   :  { %8332 = vmatprep.subr.bf16.mxu0 %v10083_v27  ;;  %v15709_v27 = vld [vmem:[#allocation39_spill] sm:$0xff]  ;;  %s8654_s21 = sshll.u32 %s10782_s11, 4  ;;  %s8655_s21 = int_to_ptr.vmem [resolvable:$true] %s8654_s21 }
 0xf72   :  { %s10738_s23 = scalar_lea.vmem %s8655_s21, 8192  ;;  %p10743_p13 = scmp.lt.s32.totalorder %s8655_s21, %s8655_s21 }
 0xf73   :  { %8178 = vmatmul.mubr.bf16.gmra.mrb[204].mxu0 %v14428_v8  ;;  %v10098_v8 = vld [vmem:[#allocation11 + $0x374] ss:$8 sps:$4 sm:$0xff]   ;;  %p10739_p12 = scmp.ne.s32.totalorder %s8655_s21, %s10738_s23  ;;  %p10744_p0 = scmp.lt.s32.totalorder %s10738_s23, %s10738_s23 }
 0xf74   :  { %8187 = vmatprep.mubr.bf16.mxu0 %v14450_v55  ;;  %8333 = vmatpush1.bf16.msra.mxu0 %v10081_v61  ;;  %v10096_v55 = vld [vmem:[#allocation11 + $0x370] ss:$8 sps:$4 sm:$0xff]  }
 0xf75   :  { %8334 = vmatprep.subr.bf16.mxu0 %v10086_v50  ;;  %p10745_p1 = por %p10744_p0, %p10743_p13 }
 0xf77   :  { %p10746_p2 = pnand %p10745_p1, %p10739_p12 }
 0xf78   :  { %8335 = vmatpush1.bf16.msra.mxu0 %v10084_v9 }
 0xf79   :  { %8336 = vmatprep.subr.bf16.mxu0 %v10089_v11 }
 0xf7b   :  { %8188 = vmatmul.mubr.bf16.gmra.mrb[208].mxu0 %v14446_v54  ;;  %v10099_v54 = vld [vmem:[#allocation11 + $0x380] ss:$8 sps:$4 sm:$0xff]  }
 0xf7c   :  { %8197 = vmatprep.mubr.bf16.mxu0 %v14468_v12  ;;  %8337 = vmatpush1.bf16.msra.mxu0 %v10087_v29  ;;  %v10104_v12 = vld [vmem:[#allocation11 + $0x394] ss:$8 sps:$4 sm:$0xff]  }
 0xf7d   :  { %8338 = vmatprep.subr.bf16.mxu0 %v10092_v42 }
 0xf80   :  { %8339 = vmatpush1.bf16.msra.mxu0 %v10090_v4 }
 0xf81   :  { %8340 = vmatprep.subr.bf16.mxu0 %v10095_v25  ;;  %v15712_v25 = vld [vmem:[#allocation47_spill] sm:$0xff] }
 0xf83   :  { %8198 = vmatmul.mubr.bf16.gmra.mrb[212].mxu0 %v14464_v6  ;;  %v10105_v6 = vld [vmem:[#allocation11 + $0x3a0] ss:$8 sps:$4 sm:$0xff]  }
 0xf84   :  { %8207 = vmatprep.mubr.bf16.mxu0 %v14486_v52  ;;  %8341 = vmatpush1.bf16.msra.mxu0 %v10093_v57  ;;  %v10110_v52 = vld [vmem:[#allocation11 + $0x3b4] ss:$8 sps:$4 sm:$0xff]  }
 0xf85   :  { %8342 = vmatprep.subr.bf16.mxu0 %v10098_v8 }
 0xf88   :  { %8343 = vmatpush1.bf16.msra.mxu0 %v10096_v55  ;;  %v15713_v55 = vld [vmem:[#allocation45_spill] sm:$0xff] }
 0xf89   :  { %8344 = vmatprep.subr.bf16.mxu0 %v10101_v21 }
 0xf8b   :  { %8208 = vmatmul.mubr.bf16.gmra.mrb[216].mxu0 %v15679_v40 }
 0xf8c   :  { %8217 = vmatprep.mubr.bf16.mxu0 %v14504_v31  ;;  %8345 = vmatpush1.bf16.msra.mxu0 %v10099_v54  ;;  %v10116_v31 = vld [vmem:[#allocation11 + $0x3d4] ss:$8 sps:$4 sm:$0xff]  }
 0xf8d   :  { %8346 = vmatprep.subr.bf16.mxu0 %v10104_v12  ;;  %v15714_v54 = vld [vmem:[#allocation71_spill] sm:$0xff] }
 0xf90   :  { %8347 = vmatpush1.bf16.msra.mxu0 %v10102_v58 }
 0xf91   :  { %8348 = vmatprep.subr.bf16.mxu0 %v10107_v35 }
 0xf93   :  { %8218 = vmatmul.mubr.bf16.gmra.mrb[220].mxu0 %v14500_v36  ;;  %v10117_v36 = vld [vmem:[#allocation11 + $0x3e0] ss:$8 sps:$4 sm:$0xff]  }
 0xf94   :  { %8227 = vmatprep.mubr.bf16.mxu0 %v14522_v30  ;;  %8349 = vmatpush1.bf16.msra.mxu0 %v10105_v6  ;;  %v10122_v30 = vld [vmem:[#allocation11 + $0x3f4] ss:$8 sps:$4 sm:$0xff]  }
 0xf95   :  { %8350 = vmatprep.subr.bf16.mxu0 %v10110_v52 }
 0xf98   :  { %8351 = vmatpush1.bf16.msra.mxu0 %v10108_v24  ;;  %v15715_v24 = vld [vmem:[#allocation73_spill] sm:$0xff] }
 0xf99   :  { %8352 = vmatprep.subr.bf16.mxu0 %v10113_v48 }
 0xf9b   :  { %8228 = vmatmul.mubr.bf16.gmra.mrb[224].mxu0 %v14518_v63  ;;  %v15680_v63 = vld [vmem:[#allocation26_spill] sm:$0xff] }
 0xf9c   :  { %8237 = vmatprep.mubr.bf16.mxu0 %v14540_v18  ;;  %8353 = vmatpush1.bf16.msra.mxu0 %v10111_v56  ;;  %v15681_v18 = vld [vmem:[#allocation43_spill] sm:$0xff] }
 0xf9d   :  { %8354 = vmatprep.subr.bf16.mxu0 %v10116_v31 }
 0xfa0   :  { %8355 = vmatpush1.bf16.msra.mxu0 %v10114_v15  ;;  %v15716_v15 = vld [vmem:[#allocation51_spill] sm:$0xff] }
 0xfa1   :  { %8356 = vmatprep.subr.bf16.mxu0 %v10119_v59 }
 0xfa3   :  { %8238 = vmatmul.mubr.bf16.gmra.mrb[228].mxu0 %v14536_v43  ;;  %v15682_v43 = vld [vmem:[#allocation98_spill] sm:$0xff] }
 0xfa4   :  { %8247 = vmatprep.mubr.bf16.mxu0 %v14558_v33  ;;  %8357 = vmatpush1.bf16.msra.mxu0 %v10117_v36  ;;  %v15684_v33 = vld [vmem:[#allocation102_spill] sm:$0xff] }
 0xfa5   :  { %8358 = vmatprep.subr.bf16.mxu0 %v10122_v30  ;;  %v15717_v30 = vld [vmem:[#allocation49_spill] sm:$0xff] }
 0xfa8   :  { %8359 = vmatpush1.bf16.msra.mxu0 %v10120_v38 }
 0xfab   :  { %8248 = vmatmul.mubr.bf16.gmra.mrb[232].mxu0 %v14554_v26  ;;  %v15683_v26 = vld [vmem:[#allocation97_spill] sm:$0xff] }
 0xfac   :  { %8257 = vmatprep.mubr.bf16.mxu0 %v14576_v22  ;;  %v15685_v22 = vld [vmem:[#allocation100_spill] sm:$0xff] }
 0xfb3   :  { %8258 = vmatmul.mubr.bf16.gmra.mrb[236].mxu0 %v15680_v63  ;;  %v15718_v63 = vld [vmem:[#allocation75_spill] sm:$0xff] }
 0xfb4   :  { %8267 = vmatprep.mubr.bf16.mxu0 %v14594_v10  ;;  %v15686_v10 = vld [vmem:[#allocation58_spill] sm:$0xff] }
 0xfbb   :  { %8268 = vmatmul.mubr.bf16.gmra.mrb[240].mxu0 %v15681_v18 }
 0xfbc   :  { %8277 = vmatprep.mubr.bf16.mxu0 %v14612_v34  ;;  %v15688_v34 = vld [vmem:[#allocation27_spill] sm:$0xff] }
 0xfc3   :  { %8278 = vmatmul.mubr.bf16.gmra.mrb[244].mxu0 %v14608_v17  ;;  %v15687_v17 = vld [vmem:[#allocation57_spill] sm:$0xff] }
 0xfc4   :  { %8287 = vmatprep.mubr.bf16.mxu0 %v14630_v47  ;;  %v15690_v47 = vld [vmem:[#allocation50_spill] sm:$0xff] }
 0xfcb   :  { %8288 = vmatmul.mubr.bf16.gmra.mrb[248].mxu0 %v14626_v53  ;;  %v15689_v53 = vld [vmem:[#allocation60_spill] sm:$0xff] }
 0xfcc   :  { %8297 = vmatprep.mubr.bf16.mxu0 %v14648_v2  ;;  %v15692_v2 = vld [vmem:[#allocation33_spill] sm:$0xff] }
 0xfd3   :  { %8298 = vmatmul.mubr.bf16.gmra.mrb[252].mxu0 %v14644_v49  ;;  %v15691_v49 = vld [vmem:[#allocation52_spill] sm:$0xff] }
 0xfd4   :  { %8307 = vmatprep.mubr.bf16.mxu0 %v14666_v23  ;;  %v15693_v23 = vld [vmem:[#allocation63_spill] sm:$0xff] }
 0xfdb   :  { %8308 = vmatmul.mubr.bf16.gmra.mrb[0].mxu0 %v14662_v5  ;;  %v15694_v5 = vld [vmem:[#allocation30_spill] sm:$0xff] }
 0xfdc   :  { %8317 = vmatprep.mubr.bf16.mxu0 %v14684_v28  ;;  %v15705_v28 = vld [vmem:[#allocation69_spill] sm:$0xff] }
 0xfe3   :  { %8318 = vmatmul.mubr.bf16.gmra.mrb[4].mxu0 %v14680_v16  ;;  %v15704_v16 = vld [vmem:[#allocation110_spill] sm:$0xff] }
 0xfe4   :  { %8360 = vmatprep.mubr.bf16.mxu0 %v15682_v43 }
 0xfeb   :  { %8361 = vmatmul.mubr.bf16.vlgmr.msra.gmra.mrb[200].mxu0 %v15683_v26 }
 0xfec   :  { %8370 = vmatprep.mubr.bf16.mxu0 %v15684_v33 }
 0xff3   :  { %8371 = vmatmul.mubr.bf16.gmra.mrb[204].mxu0 %v15685_v22 }
 0xff4   :  { %8380 = vmatprep.mubr.bf16.mxu0 %v15686_v10 }
 0xffb   :  { %8381 = vmatmul.mubr.bf16.gmra.mrb[208].mxu0 %v15687_v17  ;;  %v15719_v17 = vld [vmem:[#allocation76_spill] sm:$0xff] }
 0xffc   :  { %8390 = vmatprep.mubr.bf16.mxu0 %v15688_v34 }
0x1003   :  { %8391 = vmatmul.mubr.bf16.gmra.mrb[212].mxu0 %v15689_v53 }
0x1004   :  { %8400 = vmatprep.mubr.bf16.mxu0 %v15690_v47 }
0x100b   :  { %8401 = vmatmul.mubr.bf16.gmra.mrb[216].mxu0 %v15691_v49  ;;  %v15720_v49 = vld [vmem:[#allocation77_spill] sm:$0xff] }
0x100c   :  { %8410 = vmatprep.mubr.bf16.mxu0 %v15692_v2 }
0x1013   :  { %8411 = vmatmul.mubr.bf16.gmra.mrb[220].mxu0 %v15693_v23 }
0x1014   :  { %8420 = vmatprep.mubr.bf16.mxu0 %v15694_v5  ;;  %v15721_v5 = vld [vmem:[#allocation78_spill] sm:$0xff] }
0x101b   :  { %8421 = vmatmul.mubr.bf16.gmra.mrb[224].mxu0 %v15695_v1 }
0x101c   :  { %8430 = vmatprep.mubr.bf16.mxu0 %v15696_v44  ;;  %v15722_v44 = vld [vmem:[#allocation79_spill] sm:$0xff] }
0x1023   :  { %8431 = vmatmul.mubr.bf16.gmra.mrb[228].mxu0 %v15697_v46 }
0x1024   :  { %8440 = vmatprep.mubr.bf16.mxu0 %v15698_v37 }
0x102b   :  { %8441 = vmatmul.mubr.bf16.gmra.mrb[232].mxu0 %v15699_v20 }
0x102c   :  { %8450 = vmatprep.mubr.bf16.mxu0 %v15700_v51 }
0x1033   :  { %8451 = vmatmul.mubr.bf16.gmra.mrb[236].mxu0 %v15701_v39 }
0x1034   :  { %8460 = vmatprep.mubr.bf16.mxu0 %v15702_v62 }
0x103b   :  { %8461 = vmatmul.mubr.bf16.gmra.mrb[240].mxu0 %v15703_v7  ;;  %v15723_v7 = vld [vmem:[#allocation80_spill] sm:$0xff] }
0x103c   :  { %8470 = vmatprep.mubr.bf16.mxu0 %v15704_v16 }
0x1043   :  { %8471 = vmatmul.mubr.bf16.gmra.mrb[244].mxu0 %v15705_v28 }
0x1044   :  { %8480 = vmatprep.mubr.bf16.mxu0 %v14632_v14  ;;  %v14765_v14 = vrot.slane %v7097_v32, %v15709_v27  ;;  %v15725_v27 = vld [vmem:[#allocation82_spill] sm:$0xff] }
0x104b   :  { %8481 = vmatmul.mubr.bf16.gmra.mrb[248].mxu0 %v14628_v41  ;;  %v15710_v41 = vld [vmem:[#allocation36_spill] sm:$0xff] }
0x104c   :  { %8490 = vmatprep.mubr.bf16.mxu0 %v15706_v45  ;;  %v14768_v61 = vrot.slane %v7097_v32, %v15710_v41 }
0x1053   :  { %8491 = vmatmul.mubr.bf16.gmra.mrb[252].mxu0 %v15707_v19  ;;  %v15724_v19 = vld [vmem:[#allocation81_spill] sm:$0xff] }
0x1054   :  { %8500 = vmatprep.mubr.bf16.mxu0 %v14668_v0 }
0x105b   :  { %8501 = vmatmul.mubr.bf16.gmra.mrb[0].mxu0 %v15708_v3 }
0x105c   :  { %8510 = vmatprep.mubr.bf16.mxu0 %v14686_v60  ;;  %v15711_v60 = vld [vmem:[#allocation18_spill] sm:$0xff] }
0x1063   :  { %8511 = vmatmul.mubr.bf16.gmra.mrb[4].mxu0 %v14682_v13 }
0x10be   :  { %v8362_v50 = vpop.f32.mrb[200].mxu0 }
0x10bf   :  { %v9468_v9 = vadd.f32 %v8362_v50, %v14765_v14  ;;  %v8364_v0 = vpop.f32.mrb[201].mxu0  ;;  %v15726_v50 = vld [vmem:[#allocation83_spill] sm:$0xff] }
0x10c0   :  { %v9469_v11 = vadd.f32 %v8364_v0, %v14768_v61  ;;  %v8366_v29 = vpop.f32.mrb[202].mxu0 }
0x10c1   :  { %v8521_v42 = vadd.f32 %v9468_v9, %v15711_v60  ;;  %v9470_v13 = vadd.f32 %v8366_v29, %v14765_v14  ;;  %v8368_v4 = vpop.f32.mrb[203].mxu0 }
0x10c2   :  { %v8522_v57 = vadd.f32 %v9469_v11, %v15712_v25  ;;  %v9471_v8 = vadd.f32 %v8368_v4, %v14768_v61 }
0x10c3   :  { %8585 = vst [vmem:[#allocation12] sm:$0xff] %v8521_v42  ;;  %v8523_v21 = vadd.f32 %v9470_v13, %v15713_v55  ;;  %v15727_v13 = vld [vmem:[#allocation84_spill] sm:$0xff] }
0x10c4   :  { %8586 = vst [vmem:[#allocation12 + $0x8] sm:$0xff] %v8522_v57  ;;  %v8524_v12 = vadd.f32 %v9471_v8, %v15714_v54  ;;  %v15728_v8 = vld [vmem:[#allocation85_spill] sm:$0xff]  ;;  %v15729_v54 = vld [vmem:[#allocation86_spill] sm:$0xff] }
0x10c5   :  { %8587 = vst [vmem:[#allocation12 + $0x10] sm:$0xff] %v8523_v21 }
0x10c6   :  { %8588 = vst [vmem:[#allocation12 + $0x18] sm:$0xff] %v8524_v12  ;;  %v8372_v40 = vpop.f32.mrb[204].mxu0 }
0x10c7   :  { %v9472_v58 = vadd.f32 %v8372_v40, %v14765_v14  ;;  %v8374_v35 = vpop.f32.mrb[205].mxu0  ;;  %v15730_v40 = vld [vmem:[#allocation87_spill] sm:$0xff] }
0x10c8   :  { %v9473_v6 = vadd.f32 %v8374_v35, %v14768_v61  ;;  %v8376_v52 = vpop.f32.mrb[206].mxu0 }
0x10c9   :  { %v8525_v48 = vadd.f32 %v9472_v58, %v15715_v24  ;;  %v9474_v56 = vadd.f32 %v8376_v52, %v14765_v14  ;;  %v8378_v31 = vpop.f32.mrb[207].mxu0 }
0x10ca   :  { %v8526_v59 = vadd.f32 %v9473_v6, %v15716_v15  ;;  %v9475_v36 = vadd.f32 %v8378_v31, %v14768_v61 }
0x10cb   :  { %8589 = vst [vmem:[#allocation12 + $0x20] sm:$0xff] %v8525_v48  ;;  %v8527_v38 = vadd.f32 %v9474_v56, %v15717_v30  ;;  %v15731_v56 = vld [vmem:[#allocation88_spill] sm:$0xff] }
0x10cc   :  { %8590 = vst [vmem:[#allocation12 + $0x28] sm:$0xff] %v8526_v59  ;;  %v8528_v18 = vadd.f32 %v9475_v36, %v15718_v63  ;;  %v15732_v36 = vld [vmem:[#allocation89_spill] sm:$0xff]  ;;  %v15733_v63 = vld [vmem:[#allocation90_spill] sm:$0xff] }
0x10cd   :  { %8591 = vst [vmem:[#allocation12 + $0x30] sm:$0xff] %v8527_v38 }
0x10ce   :  { %8592 = vst [vmem:[#allocation12 + $0x38] sm:$0xff] %v8528_v18  ;;  %v8382_v43 = vpop.f32.mrb[208].mxu0 }
0x10cf   :  { %v9476_v26 = vadd.f32 %v8382_v43, %v14765_v14  ;;  %v8384_v33 = vpop.f32.mrb[209].mxu0  ;;  %v15734_v43 = vld [vmem:[#allocation91_spill] sm:$0xff] }
0x10d0   :  { %v9477_v22 = vadd.f32 %v8384_v33, %v14768_v61  ;;  %v8386_v10 = vpop.f32.mrb[210].mxu0 }
0x10d1   :  { %v8529_v34 = vadd.f32 %v9476_v26, %v15719_v17  ;;  %v9478_v53 = vadd.f32 %v8386_v10, %v14765_v14  ;;  %v8388_v47 = vpop.f32.mrb[211].mxu0 }
0x10d2   :  { %v8530_v2 = vadd.f32 %v9477_v22, %v15720_v49  ;;  %v9479_v23 = vadd.f32 %v8388_v47, %v14768_v61 }
0x10d3   :  { %8593 = vst [vmem:[#allocation12 + $0x40] sm:$0xff] %v8529_v34  ;;  %v8531_v1 = vadd.f32 %v9478_v53, %v15721_v5  ;;  %v15735_v53 = vld [vmem:[#allocation61_spill] sm:$0xff] }
0x10d4   :  { %8594 = vst [vmem:[#allocation12 + $0x48] sm:$0xff] %v8530_v2  ;;  %v8532_v46 = vadd.f32 %v9479_v23, %v15722_v44  ;;  %v15736_v23 = vld [vmem:[#allocation62_spill] sm:$0xff]  ;;  %v15737_v44 = vld [vmem:[#allocation64_spill] sm:$0xff] }
0x10d5   :  { %8595 = vst [vmem:[#allocation12 + $0x50] sm:$0xff] %v8531_v1 }
0x10d6   :  { %8596 = vst [vmem:[#allocation12 + $0x58] sm:$0xff] %v8532_v46  ;;  %v8392_v37 = vpop.f32.mrb[212].mxu0 }
0x10d7   :  { %v9480_v20 = vadd.f32 %v8392_v37, %v14765_v14  ;;  %v8394_v51 = vpop.f32.mrb[213].mxu0  ;;  %v15738_v37 = vld [vmem:[#allocation66_spill] sm:$0xff] }
0x10d8   :  { %v9481_v39 = vadd.f32 %v8394_v51, %v14768_v61  ;;  %v8396_v62 = vpop.f32.mrb[214].mxu0 }
0x10d9   :  { %v8533_v16 = vadd.f32 %v9480_v20, %v15723_v7  ;;  %v9482_v28 = vadd.f32 %v8396_v62, %v14765_v14  ;;  %v8398_v45 = vpop.f32.mrb[215].mxu0 }
0x10da   :  { %v8534_v3 = vadd.f32 %v9481_v39, %v15724_v19  ;;  %v9483_v32 = vadd.f32 %v8398_v45, %v14768_v61 }
0x10db   :  { %8597 = vst [vmem:[#allocation12 + $0x60] sm:$0xff] %v8533_v16  ;;  %v8535_v41 = vadd.f32 %v9482_v28, %v15725_v27  ;;  %v15739_v28 = vld [vmem:[#allocation68_spill] sm:$0xff] }
0x10dc   :  { %8598 = vst [vmem:[#allocation12 + $0x68] sm:$0xff] %v8534_v3  ;;  %v8536_v9 = vadd.f32 %v9483_v32, %v15726_v50  ;;  %v15740_v32 = vld [vmem:[#allocation70_spill] sm:$0xff]  ;;  %v15741_v50 = vld [vmem:[#allocation72_spill] sm:$0xff] }
0x10dd   :  { %8599 = vst [vmem:[#allocation12 + $0x70] sm:$0xff] %v8535_v41 }
0x10de   :  { %8600 = vst [vmem:[#allocation12 + $0x78] sm:$0xff] %v8536_v9  ;;  %v8402_v0 = vpop.f32.mrb[216].mxu0 }
0x10df   :  { %v9484_v11 = vadd.f32 %v8402_v0, %v14765_v14  ;;  %v8404_v29 = vpop.f32.mrb[217].mxu0  ;;  %v15742_v0 = vld [vmem:[#allocation74_spill] sm:$0xff] }
0x10e0   :  { %v9485_v60 = vadd.f32 %v8404_v29, %v14768_v61  ;;  %v8406_v42 = vpop.f32.mrb[218].mxu0 }
0x10e1   :  { %v8537_v4 = vadd.f32 %v9484_v11, %v15727_v13  ;;  %v9486_v25 = vadd.f32 %v8406_v42, %v14765_v14  ;;  %v8408_v57 = vpop.f32.mrb[219].mxu0 }
0x10e2   :  { %v8538_v55 = vadd.f32 %v9485_v60, %v15728_v8  ;;  %v9487_v21 = vadd.f32 %v8408_v57, %v14768_v61 }
0x10e3   :  { %8601 = vst [vmem:[#allocation12 + $0x80] sm:$0xff] %v8537_v4  ;;  %v8539_v12 = vadd.f32 %v9486_v25, %v15729_v54  ;;  %v15743_v25 = vld [vmem:[#allocation53_spill] sm:$0xff] }
0x10e4   :  { %8602 = vst [vmem:[#allocation12 + $0x88] sm:$0xff] %v8538_v55  ;;  %v8540_v58 = vadd.f32 %v9487_v21, %v15730_v40  ;;  %v15744_v21 = vld [vmem:[#allocation54_spill] sm:$0xff]  ;;  %v15745_v40 = vld [vmem:[#allocation55_spill] sm:$0xff] }
0x10e5   :  { %8603 = vst [vmem:[#allocation12 + $0x90] sm:$0xff] %v8539_v12 }
0x10e6   :  { %8604 = vst [vmem:[#allocation12 + $0x98] sm:$0xff] %v8540_v58  ;;  %v8412_v35 = vpop.f32.mrb[220].mxu0 }
0x10e7   :  { %v9488_v6 = vadd.f32 %v8412_v35, %v14765_v14  ;;  %v8414_v52 = vpop.f32.mrb[221].mxu0  ;;  %v15746_v35 = vld [vmem:[#allocation56_spill] sm:$0xff] }
0x10e8   :  { %v9489_v24 = vadd.f32 %v8414_v52, %v14768_v61  ;;  %v8416_v48 = vpop.f32.mrb[222].mxu0 }
0x10e9   :  { %v8541_v31 = vadd.f32 %v9488_v6, %v15731_v56  ;;  %v9490_v15 = vadd.f32 %v8416_v48, %v14765_v14  ;;  %v8418_v59 = vpop.f32.mrb[223].mxu0 }
0x10ea   :  { %v8542_v30 = vadd.f32 %v9489_v24, %v15732_v36  ;;  %v9491_v38 = vadd.f32 %v8418_v59, %v14768_v61 }
0x10eb   :  { %8605 = vst [vmem:[#allocation12 + $0xa0] sm:$0xff] %v8541_v31  ;;  %v8543_v18 = vadd.f32 %v9490_v15, %v15733_v63  ;;  %v15747_v15 = vld [vmem:[#allocation59_spill] sm:$0xff] }
0x10ec   :  { %8606 = vst [vmem:[#allocation12 + $0xa8] sm:$0xff] %v8542_v30  ;;  %v8544_v26 = vadd.f32 %v9491_v38, %v15734_v43  ;;  %v15748_v38 = vld [vmem:[#allocation29_spill] sm:$0xff]  ;;  %v15749_v43 = vld [vmem:[#allocation31_spill] sm:$0xff] }
0x10ed   :  { %8607 = vst [vmem:[#allocation12 + $0xb0] sm:$0xff] %v8543_v18 }
0x10ee   :  { %8608 = vst [vmem:[#allocation12 + $0xb8] sm:$0xff] %v8544_v26  ;;  %v8422_v33 = vpop.f32.mrb[224].mxu0 }
0x10ef   :  { %v9492_v22 = vadd.f32 %v8422_v33, %v14765_v14  ;;  %v8424_v10 = vpop.f32.mrb[225].mxu0  ;;  %v15750_v33 = vld [vmem:[#allocation28_spill] sm:$0xff] }
0x10f0   :  { %v9493_v17 = vadd.f32 %v8424_v10, %v14768_v61  ;;  %v8426_v34 = vpop.f32.mrb[226].mxu0 }
0x10f1   :  { %v8545_v47 = vadd.f32 %v9492_v22, %v15735_v53  ;;  %v9494_v49 = vadd.f32 %v8426_v34, %v14765_v14  ;;  %v8428_v2 = vpop.f32.mrb[227].mxu0 }
0x10f2   :  { %v8546_v5 = vadd.f32 %v9493_v17, %v15736_v23  ;;  %v9495_v1 = vadd.f32 %v8428_v2, %v14768_v61 }
0x10f3   :  { %8609 = vst [vmem:[#allocation12 + $0xc0] sm:$0xff] %v8545_v47  ;;  %v8547_v46 = vadd.f32 %v9494_v49, %v15737_v44  ;;  %v15751_v49 = vld [vmem:[#allocation17_spill] sm:$0xff] }
0x10f4   :  { %8610 = vst [vmem:[#allocation12 + $0xc8] sm:$0xff] %v8546_v5  ;;  %v8548_v20 = vadd.f32 %v9495_v1, %v15738_v37  ;;  %v15752_v1 = vld [vmem:[#allocation41_spill] sm:$0xff]  ;;  %v15753_v37 = vld [vmem:[#allocation44_spill] sm:$0xff] }
0x10f5   :  { %8611 = vst [vmem:[#allocation12 + $0xd0] sm:$0xff] %v8547_v46 }
0x10f6   :  { %8612 = vst [vmem:[#allocation12 + $0xd8] sm:$0xff] %v8548_v20  ;;  %v8432_v51 = vpop.f32.mrb[228].mxu0 }
0x10f7   :  { %v9496_v39 = vadd.f32 %v8432_v51, %v14765_v14  ;;  %v8434_v62 = vpop.f32.mrb[229].mxu0  ;;  %v15754_v51 = vld [vmem:[#allocation42_spill] sm:$0xff] }
0x10f8   :  { %v9497_v7 = vadd.f32 %v8434_v62, %v14768_v61  ;;  %v8436_v16 = vpop.f32.mrb[230].mxu0 }
0x10f9   :  { %v8549_v45 = vadd.f32 %v9496_v39, %v15739_v28  ;;  %v9498_v19 = vadd.f32 %v8436_v16, %v14765_v14  ;;  %v8438_v3 = vpop.f32.mrb[231].mxu0 }
0x10fa   :  { %v8550_v27 = vadd.f32 %v9497_v7, %v15740_v32  ;;  %v9499_v41 = vadd.f32 %v8438_v3, %v14768_v61 }
0x10fb   :  { %8613 = vst [vmem:[#allocation12 + $0xe0] sm:$0xff] %v8549_v45  ;;  %v8551_v9 = vadd.f32 %v9498_v19, %v15741_v50  ;;  %v15755_v19 = vld [vmem:[#allocation25_spill] sm:$0xff] }
0x10fc   :  { %8614 = vst [vmem:[#allocation12 + $0xe8] sm:$0xff] %v8550_v27  ;;  %v8552_v11 = vadd.f32 %v9499_v41, %v15742_v0  ;;  %v15756_v41 = vld [vmem:[#allocation23_spill] sm:$0xff]  ;;  %v15757_v0 = vld [vmem:[#allocation20_spill] sm:$0xff] }
0x10fd   :  { %8615 = vst [vmem:[#allocation12 + $0xf0] sm:$0xff] %v8551_v9 }
0x10fe   :  { %8616 = vst [vmem:[#allocation12 + $0xf8] sm:$0xff] %v8552_v11  ;;  %v8442_v29 = vpop.f32.mrb[232].mxu0 }
0x10ff   :  { %v9500_v60 = vadd.f32 %v8442_v29, %v14765_v14  ;;  %v8444_v42 = vpop.f32.mrb[233].mxu0  ;;  %v15758_v29 = vld [vmem:[#allocation21_spill] sm:$0xff] }
0x1100   :  { %v9501_v13 = vadd.f32 %v8444_v42, %v14768_v61  ;;  %v8446_v4 = vpop.f32.mrb[234].mxu0 }
0x1101   :  { %v8553_v57 = vadd.f32 %v9500_v60, %v15743_v25  ;;  %v9502_v8 = vadd.f32 %v8446_v4, %v14765_v14  ;;  %v8448_v55 = vpop.f32.mrb[235].mxu0 }
0x1102   :  { %v8554_v54 = vadd.f32 %v9501_v13, %v15744_v21  ;;  %v9503_v12 = vadd.f32 %v8448_v55, %v14768_v61 }
0x1103   :  { %8617 = vst [vmem:[#allocation12 + $0x100] sm:$0xff] %v8553_v57  ;;  %v8555_v58 = vadd.f32 %v9502_v8, %v15745_v40  ;;  %v15759_v8 = vld [vmem:[#allocation19_spill] sm:$0xff] }
0x1104   :  { %8618 = vst [vmem:[#allocation12 + $0x108] sm:$0xff] %v8554_v54  ;;  %v8556_v6 = vadd.f32 %v9503_v12, %v15746_v35  ;;  %v15760_v12 = vld [vmem:[#allocation38_spill] sm:$0xff]  ;;  %v15761_v35 = vld [vmem:[#allocation32_spill] sm:$0xff] }
0x1105   :  { %8619 = vst [vmem:[#allocation12 + $0x110] sm:$0xff] %v8555_v58 }
0x1106   :  { %8620 = vst [vmem:[#allocation12 + $0x118] sm:$0xff] %v8556_v6  ;;  %v8452_v52 = vpop.f32.mrb[236].mxu0 }
0x1107   :  { %v9504_v24 = vadd.f32 %v8452_v52, %v14765_v14  ;;  %v8454_v48 = vpop.f32.mrb[237].mxu0  ;;  %v15762_v52 = vld [vmem:[#allocation65_spill] sm:$0xff] }
0x1108   :  { %v9505_v56 = vadd.f32 %v8454_v48, %v14768_v61  ;;  %v8456_v31 = vpop.f32.mrb[238].mxu0 }
0x1109   :  { %v8557_v59 = vadd.f32 %v9504_v24, %v15747_v15  ;;  %v9506_v36 = vadd.f32 %v8456_v31, %v14765_v14  ;;  %v8458_v30 = vpop.f32.mrb[239].mxu0 }
0x110a   :  { %v8558_v63 = vadd.f32 %v9505_v56, %v15748_v38  ;;  %v9507_v18 = vadd.f32 %v8458_v30, %v14768_v61 }
0x110b   :  { %8621 = vst [vmem:[#allocation12 + $0x120] sm:$0xff] %v8557_v59  ;;  %v8559_v26 = vadd.f32 %v9506_v36, %v15749_v43  ;;  %v15763_v36 = vld [vmem:[#allocation92_spill] sm:$0xff] }
0x110c   :  { %8622 = vst [vmem:[#allocation12 + $0x128] sm:$0xff] %v8558_v63  ;;  %v8560_v22 = vadd.f32 %v9507_v18, %v15750_v33  ;;  %v15764_v18 = vld [vmem:[#allocation93_spill] sm:$0xff]  ;;  %v15765_v33 = vld [vmem:[#allocation94_spill] sm:$0xff] }
0x110d   :  { %8623 = vst [vmem:[#allocation12 + $0x130] sm:$0xff] %v8559_v26 }
0x110e   :  { %8624 = vst [vmem:[#allocation12 + $0x138] sm:$0xff] %v8560_v22  ;;  %v8462_v10 = vpop.f32.mrb[240].mxu0 }
0x110f   :  { %v9508_v17 = vadd.f32 %v8462_v10, %v14765_v14  ;;  %v8464_v34 = vpop.f32.mrb[241].mxu0  ;;  %v15766_v10 = vld [vmem:[#allocation95_spill] sm:$0xff] }
0x1110   :  { %v9509_v53 = vadd.f32 %v8464_v34, %v14768_v61  ;;  %v8466_v47 = vpop.f32.mrb[242].mxu0 }
0x1111   :  { %v8561_v2 = vadd.f32 %v9508_v17, %v15751_v49  ;;  %v9510_v23 = vadd.f32 %v8466_v47, %v14765_v14  ;;  %v8468_v5 = vpop.f32.mrb[243].mxu0 }
0x1112   :  { %v8562_v44 = vadd.f32 %v9509_v53, %v15752_v1  ;;  %v9511_v46 = vadd.f32 %v8468_v5, %v14768_v61 }
0x1113   :  { %8625 = vst [vmem:[#allocation12 + $0x140] sm:$0xff] %v8561_v2  ;;  %v8563_v20 = vadd.f32 %v9510_v23, %v15753_v37  ;;  %v15767_v23 = vld [vmem:[#allocation96_spill] sm:$0xff] }
0x1114   :  { %8626 = vst [vmem:[#allocation12 + $0x148] sm:$0xff] %v8562_v44  ;;  %v8564_v39 = vadd.f32 %v9511_v46, %v15754_v51  ;;  %v15768_v46 = vld [vmem:[#allocation99_spill] sm:$0xff]  ;;  %v15769_v51 = vld [vmem:[#allocation101_spill] sm:$0xff] }
0x1115   :  { %8627 = vst [vmem:[#allocation12 + $0x150] sm:$0xff] %v8563_v20 }
0x1116   :  { %8628 = vst [vmem:[#allocation12 + $0x158] sm:$0xff] %v8564_v39  ;;  %v8472_v62 = vpop.f32.mrb[244].mxu0 }
0x1117   :  { %v9512_v7 = vadd.f32 %v8472_v62, %v14765_v14  ;;  %v8474_v16 = vpop.f32.mrb[245].mxu0  ;;  %v15770_v62 = vld [vmem:[#allocation103_spill] sm:$0xff] }
0x1118   :  { %v9513_v28 = vadd.f32 %v8474_v16, %v14768_v61  ;;  %v8476_v45 = vpop.f32.mrb[246].mxu0 }
0x1119   :  { %v8565_v3 = vadd.f32 %v9512_v7, %v15755_v19  ;;  %v9514_v32 = vadd.f32 %v8476_v45, %v14765_v14  ;;  %v8478_v27 = vpop.f32.mrb[247].mxu0 }
0x111a   :  { %v8566_v50 = vadd.f32 %v9513_v28, %v15756_v41  ;;  %v9515_v9 = vadd.f32 %v8478_v27, %v14768_v61 }
0x111b   :  { %8629 = vst [vmem:[#allocation12 + $0x160] sm:$0xff] %v8565_v3  ;;  %v8567_v11 = vadd.f32 %v9514_v32, %v15757_v0  ;;  %v15771_v32 = vld [vmem:[#allocation104_spill] sm:$0xff] }
0x111c   :  { %8630 = vst [vmem:[#allocation12 + $0x168] sm:$0xff] %v8566_v50  ;;  %v8568_v60 = vadd.f32 %v9515_v9, %v15758_v29  ;;  %v15772_v9 = vld [vmem:[#allocation105_spill] sm:$0xff]  ;;  %v15773_v29 = vld [vmem:[#allocation106_spill] sm:$0xff] }
0x111d   :  { %8631 = vst [vmem:[#allocation12 + $0x170] sm:$0xff] %v8567_v11 }
0x111e   :  { %8632 = vst [vmem:[#allocation12 + $0x178] sm:$0xff] %v8568_v60  ;;  %v8482_v42 = vpop.f32.mrb[248].mxu0 }
0x111f   :  { %v9516_v13 = vadd.f32 %v8482_v42, %v14765_v14  ;;  %v8484_v4 = vpop.f32.mrb[249].mxu0  ;;  %v15774_v42 = vld [vmem:[#allocation107_spill] sm:$0xff] }
0x1120   :  { %v9517_v25 = vadd.f32 %v8484_v4, %v14768_v61  ;;  %v8486_v57 = vpop.f32.mrb[250].mxu0 }
0x1121   :  { %v8569_v55 = vadd.f32 %v9516_v13, %v15759_v8  ;;  %v9518_v21 = vadd.f32 %v8486_v57, %v14765_v14  ;;  %v8488_v54 = vpop.f32.mrb[251].mxu0 }
0x1122   :  { %v8570_v40 = vadd.f32 %v9517_v25, %v15760_v12  ;;  %v9519_v58 = vadd.f32 %v8488_v54, %v14768_v61 }
0x1123   :  { %8633 = vst [vmem:[#allocation12 + $0x180] sm:$0xff] %v8569_v55  ;;  %v8571_v6 = vadd.f32 %v9518_v21, %v15761_v35 }
0x1124   :  { %8634 = vst [vmem:[#allocation12 + $0x188] sm:$0xff] %v8570_v40  ;;  %v8572_v24 = vadd.f32 %v9519_v58, %v15762_v52 }
0x1125   :  { %8635 = vst [vmem:[#allocation12 + $0x190] sm:$0xff] %v8571_v6 }
0x1126   :  { %8636 = vst [vmem:[#allocation12 + $0x198] sm:$0xff] %v8572_v24  ;;  %v8492_v48 = vpop.f32.mrb[252].mxu0 }
0x1127   :  { %v9520_v56 = vadd.f32 %v8492_v48, %v14765_v14  ;;  %v8494_v31 = vpop.f32.mrb[253].mxu0 }
0x1128   :  { %v9521_v15 = vadd.f32 %v8494_v31, %v14768_v61  ;;  %v8496_v59 = vpop.f32.mrb[254].mxu0 }
0x1129   :  { %v8573_v30 = vadd.f32 %v9520_v56, %v15763_v36  ;;  %v9522_v38 = vadd.f32 %v8496_v59, %v14765_v14  ;;  %v8498_v63 = vpop.f32.mrb[255].mxu0 }
0x112a   :  { %v8574_v43 = vadd.f32 %v9521_v15, %v15764_v18  ;;  %v9523_v26 = vadd.f32 %v8498_v63, %v14768_v61 }
0x112b   :  { %8637 = vst [vmem:[#allocation12 + $0x1a0] sm:$0xff] %v8573_v30  ;;  %v8575_v22 = vadd.f32 %v9522_v38, %v15765_v33 }
0x112c   :  { %8638 = vst [vmem:[#allocation12 + $0x1a8] sm:$0xff] %v8574_v43  ;;  %v8576_v17 = vadd.f32 %v9523_v26, %v15766_v10 }
0x112d   :  { %8639 = vst [vmem:[#allocation12 + $0x1b0] sm:$0xff] %v8575_v22 }
0x112e   :  { %8640 = vst [vmem:[#allocation12 + $0x1b8] sm:$0xff] %v8576_v17  ;;  %v8502_v34 = vpop.f32.mrb[0].mxu0 }
0x112f   :  { %v9524_v53 = vadd.f32 %v8502_v34, %v14765_v14  ;;  %v8504_v47 = vpop.f32.mrb[1].mxu0 }
0x1130   :  { %v9525_v49 = vadd.f32 %v8504_v47, %v14768_v61  ;;  %v8506_v2 = vpop.f32.mrb[2].mxu0 }
0x1131   :  { %v8577_v5 = vadd.f32 %v9524_v53, %v15767_v23  ;;  %v9526_v1 = vadd.f32 %v8506_v2, %v14765_v14  ;;  %v8508_v44 = vpop.f32.mrb[3].mxu0 }
0x1132   :  { %v8578_v37 = vadd.f32 %v9525_v49, %v15768_v46  ;;  %v9527_v20 = vadd.f32 %v8508_v44, %v14768_v61 }
0x1133   :  { %8641 = vst [vmem:[#allocation12 + $0x1c0] sm:$0xff] %v8577_v5  ;;  %v8579_v39 = vadd.f32 %v9526_v1, %v15769_v51 }
0x1134   :  { %8642 = vst [vmem:[#allocation12 + $0x1c8] sm:$0xff] %v8578_v37  ;;  %v8580_v7 = vadd.f32 %v9527_v20, %v15770_v62 }
0x1135   :  { %8643 = vst [vmem:[#allocation12 + $0x1d0] sm:$0xff] %v8579_v39 }
0x1136   :  { %8644 = vst [vmem:[#allocation12 + $0x1d8] sm:$0xff] %v8580_v7  ;;  %v8512_v16 = vpop.f32.mrb[4].mxu0 }
0x1137   :  { %v9528_v28 = vadd.f32 %v8512_v16, %v14765_v14  ;;  %v8514_v45 = vpop.f32.mrb[5].mxu0 }
0x1138   :  { %v9529_v19 = vadd.f32 %v8514_v45, %v14768_v61  ;;  %v8516_v3 = vpop.f32.mrb[6].mxu0 }
0x1139   :  { %v8581_v27 = vadd.f32 %v9528_v28, %v15771_v32  ;;  %v9530_v41 = vadd.f32 %v8516_v3, %v14765_v14  ;;  %v8518_v50 = vpop.f32.mrb[7].mxu0 }
0x113a   :  { %v8582_v0 = vadd.f32 %v9529_v19, %v15772_v9  ;;  %v9531_v11 = vadd.f32 %v8518_v50, %v14768_v61 }
0x113b   :  { %8645 = vst [vmem:[#allocation12 + $0x1e0] sm:$0xff] %v8581_v27  ;;  %v8583_v60 = vadd.f32 %v9530_v41, %v15773_v29 }
0x113c   :  { %8646 = vst [vmem:[#allocation12 + $0x1e8] sm:$0xff] %v8582_v0  ;;  %v8584_v13 = vadd.f32 %v9531_v11, %v15774_v42 }
0x113d   :  { %8647 = vst [vmem:[#allocation12 + $0x1f0] sm:$0xff] %v8583_v60 }
0x113e   :  { %8648 = vst [vmem:[#allocation12 + $0x1f8] sm:$0xff] %v8584_v13 }
0x113f   :  { %10749 = shalt.err (!%p10746_p2)
}
0x1140   :  { %s10750_s26 = scalar_lea.hbm %s14925_s12, 8192 }
0x1141   :  { %p10751_p3 = scmp.ne.s32.totalorder %s14925_s12, %s10750_s26  ;;  %p10754_p4 = scmp.lt.u32.totalorder %s10750_s26, %s14925_s12 }
0x1143   :  { %p10756_p5 = pnand %p10754_p4, %p10751_p3 }
0x1145   :  { %10759 = shalt.err (!%p10756_p5)
}
0x1146   :  { %8660 = dma.vmem_to_hbm [thread:$0]  %s8655_s21, 8192, %s14925_s12, [#allocation5], %s10775_s8, %s10775_s8, %s10776_s18  }
0x1147   :  { %10766 = dma.done.wait [#allocation5], 8192  }
0x1148   :  { %10767 = vsyncadd [#allocation5], 4294959104 }
0x1149   :  { %8664 = vsyncpa [#allocation4], 1 }
0x114a   :  { %8665 = vsyncpa [#allocation7], 1 }
0x114b   :  { %8666 = vsyncpa [#allocation10], 1 }
0x114c   :  { %8667 = vsyncpa [#allocation5], 1 }

</bundles_post_ra>
